<compile_context>
chip_gen: v5e
topology: v5e:2x2
jax: 0.10.0
libtpu: 0.0.40
codegen_flags: <defaults>
</compile_context>

<pallas_src>
import math
import functools

import jax
import jax.numpy as jnp
from jax.experimental import pallas as pl
from jax.experimental.pallas import tpu as pltpu

_HIGHEST = jax.lax.Precision.HIGHEST


def _round_up(x, m):
    return ((x + m - 1) // m) * m


def token_level_alpha_kernel(
    ht_ref,         # (H, TM)       transposed hidden-state tile (tokens on lanes)
    wrep_ref,       # (C*L, H)      latent_encoder weight rows replicated per class
    brep_ref,       # (C*L, 1)      latent_encoder bias replicated per class
    logpc_ref,      # (C, 1)        log(global_p_c)
    z0_ref,         # (Lyr, C*L, 1) radial-flow z0 (class-major)
    alpha_ref,      # (Lyr, C, 1)   exp(log_alpha) (precomputed in wrapper)
    beta_ref,       # (Lyr, C, 1)   radial-flow beta
    seg_ref,        # (C*L, C)      0/1 expansion matrix (class -> class*latent)
    segt_ref,       # (C, C*L)      0/1 reduction matrix (class*latent -> class)
    alpha_out_ref,  # (C, TM)
    beta_out_ref,   # (C, TM)
    z_out_ref,      # (L, TM)
    *,
    num_classes,
    dim_latent,
    radial_layers,
    evidence_scale_const,
):
    C, L = num_classes, dim_latent
    f32 = jnp.float32
    tm = ht_ref.shape[1]

    ht = ht_ref[...].astype(f32)                                   # (H, TM)

    # Latent encoder, replicated per class on the MXU:
    #   zc[c*L + l, t] = (h @ W + b)[t, l]
    zc = jnp.dot(wrep_ref[...], ht, precision=_HIGHEST,
                 preferred_element_type=f32) + brep_ref[...]       # (C*L, TM)
    z_out_ref[...] = zc[:L, :].astype(z_out_ref.dtype)             # ori_z tile (L, TM)

    seg = seg_ref[...]
    segt = segt_ref[...]
    sum_log_det = jnp.zeros((C, tm), f32)

    for layer in range(radial_layers):                             # static unroll
        z0 = z0_ref[layer]                                         # (C*L, 1)
        alpha = alpha_ref[layer]                                   # (C, 1)
        beta = beta_ref[layer]                                     # (C, 1)

        z_sub = zc - z0                                            # (C*L, TM)
        # per-class ||z - z0||^2 via MXU segmented reduction
        r2 = jnp.dot(segt, z_sub * z_sub, precision=_HIGHEST,
                     preferred_element_type=f32)                   # (C, TM)
        r = jnp.sqrt(r2)
        hmul = 1.0 / (alpha + r)                                   # (C, TM)
        t = beta * hmul                                            # (C, TM)

        # strength-reduced log-det: reuse t and hmul (beta*r/(alpha+r)^2 = beta*r*hmul^2)
        sum_log_det = sum_log_det + (L - 1) * jnp.log(1.0 + t) + jnp.log(
            1.0 + t + beta - beta * r * hmul * hmul)

        # expand per-class t back to (C*L, TM) on the MXU, then apply the flow step
        t_full = jnp.dot(seg, t, precision=_HIGHEST,
                         preferred_element_type=f32)               # (C*L, TM)
        zc = zc + t_full * z_sub

    # standard-normal log prob per class (MXU segmented reduction of zc^2)
    ssq = jnp.dot(segt, zc * zc, precision=_HIGHEST,
                  preferred_element_type=f32)                      # (C, TM)
    log_prob_z = -0.5 * (L * math.log(2.0 * math.pi) + ssq)

    # global prior + Evidence('latent-new') + exp
    log_q = log_prob_z + sum_log_det + logpc_ref[...]
    scaled = jnp.clip(log_q + evidence_scale_const, -30.0, 30.0)
    beta_ft = jnp.exp(scaled)

    beta_out_ref[...] = beta_ft.astype(beta_out_ref.dtype)
    alpha_out_ref[...] = (1.0 + beta_ft).astype(alpha_out_ref.dtype)


def token_level_alpha_forward(h, w_enc, b_enc, p_c, z0, log_alpha, beta,
                              *, dim_latent, token_tile=512):
    """h: (B, S, H). Returns (alpha_features, beta_ft, ori_z) in PyTorch layouts."""
    B, S, H = h.shape
    N = B * S
    C = p_c.shape[-1]
    L = dim_latent
    CL = C * L
    Lyr = z0.shape[0]
    f32 = jnp.float32

    # Token tile on the lane axis: multiple of 128, capped at token_tile.
    TM = min(_round_up(token_tile, 128), _round_up(N, 128))
    N_pad = _round_up(N, TM)
    grid = (N_pad // TM,)

    # Tokens-on-lanes layout for the hidden states (keeps flow math lane-dense).
    h_t = jnp.transpose(h.reshape(N, H))                           # (H, N)
    if N_pad != N:
        h_t = jnp.pad(h_t, ((0, 0), (0, N_pad - N)))

    # Parameter prep (host side): class-replicated encoder, exp(log_alpha) hoisted,
    # 0/1 segment matrices for the MXU reductions/expansions.
    w_rep = jnp.tile(jnp.transpose(w_enc.astype(f32)), (C, 1))     # (C*L, H)
    b_rep = jnp.tile(b_enc.astype(f32).reshape(L, 1), (C, 1))      # (C*L, 1)
    log_pc = jnp.log(p_c.astype(f32)).reshape(C, 1)                # (C, 1)
    z0_rep = z0.astype(f32).reshape(Lyr, CL, 1)                    # (Lyr, C*L, 1)
    alpha_rep = jnp.exp(log_alpha.astype(f32)).reshape(Lyr, C, 1)  # (Lyr, C, 1)
    beta_rep = beta.astype(f32).reshape(Lyr, C, 1)                 # (Lyr, C, 1)
    seg = jnp.repeat(jnp.eye(C, dtype=f32), L, axis=0)             # (C*L, C)
    seg_t = jnp.transpose(seg)                                     # (C, C*L)

    # Evidence 'latent-new' (further_scale = 1.0, no '-plus-classes')
    evidence_const = 0.5 * L * math.log(4.0 * math.pi)

    kernel = functools.partial(
        token_level_alpha_kernel,
        num_classes=C, dim_latent=L, radial_layers=Lyr,
        evidence_scale_const=evidence_const)

    grid_spec = pltpu.PrefetchScalarGridSpec(
        num_scalar_prefetch=0,
        grid=grid,
        in_specs=[
            pl.BlockSpec((H, TM), lambda i: (0, i)),          # h tile (pipelined)
            pl.BlockSpec((CL, H), lambda i: (0, 0)),          # params: VMEM-resident
            pl.BlockSpec((CL, 1), lambda i: (0, 0)),
            pl.BlockSpec((C, 1), lambda i: (0, 0)),
            pl.BlockSpec((Lyr, CL, 1), lambda i: (0, 0, 0)),
            pl.BlockSpec((Lyr, C, 1), lambda i: (0, 0, 0)),
            pl.BlockSpec((Lyr, C, 1), lambda i: (0, 0, 0)),
            pl.BlockSpec((CL, C), lambda i: (0, 0)),
            pl.BlockSpec((C, CL), lambda i: (0, 0)),
        ],
        out_specs=[
            pl.BlockSpec((C, TM), lambda i: (0, i)),
            pl.BlockSpec((C, TM), lambda i: (0, i)),
            pl.BlockSpec((L, TM), lambda i: (0, i)),
        ],
    )

    alpha_t, beta_t, z_t = pl.pallas_call(
        kernel,
        grid_spec=grid_spec,
        out_shape=(
            jax.ShapeDtypeStruct((C, N_pad), f32),
            jax.ShapeDtypeStruct((C, N_pad), f32),
            jax.ShapeDtypeStruct((L, N_pad), f32),
        ),
        compiler_params=pltpu.CompilerParams(
            dimension_semantics=("parallel",)),
    )(h_t, w_rep, b_rep, log_pc, z0_rep, alpha_rep, beta_rep, seg, seg_t)

    alpha_features = jnp.transpose(alpha_t[:, :N]).reshape(B, S, C)
    beta_ft = jnp.transpose(beta_t[:, :N]).reshape(B, S, C)
    ori_z = jnp.transpose(z_t[:, :N]).reshape(B, S, L)
    return alpha_features, beta_ft, ori_z


def reference_forward(h, w_enc, b_enc, p_c, z0, log_alpha, beta, *, dim_latent):
    """Pure-JAX reference matching the PyTorch semantics (for validation)."""
    B, S, H = h.shape
    N = B * S
    C = p_c.shape[-1]
    L = dim_latent
    z = jnp.dot(h.reshape(N, H).astype(jnp.float32), w_enc.astype(jnp.float32),
                precision=_HIGHEST) + b_enc.reshape(1, L)
    zc = jnp.broadcast_to(z[None], (C, N, L))
    sld = jnp.zeros((C, N), jnp.float32)
    for layer in range(z0.shape[0]):
        zz0 = z0[layer][:, None, :]
        al = jnp.exp(log_alpha[layer])[:, None, :]
        be = beta[layer][:, None, :]
        z_sub = zc - zz0
        r = jnp.linalg.norm(z_sub, axis=-1, keepdims=True)
        hm = 1.0 / (al + r)
        zc = zc + be * hm * z_sub
        ld = (L - 1) * jnp.log(1.0 + be * hm) + jnp.log(
            1.0 + be * hm + be - be * r / (al + r) ** 2)
        sld = sld + ld[..., 0]
    log_prob_z = -0.5 * (L * math.log(2.0 * math.pi) + jnp.sum(zc * zc, axis=-1))
    flow_res = (log_prob_z + sld).T
    log_q = flow_res + jnp.log(p_c).reshape(1, C)
    scaled = jnp.clip(log_q + 0.5 * L * math.log(4.0 * math.pi), -30.0, 30.0)
    beta_ft = jnp.exp(scaled)
    return (
        (1.0 + beta_ft).reshape(B, S, C),
        beta_ft.reshape(B, S, C),
        z.reshape(B, S, L),
    )


if __name__ == "__main__":
    # Small config consistent with the module's __init__ shapes.
    B, S = 2, 8
    H = 32            # dim_hidden[-1]
    L = 16            # dim_latent
    C = 8             # num_classes   (C*L = 128 -> fully lane-dense slabs)
    LAYERS = 4        # radial_layers

    key = jax.random.PRNGKey(0)
    kh, kw, kb, kpc, kz0, kla, kbe = jax.random.split(key, 7)

    h = jax.random.normal(kh, (B, S, H), dtype=jnp.float32)
    # latent_encoder = nn.Linear(H, L): weight (L, H); we pass its transpose (H, L)
    w_enc = 0.1 * jax.random.normal(kw, (H, L), dtype=jnp.float32)
    b_enc = 0.1 * jax.random.normal(kb, (L,), dtype=jnp.float32)
    # global_p_c: class prior probabilities (normalize_dis == 1)
    p_c = jax.nn.softmax(jax.random.normal(kpc, (C,), dtype=jnp.float32))
    # BatchedRadial parameters per flow layer: z0 (C, L), log_alpha (C, 1), beta (C, 1)
    z0 = 0.5 * jax.random.normal(kz0, (LAYERS, C, L), dtype=jnp.float32)
    log_alpha = 0.1 * jax.random.normal(kla, (LAYERS, C, 1), dtype=jnp.float32)
    beta_p = 0.1 * jax.random.normal(kbe, (LAYERS, C, 1), dtype=jnp.float32)

    alpha_feat, beta_ft, ori_z = token_level_alpha_forward(
        h, w_enc, b_enc, p_c, z0, log_alpha, beta_p, dim_latent=L
    )
    jax.block_until_ready((alpha_feat, beta_ft, ori_z))

    ra, rb, rz = reference_forward(
        h, w_enc, b_enc, p_c, z0, log_alpha, beta_p, dim_latent=L
    )
    assert alpha_feat.shape == (B, S, C)
    assert beta_ft.shape == (B, S, C)
    assert ori_z.shape == (B, S, L)
    assert jnp.allclose(alpha_feat, ra, atol=1e-4, rtol=1e-3)
    assert jnp.allclose(beta_ft, rb, atol=1e-4, rtol=1e-3)
    assert jnp.allclose(ori_z, rz, atol=1e-4, rtol=1e-3)

    print("KERNEL_OK")
</pallas_src>

<mosaic_0001>
module attributes {stable_mosaic.version = 11 : i64} {
  func.func @token_level_alpha_kernel(%arg0: i32, %arg1: memref<32x128xf32, #tpu.memory_space<vmem>>, %arg2: memref<128x32xf32, #tpu.memory_space<vmem>>, %arg3: memref<128x1xf32, #tpu.memory_space<vmem>>, %arg4: memref<8x1xf32, #tpu.memory_space<vmem>>, %arg5: memref<4x128x1xf32, #tpu.memory_space<vmem>>, %arg6: memref<4x8x1xf32, #tpu.memory_space<vmem>>, %arg7: memref<4x8x1xf32, #tpu.memory_space<vmem>>, %arg8: memref<128x8xf32, #tpu.memory_space<vmem>>, %arg9: memref<8x128xf32, #tpu.memory_space<vmem>>, %arg10: memref<8x128xf32, #tpu.memory_space<vmem>>, %arg11: memref<8x128xf32, #tpu.memory_space<vmem>>, %arg12: memref<16x128xf32, #tpu.memory_space<vmem>>) attributes {dimension_semantics = [#tpu.dimension_semantics<parallel>], iteration_bounds = array<i64: 1>, scalar_prefetch = 0 : i64, scratch_operands = 0 : i64, tpu.core_type = #tpu.core_type<tc>, window_params = [{transform_indices = @transform_0, window_bounds = array<i64: 32, 128>}, {pipeline_mode = #tpu.pipeline_mode<synchronous>, transform_indices = @transform_1, window_bounds = array<i64: 128, 32>}, {pipeline_mode = #tpu.pipeline_mode<synchronous>, transform_indices = @transform_2, window_bounds = array<i64: 128, 1>}, {pipeline_mode = #tpu.pipeline_mode<synchronous>, transform_indices = @transform_3, window_bounds = array<i64: 8, 1>}, {pipeline_mode = #tpu.pipeline_mode<synchronous>, transform_indices = @transform_4, window_bounds = array<i64: 4, 128, 1>}, {pipeline_mode = #tpu.pipeline_mode<synchronous>, transform_indices = @transform_5, window_bounds = array<i64: 4, 8, 1>}, {pipeline_mode = #tpu.pipeline_mode<synchronous>, transform_indices = @transform_6, window_bounds = array<i64: 4, 8, 1>}, {pipeline_mode = #tpu.pipeline_mode<synchronous>, transform_indices = @transform_7, window_bounds = array<i64: 128, 8>}, {pipeline_mode = #tpu.pipeline_mode<synchronous>, transform_indices = @transform_8, window_bounds = array<i64: 8, 128>}, {transform_indices = @transform_9, window_bounds = array<i64: 8, 128>}, {transform_indices = @transform_10, window_bounds = array<i64: 8, 128>}, {transform_indices = @transform_11, window_bounds = array<i64: 16, 128>}]} {
    %c0 = arith.constant 0 : index
    %c0_0 = arith.constant 0 : index
    %0 = vector.load %arg1[%c0, %c0_0] : memref<32x128xf32, #tpu.memory_space<vmem>>, vector<32x128xf32>
    %c0_1 = arith.constant 0 : index
    %c0_2 = arith.constant 0 : index
    %1 = vector.load %arg2[%c0_1, %c0_2] : memref<128x32xf32, #tpu.memory_space<vmem>>, vector<128x32xf32>
    %cst = arith.constant dense<0.000000e+00> : vector<128x128xf32>
    %2 = tpu.matmul %1, %0, %cst {dimension_numbers = #tpu.dot_dimension_numbers<[1], [0], [0], [1], [0, 0, 1, 1], [], []>, precision = #tpu.contract_precision<fp32>} : vector<128x32xf32>, vector<32x128xf32>, vector<128x128xf32> -> vector<128x128xf32>
    %c0_3 = arith.constant 0 : index
    %c0_4 = arith.constant 0 : index
    %3 = vector.load %arg3[%c0_3, %c0_4] : memref<128x1xf32, #tpu.memory_space<vmem>>, vector<128x1xf32>
    %4 = vector.broadcast %3 : vector<128x1xf32> to vector<128x128xf32>
    %5 = arith.addf %2, %4 : vector<128x128xf32>
    %6 = vector.extract_strided_slice %5 {offsets = [0, 0], sizes = [16, 128], strides = [1, 1]} : vector<128x128xf32> to vector<16x128xf32>
    %c0_5 = arith.constant 0 : index
    %c0_6 = arith.constant 0 : index
    %7 = vector.load %arg12[%c0_5, %c0_6] : memref<16x128xf32, #tpu.memory_space<vmem>>, vector<16x128xf32>
    tpu.vector_store %arg12[%c0_5, %c0_6], %6 {strides = array<i32>} : memref<16x128xf32, #tpu.memory_space<vmem>>, vector<16x128xf32>,
    %c0_7 = arith.constant 0 : index
    %c0_8 = arith.constant 0 : index
    %8 = vector.load %arg8[%c0_7, %c0_8] : memref<128x8xf32, #tpu.memory_space<vmem>>, vector<128x8xf32>
    %c0_9 = arith.constant 0 : index
    %c0_10 = arith.constant 0 : index
    %9 = vector.load %arg9[%c0_9, %c0_10] : memref<8x128xf32, #tpu.memory_space<vmem>>, vector<8x128xf32>
    %cst_11 = arith.constant 0.000000e+00 : f32
    %10 = vector.broadcast %cst_11 : f32 to vector<8x128xf32>
    %c0_12 = arith.constant 0 : index
    %c0_13 = arith.constant 0 : index
    %c0_14 = arith.constant 0 : index
    %11 = vector.load %arg5[%c0_12, %c0_13, %c0_14] : memref<4x128x1xf32, #tpu.memory_space<vmem>>, vector<1x128x1xf32>
    %12 = vector.shape_cast %11 : vector<1x128x1xf32> to vector<128x1xf32>
    %c0_15 = arith.constant 0 : index
    %c0_16 = arith.constant 0 : index
    %c0_17 = arith.constant 0 : index
    %13 = vector.load %arg6[%c0_15, %c0_16, %c0_17] : memref<4x8x1xf32, #tpu.memory_space<vmem>>, vector<1x8x1xf32>
    %14 = vector.shape_cast %13 : vector<1x8x1xf32> to vector<8x1xf32>
    %c0_18 = arith.constant 0 : index
    %c0_19 = arith.constant 0 : index
    %c0_20 = arith.constant 0 : index
    %15 = vector.load %arg7[%c0_18, %c0_19, %c0_20] : memref<4x8x1xf32, #tpu.memory_space<vmem>>, vector<1x8x1xf32>
    %16 = vector.shape_cast %15 : vector<1x8x1xf32> to vector<8x1xf32>
    %17 = vector.broadcast %12 : vector<128x1xf32> to vector<128x128xf32>
    %18 = arith.subf %5, %17 : vector<128x128xf32>
    %19 = arith.mulf %18, %18 : vector<128x128xf32>
    %cst_21 = arith.constant dense<0.000000e+00> : vector<8x128xf32>
    %20 = tpu.matmul %9, %19, %cst_21 {dimension_numbers = #tpu.dot_dimension_numbers<[1], [0], [0], [1], [0, 0, 1, 1], [], []>, precision = #tpu.contract_precision<fp32>} : vector<8x128xf32>, vector<128x128xf32>, vector<8x128xf32> -> vector<8x128xf32>
    %21 = math.sqrt %20 : vector<8x128xf32>
    %22 = vector.broadcast %14 : vector<8x1xf32> to vector<8x128xf32>
    %23 = arith.addf %22, %21 : vector<8x128xf32>
    %cst_22 = arith.constant 1.000000e+00 : f32
    %24 = vector.broadcast %cst_22 : f32 to vector<8x128xf32>
    %25 = arith.divf %24, %23 : vector<8x128xf32>
    %26 = vector.broadcast %16 : vector<8x1xf32> to vector<8x128xf32>
    %27 = arith.mulf %26, %25 : vector<8x128xf32>
    %cst_23 = arith.constant 1.000000e+00 : f32
    %28 = vector.broadcast %cst_23 : f32 to vector<8x128xf32>
    %29 = arith.addf %28, %27 : vector<8x128xf32>
    %30 = math.log %29 : vector<8x128xf32>
    %cst_24 = arith.constant 1.500000e+01 : f32
    %31 = vector.broadcast %cst_24 : f32 to vector<8x128xf32>
    %32 = arith.mulf %31, %30 : vector<8x128xf32>
    %33 = arith.addf %10, %32 : vector<8x128xf32>
    %cst_25 = arith.constant 1.000000e+00 : f32
    %34 = vector.broadcast %cst_25 : f32 to vector<8x128xf32>
    %35 = arith.addf %34, %27 : vector<8x128xf32>
    %36 = vector.broadcast %16 : vector<8x1xf32> to vector<8x128xf32>
    %37 = arith.addf %35, %36 : vector<8x128xf32>
    %38 = vector.broadcast %16 : vector<8x1xf32> to vector<8x128xf32>
    %39 = arith.mulf %38, %21 : vector<8x128xf32>
    %40 = arith.mulf %39, %25 : vector<8x128xf32>
    %41 = arith.mulf %40, %25 : vector<8x128xf32>
    %42 = arith.subf %37, %41 : vector<8x128xf32>
    %43 = math.log %42 : vector<8x128xf32>
    %44 = arith.addf %33, %43 : vector<8x128xf32>
    %cst_26 = arith.constant dense<0.000000e+00> : vector<128x128xf32>
    %45 = tpu.matmul %8, %27, %cst_26 {dimension_numbers = #tpu.dot_dimension_numbers<[1], [0], [0], [1], [0, 0, 1, 1], [], []>, precision = #tpu.contract_precision<fp32>} : vector<128x8xf32>, vector<8x128xf32>, vector<128x128xf32> -> vector<128x128xf32>
    %46 = arith.mulf %45, %18 : vector<128x128xf32>
    %47 = arith.addf %5, %46 : vector<128x128xf32>
    %c1 = arith.constant 1 : index
    %c0_27 = arith.constant 0 : index
    %c0_28 = arith.constant 0 : index
    %48 = vector.load %arg5[%c1, %c0_27, %c0_28] : memref<4x128x1xf32, #tpu.memory_space<vmem>>, vector<1x128x1xf32>
    %49 = vector.shape_cast %48 : vector<1x128x1xf32> to vector<128x1xf32>
    %c1_29 = arith.constant 1 : index
    %c0_30 = arith.constant 0 : index
    %c0_31 = arith.constant 0 : index
    %50 = vector.load %arg6[%c1_29, %c0_30, %c0_31] : memref<4x8x1xf32, #tpu.memory_space<vmem>>, vector<1x8x1xf32>
    %51 = vector.shape_cast %50 : vector<1x8x1xf32> to vector<8x1xf32>
    %c1_32 = arith.constant 1 : index
    %c0_33 = arith.constant 0 : index
    %c0_34 = arith.constant 0 : index
    %52 = vector.load %arg7[%c1_32, %c0_33, %c0_34] : memref<4x8x1xf32, #tpu.memory_space<vmem>>, vector<1x8x1xf32>
    %53 = vector.shape_cast %52 : vector<1x8x1xf32> to vector<8x1xf32>
    %54 = vector.broadcast %49 : vector<128x1xf32> to vector<128x128xf32>
    %55 = arith.subf %47, %54 : vector<128x128xf32>
    %56 = arith.mulf %55, %55 : vector<128x128xf32>
    %cst_35 = arith.constant dense<0.000000e+00> : vector<8x128xf32>
    %57 = tpu.matmul %9, %56, %cst_35 {dimension_numbers = #tpu.dot_dimension_numbers<[1], [0], [0], [1], [0, 0, 1, 1], [], []>, precision = #tpu.contract_precision<fp32>} : vector<8x128xf32>, vector<128x128xf32>, vector<8x128xf32> -> vector<8x128xf32>
    %58 = math.sqrt %57 : vector<8x128xf32>
    %59 = vector.broadcast %51 : vector<8x1xf32> to vector<8x128xf32>
    %60 = arith.addf %59, %58 : vector<8x128xf32>
    %cst_36 = arith.constant 1.000000e+00 : f32
    %61 = vector.broadcast %cst_36 : f32 to vector<8x128xf32>
    %62 = arith.divf %61, %60 : vector<8x128xf32>
    %63 = vector.broadcast %53 : vector<8x1xf32> to vector<8x128xf32>
    %64 = arith.mulf %63, %62 : vector<8x128xf32>
    %cst_37 = arith.constant 1.000000e+00 : f32
    %65 = vector.broadcast %cst_37 : f32 to vector<8x128xf32>
    %66 = arith.addf %65, %64 : vector<8x128xf32>
    %67 = math.log %66 : vector<8x128xf32>
    %cst_38 = arith.constant 1.500000e+01 : f32
    %68 = vector.broadcast %cst_38 : f32 to vector<8x128xf32>
    %69 = arith.mulf %68, %67 : vector<8x128xf32>
    %70 = arith.addf %44, %69 : vector<8x128xf32>
    %cst_39 = arith.constant 1.000000e+00 : f32
    %71 = vector.broadcast %cst_39 : f32 to vector<8x128xf32>
    %72 = arith.addf %71, %64 : vector<8x128xf32>
    %73 = vector.broadcast %53 : vector<8x1xf32> to vector<8x128xf32>
    %74 = arith.addf %72, %73 : vector<8x128xf32>
    %75 = vector.broadcast %53 : vector<8x1xf32> to vector<8x128xf32>
    %76 = arith.mulf %75, %58 : vector<8x128xf32>
    %77 = arith.mulf %76, %62 : vector<8x128xf32>
    %78 = arith.mulf %77, %62 : vector<8x128xf32>
    %79 = arith.subf %74, %78 : vector<8x128xf32>
    %80 = math.log %79 : vector<8x128xf32>
    %81 = arith.addf %70, %80 : vector<8x128xf32>
    %cst_40 = arith.constant dense<0.000000e+00> : vector<128x128xf32>
    %82 = tpu.matmul %8, %64, %cst_40 {dimension_numbers = #tpu.dot_dimension_numbers<[1], [0], [0], [1], [0, 0, 1, 1], [], []>, precision = #tpu.contract_precision<fp32>} : vector<128x8xf32>, vector<8x128xf32>, vector<128x128xf32> -> vector<128x128xf32>
    %83 = arith.mulf %82, %55 : vector<128x128xf32>
    %84 = arith.addf %47, %83 : vector<128x128xf32>
    %c2 = arith.constant 2 : index
    %c0_41 = arith.constant 0 : index
    %c0_42 = arith.constant 0 : index
    %85 = vector.load %arg5[%c2, %c0_41, %c0_42] : memref<4x128x1xf32, #tpu.memory_space<vmem>>, vector<1x128x1xf32>
    %86 = vector.shape_cast %85 : vector<1x128x1xf32> to vector<128x1xf32>
    %c2_43 = arith.constant 2 : index
    %c0_44 = arith.constant 0 : index
    %c0_45 = arith.constant 0 : index
    %87 = vector.load %arg6[%c2_43, %c0_44, %c0_45] : memref<4x8x1xf32, #tpu.memory_space<vmem>>, vector<1x8x1xf32>
    %88 = vector.shape_cast %87 : vector<1x8x1xf32> to vector<8x1xf32>
    %c2_46 = arith.constant 2 : index
    %c0_47 = arith.constant 0 : index
    %c0_48 = arith.constant 0 : index
    %89 = vector.load %arg7[%c2_46, %c0_47, %c0_48] : memref<4x8x1xf32, #tpu.memory_space<vmem>>, vector<1x8x1xf32>
    %90 = vector.shape_cast %89 : vector<1x8x1xf32> to vector<8x1xf32>
    %91 = vector.broadcast %86 : vector<128x1xf32> to vector<128x128xf32>
    %92 = arith.subf %84, %91 : vector<128x128xf32>
    %93 = arith.mulf %92, %92 : vector<128x128xf32>
    %cst_49 = arith.constant dense<0.000000e+00> : vector<8x128xf32>
    %94 = tpu.matmul %9, %93, %cst_49 {dimension_numbers = #tpu.dot_dimension_numbers<[1], [0], [0], [1], [0, 0, 1, 1], [], []>, precision = #tpu.contract_precision<fp32>} : vector<8x128xf32>, vector<128x128xf32>, vector<8x128xf32> -> vector<8x128xf32>
    %95 = math.sqrt %94 : vector<8x128xf32>
    %96 = vector.broadcast %88 : vector<8x1xf32> to vector<8x128xf32>
    %97 = arith.addf %96, %95 : vector<8x128xf32>
    %cst_50 = arith.constant 1.000000e+00 : f32
    %98 = vector.broadcast %cst_50 : f32 to vector<8x128xf32>
    %99 = arith.divf %98, %97 : vector<8x128xf32>
    %100 = vector.broadcast %90 : vector<8x1xf32> to vector<8x128xf32>
    %101 = arith.mulf %100, %99 : vector<8x128xf32>
    %cst_51 = arith.constant 1.000000e+00 : f32
    %102 = vector.broadcast %cst_51 : f32 to vector<8x128xf32>
    %103 = arith.addf %102, %101 : vector<8x128xf32>
    %104 = math.log %103 : vector<8x128xf32>
    %cst_52 = arith.constant 1.500000e+01 : f32
    %105 = vector.broadcast %cst_52 : f32 to vector<8x128xf32>
    %106 = arith.mulf %105, %104 : vector<8x128xf32>
    %107 = arith.addf %81, %106 : vector<8x128xf32>
    %cst_53 = arith.constant 1.000000e+00 : f32
    %108 = vector.broadcast %cst_53 : f32 to vector<8x128xf32>
    %109 = arith.addf %108, %101 : vector<8x128xf32>
    %110 = vector.broadcast %90 : vector<8x1xf32> to vector<8x128xf32>
    %111 = arith.addf %109, %110 : vector<8x128xf32>
    %112 = vector.broadcast %90 : vector<8x1xf32> to vector<8x128xf32>
    %113 = arith.mulf %112, %95 : vector<8x128xf32>
    %114 = arith.mulf %113, %99 : vector<8x128xf32>
    %115 = arith.mulf %114, %99 : vector<8x128xf32>
    %116 = arith.subf %111, %115 : vector<8x128xf32>
    %117 = math.log %116 : vector<8x128xf32>
    %118 = arith.addf %107, %117 : vector<8x128xf32>
    %cst_54 = arith.constant dense<0.000000e+00> : vector<128x128xf32>
    %119 = tpu.matmul %8, %101, %cst_54 {dimension_numbers = #tpu.dot_dimension_numbers<[1], [0], [0], [1], [0, 0, 1, 1], [], []>, precision = #tpu.contract_precision<fp32>} : vector<128x8xf32>, vector<8x128xf32>, vector<128x128xf32> -> vector<128x128xf32>
    %120 = arith.mulf %119, %92 : vector<128x128xf32>
    %121 = arith.addf %84, %120 : vector<128x128xf32>
    %c3 = arith.constant 3 : index
    %c0_55 = arith.constant 0 : index
    %c0_56 = arith.constant 0 : index
    %122 = vector.load %arg5[%c3, %c0_55, %c0_56] : memref<4x128x1xf32, #tpu.memory_space<vmem>>, vector<1x128x1xf32>
    %123 = vector.shape_cast %122 : vector<1x128x1xf32> to vector<128x1xf32>
    %c3_57 = arith.constant 3 : index
    %c0_58 = arith.constant 0 : index
    %c0_59 = arith.constant 0 : index
    %124 = vector.load %arg6[%c3_57, %c0_58, %c0_59] : memref<4x8x1xf32, #tpu.memory_space<vmem>>, vector<1x8x1xf32>
    %125 = vector.shape_cast %124 : vector<1x8x1xf32> to vector<8x1xf32>
    %c3_60 = arith.constant 3 : index
    %c0_61 = arith.constant 0 : index
    %c0_62 = arith.constant 0 : index
    %126 = vector.load %arg7[%c3_60, %c0_61, %c0_62] : memref<4x8x1xf32, #tpu.memory_space<vmem>>, vector<1x8x1xf32>
    %127 = vector.shape_cast %126 : vector<1x8x1xf32> to vector<8x1xf32>
    %128 = vector.broadcast %123 : vector<128x1xf32> to vector<128x128xf32>
    %129 = arith.subf %121, %128 : vector<128x128xf32>
    %130 = arith.mulf %129, %129 : vector<128x128xf32>
    %cst_63 = arith.constant dense<0.000000e+00> : vector<8x128xf32>
    %131 = tpu.matmul %9, %130, %cst_63 {dimension_numbers = #tpu.dot_dimension_numbers<[1], [0], [0], [1], [0, 0, 1, 1], [], []>, precision = #tpu.contract_precision<fp32>} : vector<8x128xf32>, vector<128x128xf32>, vector<8x128xf32> -> vector<8x128xf32>
    %132 = math.sqrt %131 : vector<8x128xf32>
    %133 = vector.broadcast %125 : vector<8x1xf32> to vector<8x128xf32>
    %134 = arith.addf %133, %132 : vector<8x128xf32>
    %cst_64 = arith.constant 1.000000e+00 : f32
    %135 = vector.broadcast %cst_64 : f32 to vector<8x128xf32>
    %136 = arith.divf %135, %134 : vector<8x128xf32>
    %137 = vector.broadcast %127 : vector<8x1xf32> to vector<8x128xf32>
    %138 = arith.mulf %137, %136 : vector<8x128xf32>
    %cst_65 = arith.constant 1.000000e+00 : f32
    %139 = vector.broadcast %cst_65 : f32 to vector<8x128xf32>
    %140 = arith.addf %139, %138 : vector<8x128xf32>
    %141 = math.log %140 : vector<8x128xf32>
    %cst_66 = arith.constant 1.500000e+01 : f32
    %142 = vector.broadcast %cst_66 : f32 to vector<8x128xf32>
    %143 = arith.mulf %142, %141 : vector<8x128xf32>
    %144 = arith.addf %118, %143 : vector<8x128xf32>
    %cst_67 = arith.constant 1.000000e+00 : f32
    %145 = vector.broadcast %cst_67 : f32 to vector<8x128xf32>
    %146 = arith.addf %145, %138 : vector<8x128xf32>
    %147 = vector.broadcast %127 : vector<8x1xf32> to vector<8x128xf32>
    %148 = arith.addf %146, %147 : vector<8x128xf32>
    %149 = vector.broadcast %127 : vector<8x1xf32> to vector<8x128xf32>
    %150 = arith.mulf %149, %132 : vector<8x128xf32>
    %151 = arith.mulf %150, %136 : vector<8x128xf32>
    %152 = arith.mulf %151, %136 : vector<8x128xf32>
    %153 = arith.subf %148, %152 : vector<8x128xf32>
    %154 = math.log %153 : vector<8x128xf32>
    %155 = arith.addf %144, %154 : vector<8x128xf32>
    %cst_68 = arith.constant dense<0.000000e+00> : vector<128x128xf32>
    %156 = tpu.matmul %8, %138, %cst_68 {dimension_numbers = #tpu.dot_dimension_numbers<[1], [0], [0], [1], [0, 0, 1, 1], [], []>, precision = #tpu.contract_precision<fp32>} : vector<128x8xf32>, vector<8x128xf32>, vector<128x128xf32> -> vector<128x128xf32>
    %157 = arith.mulf %156, %129 : vector<128x128xf32>
    %158 = arith.addf %121, %157 : vector<128x128xf32>
    %159 = arith.mulf %158, %158 : vector<128x128xf32>
    %cst_69 = arith.constant dense<0.000000e+00> : vector<8x128xf32>
    %160 = tpu.matmul %9, %159, %cst_69 {dimension_numbers = #tpu.dot_dimension_numbers<[1], [0], [0], [1], [0, 0, 1, 1], [], []>, precision = #tpu.contract_precision<fp32>} : vector<8x128xf32>, vector<128x128xf32>, vector<8x128xf32> -> vector<8x128xf32>
    %cst_70 = arith.constant 29.4060326 : f32
    %161 = vector.broadcast %cst_70 : f32 to vector<8x128xf32>
    %162 = arith.addf %161, %160 : vector<8x128xf32>
    %cst_71 = arith.constant -5.000000e-01 : f32
    %163 = vector.broadcast %cst_71 : f32 to vector<8x128xf32>
    %164 = arith.mulf %163, %162 : vector<8x128xf32>
    %165 = arith.addf %164, %155 : vector<8x128xf32>
    %c0_72 = arith.constant 0 : index
    %c0_73 = arith.constant 0 : index
    %166 = vector.load %arg4[%c0_72, %c0_73] : memref<8x1xf32, #tpu.memory_space<vmem>>, vector<8x1xf32>
    %167 = vector.broadcast %166 : vector<8x1xf32> to vector<8x128xf32>
    %168 = arith.addf %165, %167 : vector<8x128xf32>
    %cst_74 = arith.constant 20.2481937 : f32
    %169 = vector.broadcast %cst_74 : f32 to vector<8x128xf32>
    %170 = arith.addf %168, %169 : vector<8x128xf32>
    %cst_75 = arith.constant -3.000000e+01 : f32
    %cst_76 = arith.constant 3.000000e+01 : f32
    %171 = vector.broadcast %cst_75 : f32 to vector<8x128xf32>
    %172 = arith.maximumf %171, %170 : vector<8x128xf32>
    %173 = vector.broadcast %cst_76 : f32 to vector<8x128xf32>
    %174 = arith.minimumf %173, %172 : vector<8x128xf32>
    %175 = math.exp %174 : vector<8x128xf32>
    %c0_77 = arith.constant 0 : index
    %c0_78 = arith.constant 0 : index
    %176 = vector.load %arg11[%c0_77, %c0_78] : memref<8x128xf32, #tpu.memory_space<vmem>>, vector<8x128xf32>
    tpu.vector_store %arg11[%c0_77, %c0_78], %175 {strides = array<i32>} : memref<8x128xf32, #tpu.memory_space<vmem>>, vector<8x128xf32>,
    %cst_79 = arith.constant 1.000000e+00 : f32
    %177 = vector.broadcast %cst_79 : f32 to vector<8x128xf32>
    %178 = arith.addf %177, %175 : vector<8x128xf32>
    %c0_80 = arith.constant 0 : index
    %c0_81 = arith.constant 0 : index
    %179 = vector.load %arg10[%c0_80, %c0_81] : memref<8x128xf32, #tpu.memory_space<vmem>>, vector<8x128xf32>
    tpu.vector_store %arg10[%c0_80, %c0_81], %178 {strides = array<i32>} : memref<8x128xf32, #tpu.memory_space<vmem>>, vector<8x128xf32>,
    return
  }
  func.func @transform_0(%arg0: i32) -> (i32, i32) {
    %c0_i32 = arith.constant 0 : i32
    %c0_i32_0 = arith.constant 0 : i32
    return %c0_i32, %arg0 : i32, i32
  }
  func.func @transform_1(%arg0: i32) -> (i32, i32) {
    %c0_i32 = arith.constant 0 : i32
    %c0_i32_0 = arith.constant 0 : i32
    %c0_i32_1 = arith.constant 0 : i32
    return %c0_i32, %c0_i32_0 : i32, i32
  }
  func.func @transform_2(%arg0: i32) -> (i32, i32) {
    %c0_i32 = arith.constant 0 : i32
    %c0_i32_0 = arith.constant 0 : i32
    %c0_i32_1 = arith.constant 0 : i32
    return %c0_i32, %c0_i32_0 : i32, i32
  }
  func.func @transform_3(%arg0: i32) -> (i32, i32) {
    %c0_i32 = arith.constant 0 : i32
    %c0_i32_0 = arith.constant 0 : i32
    %c0_i32_1 = arith.constant 0 : i32
    return %c0_i32, %c0_i32_0 : i32, i32
  }
  func.func @transform_4(%arg0: i32) -> (i32, i32, i32) {
    %c0_i32 = arith.constant 0 : i32
    %c0_i32_0 = arith.constant 0 : i32
    %c0_i32_1 = arith.constant 0 : i32
    %c0_i32_2 = arith.constant 0 : i32
    return %c0_i32, %c0_i32_0, %c0_i32_1 : i32, i32, i32
  }
  func.func @transform_5(%arg0: i32) -> (i32, i32, i32) {
    %c0_i32 = arith.constant 0 : i32
    %c0_i32_0 = arith.constant 0 : i32
    %c0_i32_1 = arith.constant 0 : i32
    %c0_i32_2 = arith.constant 0 : i32
    return %c0_i32, %c0_i32_0, %c0_i32_1 : i32, i32, i32
  }
  func.func @transform_6(%arg0: i32) -> (i32, i32, i32) {
    %c0_i32 = arith.constant 0 : i32
    %c0_i32_0 = arith.constant 0 : i32
    %c0_i32_1 = arith.constant 0 : i32
    %c0_i32_2 = arith.constant 0 : i32
    return %c0_i32, %c0_i32_0, %c0_i32_1 : i32, i32, i32
  }
  func.func @transform_7(%arg0: i32) -> (i32, i32) {
    %c0_i32 = arith.constant 0 : i32
    %c0_i32_0 = arith.constant 0 : i32
    %c0_i32_1 = arith.constant 0 : i32
    return %c0_i32, %c0_i32_0 : i32, i32
  }
  func.func @transform_8(%arg0: i32) -> (i32, i32) {
    %c0_i32 = arith.constant 0 : i32
    %c0_i32_0 = arith.constant 0 : i32
    %c0_i32_1 = arith.constant 0 : i32
    return %c0_i32, %c0_i32_0 : i32, i32
  }
  func.func @transform_9(%arg0: i32) -> (i32, i32) {
    %c0_i32 = arith.constant 0 : i32
    %c0_i32_0 = arith.constant 0 : i32
    return %c0_i32, %arg0 : i32, i32
  }
  func.func @transform_10(%arg0: i32) -> (i32, i32) {
    %c0_i32 = arith.constant 0 : i32
    %c0_i32_0 = arith.constant 0 : i32
    return %c0_i32, %arg0 : i32, i32
  }
  func.func @transform_11(%arg0: i32) -> (i32, i32) {
    %c0_i32 = arith.constant 0 : i32
    %c0_i32_0 = arith.constant 0 : i32
    return %c0_i32, %arg0 : i32, i32
  }
}

</mosaic_0001>

<bundles_post_ra>
// kernel: tpu_custom_call.1
= control target key start
LH: loop header
LB: loop body
LE: loop exit
PB: predicated region body
PF: predicated region fallthrough
CT: control target
= control target key end

     0   :  { %17 = vsyncpa [#allocation3], 0  ;;  %vm153_vm0 = vcmask 261120   ;;  %v6200_v3 = vmov 0   ;;  %s10296_s0 = inlined_call_operand.vmem [shape: f32[32,128], index: 0, kind: input, shape index: {}]   ;;  %s10297_s1 = inlined_call_operand.vmem [shape: f32[128,32], index: 1, kind: input, shape index: {}]   ;;  %s10298_s2 = inlined_call_operand.vmem [shape: f32[128,1], index: 2, kind: input, shape index: {}]   ;;  %s10299_s3 = inlined_call_operand.vmem [shape: f32[8,1], index: 3, kind: input, shape index: {}]   ;;  %s10300_s4 = inlined_call_operand.vmem [shape: f32[4,128,1], index: 4, kind: input, shape index: {}]   ;;  %s10301_s5 = inlined_call_operand.vmem [shape: f32[4,8,1], index: 5, kind: input, shape index: {}]   ;;  %s10302_s6 = inlined_call_operand.vmem [shape: f32[4,8,1], index: 6, kind: input, shape index: {}]   ;;  %s10303_s7 = inlined_call_operand.vmem [shape: f32[128,8], index: 7, kind: input, shape index: {}]   ;;  %s10304_s8 = inlined_call_operand.vmem [shape: f32[8,128], index: 8, kind: input, shape index: {}]   ;;  %s10305_s9 = inlined_call_operand.hbm [shape: f32[8,128], index: 9, kind: output, shape index: {0}]   ;;  %s10306_s10 = inlined_call_operand.hbm [shape: f32[8,128], index: 10, kind: output, shape index: {1}]   ;;  %s10307_s11 = inlined_call_operand.hbm [shape: f32[16,128], index: 11, kind: output, shape index: {2}]  }
   0x1   :  { %v72_v0 = vld [vmem:[%s10298_s2 + $0x78] sm:$0xff]  ;;  %v70_v1 = vld [vmem:[%s10298_s2 + $0x68] sm:$0xff]  ;;  %6086 = vset.pattern.permute.xlu1 %v6200_v3  ;;  %6085 = vset.pattern.permute.xlu0 %v6200_v3  ;;  %v39_v5 = vld [vmem:[%s10296_s0 + $0x10] sm:$0xff] }
   0x2   :  { %v40_v2 = vld [vmem:[%s10296_s0 + $0x18] sm:$0xff]  ;;  %v38_v6 = vld [vmem:[%s10296_s0 + $0x8] sm:$0xff]  ;;  %150 = vperm.xlu0 %6085, %v72_v0   ;;  %140 = vperm.xlu1 %6086, %v70_v1   ;;  %v6283_v7 = vand.u32 4294901760, %v39_v5  ;;  %v37_v9 = vld [vmem:[%s10296_s0] sm:$0xff] }
   0x3   :  { %v6275_v4 = vand.u32 4294901760, %v40_v2  ;;  %v6285_v8 = vand.u32 4294901760, %v38_v6  ;;  %v41_v10 = vld [vmem:[%s10297_s1] sm:$0xff]  ;;  %v6295_v11 = vand.u32 4294901760, %v37_v9  ;;  %v56_v14 = vld [vmem:[%s10297_s1 + $0x78] sm:$0xff]  ;;  %6087 = vset.pattern.permute.xlu2 %v6200_v3  ;;  %v42_v20 = vld [vmem:[%s10297_s1 + $0x8] sm:$0xff] }
   0x4   :  { %v155_v13 = vsel %vm153_vm0, %v41_v10, 0  ;;  %v200_v16 = vsel %vm153_vm0, %v56_v14, 0  ;;  %v6306_v17 = vsub.f32 %v39_v5, %v6283_v7  ;;  %v68_v19 = vld [vmem:[%s10298_s2 + $0x58] sm:$0xff]  ;;  %v158_v24 = vsel %vm153_vm0, %v42_v20, 0  ;;  %v43_v25 = vld [vmem:[%s10297_s1 + $0x10] sm:$0xff]  ;;  %v69_v31 = vld [vmem:[%s10298_s2 + $0x60] sm:$0xff] }
   0x5   :  { %215 = vmatpush.msra.mxu0 %v6275_v4  ;;  %6071 = vmatpush.msra.mxu2 %v6275_v4  ;;  %v364_v12 = vsub.f32 %v40_v2, %v6275_v4  ;;  %v6302_v15 = vand.u32 4294901760, %v155_v13  ;;  %v6309_v18 = vsub.f32 %v38_v6, %v6285_v8  ;;  %v6319_v22 = vand.u32 4294901760, %v200_v16  ;;  %v71_v30 = vld [vmem:[%s10298_s2 + $0x70] sm:$0xff] }
   0x6   :  { %v6322_v23 = vsub.f32 %v37_v9, %v6295_v11  ;;  %v371_v27 = vand.u32 4294901760, %v6306_v17  ;;  %130 = vperm.xlu2 %6087, %v68_v19   ;;  %v6333_v29 = vand.u32 4294901760, %v158_v24  ;;  %v161_v35 = vsel %vm153_vm0, %v43_v25, 0 }
   0x7   :  { %217 = vmatpush.msra.mxu0 %v6283_v7  ;;  %6072 = vmatpush.msra.mxu2 %v6283_v7  ;;  %v365_v21 = vand.u32 4294901760, %v364_v12  ;;  %v6329_v26 = vsub.f32 %v155_v13, %v6302_v15  ;;  %v377_v28 = vand.u32 4294901760, %v6309_v18  ;;  %v6344_v33 = vsub.f32 %v200_v16, %v6319_v22 }
   0x8   :  { %v383_v34 = vand.u32 4294901760, %v6322_v23  ;;  %v372_v37 = vsub.f32 %v6306_v17, %v371_v27  ;;  %v6356_v39 = vsub.f32 %v158_v24, %v6333_v29 }
   0x9   :  { %219 = vmatpush.msra.mxu0 %v6285_v8  ;;  %6073 = vmatpush.msra.mxu2 %v6285_v8  ;;  %v366_v32 = vsub.f32 %v364_v12, %v365_v21  ;;  %v224_v36 = vand.u32 4294901760, %v6329_v26  ;;  %v378_v38 = vsub.f32 %v6309_v18, %v377_v28 }
   0xa   :  { %18 = vsyncpa [#allocation5], 0  ;;  %v344_v41 = vand.u32 4294901760, %v6344_v33  ;;  %v384_v42 = vsub.f32 %v6322_v23, %v383_v34  ;;  %145 = vperm.xlu0 %6085, %v71_v30   ;;  %135 = vperm.xlu1 %6086, %v69_v31   ;;  %v373_v44 = vand.u32 4294901760, %v372_v37  ;;  %v232_v45 = vand.u32 4294901760, %v6356_v39  ;;  %v44_v50 = vld [vmem:[%s10297_s1 + $0x18] sm:$0xff] }
   0xb   :  { %221 = vmatpush.msra.mxu0 %v6295_v11  ;;  %6074 = vmatpush.msra.mxu2 %v6295_v11  ;;  %v367_v40 = vand.u32 4294901760, %v366_v32  ;;  %v225_v43 = vsub.f32 %v6329_v26, %v224_v36  ;;  %v6368_v46 = vand.u32 4294901760, %v161_v35  ;;  %v379_v48 = vand.u32 4294901760, %v378_v38  ;;  %v67_v54 = vld [vmem:[%s10298_s2 + $0x50] sm:$0xff]  ;;  %v886_v56 = vld [vmem:[%s10300_s4 + $0x78] sm:$0xff]  ;;  %v66_v58 = vld [vmem:[%s10298_s2 + $0x48] sm:$0xff] }
   0xc   :  { %v345_v47 = vsub.f32 %v6344_v33, %v344_v41  ;;  %v385_v52 = vand.u32 4294901760, %v384_v42  ;;  %v233_v53 = vsub.f32 %v6356_v39, %v232_v45  ;;  %v164_v57 = vsel %vm153_vm0, %v44_v50, 0  ;;  %v45_v62 = vld [vmem:[%s10297_s1 + $0x20] sm:$0xff]  ;;  %v64_v2 = vld [vmem:[%s10298_s2 + $0x38] sm:$0xff]  ;;  %v885_v5 = vld [vmem:[%s10300_s4 + $0x70] sm:$0xff]  ;;  %s5985_s28 = sshll.u32 %s10306_s10, 4  ;;  %s5986_s28 = int_to_ptr.hbm [resolvable:$true] %s5985_s28 }
   0xd   :  { %368 = vmatpush.msra.mxu1 %v367_v40  ;;  %6075 = vmatpush.msra.mxu3 %v367_v40  ;;  %v226_v49 = vand.u32 4294901760, %v225_v43  ;;  %v6384_v55 = vsub.f32 %v161_v35, %v6368_v46  ;;  %v6395_v61 = vand.u32 4294901760, %v164_v57  ;;  %v65_v0 = vld [vmem:[%s10298_s2 + $0x40] sm:$0xff]  ;;  %v167_v3 = vsel %vm153_vm0, %v45_v62, 0  ;;  %v48_v31 = vld [vmem:[%s10297_s1 + $0x38] sm:$0xff]  ;;  %s6202_s29 = smov [#allocation6]  }
   0xe   :  { %466 = vmatpush.msrb.mxu2 %v364_v12  ;;  %689 = vmatpush.msrb.mxu0 %v365_v21  ;;  %v346_v51 = vand.u32 4294901760, %v345_v47  ;;  %v234_v59 = vand.u32 4294901760, %v233_v53  ;;  %v6430_v9 = vand.u32 4294901760, %v167_v3  ;;  %v884_v12 = vld [vmem:[%s10300_s4 + $0x68] sm:$0xff]  ;;  %v883_v14 = vld [vmem:[%s10300_s4 + $0x60] sm:$0xff]  ;;  %v176_v37 = vsel %vm153_vm0, %v48_v31, 0 }
   0xf   :  { %374 = vmatpush.msra.mxu1 %v373_v44  ;;  %6076 = vmatpush.msra.mxu3 %v373_v44  ;;  %v240_v60 = vand.u32 4294901760, %v6384_v55  ;;  %v6413_v1 = vsub.f32 %v164_v57, %v6395_v61  ;;  %v62_v21 = vld [vmem:[%s10298_s2 + $0x28] sm:$0xff]  ;;  %v61_v24 = vld [vmem:[%s10298_s2 + $0x20] sm:$0xff]  ;;  %v60_v38 = vld [vmem:[%s10298_s2 + $0x18] sm:$0xff]  ;;  %v6507_v42 = vand.u32 4294901760, %v176_v37  ;;  %vm1394_vm3 = vcmask 64512  }
  0x10   :  { %227 = vmatmul.f32.vlgmr.msra.gmra.mxu0 %v226_v49  ;;  %469 = vmatpush.msrb.mxu2 %v6306_v17  ;;  %v6447_v13 = vsub.f32 %v167_v3, %v6430_v9  ;;  %v49_v43 = vld [vmem:[%s10297_s1 + $0x40] sm:$0xff]  ;;  %v878_v57 = vld [vmem:[%s10300_s4 + $0x38] sm:$0xff]  ;;  %s5993_s30 = sshll.u32 %s6202_s29, 4  ;;  %s5995_s0 = sshll.u32 %s10307_s11, 4  ;;  %s5994_s30 = int_to_ptr.vmem [resolvable:$true] %s5993_s30  ;;  %s5996_s0 = int_to_ptr.hbm [resolvable:$true] %s5995_s0 }
  0x11   :  { %347 = vmatmul.f32.vlgmr.msra.gmra.mxu2 %v346_v51  ;;  %380 = vmatpush.msra.mxu1 %v379_v48  ;;  %v241_v63 = vsub.f32 %v6384_v55, %v240_v60  ;;  %v248_v6 = vand.u32 4294901760, %v6413_v1  ;;  %v6518_v47 = vsub.f32 %v176_v37, %v6507_v42  ;;  %v179_v49 = vsel %vm153_vm0, %v49_v43, 0  ;;  %v879_v50 = vld [vmem:[%s10300_s4 + $0x40] sm:$0xff]  ;;  %v6031_v31 = vld [vmem:[%s10300_s4 + $0xf8] sm:$0xff]  ;;  %v6030_v43 = vld [vmem:[%s10300_s4 + $0xf0] sm:$0xff]  ;;  %s6203_s14 = smov [#allocation2]  }
  0x12   :  { %6077 = vmatpush.msra.mxu3 %v379_v48  ;;  %472 = vmatpush.msrb.mxu2 %v6309_v18  ;;  %v256_v18 = vand.u32 4294901760, %v6447_v13  ;;  %v58_v48 = vld [vmem:[%s10298_s2 + $0x8] sm:$0xff]  ;;  %v6529_v53 = vand.u32 4294901760, %v179_v49  ;;  %s5972_s15 = sshll.u32 %s6203_s14, 4  ;;  %s5974_s17 = sshll.u32 %s10305_s9, 4  ;;  %s5973_s15 = int_to_ptr.vmem [resolvable:$true] %s5972_s15  ;;  %s5975_s17 = int_to_ptr.hbm [resolvable:$true] %s5974_s17 }
  0x13   :  { %386 = vmatpush.msra.mxu1 %v385_v52  ;;  %125 = vperm.xlu2 %6087, %v67_v54   ;;  %v249_v10 = vsub.f32 %v6413_v1, %v248_v6  ;;  %v50_v54 = vld [vmem:[%s10297_s1 + $0x48] sm:$0xff]  ;;  %s6204_s10 = smov 128   ;;  %s6205_s18 = smov 8  }
  0x14   :  { %6078 = vmatpush.msra.mxu3 %v385_v52  ;;  %966 = vperm.xlu1 %6086, %v886_v56   ;;  %v257_v20 = vsub.f32 %v6447_v13, %v256_v18  ;;  %v280_v52 = vand.u32 4294901760, %v6518_v47  ;;  %v6537_v56 = vsub.f32 %v179_v49, %v6529_v53 }
  0x15   :  { %120 = vperm.xlu0 %6085, %v66_v58   ;;  %388 = vmatmul.f32.vlgmr.msra.gmra.mxu1 %v6302_v15  ;;  %v250_v17 = vand.u32 4294901760, %v249_v10  ;;  %v877_v58 = vld [vmem:[%s10300_s4 + $0x30] sm:$0xff] }
  0x16   :  { %448 = vmatmul.f32.vlgmr.msra.gmra.mxu3 %v6319_v22  ;;  %475 = vmatpush.msrb.mxu2 %v6322_v23 }
  0x17   :  { %570 = vmatpush.msrb.mxu3 %v6275_v4  ;;  %693 = vmatpush.msrb.mxu0 %v371_v27  ;;  %v258_v27 = vand.u32 4294901760, %v257_v20  ;;  %v872_v20 = vld [vmem:[%s10300_s4 + $0x8] sm:$0xff] }
  0x18   :  { %235 = vmatmul.f32.gmra.mxu0 %v234_v59  ;;  %780 = vmatpush.msrb.mxu1 %v6275_v4  ;;  %v242_v4 = vand.u32 4294901760, %v241_v63  ;;  %v182_v59 = vsel %vm153_vm0, %v50_v54, 0  ;;  %v288_v63 = vand.u32 4294901760, %v6537_v56 }
  0x19   :  { %478 = vmatmul.f32.vlgmr.msrb.gmra.mxu2 %v6329_v26  ;;  %572 = vmatpush.msrb.mxu3 %v6283_v7  ;;  %v882_v26 = vld [vmem:[%s10300_s4 + $0x58] sm:$0xff] }
  0x1a   :  { %697 = vmatpush.msrb.mxu0 %v377_v28  ;;  %782 = vmatpush.msrb.mxu1 %v6283_v7  ;;  %v46_v7 = vld [vmem:[%s10297_s1 + $0x28] sm:$0xff] }
  0x1b   :  { %574 = vmatpush.msrb.mxu3 %v6285_v8  ;;  %115 = vperm.xlu2 %6087, %v65_v0   ;;  %v170_v16 = vsel %vm153_vm0, %v46_v7, 0  ;;  %v6551_v0 = vand.u32 4294901760, %v182_v59  ;;  %v875_v7 = vld [vmem:[%s10300_s4 + $0x20] sm:$0xff] }
  0x1c   :  { %110 = vperm.xlu1 %6086, %v64_v2   ;;  %701 = vmatpush.msrb.mxu0 %v383_v34  ;;  %v6459_v19 = vand.u32 4294901760, %v170_v16  ;;  %v881_v34 = vld [vmem:[%s10300_s4 + $0x50] sm:$0xff]  ;;  %v289_v2 = vsub.f32 %v6537_v56, %v288_v63 }
  0x1d   :  { %576 = vmatpush.msrb.mxu3 %v6295_v11  ;;  %961 = vperm.xlu0 %6085, %v885_v5   ;;  %v6559_v3 = vsub.f32 %v182_v59, %v6551_v0  ;;  %v876_v5 = vld [vmem:[%s10300_s4 + $0x28] sm:$0xff] }
  0x1e   :  { %392 = vmatmul.f32.gmra.mxu1 %v6333_v29  ;;  %580 = vmatmul.f32.vlgmr.msrb.gmra.mxu3 %v224_v36  ;;  %v6472_v23 = vsub.f32 %v170_v16, %v6459_v19  ;;  %v880_v36 = vld [vmem:[%s10300_s4 + $0x48] sm:$0xff]  ;;  %v290_v10 = vand.u32 4294901760, %v289_v2  ;;  %v6024_v2 = vld [vmem:[%s10300_s4 + $0xc0] sm:$0xff] }
  0x1f   :  { %784 = vmatpush.msrb.mxu1 %v6285_v8  ;;  %v63_v8 = vld [vmem:[%s10298_s2 + $0x30] sm:$0xff] }
  0x20   :  { %243 = vmatmul.f32.gmra.mxu0 %v242_v4  ;;  %v264_v28 = vand.u32 4294901760, %v6472_v23  ;;  %v874_v4 = vld [vmem:[%s10300_s4 + $0x18] sm:$0xff] }
  0x21   :  { %483 = vmatmul.f32.gmra.mxu2 %v6356_v39  ;;  %786 = vmatpush.msrb.mxu1 %v6295_v11  ;;  %v47_v11 = vld [vmem:[%s10297_s1 + $0x30] sm:$0xff] }
  0x22   :  { %v173_v25 = vsel %vm153_vm0, %v47_v11, 0  ;;  %v265_v32 = vsub.f32 %v6472_v23, %v264_v28 }
  0x23   :  { %956 = vperm.xlu2 %6087, %v884_v12   ;;  %v6483_v30 = vand.u32 4294901760, %v173_v25  ;;  %v296_v12 = vand.u32 4294901760, %v6559_v3 }
  0x24   :  { %951 = vperm.xlu1 %6086, %v883_v14   ;;  %v266_v39 = vand.u32 4294901760, %v265_v32  ;;  %v52_v14 = vld [vmem:[%s10297_s1 + $0x58] sm:$0xff] }
  0x25   :  { %105 = vperm.xlu0 %6085, %v63_v8   ;;  %v6496_v35 = vsub.f32 %v173_v25, %v6483_v30  ;;  %v297_v16 = vsub.f32 %v6559_v3, %v296_v12  ;;  %v188_v11 = vsel %vm153_vm0, %v52_v14, 0  ;;  %v53_v25 = vld [vmem:[%s10297_s1 + $0x60] sm:$0xff]  ;;  %v6021_v14 = vld [vmem:[%s10300_s4 + $0xa8] sm:$0xff] }
  0x26   :  { %396 = vmatmul.f32.gmra.mxu1 %v6368_v46  ;;  %586 = vmatmul.f32.gmra.mxu3 %v232_v45  ;;  %v59_v45 = vld [vmem:[%s10298_s2 + $0x10] sm:$0xff]  ;;  %v191_v32 = vsel %vm153_vm0, %v53_v25, 0 }
  0x27   :  { %v272_v40 = vand.u32 4294901760, %v6496_v35  ;;  %v6614_v37 = vand.u32 4294901760, %v191_v32 }
  0x28   :  { %251 = vmatmul.f32.gmra.mxu0 %v250_v17  ;;  %v873_v17 = vld [vmem:[%s10300_s4 + $0x10] sm:$0xff] }
  0x29   :  { %488 = vmatmul.f32.gmra.mxu2 %v6384_v55  ;;  %v273_v44 = vsub.f32 %v6496_v35, %v272_v40  ;;  %v281_v55 = vsub.f32 %v6518_v47, %v280_v52 }
  0x2b   :  { %100 = vperm.xlu2 %6087, %v62_v21   ;;  %v274_v51 = vand.u32 4294901760, %v273_v44  ;;  %v282_v62 = vand.u32 4294901760, %v281_v55  ;;  %v298_v21 = vand.u32 4294901760, %v297_v16  ;;  %v6028_v44 = vld [vmem:[%s10300_s4 + $0xe0] sm:$0xff]  ;;  %v6027_v55 = vld [vmem:[%s10300_s4 + $0xd8] sm:$0xff] }
  0x2c   :  { %95 = vperm.xlu1 %6086, %v61_v24   ;;  %v6595_v24 = vand.u32 4294901760, %v188_v11  ;;  %v6019_v16 = vld [vmem:[%s10300_s4 + $0x98] sm:$0xff] }
  0x2d   :  { %946 = vperm.xlu0 %6085, %v882_v26  }
  0x2e   :  { %400 = vmatmul.f32.gmra.mxu1 %v6395_v61  ;;  %592 = vmatmul.f32.gmra.mxu3 %v240_v60  ;;  %v57_v60 = vld [vmem:[%s10298_s2] sm:$0xff] }
  0x30   :  { %259 = vmatmul.f32.gmra.mxu0 %v258_v27  ;;  %v311_v27 = vsub.f32 %v188_v11, %v6595_v24 }
  0x31   :  { %493 = vmatmul.f32.gmra.mxu2 %v6413_v1  ;;  %v51_v1 = vld [vmem:[%s10297_s1 + $0x50] sm:$0xff] }
  0x33   :  { %941 = vperm.xlu2 %6087, %v881_v34   ;;  %v888_v34 = vld [vmem:[%s10302_s6] sm:$0xff] }
  0x34   :  { %936 = vperm.xlu1 %6086, %v880_v36   ;;  %v312_v36 = vand.u32 4294901760, %v311_v27 }
  0x35   :  { %90 = vperm.xlu0 %6085, %v60_v38   ;;  %v54_v38 = vld [vmem:[%s10297_s1 + $0x68] sm:$0xff] }
  0x36   :  { %404 = vmatmul.f32.gmra.mxu1 %v6430_v9  ;;  %598 = vmatmul.f32.gmra.mxu3 %v248_v6  ;;  %v185_v6 = vsel %vm153_vm0, %v51_v1, 0 }
  0x38   :  { %267 = vmatmul.f32.gmra.mxu0 %v266_v39  ;;  %v313_v39 = vsub.f32 %v311_v27, %v312_v36 }
  0x39   :  { %498 = vmatmul.f32.gmra.mxu2 %v6447_v13  ;;  %v6573_v13 = vand.u32 4294901760, %v185_v6 }
  0x3b   :  { %85 = vperm.xlu2 %6087, %v59_v45   ;;  %v6581_v8 = vsub.f32 %v185_v6, %v6573_v13  ;;  %v194_v45 = vsel %vm153_vm0, %v54_v38, 0  ;;  %v6046_v38 = vld [vmem:[%s10300_s4 + $0x160] sm:$0xff] }
  0x3c   :  { %80 = vperm.xlu1 %6086, %v58_v48   ;;  %v314_v48 = vand.u32 4294901760, %v313_v39 }
  0x3d   :  { %931 = vperm.xlu0 %6085, %v879_v50   ;;  %v6632_v50 = vand.u32 4294901760, %v194_v45 }
  0x3e   :  { %408 = vmatmul.f32.gmra.mxu1 %v6459_v19  ;;  %604 = vmatmul.f32.gmra.mxu3 %v256_v18  ;;  %v871_v18 = vld [vmem:[%s10300_s4] sm:$0xff] }
  0x3f   :  { %v327_v54 = vsub.f32 %v194_v45, %v6632_v50  ;;  %v6045_v45 = vld [vmem:[%s10300_s4 + $0x158] sm:$0xff] }
  0x40   :  { %275 = vmatmul.f32.gmra.mxu0 %v274_v51  ;;  %v55_v51 = vld [vmem:[%s10297_s1 + $0x70] sm:$0xff] }
  0x41   :  { %503 = vmatmul.f32.gmra.mxu2 %v6472_v23  ;;  %v304_v23 = vand.u32 4294901760, %v6581_v8 }
  0x43   :  { %926 = vperm.xlu2 %6087, %v878_v57   ;;  %v305_v26 = vsub.f32 %v6581_v8, %v304_v23  ;;  %v197_v57 = vsel %vm153_vm0, %v55_v51, 0  ;;  %v6042_v51 = vld [vmem:[%s10300_s4 + $0x140] sm:$0xff] }
  0x44   :  { %921 = vperm.xlu1 %6086, %v877_v58   ;;  %v6026_v58 = vld [vmem:[%s10300_s4 + $0xd0] sm:$0xff] }
  0x45   :  { %75 = vperm.xlu0 %6085, %v57_v60   ;;  %v328_v60 = vand.u32 4294901760, %v327_v54 }
  0x46   :  { %412 = vmatmul.f32.gmra.mxu1 %v6483_v30  ;;  %610 = vmatmul.f32.gmra.mxu3 %v264_v28  ;;  %v887_v28 = vld [vmem:[%s10301_s5] sm:$0xff] }
  0x48   :  { %283 = vmatmul.f32.gmra.mxu0 %v282_v62  ;;  %v6650_v62 = vand.u32 4294901760, %v197_v57 }
  0x49   :  { %508 = vmatmul.f32.gmra.mxu2 %v6496_v35  ;;  %v306_v35 = vand.u32 4294901760, %v305_v26 }
  0x4a   :  { %v335_v1 = vsub.f32 %v197_v57, %v6650_v62 }
  0x4b   :  { %916 = vperm.xlu2 %6087, %v876_v5   ;;  %v6023_v5 = vld [vmem:[%s10300_s4 + $0xb8] sm:$0xff] }
  0x4c   :  { %906 = vperm.xlu1 %6086, %v874_v4   ;;  %v336_v6 = vand.u32 4294901760, %v335_v1 }
  0x4d   :  { %911 = vperm.xlu0 %6085, %v875_v7  }
  0x4e   :  { %416 = vmatmul.f32.gmra.mxu1 %v6507_v42  ;;  %616 = vmatmul.f32.gmra.mxu3 %v272_v40  ;;  %v319_v40 = vsub.f32 %v191_v32, %v6614_v37 }
  0x50   :  { %291 = vmatmul.f32.gmra.mxu0 %v290_v10  ;;  %v320_v49 = vand.u32 4294901760, %v319_v40 }
  0x51   :  { %513 = vmatmul.f32.gmra.mxu2 %v6518_v47  ;;  %v6029_v47 = vld [vmem:[%s10300_s4 + $0xe8] sm:$0xff] }
  0x53   :  { %901 = vperm.xlu2 %6087, %v873_v17  }
  0x54   :  { %891 = vperm.xlu1 %6086, %v871_v18  }
  0x55   :  { %896 = vperm.xlu0 %6085, %v872_v20   ;;  %v6018_v20 = vld [vmem:[%s10300_s4 + $0x90] sm:$0xff] }
  0x56   :  { %420 = vmatmul.f32.gmra.mxu1 %v6529_v53  ;;  %622 = vmatmul.f32.gmra.mxu3 %v280_v52  ;;  %v321_v52 = vsub.f32 %v319_v40, %v320_v49 }
  0x58   :  { %299 = vmatmul.f32.gmra.mxu0 %v298_v21  ;;  %v322_v59 = vand.u32 4294901760, %v321_v52  ;;  %v6016_v21 = vld [vmem:[%s10300_s4 + $0x80] sm:$0xff]  ;;  %v6040_v52 = vld [vmem:[%s10300_s4 + $0x130] sm:$0xff] }
  0x59   :  { %518 = vmatmul.f32.gmra.mxu2 %v6537_v56  ;;  %v6025_v56 = vld [vmem:[%s10300_s4 + $0xc8] sm:$0xff] }
  0x5b   :  { %1356 = vperm.xlu2 %6087, %v887_v28   ;;  %v6049_v28 = vld [vmem:[%s10300_s4 + $0x178] sm:$0xff] }
  0x5c   :  { %2184 = vperm.xlu1 %6086, %v6031_v31   ;;  %v6033_v31 = vld [vmem:[%s10302_s6 + $0x8] sm:$0xff] }
  0x5d   :  { %1377 = vperm.xlu0 %6085, %v888_v34  }
  0x5e   :  { %424 = vmatmul.f32.gmra.mxu1 %v6551_v0  ;;  %628 = vmatmul.f32.gmra.mxu3 %v288_v63  ;;  %v329_v63 = vsub.f32 %v327_v54, %v328_v60 }
  0x60   :  { %307 = vmatmul.f32.gmra.mxu0 %v306_v35  ;;  %v330_v4 = vand.u32 4294901760, %v329_v63  ;;  %v6038_v63 = vld [vmem:[%s10300_s4 + $0x120] sm:$0xff] }
  0x61   :  { %523 = vmatmul.f32.gmra.mxu2 %v6559_v3  ;;  %v6022_v3 = vld [vmem:[%s10300_s4 + $0xb0] sm:$0xff] }
  0x63   :  { %2179 = vperm.xlu2 %6087, %v6030_v43  }
  0x64   :  { %2169 = vperm.xlu1 %6086, %v6028_v44  }
  0x65   :  { %2174 = vperm.xlu0 %6085, %v6029_v47   ;;  %v6043_v47 = vld [vmem:[%s10300_s4 + $0x148] sm:$0xff] }
  0x66   :  { %428 = vmatmul.f32.gmra.mxu1 %v6573_v13  ;;  %634 = vmatmul.f32.gmra.mxu3 %v296_v12  ;;  %v337_v12 = vsub.f32 %v335_v1, %v336_v6 }
  0x68   :  { %315 = vmatmul.f32.gmra.mxu0 %v314_v48  ;;  %v338_v17 = vand.u32 4294901760, %v337_v12  ;;  %v6034_v12 = vld [vmem:[%s10300_s4 + $0x100] sm:$0xff] }
  0x69   :  { %528 = vmatmul.f32.gmra.mxu2 %v6581_v8  ;;  %v6020_v8 = vld [vmem:[%s10300_s4 + $0xa0] sm:$0xff] }
  0x6b   :  { %2164 = vperm.xlu2 %6087, %v6027_v55  }
  0x6c   :  { %2154 = vperm.xlu1 %6086, %v6025_v56  }
  0x6d   :  { %2159 = vperm.xlu0 %6085, %v6026_v58  }
  0x6e   :  { %432 = vmatmul.f32.gmra.mxu1 %v6595_v24  ;;  %640 = vmatmul.f32.gmra.mxu3 %v304_v23  ;;  %v6017_v23 = vld [vmem:[%s10300_s4 + $0x88] sm:$0xff] }
  0x70   :  { %323 = vmatmul.f32.gmra.mxu0 %v322_v59  ;;  %v6039_v59 = vld [vmem:[%s10300_s4 + $0x128] sm:$0xff] }
  0x71   :  { %533 = vmatmul.f32.gmra.mxu2 %v311_v27  ;;  %v6032_v27 = vld [vmem:[%s10301_s5 + $0x8] sm:$0xff] }
  0x73   :  { %2149 = vperm.xlu2 %6087, %v6024_v2  }
  0x74   :  { %2139 = vperm.xlu1 %6086, %v6022_v3   ;;  %v6664_v7 = vpop.permute.xlu0 %150  ;;  %v6666_v10 = vpop.permute.xlu1 %140 }
  0x75   :  { %2144 = vperm.xlu0 %6085, %v6023_v5  }
  0x76   :  { %436 = vmatmul.f32.gmra.mxu1 %v6614_v37  ;;  %646 = vmatmul.f32.gmra.mxu3 %v312_v36  ;;  %v6048_v36 = vld [vmem:[%s10300_s4 + $0x170] sm:$0xff] }
  0x78   :  { %331 = vmatmul.f32.gmra.mxu0 %v330_v4  ;;  %v6036_v4 = vld [vmem:[%s10300_s4 + $0x110] sm:$0xff] }
  0x79   :  { %538 = vmatmul.f32.gmra.mxu2 %v319_v40 }
  0x7b   :  { %2134 = vperm.xlu2 %6087, %v6021_v14  }
  0x7c   :  { %2124 = vperm.xlu1 %6086, %v6019_v16   ;;  %v6678_v18 = vpop.permute.xlu0 %145  ;;  %v6680_v11 = vpop.permute.xlu1 %135 }
  0x7d   :  { %2129 = vperm.xlu0 %6085, %v6020_v8  }
  0x7e   :  { %440 = vmatmul.f32.gmra.mxu1 %v6632_v50  ;;  %652 = vmatmul.f32.gmra.mxu3 %v320_v49 }
  0x80   :  { %339 = vmatmul.f32.gmra.mxu0 %v338_v17 }
  0x81   :  { %543 = vmatmul.f32.gmra.mxu2 %v327_v54  ;;  %v6041_v54 = vld [vmem:[%s10300_s4 + $0x138] sm:$0xff] }
  0x83   :  { %2119 = vperm.xlu2 %6087, %v6018_v20   ;;  %v6050_v20 = vld [vmem:[%s10301_s5 + $0x10] sm:$0xff] }
  0x84   :  { %2109 = vperm.xlu1 %6086, %v6016_v21   ;;  %v6067_v21 = vld [vmem:[%s10300_s4 + $0x1f8] sm:$0xff] }
  0x85   :  { %2114 = vperm.xlu0 %6085, %v6017_v23  }
  0x86   :  { %444 = vmatmul.f32.gmra.mxu1 %v6650_v62  ;;  %658 = vmatmul.f32.gmra.mxu3 %v328_v60  ;;  %v6692_v25 = vpop.permute.xlu1 %966  ;;  %v6037_v60 = vld [vmem:[%s10300_s4 + $0x118] sm:$0xff] }
  0x87   :  { %10617 = vst [vmem:[#allocation9_spill] sm:$0xff] %v6692_v25  ;;  %v6694_v26 = vpop.permute.xlu0 %120 }
  0x88   :  { %703 = vmatmul.f32.vlgmr.msrb.gmra.mxu0 %v6302_v15 }
  0x89   :  { %548 = vmatmul.f32.gmra.mxu2 %v335_v1 }
  0x8b   :  { %2574 = vperm.xlu2 %6087, %v6032_v27  }
  0x8c   :  { %3353 = vperm.xlu1 %6086, %v6049_v28  }
  0x8d   :  { %v6706_v32 = vpop.f32.mrf.mxu0  ;;  %2595 = vperm.xlu0 %6085, %v6033_v31   ;;  %v6066_v31 = vld [vmem:[%s10300_s4 + $0x1f0] sm:$0xff] }
  0x8e   :  { %664 = vmatmul.f32.gmra.mxu3 %v336_v6  ;;  %788 = vmatmul.f32.vlgmr.msrb.gmra.mxu1 %v6302_v15  ;;  %v6709_v34 = vpop.permute.xlu1 %110  ;;  %v6047_v15 = vld [vmem:[%s10300_s4 + $0x168] sm:$0xff] }
  0x8f   :  { %v6711_v35 = vpop.permute.xlu0 %961 }
  0x90   :  { %10618 = vst [vmem:[#allocation10_spill] sm:$0xff] %v6711_v35  ;;  %707 = vmatmul.f32.gmra.mxu0 %v6333_v29 }
  0x91   :  { %553 = vmatmul.f32.gmra.mxu2 %v6344_v33  ;;  %v6044_v33 = vld [vmem:[%s10300_s4 + $0x150] sm:$0xff] }
  0x92   :  { %v6721_v39 = vpop.f32.mrf.mxu1 }
  0x93   :  { %3348 = vperm.xlu2 %6087, %v6048_v36   ;;  %v6065_v36 = vld [vmem:[%s10300_s4 + $0x1e8] sm:$0xff] }
  0x94   :  { %3338 = vperm.xlu1 %6086, %v6046_v38  }
  0x95   :  { %v236_v40 = vpop.f32.mrf.mxu0  ;;  %3343 = vperm.xlu0 %6085, %v6047_v15   ;;  %v6061_v15 = vld [vmem:[%s10300_s4 + $0x1c8] sm:$0xff] }
  0x96   :  { %670 = vmatmul.f32.gmra.mxu3 %v344_v41  ;;  %792 = vmatmul.f32.gmra.mxu1 %v6333_v29  ;;  %v6729_v43 = vpop.permute.xlu1 %951 }
  0x97   :  { %10619 = vst [vmem:[#allocation11_spill] sm:$0xff] %v6729_v43  ;;  %v6731_v44 = vpop.permute.xlu0 %105 }
  0x98   :  { %711 = vmatmul.f32.gmra.mxu0 %v6368_v46 }
  0x9b   :  { %v393_v41 = vpop.f32.mrf.mxu1  ;;  %3333 = vperm.xlu2 %6087, %v6045_v45  }
  0x9c   :  { %3323 = vperm.xlu1 %6086, %v6043_v47  }
  0x9d   :  { %v6743_v29 = vpop.f32.mrf.mxu0  ;;  %3328 = vperm.xlu0 %6085, %v6044_v33   ;;  %v6058_v33 = vld [vmem:[%s10300_s4 + $0x1b0] sm:$0xff] }
  0x9e   :  { %796 = vmatmul.f32.gmra.mxu1 %v6368_v46  ;;  %v6746_v48 = vpop.permute.xlu1 %95 }
  0x9f   :  { %v6748_v49 = vpop.permute.xlu0 %946 }
  0xa0   :  { %10620 = vst [vmem:[#allocation12_spill] sm:$0xff] %v6748_v49  ;;  %715 = vmatmul.f32.gmra.mxu0 %v6395_v61 }
  0xa3   :  { %v6760_v55 = vpop.f32.mrf.mxu1  ;;  %3318 = vperm.xlu2 %6087, %v6042_v51  }
  0xa4   :  { %3308 = vperm.xlu1 %6086, %v6040_v52  }
  0xa5   :  { %v252_v46 = vpop.f32.mrf.mxu0  ;;  %3313 = vperm.xlu0 %6085, %v6041_v54   ;;  %v6055_v54 = vld [vmem:[%s10300_s4 + $0x198] sm:$0xff] }
  0xa6   :  { %800 = vmatmul.f32.gmra.mxu1 %v6395_v61  ;;  %v6763_v56 = vpop.permute.xlu1 %936 }
  0xa7   :  { %10621 = vst [vmem:[#allocation13_spill] sm:$0xff] %v6763_v56  ;;  %v91_v57 = vpop.permute.xlu0 %90 }
  0xa8   :  { %v6765_v58 = vadd.f32 %v252_v46, %v91_v57  ;;  %719 = vmatmul.f32.gmra.mxu0 %v6430_v9  ;;  %v6872_v46 = vpop.f32.mrf.mxu2  ;;  %v6056_v57 = vld [vmem:[%s10300_s4 + $0x1a0] sm:$0xff] }
  0xab   :  { %v6777_v61 = vpop.f32.mrf.mxu1  ;;  %3303 = vperm.xlu2 %6087, %v6039_v59  }
  0xac   :  { %3293 = vperm.xlu1 %6086, %v6037_v60  }
  0xad   :  { %v6779_v1 = vpop.f32.mrf.mxu0  ;;  %3298 = vperm.xlu0 %6085, %v6038_v63   ;;  %v6054_v63 = vld [vmem:[%s10300_s4 + $0x190] sm:$0xff] }
  0xae   :  { %804 = vmatmul.f32.gmra.mxu1 %v6430_v9  ;;  %v81_v2 = vpop.permute.xlu1 %80  ;;  %v6035_v9 = vld [vmem:[%s10300_s4 + $0x108] sm:$0xff] }
  0xaf   :  { %v6782_v3 = vpop.permute.xlu0 %931  ;;  %v237_v5 = vadd.f32 %v236_v40, %v81_v2  ;;  %v6062_v40 = vld [vmem:[%s10300_s4 + $0x1d0] sm:$0xff]  ;;  %v6052_v2 = vld [vmem:[%s10300_s4 + $0x180] sm:$0xff] }
  0xb0   :  { %10622 = vst [vmem:[#allocation14_spill] sm:$0xff] %v6782_v3  ;;  %723 = vmatmul.f32.gmra.mxu0 %v6459_v19 }
  0xb1   :  { %v6788_v6 = vadd.f32 %v393_v41, %v237_v5  ;;  %v6059_v41 = vld [vmem:[%s10300_s4 + $0x1b8] sm:$0xff]  ;;  %v6053_v5 = vld [vmem:[%s10300_s4 + $0x188] sm:$0xff] }
  0xb3   :  { %v6796_v14 = vpop.f32.mrf.mxu1  ;;  %3288 = vperm.xlu2 %6087, %v6036_v4  }
  0xb4   :  { %3278 = vperm.xlu1 %6086, %v6034_v12   ;;  %v479_v12 = vpop.f32.mrf.mxu2 }
  0xb5   :  { %v6798_v16 = vpop.f32.mrf.mxu0  ;;  %3283 = vperm.xlu0 %6085, %v6035_v9  }
  0xb6   :  { %808 = vmatmul.f32.gmra.mxu1 %v6459_v19  ;;  %v6051_v19 = vld [vmem:[%s10302_s6 + $0x10] sm:$0xff] }
  0xb7   :  { %v76_v8 = vpop.permute.xlu0 %75 }
  0xb8   :  { %v229_v17 = vadd.f32 %v6706_v32, %v76_v8  ;;  %727 = vmatmul.f32.gmra.mxu0 %v6483_v30  ;;  %v6064_v32 = vld [vmem:[%s10300_s4 + $0x1e0] sm:$0xff]  ;;  %v6068_v8 = vld [vmem:[%s10301_s5 + $0x18] sm:$0xff] }
  0xba   :  { %v6810_v23 = vadd.f32 %v6721_v39, %v229_v17  ;;  %v5952_v17 = vld [vmem:[%s10299_s3] sm:$0xff] }
  0xbb   :  { %v6815_v27 = vpop.f32.mrf.mxu1  ;;  %3743 = vperm.xlu2 %6087, %v6050_v20   ;;  %v6069_v20 = vld [vmem:[%s10302_s6 + $0x18] sm:$0xff] }
  0xbc   :  { %10623 = vst [vmem:[#allocation15_spill] sm:$0xff] %v6815_v27  ;;  %4522 = vperm.xlu1 %6086, %v6067_v21  }
  0xbd   :  { %v6817_v28 = vpop.f32.mrf.mxu0  ;;  %3764 = vperm.xlu0 %6085, %v6051_v19  }
  0xbe   :  { %812 = vmatmul.f32.gmra.mxu1 %v6483_v30  ;;  %v6063_v30 = vld [vmem:[%s10300_s4 + $0x1d8] sm:$0xff] }
  0xc0   :  { %731 = vmatmul.f32.gmra.mxu0 %v6507_v42 }
  0xc3   :  { %v6830_v38 = vpop.f32.mrf.mxu1  ;;  %4517 = vperm.xlu2 %6087, %v6066_v31  }
  0xc4   :  { %10624 = vst [vmem:[#allocation16_spill] sm:$0xff] %v6830_v38  ;;  %4507 = vperm.xlu1 %6086, %v6064_v32  }
  0xc5   :  { %v6832_v39 = vpop.f32.mrf.mxu0  ;;  %4512 = vperm.xlu0 %6085, %v6065_v36  }
  0xc6   :  { %816 = vmatmul.f32.gmra.mxu1 %v6507_v42  ;;  %v6060_v42 = vld [vmem:[%s10300_s4 + $0x1c0] sm:$0xff] }
  0xc8   :  { %735 = vmatmul.f32.gmra.mxu0 %v6529_v53 }
  0xcb   :  { %v6845_v45 = vpop.f32.mrf.mxu1  ;;  %4502 = vperm.xlu2 %6087, %v6063_v30  }
  0xcc   :  { %10625 = vst [vmem:[#allocation17_spill] sm:$0xff] %v6845_v45  ;;  %4492 = vperm.xlu1 %6086, %v6061_v15  }
  0xcd   :  { %v6847_v47 = vpop.f32.mrf.mxu0  ;;  %4497 = vperm.xlu0 %6085, %v6062_v40  }
  0xce   :  { %820 = vmatmul.f32.gmra.mxu1 %v6529_v53  ;;  %v6057_v53 = vld [vmem:[%s10300_s4 + $0x1a8] sm:$0xff] }
  0xd0   :  { %739 = vmatmul.f32.gmra.mxu0 %v6551_v0 }
  0xd3   :  { %v6860_v51 = vpop.f32.mrf.mxu1  ;;  %4487 = vperm.xlu2 %6087, %v6060_v42  }
  0xd4   :  { %4477 = vperm.xlu1 %6086, %v6058_v33  }
  0xd5   :  { %v6862_v52 = vpop.f32.mrf.mxu0  ;;  %4482 = vperm.xlu0 %6085, %v6059_v41  }
  0xd6   :  { %824 = vmatmul.f32.gmra.mxu1 %v6551_v0  ;;  %v6879_v0 = vpop.f32.mrf.mxu3 }
  0xd8   :  { %743 = vmatmul.f32.gmra.mxu0 %v6573_v13 }
  0xdb   :  { %v6877_v59 = vpop.f32.mrf.mxu1  ;;  %4472 = vperm.xlu2 %6087, %v6057_v53  }
  0xdc   :  { %4462 = vperm.xlu1 %6086, %v6055_v54  }
  0xdd   :  { %v6881_v60 = vpop.f32.mrf.mxu0  ;;  %4467 = vperm.xlu0 %6085, %v6056_v57  }
  0xde   :  { %828 = vmatmul.f32.gmra.mxu1 %v6573_v13  ;;  %v581_v9 = vpop.f32.mrf.mxu3 }
  0xe0   :  { %747 = vmatmul.f32.gmra.mxu0 %v6595_v24 }
  0xe3   :  { %v6894_v4 = vpop.f32.mrf.mxu1  ;;  %4457 = vperm.xlu2 %6087, %v6054_v63  }
  0xe4   :  { %4447 = vperm.xlu1 %6086, %v6052_v2  }
  0xe5   :  { %v6896_v13 = vpop.f32.mrf.mxu0  ;;  %4452 = vperm.xlu0 %6085, %v6053_v5  }
  0xe6   :  { %832 = vmatmul.f32.gmra.mxu1 %v6595_v24  ;;  %v484_v24 = vpop.f32.mrf.mxu2  ;;  %v587_v31 = vpop.f32.mrf.mxu3 }
  0xe7   :  { %v485_v2 = vadd.f32 %v484_v24, %v6788_v6 }
  0xe8   :  { %751 = vmatmul.f32.gmra.mxu0 %v6614_v37 }
  0xeb   :  { %v6909_v21 = vpop.f32.mrf.mxu1  ;;  %4912 = vperm.xlu2 %6087, %v6068_v8  }
  0xec   :  { %5955 = vperm.xlu1 %6086, %v5952_v17  }
  0xed   :  { %v6911_v19 = vpop.f32.mrf.mxu0  ;;  %4933 = vperm.xlu0 %6085, %v6069_v20  }
  0xee   :  { %836 = vmatmul.f32.gmra.mxu1 %v6614_v37  ;;  %v6920_v30 = vpop.f32.mrf.mxu2  ;;  %v6923_v15 = vpop.f32.mrf.mxu3 }
  0xf0   :  { %755 = vmatmul.f32.gmra.mxu0 %v6632_v50 }
  0xf3   :  { %v6915_v32 = vpop.f32.mrf.mxu1 }
  0xf5   :  { %v6917_v36 = vpop.f32.mrf.mxu0 }
  0xf6   :  { %840 = vmatmul.f32.gmra.mxu1 %v6632_v50  ;;  %v6931_v37 = vpop.f32.mrf.mxu2  ;;  %v480_v50 = vadd.f32 %v479_v12, %v6810_v23  ;;  %v6936_v41 = vpop.f32.mrf.mxu3  ;;  %v588_v23 = vadd.f32 %v587_v31, %v485_v2 }
  0xf7   :  { %10626 = vst [vmem:[#allocation18_spill] sm:$0xff] %v6936_v41 }
  0xf8   :  { %759 = vmatmul.f32.gmra.mxu0 %v6650_v62  ;;  %v582_v54 = vadd.f32 %v581_v9, %v480_v50 }
  0xfb   :  { %v6925_v40 = vpop.f32.mrf.mxu1 }
  0xfd   :  { %v6927_v42 = vpop.f32.mrf.mxu0 }
  0xfe   :  { %844 = vmatmul.f32.gmra.mxu1 %v6650_v62  ;;  %v6940_v5 = vpop.f32.mrf.mxu2  ;;  %v6944_v17 = vpop.f32.mrf.mxu3 }
  0xff   :  { %10627 = vst [vmem:[#allocation19_spill] sm:$0xff] %v6940_v5 }
 0x100   :  { %763 = vmatmul.f32.gmra.mxu0 %v6319_v22  ;;  %10629 = vst [vmem:[#allocation21_spill] sm:$0xff] %v6944_v17 }
 0x103   :  { %v6933_v33 = vpop.f32.mrf.mxu1 }
 0x105   :  { %v704_v53 = vpop.f32.mrf.mxu0 }
 0x106   :  { %848 = vmatmul.f32.gmra.mxu1 %v6319_v22  ;;  %v705_v57 = vadd.f32 %v704_v53, %v582_v54  ;;  %v6951_v9 = vpop.f32.mrf.mxu2  ;;  %v6954_v6 = vpop.f32.mrf.mxu3 }
 0x107   :  { %10632 = vst [vmem:[#allocation24_spill] sm:$0xff] %v6951_v9 }
 0x108   :  { %10633 = vst [vmem:[#allocation25_spill] sm:$0xff] %v6954_v6 }
 0x10b   :  { %v789_v63 = vpop.f32.mrf.mxu1 }
 0x10c   :  { %v6942_v62 = vadd.f32 %v789_v63, %v705_v57 }
 0x10d   :  { %v708_v8 = vpop.f32.mrf.mxu0 }
 0x10e   :  { %10628 = vst [vmem:[#allocation20_spill] sm:$0xff] %v6942_v62  ;;  %v709_v12 = vadd.f32 %v708_v8, %v588_v23  ;;  %v6960_v53 = vpop.f32.mrf.mxu2  ;;  %v6962_v54 = vpop.f32.mrf.mxu3 }
 0x10f   :  { %852 = vst [vmem:[#allocation6] sm:$0xff] %v6942_v62 }
 0x110   :  { %10636 = vst [vmem:[#allocation28_spill] sm:$0xff] %v6960_v53 }
 0x111   :  { %10637 = vst [vmem:[#allocation29_spill] sm:$0xff] %v6962_v54 }
 0x113   :  { %v793_v20 = vpop.f32.mrf.mxu1 }
 0x114   :  { %v6947_v41 = vadd.f32 %v793_v20, %v709_v12  ;;  %v131_v12 = vpop.permute.xlu2 %130 }
 0x115   :  { %v6949_v22 = vpop.f32.mrf.mxu0 }
 0x116   :  { %10630 = vst [vmem:[#allocation22_spill] sm:$0xff] %v6947_v41  ;;  %v6968_v63 = vpop.f32.mrf.mxu2  ;;  %v6972_v8 = vpop.f32.mrf.mxu3 }
 0x117   :  { %10631 = vst [vmem:[#allocation23_spill] sm:$0xff] %v6949_v22 }
 0x118   :  { %853 = vst [vmem:[#allocation6 + $0x8] sm:$0xff] %v6947_v41 }
 0x119   :  { %10640 = vst [vmem:[#allocation32_spill] sm:$0xff] %v6968_v63 }
 0x11a   :  { %10642 = vst [vmem:[#allocation34_spill] sm:$0xff] %v6972_v8 }
 0x11b   :  { %v6956_v24 = vpop.f32.mrf.mxu1 }
 0x11c   :  { %10634 = vst [vmem:[#allocation26_spill] sm:$0xff] %v6956_v24 }
 0x11d   :  { %v6958_v50 = vpop.f32.mrf.mxu0 }
 0x11e   :  { %10635 = vst [vmem:[#allocation27_spill] sm:$0xff] %v6958_v50  ;;  %v6978_v62 = vpop.f32.mrf.mxu2  ;;  %v6982_v24 = vpop.f32.mrf.mxu3 }
 0x11f   :  { %10645 = vst [vmem:[#allocation37_spill] sm:$0xff] %v6978_v62 }
 0x120   :  { %10647 = vst [vmem:[#allocation39_spill] sm:$0xff] %v6982_v24 }
 0x123   :  { %v6964_v31 = vpop.f32.mrf.mxu1 }
 0x124   :  { %10638 = vst [vmem:[#allocation30_spill] sm:$0xff] %v6964_v31  ;;  %v126_v31 = vpop.permute.xlu2 %125 }
 0x125   :  { %v6966_v57 = vpop.f32.mrf.mxu0 }
 0x126   :  { %10639 = vst [vmem:[#allocation31_spill] sm:$0xff] %v6966_v57  ;;  %v6988_v57 = vpop.f32.mrf.mxu2 }
 0x12b   :  { %v6970_v2 = vpop.f32.mrf.mxu1 }
 0x12c   :  { %10641 = vst [vmem:[#allocation33_spill] sm:$0xff] %v6970_v2  ;;  %v6990_v2 = vpop.f32.mrf.mxu3 }
 0x12d   :  { %v6974_v23 = vpop.f32.mrf.mxu0  ;;  %10650 = vst [vmem:[#allocation42_spill] sm:$0xff] %v6990_v2 }
 0x12e   :  { %10643 = vst [vmem:[#allocation35_spill] sm:$0xff] %v6974_v23  ;;  %v116_v23 = vpop.permute.xlu2 %115 }
 0x133   :  { %v6976_v20 = vpop.f32.mrf.mxu1 }
 0x134   :  { %10644 = vst [vmem:[#allocation36_spill] sm:$0xff] %v6976_v20  ;;  %v529_v20 = vpop.f32.mrf.mxu2  ;;  %v6996_v25 = vpop.f32.mrf.mxu3 }
 0x135   :  { %v6980_v41 = vpop.f32.mrf.mxu0 }
 0x136   :  { %10646 = vst [vmem:[#allocation38_spill] sm:$0xff] %v6980_v41  ;;  %v7002_v6 = vpop.permute.xlu2 %956 }
 0x137   :  { %10655 = vst [vmem:[#allocation47_spill] sm:$0xff] %v7002_v6  ;;  %v341_v6 = vadd.f32 %v6927_v42, %v6678_v18 }
 0x139   :  { %v446_v18 = vadd.f32 %v6933_v33, %v341_v6  ;;  %v10665_v6 = vld [vmem:[#allocation37_spill] sm:$0xff] }
 0x13b   :  { %v6984_v22 = vpop.f32.mrf.mxu1 }
 0x13c   :  { %10648 = vst [vmem:[#allocation40_spill] sm:$0xff] %v6984_v22  ;;  %v534_v22 = vpop.f32.mrf.mxu2 }
 0x13d   :  { %v6986_v50 = vpop.f32.mrf.mxu0 }
 0x13e   :  { %10649 = vst [vmem:[#allocation41_spill] sm:$0xff] %v6986_v50  ;;  %v647_v50 = vpop.f32.mrf.mxu3  ;;  %v101_v9 = vpop.permute.xlu2 %100 }
 0x143   :  { %v6992_v3 = vpop.f32.mrf.mxu1 }
 0x144   :  { %10651 = vst [vmem:[#allocation43_spill] sm:$0xff] %v6992_v3  ;;  %v539_v49 = vpop.f32.mrf.mxu2 }
 0x145   :  { %v6994_v17 = vpop.f32.mrf.mxu0 }
 0x146   :  { %10652 = vst [vmem:[#allocation44_spill] sm:$0xff] %v6994_v17  ;;  %v653_v8 = vpop.f32.mrf.mxu3  ;;  %v7010_v53 = vpop.permute.xlu2 %941 }
 0x147   :  { %10659 = vst [vmem:[#allocation51_spill] sm:$0xff] %v7010_v53 }
 0x14b   :  { %v6998_v56 = vpop.f32.mrf.mxu1 }
 0x14c   :  { %10653 = vst [vmem:[#allocation45_spill] sm:$0xff] %v6998_v56  ;;  %v544_v43 = vpop.f32.mrf.mxu2 }
 0x14d   :  { %v7000_v41 = vpop.f32.mrf.mxu0 }
 0x14e   :  { %10654 = vst [vmem:[#allocation46_spill] sm:$0xff] %v7000_v41  ;;  %v659_v41 = vpop.f32.mrf.mxu3  ;;  %v86_v63 = vpop.permute.xlu2 %85 }
 0x14f   :  { %v245_v35 = vadd.f32 %v6743_v29, %v86_v63  ;;  %v309_v29 = vadd.f32 %v6881_v60, %v126_v31  ;;  %v10673_v63 = vld [vmem:[#allocation16_spill] sm:$0xff] }
 0x151   :  { %v398_v45 = vadd.f32 %v6760_v55, %v245_v35  ;;  %v301_v35 = vadd.f32 %v6862_v52, %v6694_v26 }
 0x153   :  { %v7004_v5 = vpop.f32.mrf.mxu1  ;;  %v426_v52 = vadd.f32 %v6877_v59, %v301_v35  ;;  %v10681_v35 = vld [vmem:[#allocation15_spill] sm:$0xff] }
 0x154   :  { %10656 = vst [vmem:[#allocation48_spill] sm:$0xff] %v7004_v5  ;;  %v333_v5 = vadd.f32 %v6917_v36, %v6666_v10  ;;  %v549_v53 = vpop.f32.mrf.mxu2  ;;  %v261_v10 = vadd.f32 %v6779_v1, %v6746_v48 }
 0x155   :  { %v7006_v54 = vpop.f32.mrf.mxu0  ;;  %v525_v33 = vadd.f32 %v6988_v57, %v426_v52 }
 0x156   :  { %10657 = vst [vmem:[#allocation49_spill] sm:$0xff] %v7006_v54  ;;  %v317_v54 = vadd.f32 %v6896_v13, %v131_v12  ;;  %v442_v2 = vadd.f32 %v6925_v40, %v333_v5  ;;  %v665_v62 = vpop.f32.mrf.mxu3  ;;  %v490_v13 = vadd.f32 %v6920_v30, %v398_v45  ;;  %v550_v40 = vadd.f32 %v549_v53, %v446_v18  ;;  %v10675_v12 = vld [vmem:[#allocation39_spill] sm:$0xff] }
 0x158   :  { %v545_v36 = vadd.f32 %v544_v43, %v442_v2  ;;  %v434_v48 = vadd.f32 %v6909_v21, %v317_v54  ;;  %v406_v43 = vadd.f32 %v6796_v14, %v261_v10 }
 0x15a   :  { %v660_v60 = vadd.f32 %v659_v41, %v545_v36 }
 0x15b   :  { %v7008_v3 = vpop.f32.mrf.mxu1 }
 0x15c   :  { %10658 = vst [vmem:[#allocation50_spill] sm:$0xff] %v7008_v3  ;;  %v325_v3 = vadd.f32 %v6911_v19, %v6680_v11 }
 0x15d   :  { %v748_v17 = vpop.f32.mrf.mxu0 }
 0x15e   :  { %v438_v19 = vadd.f32 %v6915_v32, %v325_v3  ;;  %v7039_v3 = vadd.f32 %v6923_v15, %v490_v13  ;;  %v554_v15 = vpop.f32.mrf.mxu2 }
 0x160   :  { %v540_v1 = vadd.f32 %v539_v49, %v438_v19  ;;  %v285_v49 = vadd.f32 %v6832_v39, %v6709_v34  ;;  %v671_v39 = vpop.f32.mrf.mxu3 }
 0x162   :  { %v654_v45 = vadd.f32 %v653_v8, %v540_v1  ;;  %v10674_v8 = vld [vmem:[#allocation32_spill] sm:$0xff] }
 0x163   :  { %v7012_v27 = vpop.f32.mrf.mxu1  ;;  %v10677_v18 = vld [vmem:[#allocation50_spill] sm:$0xff] }
 0x164   :  { %10660 = vst [vmem:[#allocation52_spill] sm:$0xff] %v7012_v27  ;;  %v349_v27 = vadd.f32 %v6872_v46, %v6664_v7  ;;  %v402_v46 = vadd.f32 %v6777_v61, %v6765_v58  ;;  %v430_v58 = vadd.f32 %v6894_v4, %v309_v29  ;;  %v535_v61 = vadd.f32 %v534_v22, %v434_v48  ;;  %v10682_v48 = vld [vmem:[#allocation28_spill] sm:$0xff] }
 0x165   :  { %v752_v56 = vpop.f32.mrf.mxu0  ;;  %v269_v4 = vadd.f32 %v6798_v16, %v101_v9  ;;  %v10666_v9 = vld [vmem:[#allocation42_spill] sm:$0xff] }
 0x166   :  { %v450_v7 = vadd.f32 %v6879_v0, %v349_v27  ;;  %v293_v27 = vadd.f32 %v6847_v47, %v116_v23  ;;  %v666_v0 = vadd.f32 %v665_v62, %v550_v40  ;;  %v7045_v26 = vadd.f32 %v6931_v37, %v402_v46  ;;  %v10664_v62 = vld [vmem:[#allocation17_spill] sm:$0xff] }
 0x167   :  { %v530_v21 = vadd.f32 %v529_v20, %v430_v58  ;;  %v648_v30 = vadd.f32 %v647_v50, %v535_v61  ;;  %v753_v14 = vadd.f32 %v752_v56, %v654_v45  ;;  %v418_v22 = vadd.f32 %v10664_v62, %v285_v49  ;;  %v922_v61 = vpop.permute.xlu1 %921  ;;  %v10685_v45 = vld [vmem:[#allocation48_spill] sm:$0xff] }
 0x168   :  { %v422_v37 = vadd.f32 %v6860_v51, %v293_v27  ;;  %v636_v50 = vadd.f32 %v10666_v9, %v525_v33  ;;  %v10667_v51 = vld [vmem:[#allocation49_spill] sm:$0xff]  ;;  %v10684_v27 = vld [vmem:[#allocation44_spill] sm:$0xff] }
 0x169   :  { %v642_v34 = vadd.f32 %v6996_v25, %v530_v21  ;;  %v749_v59 = vadd.f32 %v748_v17, %v648_v30  ;;  %v10670_v25 = vld [vmem:[#allocation47_spill] sm:$0xff]  ;;  %v515_v23 = vadd.f32 %v10674_v8, %v418_v22  ;;  %v10689_v30 = vld [vmem:[#allocation24_spill] sm:$0xff]  ;;  %v10698_v9 = vld [vmem:[#allocation25_spill] sm:$0xff] }
 0x16a   :  { %v520_v16 = vadd.f32 %v10665_v6, %v422_v37  ;;  %v10692_v37 = vld [vmem:[#allocation45_spill] sm:$0xff]  ;;  %v10697_v6 = vld [vmem:[#allocation19_spill] sm:$0xff] }
 0x16b   :  { %v837_v24 = vpop.f32.mrf.mxu1  ;;  %v745_v53 = vadd.f32 %v10667_v51, %v642_v34  ;;  %v10668_v54 = vld [vmem:[#allocation52_spill] sm:$0xff]  ;;  %v10694_v34 = vld [vmem:[#allocation51_spill] sm:$0xff] }
 0x16c   :  { %v7058_v5 = vadd.f32 %v837_v24, %v753_v14  ;;  %v7067_v31 = vadd.f32 %v10668_v54, %v749_v59  ;;  %v10671_v24 = vld [vmem:[#allocation10_spill] sm:$0xff]  ;;  %v630_v20 = vadd.f32 %v10675_v12, %v520_v16  ;;  %v10690_v14 = vld [vmem:[#allocation29_spill] sm:$0xff]  ;;  %v500_v16 = vadd.f32 %v10697_v6, %v406_v43 }
 0x16d   :  { %v756_v38 = vpop.f32.mrf.mxu0  ;;  %v7082_v36 = vadd.f32 %v10677_v18, %v745_v53  ;;  %v10700_v53 = vld [vmem:[#allocation43_spill] sm:$0xff]  ;;  %v10706_v43 = vld [vmem:[#allocation21_spill] sm:$0xff] }
 0x16e   :  { %v757_v32 = vadd.f32 %v756_v38, %v660_v60  ;;  %v277_v38 = vadd.f32 %v6817_v28, %v6731_v44  ;;  %10662 = vst [vmem:[#allocation54_spill] sm:$0xff] %v7058_v5  ;;  %v555_v44 = vadd.f32 %v554_v15, %v450_v7  ;;  %v927_v28 = vpop.permute.xlu2 %926  ;;  %v10679_v7 = vld [vmem:[#allocation11_spill] sm:$0xff]  ;;  %v10683_v60 = vld [vmem:[#allocation34_spill] sm:$0xff]  ;;  %v737_v58 = vadd.f32 %v10684_v27, %v630_v20 }
 0x16f   :  { %10669 = vst [vmem:[#allocation17_spill] sm:$0xff] %v7067_v31  ;;  %v7086_v46 = vsub.f32 %v7058_v5, %v10679_v7  ;;  %v624_v40 = vadd.f32 %v10683_v60, %v515_v23  ;;  %v606_v12 = vadd.f32 %v10706_v43, %v500_v16  ;;  %v10707_v20 = vld [vmem:[#allocation35_spill] sm:$0xff]  ;;  %v10712_v60 = vld [vmem:[#allocation18_spill] sm:$0xff] }
 0x170   :  { %v414_v2 = vadd.f32 %v10673_v63, %v277_v38  ;;  %v672_v10 = vadd.f32 %v671_v39, %v555_v44  ;;  %10678 = vst [vmem:[#allocation42_spill] sm:$0xff] %v7082_v36  ;;  %v7107_v33 = vadd.f32 %v10692_v37, %v737_v58  ;;  %v7111_v39 = vsub.f32 %v7082_v36, %v10694_v34  ;;  %v10699_v44 = vld [vmem:[#allocation38_spill] sm:$0xff]  ;;  %v10713_v27 = vld [vmem:[#allocation31_spill] sm:$0xff]  ;;  %v907_v34 = vpop.permute.xlu1 %906 }
 0x171   :  { %10680 = vst [vmem:[#allocation49_spill] sm:$0xff] %v7086_v46  ;;  %v997_v59 = vmul.f32 %v7086_v46, %v7086_v46  ;;  %v721_v58 = vadd.f32 %v10713_v27, %v606_v12 }
 0x172   :  { %v510_v1 = vadd.f32 %v10682_v48, %v414_v2  ;;  %10693 = vst [vmem:[#allocation10_spill] sm:$0xff] %v7107_v33  ;;  %v10704_v2 = vld [vmem:[#allocation9_spill] sm:$0xff] }
 0x173   :  { %v841_v11 = vpop.f32.mrf.mxu1  ;;  %10695 = vst [vmem:[#allocation16_spill] sm:$0xff] %v7111_v39  ;;  %v7150_v48 = vand.u32 4294901760, %v997_v59 }
 0x174   :  { %v7050_v42 = vadd.f32 %v841_v11, %v757_v32  ;;  %v10676_v11 = vld [vmem:[#allocation46_spill] sm:$0xff]  ;;  %v10687_v32 = vld [vmem:[#allocation12_spill] sm:$0xff] }
 0x175   :  { %v760_v55 = vpop.f32.mrf.mxu0  ;;  %v741_v19 = vadd.f32 %v10676_v11, %v636_v50  ;;  %v7099_v49 = vsub.f32 %v7067_v31, %v10687_v32 }
 0x176   :  { %10661 = vst [vmem:[#allocation53_spill] sm:$0xff] %v7050_v42  ;;  %v761_v47 = vadd.f32 %v760_v55, %v666_v0  ;;  %v7071_v17 = vsub.f32 %v7050_v42, %v10670_v25  ;;  %v410_v55 = vadd.f32 %v10681_v35, %v269_v4  ;;  %v10691_v4 = vld [vmem:[#allocation41_spill] sm:$0xff]  ;;  %v917_v7 = vpop.permute.xlu2 %916  ;;  %v995_v35 = vmul.f32 %v7111_v39, %v7111_v39 }
 0x177   :  { %v7095_v0 = vadd.f32 %v10685_v45, %v741_v19  ;;  %10688 = vst [vmem:[#allocation47_spill] sm:$0xff] %v7099_v49  ;;  %v733_v38 = vadd.f32 %v10691_v4, %v624_v40  ;;  %v10702_v25 = vld [vmem:[#allocation13_spill] sm:$0xff]  ;;  %v996_v63 = vmul.f32 %v7099_v49, %v7099_v49  ;;  %v10710_v19 = vld [vmem:[#allocation14_spill] sm:$0xff]  ;;  %v600_v40 = vadd.f32 %v10712_v60, %v7045_v26  ;;  %v10714_v45 = vld [vmem:[#allocation36_spill] sm:$0xff] }
 0x178   :  { %v998_v52 = vmul.f32 %v7071_v17, %v7071_v17  ;;  %v505_v15 = vadd.f32 %v10689_v30, %v410_v55  ;;  %v7144_v18 = vsub.f32 %v7107_v33, %v10710_v19  ;;  %v912_v30 = vpop.permute.xlu0 %911  ;;  %v10717_v26 = vld [vmem:[#allocation27_spill] sm:$0xff]  ;;  %v7186_v16 = vand.u32 4294901760, %v995_v35 }
 0x179   :  { %10686 = vst [vmem:[#allocation52_spill] sm:$0xff] %v7095_v0  ;;  %v7123_v54 = vadd.f32 %v10700_v53, %v733_v38  ;;  %v717_v4 = vadd.f32 %v10717_v26, %v600_v40  ;;  %v10718_v38 = vld [vmem:[#allocation33_spill] sm:$0xff] }
 0x17a   :  { %v612_v50 = vadd.f32 %v10698_v9, %v505_v15  ;;  %v7135_v23 = vand.u32 4294901760, %v998_v52  ;;  %10711 = vst [vmem:[#allocation15_spill] sm:$0xff] %v7144_v18  ;;  %v7175_v37 = vadd.f32 %v10718_v38, %v721_v58  ;;  %v7190_v9 = vsub.f32 %v997_v59, %v7150_v48 }
 0x17b   :  { %v845_v41 = vpop.f32.mrf.mxu1  ;;  %10701 = vst [vmem:[#allocation39_spill] sm:$0xff] %v7123_v54  ;;  %v7229_v60 = vsub.f32 %v995_v35, %v7186_v16 }
 0x17c   :  { %v7060_v56 = vadd.f32 %v845_v41, %v761_v47  ;;  %v618_v47 = vadd.f32 %v10690_v14, %v510_v1  ;;  %10719 = vst [vmem:[#allocation44_spill] sm:$0xff] %v7175_v37 }
 0x17d   :  { %v764_v29 = vpop.f32.mrf.mxu0 }
 0x17e   :  { %10663 = vst [vmem:[#allocation55_spill] sm:$0xff] %v7060_v56  ;;  %v7075_v57 = vsub.f32 %v7060_v56, %v10671_v24  ;;  %v765_v21 = vadd.f32 %v764_v29, %v672_v10  ;;  %v729_v51 = vadd.f32 %v10699_v44, %v618_v47  ;;  %v7127_v24 = vsub.f32 %v7095_v0, %v10702_v25  ;;  %v10708_v29 = vld [vmem:[#allocation40_spill] sm:$0xff]  ;;  %v10722_v44 = vld [vmem:[#allocation30_spill] sm:$0xff] }
 0x17f   :  { %v725_v10 = vadd.f32 %v10707_v20, %v612_v50  ;;  %v7168_v47 = vand.u32 4294901760, %v996_v63  ;;  %v10721_v50 = vld [vmem:[#allocation23_spill] sm:$0xff] }
 0x180   :  { %10672 = vst [vmem:[#allocation37_spill] sm:$0xff] %v7075_v57  ;;  %v999_v13 = vmul.f32 %v7075_v57, %v7075_v57  ;;  %v7140_v11 = vadd.f32 %v10708_v29, %v729_v51  ;;  %v994_v15 = vmul.f32 %v7127_v24, %v7127_v24  ;;  %v7195_v51 = vadd.f32 %v10722_v44, %v717_v4  ;;  %v892_v4 = vpop.permute.xlu1 %891 }
 0x181   :  { %10703 = vst [vmem:[#allocation46_spill] sm:$0xff] %v7127_v24  ;;  %v7159_v32 = vadd.f32 %v10714_v45, %v725_v10  ;;  %v7208_v12 = vsub.f32 %v996_v63, %v7168_v47  ;;  %v7214_v10 = vsub.f32 %v7175_v37, %v912_v30  ;;  %v902_v45 = vpop.permute.xlu2 %901 }
 0x182   :  { %v7117_v22 = vand.u32 4294901760, %v999_v13  ;;  %10709 = vst [vmem:[#allocation11_spill] sm:$0xff] %v7140_v11  ;;  %v7204_v43 = vand.u32 4294901760, %v994_v15  ;;  %v7232_v40 = vsub.f32 %v7195_v51, %v907_v34 }
 0x183   :  { %v849_v41 = vpop.f32.mrf.mxu1  ;;  %10715 = vst [vmem:[#allocation28_spill] sm:$0xff] %v7159_v32  ;;  %v7198_v53 = vsub.f32 %v7159_v32, %v917_v7  ;;  %v989_v34 = vmul.f32 %v7214_v10, %v7214_v10 }
 0x184   :  { %v7115_v62 = vadd.f32 %v849_v41, %v765_v21  ;;  %v7153_v1 = vsub.f32 %v999_v13, %v7117_v22  ;;  %v7162_v21 = vsub.f32 %v7123_v54, %v927_v28  ;;  %v7171_v13 = vsub.f32 %v998_v52, %v7135_v23  ;;  %10723 = vst [vmem:[#allocation12_spill] sm:$0xff] %v7195_v51 }
 0x185   :  { %v7178_v41 = vsub.f32 %v7140_v11, %v922_v61  ;;  %v993_v28 = vmul.f32 %v7144_v18, %v7144_v18  ;;  %v713_v61 = vadd.f32 %v10721_v50, %v7039_v3  ;;  %10724 = vst [vmem:[#allocation24_spill] sm:$0xff] %v7198_v53  ;;  %v10725_v3 = vld [vmem:[#allocation26_spill] sm:$0xff]  ;;  %v990_v27 = vmul.f32 %v7198_v53, %v7198_v53 }
 0x186   :  { %10696 = vst [vmem:[#allocation32_spill] sm:$0xff] %v7115_v62  ;;  %v7133_v8 = vsub.f32 %v7115_v62, %v10704_v2  ;;  %v10311_v52 = vand.u32 4294901760, %v7153_v1  ;;  %v992_v25 = vmul.f32 %v7162_v21, %v7162_v21  ;;  %v10310_v59 = vand.u32 4294901760, %v7171_v13 }
 0x187   :  { %10716 = vst [vmem:[#allocation34_spill] sm:$0xff] %v7162_v21  ;;  %v7211_v20 = vadd.f32 %v10725_v3, %v713_v61  ;;  %v991_v29 = vmul.f32 %v7178_v41, %v7178_v41  ;;  %v7218_v19 = vand.u32 4294901760, %v993_v28  ;;  %v7244_v35 = vsub.f32 %v994_v15, %v7204_v43  ;;  %v897_v61 = vpop.permute.xlu0 %896 }
 0x188   :  { %10705 = vst [vmem:[#allocation50_spill] sm:$0xff] %v7133_v8  ;;  %v1000_v55 = vmul.f32 %v7133_v8, %v7133_v8  ;;  %v1051_v63 = vsub.f32 %v7153_v1, %v10311_v52  ;;  %v7236_v58 = vand.u32 4294901760, %v992_v25  ;;  %v1057_v26 = vsub.f32 %v7171_v13, %v10310_v59  ;;  %v7945_v57 = vpop.permute.xlu1 %2184 }
 0x189   :  { %10720 = vst [vmem:[#allocation48_spill] sm:$0xff] %v7178_v41  ;;  %v7247_v38 = vsub.f32 %v7211_v20, %v902_v45  ;;  %v7251_v50 = vand.u32 4294901760, %v991_v29  ;;  %v10730_v45 = vld [vmem:[#allocation22_spill] sm:$0xff]  ;;  %v988_v52 = vmul.f32 %v7232_v40, %v7232_v40  ;;  %v7281_v51 = vand.u32 4294901760, %v989_v34 }
 0x18a   :  { %v7166_v14 = vand.u32 4294901760, %v1000_v55  ;;  %10726 = vst [vmem:[#allocation29_spill] sm:$0xff] %v7211_v20  ;;  %v1052_v44 = vand.u32 4294901760, %v1051_v63  ;;  %v7262_v59 = vsub.f32 %v10730_v45, %v897_v61  ;;  %v1058_v63 = vand.u32 4294901760, %v1057_v26  ;;  %v10733_v61 = vld [vmem:[#allocation20_spill] sm:$0xff] }
 0x18b   :  { %10727 = vst [vmem:[#allocation41_spill] sm:$0xff] %v7214_v10  ;;  %v7274_v15 = vsub.f32 %v992_v25, %v7236_v58  ;;  %v7277_v45 = vsub.f32 %v10733_v61, %v892_v4  ;;  %v987_v20 = vmul.f32 %v7247_v38, %v7247_v38  ;;  %v7289_v25 = vsub.f32 %v991_v29, %v7251_v50 }
 0x18c   :  { %1002 = vmatpush.msra.mxu2 %v7166_v14  ;;  %v7184_v6 = vsub.f32 %v1000_v55, %v7166_v14  ;;  %v10313_v55 = vand.u32 4294901760, %v7190_v9  ;;  %10728 = vst [vmem:[#allocation45_spill] sm:$0xff] %v7232_v40  ;;  %v986_v4 = vmul.f32 %v7262_v59, %v7262_v59  ;;  %v7293_v61 = vand.u32 4294901760, %v988_v52 }
 0x18d   :  { %10729 = vst [vmem:[#allocation51_spill] sm:$0xff] %v7247_v38  ;;  %v985_v29 = vmul.f32 %v7277_v45, %v7277_v45  ;;  %v7305_v37 = vand.u32 4294901760, %v987_v20  ;;  %v10738_v40 = vand.u32 4294901760, %v7274_v15 }
 0x18e   :  { %1004 = vmatpush.msra.mxu2 %v7117_v22  ;;  %v10312_v2 = vand.u32 4294901760, %v7184_v6  ;;  %v1063_v3 = vsub.f32 %v7190_v9, %v10313_v55  ;;  %10731 = vst [vmem:[#allocation19_spill] sm:$0xff] %v7262_v59  ;;  %v7323_v11 = vsub.f32 %v988_v52, %v7293_v61  ;;  %v870_v52 = vld [vmem:[%s10304_s8] sm:$0xff] }
 0x18f   :  { %10734 = vst [vmem:[#allocation25_spill] sm:$0xff] %v7277_v45  ;;  %v7333_v10 = vsub.f32 %v987_v20, %v7305_v37 }
 0x190   :  { %1006 = vmatpush.msra.mxu2 %v7135_v23  ;;  %v1045_v7 = vsub.f32 %v7184_v6, %v10312_v2  ;;  %v7266_v2 = vand.u32 4294901760, %v990_v27  ;;  %v1064_v26 = vand.u32 4294901760, %v1063_v3  ;;  %v10736_v3 = vand.u32 4294901760, %v7244_v35  ;;  %10848 = vst [vmem:[#allocation132_spill] sm:$0xff] %v7945_v57 }
 0x192   :  { %1008 = vmatpush.msra.mxu2 %v7150_v48  ;;  %v1046_v30 = vand.u32 4294901760, %v1045_v7  ;;  %v7259_v7 = vsub.f32 %v993_v28, %v7218_v19  ;;  %v7301_v28 = vsub.f32 %v990_v27, %v7266_v2  ;;  %v7315_v27 = vand.u32 4294901760, %v986_v4 }
 0x194   :  { %1010 = vmatpush.msra.mxu2 %v7168_v47  ;;  %1047 = vmatpush.msra.mxu3 %v1046_v30  ;;  %v10732_v30 = vand.u32 4294901760, %v7208_v12 }
 0x196   :  { %1012 = vmatpush.msra.mxu2 %v7186_v16  ;;  %1053 = vmatpush.msra.mxu3 %v1052_v44  ;;  %v1069_v55 = vsub.f32 %v7208_v12, %v10732_v30  ;;  %v10735_v44 = vand.u32 4294901760, %v7229_v60 }
 0x198   :  { %1014 = vmatpush.msra.mxu2 %v7204_v43  ;;  %1059 = vmatpush.msra.mxu3 %v1058_v63  ;;  %v1075_v30 = vsub.f32 %v7229_v60, %v10735_v44  ;;  %v1070_v38 = vand.u32 4294901760, %v1069_v55  ;;  %v1081_v63 = vsub.f32 %v7244_v35, %v10736_v3  ;;  %v10737_v55 = vand.u32 4294901760, %v7259_v7 }
 0x199   :  { %v10323_v3 = vand.u32 4294901760, %v7289_v25  ;;  %v7313_v44 = vsub.f32 %v989_v34, %v7281_v51 }
 0x19a   :  { %1016 = vmatpush.msra.mxu2 %v7218_v19  ;;  %1065 = vmatpush.msra.mxu3 %v1064_v26  ;;  %v1076_v59 = vand.u32 4294901760, %v1075_v30  ;;  %v1087_v26 = vsub.f32 %v7259_v7, %v10737_v55  ;;  %v1082_v32 = vand.u32 4294901760, %v1081_v63  ;;  %v10326_v30 = vand.u32 4294901760, %v7301_v28 }
 0x19b   :  { %v7325_v55 = vand.u32 4294901760, %v985_v29  ;;  %v7346_v63 = vsub.f32 %v986_v4, %v7315_v27  ;;  %v10741_v53 = vand.u32 4294901760, %v7313_v44 }
 0x19c   :  { %1018 = vmatpush.msra.mxu2 %v7236_v58  ;;  %1071 = vmatpush.msra.mxu3 %v1070_v38  ;;  %v1093_v38 = vsub.f32 %v7274_v15, %v10738_v40  ;;  %v1088_v34 = vand.u32 4294901760, %v1087_v26  ;;  %v7338_v40 = vand.u32 4294901760, %v870_v52  ;;  %v1105_v26 = vsub.f32 %v7301_v28, %v10326_v30 }
 0x19d   :  { %v7357_v30 = vsub.f32 %v985_v29, %v7325_v55 }
 0x19e   :  { %1020 = vmatpush.msra.mxu2 %v7251_v50  ;;  %1077 = vmatpush.msra.mxu3 %v1076_v59  ;;  %v1099_v59 = vsub.f32 %v7289_v25, %v10323_v3  ;;  %10739 = vst [vmem:[#allocation38_spill] sm:$0xff] %v7338_v40  ;;  %v7349_v20 = vsub.f32 %v870_v52, %v7338_v40  ;;  %v1106_v4 = vand.u32 4294901760, %v1105_v26  ;;  %v10743_v52 = vand.u32 4294901760, %v7323_v11 }
 0x1a0   :  { %1022 = vmatpush.msra.mxu2 %v7266_v2  ;;  %1083 = vmatpush.msra.mxu3 %v1082_v32  ;;  %v1094_v32 = vand.u32 4294901760, %v1093_v38  ;;  %10740 = vst [vmem:[#allocation43_spill] sm:$0xff] %v7349_v20  ;;  %v1100_v54 = vand.u32 4294901760, %v1099_v59  ;;  %v1111_v38 = vsub.f32 %v7313_v44, %v10741_v53  ;;  %v7360_v3 = vand.u32 4294901760, %v7349_v20 }
 0x1a1   :  { %v1117_v59 = vsub.f32 %v7323_v11, %v10743_v52 }
 0x1a2   :  { %1024 = vmatpush.msra.mxu2 %v7281_v51  ;;  %1089 = vmatpush.msra.mxu3 %v1088_v34  ;;  %v1122_v34 = vand.u32 4294901760, %v7333_v10  ;;  %10742 = vst [vmem:[#allocation13_spill] sm:$0xff] %v7360_v3  ;;  %v1036_v53 = vsub.f32 %v7349_v20, %v7360_v3  ;;  %v1112_v29 = vand.u32 4294901760, %v1111_v38 }
 0x1a3   :  { %v1118_v52 = vand.u32 4294901760, %v1117_v59 }
 0x1a4   :  { %1026 = vmatpush.msra.mxu2 %v7293_v61  ;;  %1095 = vmatpush.msra.mxu3 %v1094_v32  ;;  %v1128_v32 = vand.u32 4294901760, %v7346_v63  ;;  %v1123_v45 = vsub.f32 %v7333_v10, %v1122_v34  ;;  %v7374_v26 = vand.u32 4294901760, %v1036_v53 }
 0x1a6   :  { %1028 = vmatpush.msra.mxu2 %v7305_v37  ;;  %1101 = vmatpush.msra.mxu3 %v1100_v54  ;;  %v1134_v54 = vand.u32 4294901760, %v7357_v30  ;;  %10744 = vst [vmem:[#allocation9_spill] sm:$0xff] %v7374_v26  ;;  %v1129_v62 = vsub.f32 %v7346_v63, %v1128_v32  ;;  %v1124_v38 = vand.u32 4294901760, %v1123_v45  ;;  %v10746_v45 = vand.u32 4294901760, %v7153_v1 }
 0x1a8   :  { %1030 = vmatpush.msra.mxu2 %v7315_v27  ;;  %1107 = vmatpush.msra.mxu3 %v1106_v4  ;;  %v1135_v4 = vsub.f32 %v7357_v30, %v1134_v54  ;;  %v1130_v53 = vand.u32 4294901760, %v1129_v62  ;;  %v10745_v62 = vand.u32 4294901760, %v7184_v6 }
 0x1aa   :  { %1032 = vmatpush.msra.mxu2 %v7325_v55  ;;  %1113 = vmatpush.msra.mxu3 %v1112_v29  ;;  %v1136_v59 = vand.u32 4294901760, %v1135_v4  ;;  %v10747_v29 = vand.u32 4294901760, %v7171_v13 }
 0x1ab   :  { %1038 = vmatmul.f32.vlgmr.msra.gmra.mxu2 %v7374_v26 }
 0x1ac   :  { %1145 = vmatpush.msrb.mxu2 %v7184_v6  ;;  %1119 = vmatpush.msra.mxu3 %v1118_v52  ;;  %v10748_v52 = vand.u32 4294901760, %v7190_v9  ;;  %v10749_v6 = vand.u32 4294901760, %v7208_v12 }
 0x1ae   :  { %1148 = vmatpush.msrb.mxu2 %v7153_v1  ;;  %1125 = vmatpush.msra.mxu3 %v1124_v38  ;;  %v10750_v1 = vand.u32 4294901760, %v7229_v60  ;;  %v855_v38 = vld [vmem:[%s10303_s7 + $0x8] sm:$0xff] }
 0x1b0   :  { %1151 = vmatpush.msrb.mxu2 %v7171_v13  ;;  %1131 = vmatpush.msra.mxu3 %v1130_v53  ;;  %v10751_v13 = vand.u32 4294901760, %v7244_v35 }
 0x1b2   :  { %1154 = vmatpush.msrb.mxu2 %v7190_v9  ;;  %1137 = vmatpush.msra.mxu3 %v1136_v59  ;;  %v10752_v9 = vand.u32 4294901760, %v7259_v7 }
 0x1b3   :  { %1139 = vmatmul.f32.vlgmr.msra.gmra.mxu3 %v7338_v40 }
 0x1b4   :  { %1157 = vmatpush.msrb.mxu2 %v7208_v12  ;;  %1198 = vmatpush.msrb.mxu3 %v7166_v14  ;;  %v10753_v12 = vand.u32 4294901760, %v7274_v15 }
 0x1b6   :  { %1160 = vmatpush.msrb.mxu2 %v7229_v60  ;;  %1200 = vmatpush.msrb.mxu3 %v7117_v22 }
 0x1b8   :  { %1163 = vmatpush.msrb.mxu2 %v7244_v35  ;;  %1202 = vmatpush.msrb.mxu3 %v7135_v23 }
 0x1ba   :  { %1166 = vmatpush.msrb.mxu2 %v7259_v7  ;;  %1204 = vmatpush.msrb.mxu3 %v7150_v48 }
 0x1bc   :  { %1169 = vmatpush.msrb.mxu2 %v7274_v15  ;;  %1206 = vmatpush.msrb.mxu3 %v7168_v47 }
 0x1be   :  { %1172 = vmatpush.msrb.mxu2 %v7289_v25  ;;  %1208 = vmatpush.msrb.mxu3 %v7186_v16 }
 0x1c0   :  { %1175 = vmatpush.msrb.mxu2 %v7301_v28  ;;  %1210 = vmatpush.msrb.mxu3 %v7204_v43 }
 0x1c2   :  { %1178 = vmatpush.msrb.mxu2 %v7313_v44  ;;  %1212 = vmatpush.msrb.mxu3 %v7218_v19 }
 0x1c4   :  { %1181 = vmatpush.msrb.mxu2 %v7323_v11  ;;  %1214 = vmatpush.msrb.mxu3 %v7236_v58 }
 0x1c6   :  { %1184 = vmatpush.msrb.mxu2 %v7333_v10  ;;  %1216 = vmatpush.msrb.mxu3 %v7251_v50 }
 0x1c8   :  { %1187 = vmatpush.msrb.mxu2 %v7346_v63  ;;  %1218 = vmatpush.msrb.mxu3 %v7266_v2 }
 0x1ca   :  { %1190 = vmatpush.msrb.mxu2 %v7357_v30  ;;  %1220 = vmatpush.msrb.mxu3 %v7281_v51  ;;  %v854_v30 = vld [vmem:[%s10303_s7] sm:$0xff] }
 0x1cb   :  { %1193 = vmatmul.f32.vlgmr.msrb.gmra.mxu2 %v7349_v20 }
 0x1cc   :  { %1239 = vmatpush.msra.mxu2 %v10745_v62  ;;  %1222 = vmatpush.msrb.mxu3 %v7293_v61  ;;  %v1399_v62 = vsel %vm1394_vm3, %v855_v38, 0 }
 0x1ce   :  { %1243 = vmatpush.msra.mxu2 %v10746_v45  ;;  %1224 = vmatpush.msrb.mxu3 %v7305_v37 }
 0x1d0   :  { %1247 = vmatpush.msra.mxu2 %v10747_v29  ;;  %1226 = vmatpush.msrb.mxu3 %v7315_v27 }
 0x1d2   :  { %1251 = vmatpush.msra.mxu2 %v10748_v52  ;;  %1228 = vmatpush.msrb.mxu3 %v7325_v55 }
 0x1d3   :  { %1232 = vmatmul.f32.vlgmr.msrb.gmra.mxu3 %v7360_v3 }
 0x1d4   :  { %1255 = vmatpush.msra.mxu2 %v10749_v6  ;;  %1306 = vmatpush.msra.mxu3 %v7166_v14  ;;  %v10754_v14 = vand.u32 4294901760, %v7289_v25  ;;  %v7485_v6 = vand.u32 4294901760, %v1399_v62 }
 0x1d6   :  { %1259 = vmatpush.msra.mxu2 %v10750_v1  ;;  %1308 = vmatpush.msra.mxu3 %v7117_v22  ;;  %v10755_v22 = vand.u32 4294901760, %v7301_v28  ;;  %10761 = vst [vmem:[#allocation14_spill] sm:$0xff] %v7485_v6 }
 0x1d8   :  { %1263 = vmatpush.msra.mxu2 %v10751_v13  ;;  %1310 = vmatpush.msra.mxu3 %v7135_v23  ;;  %v10756_v23 = vand.u32 4294901760, %v7313_v44 }
 0x1da   :  { %1267 = vmatpush.msra.mxu2 %v10752_v9  ;;  %1312 = vmatpush.msra.mxu3 %v7150_v48  ;;  %v10757_v48 = vand.u32 4294901760, %v7323_v11  ;;  %v856_v9 = vld [vmem:[%s10303_s7 + $0x10] sm:$0xff] }
 0x1dc   :  { %1271 = vmatpush.msra.mxu2 %v10753_v12  ;;  %1314 = vmatpush.msra.mxu3 %v7168_v47 }
 0x1de   :  { %1275 = vmatpush.msra.mxu2 %v10754_v14  ;;  %1316 = vmatpush.msra.mxu3 %v7186_v16  ;;  %v1378_v14 = vpop.permute.xlu0 %1377 }
 0x1e0   :  { %1279 = vmatpush.msra.mxu2 %v10755_v22  ;;  %1318 = vmatpush.msra.mxu3 %v7204_v43 }
 0x1e2   :  { %1283 = vmatpush.msra.mxu2 %v10756_v23  ;;  %1320 = vmatpush.msra.mxu3 %v7218_v19 }
 0x1e4   :  { %1287 = vmatpush.msra.mxu2 %v10757_v48  ;;  %1322 = vmatpush.msra.mxu3 %v7236_v58  ;;  %v7493_v48 = vsub.f32 %v1399_v62, %v7485_v6 }
 0x1e6   :  { %1291 = vmatpush.msra.mxu2 %v1122_v34  ;;  %1324 = vmatpush.msra.mxu3 %v7251_v50  ;;  %10762 = vst [vmem:[#allocation18_spill] sm:$0xff] %v7493_v48 }
 0x1e8   :  { %1295 = vmatpush.msra.mxu2 %v1128_v32  ;;  %1326 = vmatpush.msra.mxu3 %v7266_v2  ;;  %v1396_v32 = vsel %vm1394_vm3, %v854_v30, 0 }
 0x1ea   :  { %1299 = vmatpush.msra.mxu2 %v1134_v54  ;;  %1328 = vmatpush.msra.mxu3 %v7281_v51  ;;  %v7473_v54 = vand.u32 4294901760, %v1396_v32 }
 0x1eb   :  { %1301 = vmatmul.f32.vlgmr.msra.gmra.mxu2 %v7338_v40 }
 0x1ec   :  { %1330 = vmatpush.msra.mxu3 %v7293_v61  ;;  %10758 = vst [vmem:[#allocation21_spill] sm:$0xff] %v7473_v54  ;;  %v7479_v53 = vsub.f32 %v1396_v32, %v7473_v54 }
 0x1ee   :  { %1332 = vmatpush.msra.mxu3 %v7305_v37  ;;  %10759 = vst [vmem:[#allocation35_spill] sm:$0xff] %v7479_v53  ;;  %v7483_v52 = vand.u32 4294901760, %v7479_v53 }
 0x1f0   :  { %1334 = vmatpush.msra.mxu3 %v7315_v27  ;;  %10760 = vst [vmem:[#allocation40_spill] sm:$0xff] %v7483_v52  ;;  %v1463_v23 = vsub.f32 %v7479_v53, %v7483_v52 }
 0x1f2   :  { %1336 = vmatpush.msra.mxu3 %v7325_v55  ;;  %v1357_v55 = vpop.permute.xlu2 %1356 }
 0x1f3   :  { %1338 = vmatmul.f32.vlgmr.msra.gmra.mxu3 %v7338_v40 }
 0x1fa   :  { %v7954_v46 = vpop.permute.xlu2 %2179 }
 0x22e   :  { %v1039_v11 = vpop.f32.mrf.mxu2 }
 0x236   :  { %v1140_v47 = vpop.f32.mrf.mxu3 }
 0x237   :  { %v1141_v2 = vadd.f32 %v1140_v47, %v1039_v11 }
 0x24e   :  { %v1194_v16 = vpop.f32.mrf.mxu2 }
 0x24f   :  { %v1195_v10 = vadd.f32 %v1194_v16, %v1141_v2  ;;  %v1402_v16 = vsel %vm1394_vm3, %v856_v9, 0 }
 0x256   :  { %v1233_v43 = vpop.f32.mrf.mxu3 }
 0x257   :  { %v1234_v51 = vadd.f32 %v1233_v43, %v1195_v10 }
 0x26e   :  { %v1302_v19 = vpop.f32.mrf.mxu2 }
 0x26f   :  { %v1303_v60 = vadd.f32 %v1302_v19, %v1234_v51  ;;  %v7496_v19 = vand.u32 4294901760, %v1463_v23  ;;  %v7499_v51 = vand.u32 4294901760, %v7493_v48 }
 0x271   :  { %10763 = vst [vmem:[#allocation31_spill] sm:$0xff] %v7496_v19 }
 0x272   :  { %10764 = vst [vmem:[#allocation36_spill] sm:$0xff] %v7499_v51 }
 0x276   :  { %v1339_v58 = vpop.f32.mrf.mxu3 }
 0x277   :  { %v1340_v35 = vadd.f32 %v1339_v58, %v1303_v60  ;;  %v7501_v60 = vand.u32 4294901760, %v1402_v16 }
 0x279   :  { %6088 = vrsqrt.f32 %v1340_v35  ;;  %vm1349_vm1 = vcmp.eq.f32.partialorder %v1340_v35, inf  ;;  %v1352_v44 = vand.u32 2147483648, %v1340_v35  ;;  %vm1351_vm2 = vcmp.eq.f32.partialorder %v1340_v35, 0.0  ;;  %10765 = vst [vmem:[#allocation27_spill] sm:$0xff] %v7501_v60 }
 0x27f   :  { %v6089_v50 = vpop.eup %6088 }
 0x280   :  { %v1343_v37 = vmul.f32 %v6089_v50, %v1340_v35 }
 0x282   :  { %v1344_v15 = vmul.f32 %v6089_v50, %v1343_v37  ;;  %v857_v37 = vld [vmem:[%s10303_s7 + $0x18] sm:$0xff] }
 0x284   :  { %v1345_v7 = vmul.f32 0.5, %v1344_v15 }
 0x286   :  { %v1346_v28 = vsub.f32 1.5, %v1345_v7 }
 0x288   :  { %v1347_v25 = vmul.f32 %v6089_v50, %v1346_v28  ;;  %v1471_v28 = vsub.f32 %v7493_v48, %v7499_v51 }
 0x28a   :  { %v1348_v61 = vmul.f32 %v1347_v25, %v1340_v35  ;;  %v7510_v25 = vsub.f32 %v1402_v16, %v7501_v60 }
 0x28c   :  { %v1350_v27 = vsel %vm1349_vm1, %v1340_v35, %v1348_v61  ;;  %10766 = vst [vmem:[#allocation33_spill] sm:$0xff] %v7510_v25 }
 0x28d   :  { %v1353_v63 = vsel %vm1351_vm2, %v1352_v44, %v1350_v27  ;;  %v1405_v27 = vsel %vm1394_vm3, %v857_v37, 0 }
 0x28e   :  { %v1359_v34 = vadd.f32 %v1357_v55, %v1353_v63  ;;  %v1387_v47 = vmul.f32 %v1378_v14, %v1353_v63  ;;  %v7515_v55 = vand.u32 4294901760, %v1471_v28  ;;  %v7518_v63 = vand.u32 4294901760, %v7510_v25 }
 0x290   :  { %6090 = vrcp.f32 %v1359_v34  ;;  %v1371_v29 = vand.u32 2147483648, %v1359_v34  ;;  %v1369_v13 = vand.u32 2147483647, %v1359_v34  ;;  %vm1365_vm5 = vweird.f32 %v1359_v34  ;;  %10767 = vst [vmem:[#allocation23_spill] sm:$0xff] %v7515_v55 }
 0x291   :  { %10768 = vst [vmem:[#allocation30_spill] sm:$0xff] %v7518_v63  ;;  %v1479_v62 = vsub.f32 %v7510_v25, %v7518_v63 }
 0x292   :  { %v1372_v22 = vor.u32 1.1754944e-38, %v1371_v29  ;;  %vm1370_vm7 = vcmp.eq.f32.partialorder %v1369_v13, 8.507059e+37 }
 0x296   :  { %v6091_v4 = vpop.eup %6090 }
 0x297   :  { %v1361_v59 = vmul.f32 %v6091_v4, %v1359_v34  ;;  %vm1366_vm4 = vweird.f32 %v6091_v4  ;;  %v7520_v34 = vand.u32 4294901760, %v1405_v27 }
 0x298   :  { %vm1367_vm6 = vmor %vm1365_vm5, %vm1366_vm4 }
 0x299   :  { %v1362_v45 = vsub.f32 1.0, %v1361_v59  ;;  %10769 = vst [vmem:[#allocation26_spill] sm:$0xff] %v7520_v34 }
 0x29b   :  { %v1363_v1 = vmul.f32 %v6091_v4, %v1362_v45  ;;  %v7530_v45 = vsub.f32 %v1405_v27, %v7520_v34 }
 0x29d   :  { %v1364_v12 = vadd.f32 %v6091_v4, %v1363_v1  ;;  %10770 = vst [vmem:[#allocation22_spill] sm:$0xff] %v7530_v45 }
 0x29f   :  { %v1368_v11 = vsel %vm1367_vm6, %v6091_v4, %v1364_v12  ;;  %v858_v4 = vld [vmem:[%s10303_s7 + $0x20] sm:$0xff]  ;;  %v7535_v12 = vand.u32 4294901760, %v1479_v62 }
 0x2a0   :  { %v1373_v2 = vsel %vm1370_vm7, %v1372_v22, %v1368_v11  ;;  %v1408_v1 = vsel %vm1394_vm3, %v858_v4, 0  ;;  %v859_v11 = vld [vmem:[%s10303_s7 + $0x28] sm:$0xff]  ;;  %v862_v62 = vld [vmem:[%s10303_s7 + $0x40] sm:$0xff] }
 0x2a1   :  { %v1380_v43 = vmul.f32 %v1378_v14, %v1373_v2  ;;  %v1388_v10 = vmul.f32 %v1387_v47, %v1373_v2  ;;  %10771 = vst [vmem:[#allocation20_spill] sm:$0xff] %v7535_v12  ;;  %v7540_v22 = vand.u32 4294901760, %v1408_v1 }
 0x2a3   :  { %v1381_v58 = vadd.f32 1.0, %v1380_v43  ;;  %v1389_v35 = vmul.f32 %v1388_v10, %v1373_v2  ;;  %v1458_v50 = vand.u32 4294901760, %v1380_v43  ;;  %10773 = vst [vmem:[#allocation57_spill] sm:$0xff] %v7540_v22  ;;  %v7552_v16 = vsub.f32 %v1408_v1, %v7540_v22 }
 0x2a4   :  { %v1411_v2 = vsel %vm1394_vm3, %v859_v11, 0 }
 0x2a5   :  { %6092 = vlog2.f32 %v1381_v58  ;;  %v1386_v15 = vadd.f32 %v1381_v58, %v1378_v14  ;;  %1459 = vmatpush.msrb.mxu2 %v1458_v50  ;;  %1790 = vmatpush.msra.mxu1 %v1458_v50  ;;  %v1605_v7 = vsub.f32 %v1380_v43, %v1458_v50  ;;  %v7538_v14 = vand.u32 4294901760, %v7530_v45  ;;  %10775 = vst [vmem:[#allocation59_spill] sm:$0xff] %v7552_v16 }
 0x2a6   :  { %1465 = vmatmul.f32.vlgmr.msrb.gmra.mxu2 %v7496_v19  ;;  %1794 = vmatmul.f32.vlgmr.msra.gmra.mxu1 %v7483_v52  ;;  %v7560_v10 = vand.u32 4294901760, %v7552_v16  ;;  %v7562_v58 = vand.u32 4294901760, %v1411_v2 }
 0x2a7   :  { %v1390_v61 = vsub.f32 %v1386_v15, %v1389_v35  ;;  %1692 = vmatpush.msra.mxu0 %v1605_v7  ;;  %v1606_v44 = vand.u32 4294901760, %v1605_v7  ;;  %10772 = vst [vmem:[#allocation56_spill] sm:$0xff] %v7538_v14  ;;  %v1487_v47 = vsub.f32 %v7530_v45, %v7538_v14  ;;  %v860_v35 = vld [vmem:[%s10303_s7 + $0x30] sm:$0xff] }
 0x2a8   :  { %1695 = vmatmul.f32.vlgmr.msra.gmra.mxu0 %v7479_v53  ;;  %10777 = vst [vmem:[#allocation61_spill] sm:$0xff] %v7560_v10  ;;  %v7572_v37 = vsub.f32 %v1411_v2, %v7562_v58  ;;  %v1414_v15 = vsel %vm1394_vm3, %v860_v35, 0  ;;  %v863_v2 = vld [vmem:[%s10303_s7 + $0x48] sm:$0xff] }
 0x2a9   :  { %6094 = vlog2.f32 %v1390_v61  ;;  %1906 = vmatpush.msra.mxu2 %v1606_v44  ;;  %v1607_v30 = vsub.f32 %v1605_v7, %v1606_v44  ;;  %v7557_v43 = vand.u32 4294901760, %v1487_v47  ;;  %10778 = vst [vmem:[#allocation62_spill] sm:$0xff] %v7562_v58  ;;  %v7582_v61 = vand.u32 4294901760, %v1414_v15  ;;  %v861_v44 = vld [vmem:[%s10303_s7 + $0x38] sm:$0xff] }
 0x2aa   :  { %10779 = vst [vmem:[#allocation63_spill] sm:$0xff] %v7572_v37  ;;  %v7580_v28 = vand.u32 4294901760, %v7572_v37 }
 0x2ab   :  { %v6093_v32 = vpop.eup %6092  ;;  %v1608_v38 = vand.u32 4294901760, %v1607_v30  ;;  %10776 = vst [vmem:[#allocation60_spill] sm:$0xff] %v7557_v43  ;;  %v7592_v30 = vsub.f32 %v1414_v15, %v7582_v61  ;;  %v1423_v15 = vsel %vm1394_vm3, %v863_v2, 0 }
 0x2ac   :  { %v1383_v59 = vmul.f32 0.6931472, %v6093_v32  ;;  %10781 = vst [vmem:[#allocation65_spill] sm:$0xff] %v7580_v28  ;;  %v1503_v27 = vsub.f32 %v7572_v37, %v7580_v28  ;;  %v1417_v32 = vsel %vm1394_vm3, %v861_v44, 0 }
 0x2ad   :  { %1609 = vmatpush.msrb.mxu3 %v1608_v38  ;;  %10782 = vst [vmem:[#allocation66_spill] sm:$0xff] %v7582_v61  ;;  %v7600_v4 = vand.u32 4294901760, %v7592_v30 }
 0x2ae   :  { %1473 = vmatmul.f32.gmra.mxu2 %v7515_v55  ;;  %1611 = vmatmul.f32.vlgmr.msrb.gmra.mxu3 %v7473_v54  ;;  %v1384_v13 = vmul.f32 15.0, %v1383_v59  ;;  %10783 = vst [vmem:[#allocation67_spill] sm:$0xff] %v7592_v30  ;;  %v7597_v38 = vand.u32 4294901760, %v1503_v27  ;;  %v7602_v59 = vand.u32 4294901760, %v1417_v32 }
 0x2af   :  { %v6095_v29 = vpop.eup %6094  ;;  %1988 = vmatpush.msra.mxu3 %v1458_v50  ;;  %1800 = vmatmul.f32.gmra.mxu1 %v7499_v51  ;;  %v1495_v50 = vsub.f32 %v7552_v16, %v7560_v10  ;;  %10785 = vst [vmem:[#allocation69_spill] sm:$0xff] %v7600_v4 }
 0x2b0   :  { %1700 = vmatmul.f32.gmra.mxu0 %v7493_v48  ;;  %v1392_v9 = vmul.f32 0.6931472, %v6095_v29  ;;  %10784 = vst [vmem:[#allocation68_spill] sm:$0xff] %v7597_v38  ;;  %v1511_v29 = vsub.f32 %v7592_v30, %v7600_v4  ;;  %v7612_v1 = vsub.f32 %v1417_v32, %v7602_v59  ;;  %v7642_v32 = vand.u32 4294901760, %v1423_v15 }
 0x2b1   :  { %v7577_v7 = vand.u32 4294901760, %v1495_v50  ;;  %10786 = vst [vmem:[#allocation70_spill] sm:$0xff] %v7602_v59 }
 0x2b2   :  { %v7542_v23 = vadd.f32 %v1392_v9, %v1384_v13  ;;  %10787 = vst [vmem:[#allocation71_spill] sm:$0xff] %v7612_v1  ;;  %v1420_v13 = vsel %vm1394_vm3, %v862_v62, 0  ;;  %v7617_v9 = vand.u32 4294901760, %v1511_v29  ;;  %v7620_v11 = vand.u32 4294901760, %v7612_v1  ;;  %v864_v62 = vld [vmem:[%s10303_s7 + $0x50] sm:$0xff] }
 0x2b3   :  { %10780 = vst [vmem:[#allocation64_spill] sm:$0xff] %v7577_v7  ;;  %v7622_v47 = vand.u32 4294901760, %v1420_v13  ;;  %v1426_v2 = vsel %vm1394_vm3, %v864_v62, 0 }
 0x2b4   :  { %10774 = vst [vmem:[#allocation58_spill] sm:$0xff] %v7542_v23  ;;  %v1519_v35 = vsub.f32 %v7612_v1, %v7620_v11 }
 0x2b5   :  { %10788 = vst [vmem:[#allocation72_spill] sm:$0xff] %v7617_v9  ;;  %v7632_v50 = vsub.f32 %v1420_v13, %v7622_v47  ;;  %v7652_v13 = vsub.f32 %v1423_v15, %v7642_v32 }
 0x2b6   :  { %1481 = vmatmul.f32.gmra.mxu2 %v7535_v12  ;;  %1615 = vmatmul.f32.gmra.mxu3 %v7485_v6  ;;  %10789 = vst [vmem:[#allocation73_spill] sm:$0xff] %v7620_v11  ;;  %v7637_v44 = vand.u32 4294901760, %v1519_v35 }
 0x2b7   :  { %1806 = vmatmul.f32.gmra.mxu1 %v7518_v63  ;;  %10790 = vst [vmem:[#allocation74_spill] sm:$0xff] %v7622_v47  ;;  %v7640_v27 = vand.u32 4294901760, %v7632_v50 }
 0x2b8   :  { %1705 = vmatmul.f32.gmra.mxu0 %v7510_v25  ;;  %10791 = vst [vmem:[#allocation75_spill] sm:$0xff] %v7632_v50 }
 0x2b9   :  { %10792 = vst [vmem:[#allocation76_spill] sm:$0xff] %v7637_v44  ;;  %v1527_v29 = vsub.f32 %v7632_v50, %v7640_v27 }
 0x2ba   :  { %10793 = vst [vmem:[#allocation77_spill] sm:$0xff] %v7640_v27 }
 0x2bb   :  { %10794 = vst [vmem:[#allocation78_spill] sm:$0xff] %v7642_v32  ;;  %v7657_v35 = vand.u32 4294901760, %v1527_v29 }
 0x2bc   :  { %10795 = vst [vmem:[#allocation79_spill] sm:$0xff] %v7652_v13 }
 0x2bd   :  { %10796 = vst [vmem:[#allocation80_spill] sm:$0xff] %v7657_v35 }
 0x2be   :  { %1489 = vmatmul.f32.gmra.mxu2 %v7557_v43  ;;  %1619 = vmatmul.f32.gmra.mxu3 %v7501_v60 }
 0x2bf   :  { %1812 = vmatmul.f32.gmra.mxu1 %v7538_v14 }
 0x2c0   :  { %1710 = vmatmul.f32.gmra.mxu0 %v7530_v45 }
 0x2c6   :  { %1497 = vmatmul.f32.gmra.mxu2 %v7577_v7  ;;  %1623 = vmatmul.f32.gmra.mxu3 %v7520_v34 }
 0x2c7   :  { %1818 = vmatmul.f32.gmra.mxu1 %v7560_v10 }
 0x2c8   :  { %1715 = vmatmul.f32.gmra.mxu0 %v7552_v16 }
 0x2ce   :  { %1505 = vmatmul.f32.gmra.mxu2 %v7597_v38  ;;  %1627 = vmatmul.f32.gmra.mxu3 %v7540_v22  ;;  %v869_v38 = vld [vmem:[%s10303_s7 + $0x78] sm:$0xff] }
 0x2cf   :  { %1824 = vmatmul.f32.gmra.mxu1 %v7580_v28  ;;  %v868_v28 = vld [vmem:[%s10303_s7 + $0x70] sm:$0xff] }
 0x2d0   :  { %1720 = vmatmul.f32.gmra.mxu0 %v7572_v37  ;;  %v867_v37 = vld [vmem:[%s10303_s7 + $0x68] sm:$0xff] }
 0x2d6   :  { %1513 = vmatmul.f32.gmra.mxu2 %v7617_v9  ;;  %1631 = vmatmul.f32.gmra.mxu3 %v7562_v58  ;;  %v866_v9 = vld [vmem:[%s10303_s7 + $0x60] sm:$0xff] }
 0x2d7   :  { %1830 = vmatmul.f32.gmra.mxu1 %v7600_v4  ;;  %v865_v4 = vld [vmem:[%s10303_s7 + $0x58] sm:$0xff]  ;;  %s6201_s7 = smov [#allocation4]  }
 0x2d8   :  { %1725 = vmatmul.f32.gmra.mxu0 %v7592_v30  ;;  %v7660_v30 = vand.u32 4294901760, %v7652_v13  ;;  %v1429_v29 = vsel %vm1394_vm3, %v865_v4, 0  ;;  %s5983_s25 = sshll.u32 %s6201_s7, 4  ;;  %s5984_s25 = int_to_ptr.vmem [resolvable:$true] %s5983_s25 }
 0x2da   :  { %10797 = vst [vmem:[#allocation81_spill] sm:$0xff] %v7660_v30  ;;  %v1535_v15 = vsub.f32 %v7652_v13, %v7660_v30 }
 0x2de   :  { %1521 = vmatmul.f32.gmra.mxu2 %v7637_v44  ;;  %1635 = vmatmul.f32.gmra.mxu3 %v7582_v61  ;;  %v7662_v44 = vand.u32 4294901760, %v1426_v2 }
 0x2df   :  { %1836 = vmatmul.f32.gmra.mxu1 %v7620_v11 }
 0x2e0   :  { %1730 = vmatmul.f32.gmra.mxu0 %v7612_v1  ;;  %10798 = vst [vmem:[#allocation82_spill] sm:$0xff] %v7662_v44  ;;  %v7672_v62 = vsub.f32 %v1426_v2, %v7662_v44  ;;  %v7677_v1 = vand.u32 4294901760, %v1535_v15  ;;  %v1432_v15 = vsel %vm1394_vm3, %v866_v9, 0 }
 0x2e2   :  { %10799 = vst [vmem:[#allocation83_spill] sm:$0xff] %v7672_v62  ;;  %v7680_v11 = vand.u32 4294901760, %v7672_v62 }
 0x2e3   :  { %10800 = vst [vmem:[#allocation84_spill] sm:$0xff] %v7677_v1 }
 0x2e4   :  { %10801 = vst [vmem:[#allocation85_spill] sm:$0xff] %v7680_v11  ;;  %v1543_v4 = vsub.f32 %v7672_v62, %v7680_v11 }
 0x2e6   :  { %1529 = vmatmul.f32.gmra.mxu2 %v7657_v35  ;;  %1639 = vmatmul.f32.gmra.mxu3 %v7602_v59  ;;  %v7682_v35 = vand.u32 4294901760, %v1429_v29 }
 0x2e7   :  { %1842 = vmatmul.f32.gmra.mxu1 %v7640_v27 }
 0x2e8   :  { %1735 = vmatmul.f32.gmra.mxu0 %v7632_v50  ;;  %10802 = vst [vmem:[#allocation86_spill] sm:$0xff] %v7682_v35  ;;  %v7692_v2 = vsub.f32 %v1429_v29, %v7682_v35  ;;  %v7697_v50 = vand.u32 4294901760, %v1543_v4  ;;  %v1435_v4 = vsel %vm1394_vm3, %v867_v37, 0 }
 0x2ea   :  { %10803 = vst [vmem:[#allocation87_spill] sm:$0xff] %v7692_v2  ;;  %v7700_v27 = vand.u32 4294901760, %v7692_v2 }
 0x2eb   :  { %10804 = vst [vmem:[#allocation88_spill] sm:$0xff] %v7697_v50 }
 0x2ec   :  { %10805 = vst [vmem:[#allocation89_spill] sm:$0xff] %v7700_v27  ;;  %v1551_v9 = vsub.f32 %v7692_v2, %v7700_v27 }
 0x2ee   :  { %1537 = vmatmul.f32.gmra.mxu2 %v7677_v1  ;;  %1643 = vmatmul.f32.gmra.mxu3 %v7622_v47  ;;  %v7702_v1 = vand.u32 4294901760, %v1432_v15 }
 0x2ef   :  { %1848 = vmatmul.f32.gmra.mxu1 %v7660_v30 }
 0x2f0   :  { %1740 = vmatmul.f32.gmra.mxu0 %v7652_v13  ;;  %10806 = vst [vmem:[#allocation90_spill] sm:$0xff] %v7702_v1  ;;  %v7712_v29 = vsub.f32 %v1432_v15, %v7702_v1  ;;  %v7717_v13 = vand.u32 4294901760, %v1551_v9  ;;  %v1438_v9 = vsel %vm1394_vm3, %v868_v28, 0 }
 0x2f2   :  { %10807 = vst [vmem:[#allocation91_spill] sm:$0xff] %v7712_v29  ;;  %v7720_v30 = vand.u32 4294901760, %v7712_v29 }
 0x2f3   :  { %10808 = vst [vmem:[#allocation92_spill] sm:$0xff] %v7717_v13 }
 0x2f4   :  { %10809 = vst [vmem:[#allocation93_spill] sm:$0xff] %v7720_v30  ;;  %v1559_v37 = vsub.f32 %v7712_v29, %v7720_v30 }
 0x2f6   :  { %1545 = vmatmul.f32.gmra.mxu2 %v7697_v50  ;;  %1647 = vmatmul.f32.gmra.mxu3 %v7642_v32  ;;  %v7722_v50 = vand.u32 4294901760, %v1435_v4 }
 0x2f7   :  { %1854 = vmatmul.f32.gmra.mxu1 %v7680_v11 }
 0x2f8   :  { %1745 = vmatmul.f32.gmra.mxu0 %v7672_v62  ;;  %10810 = vst [vmem:[#allocation94_spill] sm:$0xff] %v7722_v50  ;;  %v7732_v15 = vsub.f32 %v1435_v4, %v7722_v50  ;;  %v7737_v62 = vand.u32 4294901760, %v1559_v37  ;;  %v1441_v37 = vsel %vm1394_vm3, %v869_v38, 0 }
 0x2fa   :  { %10811 = vst [vmem:[#allocation95_spill] sm:$0xff] %v7732_v15  ;;  %v7740_v11 = vand.u32 4294901760, %v7732_v15 }
 0x2fb   :  { %10812 = vst [vmem:[#allocation96_spill] sm:$0xff] %v7737_v62 }
 0x2fc   :  { %10813 = vst [vmem:[#allocation97_spill] sm:$0xff] %v7740_v11  ;;  %v1567_v28 = vsub.f32 %v7732_v15, %v7740_v11 }
 0x2fe   :  { %1553 = vmatmul.f32.gmra.mxu2 %v7717_v13  ;;  %1651 = vmatmul.f32.gmra.mxu3 %v7662_v44  ;;  %v7742_v13 = vand.u32 4294901760, %v1438_v9 }
 0x2ff   :  { %1860 = vmatmul.f32.gmra.mxu1 %v7700_v27 }
 0x300   :  { %1750 = vmatmul.f32.gmra.mxu0 %v7692_v2  ;;  %10814 = vst [vmem:[#allocation98_spill] sm:$0xff] %v7742_v13  ;;  %v7752_v4 = vsub.f32 %v1438_v9, %v7742_v13  ;;  %v7757_v2 = vand.u32 4294901760, %v1567_v28 }
 0x302   :  { %10815 = vst [vmem:[#allocation99_spill] sm:$0xff] %v7752_v4  ;;  %v7760_v27 = vand.u32 4294901760, %v7752_v4 }
 0x303   :  { %10816 = vst [vmem:[#allocation100_spill] sm:$0xff] %v7757_v2 }
 0x304   :  { %10817 = vst [vmem:[#allocation101_spill] sm:$0xff] %v7760_v27  ;;  %v1575_v9 = vsub.f32 %v7752_v4, %v7760_v27 }
 0x306   :  { %1561 = vmatmul.f32.gmra.mxu2 %v7737_v62  ;;  %1655 = vmatmul.f32.gmra.mxu3 %v7682_v35  ;;  %v7762_v62 = vand.u32 4294901760, %v1441_v37  ;;  %v7773_v38 = vand.u32 4294901760, %v1575_v9 }
 0x307   :  { %1866 = vmatmul.f32.gmra.mxu1 %v7720_v30 }
 0x308   :  { %1755 = vmatmul.f32.gmra.mxu0 %v7712_v29  ;;  %10818 = vst [vmem:[#allocation102_spill] sm:$0xff] %v7762_v62  ;;  %v7769_v30 = vsub.f32 %v1441_v37, %v7762_v62 }
 0x309   :  { %10820 = vst [vmem:[#allocation104_spill] sm:$0xff] %v7773_v38 }
 0x30a   :  { %10819 = vst [vmem:[#allocation103_spill] sm:$0xff] %v7769_v30  ;;  %v7776_v28 = vand.u32 4294901760, %v7769_v30 }
 0x30c   :  { %10821 = vst [vmem:[#allocation105_spill] sm:$0xff] %v7776_v28 }
 0x30e   :  { %1569 = vmatmul.f32.gmra.mxu2 %v7757_v2  ;;  %1659 = vmatmul.f32.gmra.mxu3 %v7702_v1  ;;  %v1583_v2 = vsub.f32 %v7769_v30, %v7776_v28 }
 0x30f   :  { %1872 = vmatmul.f32.gmra.mxu1 %v7740_v11 }
 0x310   :  { %1760 = vmatmul.f32.gmra.mxu0 %v7732_v15  ;;  %v7784_v37 = vand.u32 4294901760, %v1583_v2 }
 0x312   :  { %10822 = vst [vmem:[#allocation106_spill] sm:$0xff] %v7784_v37 }
 0x316   :  { %1577 = vmatmul.f32.gmra.mxu2 %v7773_v38  ;;  %1663 = vmatmul.f32.gmra.mxu3 %v7722_v50 }
 0x317   :  { %1878 = vmatmul.f32.gmra.mxu1 %v7760_v27 }
 0x318   :  { %1765 = vmatmul.f32.gmra.mxu0 %v7752_v4 }
 0x31e   :  { %1585 = vmatmul.f32.gmra.mxu2 %v7784_v37  ;;  %1667 = vmatmul.f32.gmra.mxu3 %v7742_v13 }
 0x31f   :  { %1884 = vmatmul.f32.gmra.mxu1 %v7776_v28 }
 0x320   :  { %1770 = vmatmul.f32.gmra.mxu0 %v7769_v30 }
 0x326   :  { %1671 = vmatmul.f32.gmra.mxu3 %v7762_v62  ;;  %1908 = vmatmul.f32.vlgmr.msra.gmra.mxu2 %v7473_v54 }
 0x329   :  { %v1466_v9 = vpop.f32.mrf.mxu2 }
 0x32e   :  { %1912 = vmatmul.f32.gmra.mxu2 %v7485_v6  ;;  %1990 = vmatmul.f32.vlgmr.msra.gmra.mxu3 %v7473_v54 }
 0x331   :  { %v1474_v4 = vpop.f32.mrf.mxu2  ;;  %v1612_v2 = vpop.f32.mrf.mxu3 }
 0x332   :  { %v7794_v27 = vadd.f32 %v1612_v2, %v1466_v9 }
 0x336   :  { %1916 = vmatmul.f32.gmra.mxu2 %v7501_v60  ;;  %1994 = vmatmul.f32.gmra.mxu3 %v7485_v6 }
 0x339   :  { %v1482_v28 = vpop.f32.mrf.mxu2  ;;  %v1616_v37 = vpop.f32.mrf.mxu3 }
 0x33a   :  { %v7798_v30 = vadd.f32 %v1616_v37, %v1474_v4 }
 0x33e   :  { %1920 = vmatmul.f32.gmra.mxu2 %v7520_v34  ;;  %1998 = vmatmul.f32.gmra.mxu3 %v7501_v60 }
 0x341   :  { %v1490_v38 = vpop.f32.mrf.mxu2  ;;  %v1620_v15 = vpop.f32.mrf.mxu3 }
 0x342   :  { %v7802_v11 = vadd.f32 %v1620_v15, %v1482_v28 }
 0x346   :  { %1924 = vmatmul.f32.gmra.mxu2 %v7540_v22  ;;  %2002 = vmatmul.f32.gmra.mxu3 %v7520_v34 }
 0x349   :  { %v1498_v9 = vpop.f32.mrf.mxu2  ;;  %v1624_v2 = vpop.f32.mrf.mxu3 }
 0x34a   :  { %v7806_v29 = vadd.f32 %v1624_v2, %v1490_v38 }
 0x34e   :  { %1928 = vmatmul.f32.gmra.mxu2 %v7562_v58  ;;  %2006 = vmatmul.f32.gmra.mxu3 %v7540_v22 }
 0x351   :  { %v1506_v4 = vpop.f32.mrf.mxu2  ;;  %v1628_v37 = vpop.f32.mrf.mxu3 }
 0x352   :  { %v7810_v16 = vadd.f32 %v1628_v37, %v1498_v9 }
 0x356   :  { %1932 = vmatmul.f32.gmra.mxu2 %v7582_v61  ;;  %2010 = vmatmul.f32.gmra.mxu3 %v7562_v58 }
 0x359   :  { %v1514_v15 = vpop.f32.mrf.mxu2  ;;  %v1632_v28 = vpop.f32.mrf.mxu3 }
 0x35a   :  { %v7814_v10 = vadd.f32 %v1632_v28, %v1506_v4 }
 0x35e   :  { %1936 = vmatmul.f32.gmra.mxu2 %v7602_v59  ;;  %2014 = vmatmul.f32.gmra.mxu3 %v7582_v61  ;;  %v7852_v61 = vpop.f32.mrf.mxu1 }
 0x361   :  { %v1522_v38 = vpop.f32.mrf.mxu2  ;;  %v1636_v2 = vpop.f32.mrf.mxu3 }
 0x362   :  { %v7818_v34 = vadd.f32 %v1636_v2, %v1514_v15 }
 0x366   :  { %1940 = vmatmul.f32.gmra.mxu2 %v7622_v47  ;;  %2018 = vmatmul.f32.gmra.mxu3 %v7602_v59  ;;  %v7862_v45 = vpop.f32.mrf.mxu1 }
 0x369   :  { %v7822_v9 = vpop.f32.mrf.mxu2  ;;  %v1640_v37 = vpop.f32.mrf.mxu3 }
 0x36a   :  { %v7824_v58 = vadd.f32 %v1640_v37, %v1522_v38 }
 0x36e   :  { %1944 = vmatmul.f32.gmra.mxu2 %v7642_v32  ;;  %2022 = vmatmul.f32.gmra.mxu3 %v7622_v47  ;;  %v7846_v47 = vpop.f32.mrf.mxu0 }
 0x371   :  { %v7828_v4 = vpop.f32.mrf.mxu2  ;;  %v7830_v28 = vpop.f32.mrf.mxu3 }
 0x376   :  { %1948 = vmatmul.f32.gmra.mxu2 %v7662_v44  ;;  %2026 = vmatmul.f32.gmra.mxu3 %v7642_v32  ;;  %v7860_v7 = vpop.f32.mrf.mxu0 }
 0x379   :  { %v7834_v15 = vpop.f32.mrf.mxu2  ;;  %v7836_v2 = vpop.f32.mrf.mxu3 }
 0x37e   :  { %1952 = vmatmul.f32.gmra.mxu2 %v7682_v35  ;;  %2030 = vmatmul.f32.gmra.mxu3 %v7662_v44  ;;  %v7868_v60 = vpop.f32.mrf.mxu0 }
 0x381   :  { %v7840_v38 = vpop.f32.mrf.mxu2  ;;  %v7842_v37 = vpop.f32.mrf.mxu3 }
 0x386   :  { %1956 = vmatmul.f32.gmra.mxu2 %v7702_v1  ;;  %2034 = vmatmul.f32.gmra.mxu3 %v7682_v35  ;;  %v7876_v63 = vpop.f32.mrf.mxu0 }
 0x389   :  { %v7848_v59 = vpop.f32.mrf.mxu2  ;;  %v7850_v32 = vpop.f32.mrf.mxu3 }
 0x38e   :  { %1960 = vmatmul.f32.gmra.mxu2 %v7722_v50  ;;  %2038 = vmatmul.f32.gmra.mxu3 %v7702_v1  ;;  %v7872_v1 = vpop.f32.mrf.mxu1  ;;  %v7885_v23 = vpop.f32.mrf.mxu0 }
 0x391   :  { %v7856_v44 = vpop.f32.mrf.mxu2  ;;  %v7858_v22 = vpop.f32.mrf.mxu3 }
 0x396   :  { %1964 = vmatmul.f32.gmra.mxu2 %v7742_v13  ;;  %2042 = vmatmul.f32.gmra.mxu3 %v7722_v50  ;;  %v7883_v12 = vpop.f32.mrf.mxu1  ;;  %v7897_v53 = vpop.f32.mrf.mxu0 }
 0x397   :  { %10824 = vst [vmem:[#allocation108_spill] sm:$0xff] %v7883_v12 }
 0x399   :  { %v7866_v35 = vpop.f32.mrf.mxu2  ;;  %v1664_v14 = vpop.f32.mrf.mxu3 }
 0x39a   :  { %v1665_v42 = vadd.f32 %v1664_v14, %v7856_v44  ;;  %v1649_v14 = vadd.f32 %v7836_v2, %v7828_v4  ;;  %v7959_v44 = vpop.permute.xlu0 %2174  ;;  %v7969_v4 = vpop.permute.xlu1 %2169 }
 0x39e   :  { %1968 = vmatmul.f32.gmra.mxu2 %v7762_v62  ;;  %2046 = vmatmul.f32.gmra.mxu3 %v7742_v13  ;;  %v7891_v51 = vpop.f32.mrf.mxu1  ;;  %v7905_v40 = vpop.f32.mrf.mxu0 }
 0x39f   :  { %10827 = vst [vmem:[#allocation111_spill] sm:$0xff] %v7891_v51  ;;  %v1661_v51 = vadd.f32 %v7858_v22, %v7848_v59  ;;  %v1697_v22 = vadd.f32 %v7846_v47, %v7794_v27 }
 0x3a1   :  { %v7874_v43 = vpop.f32.mrf.mxu2  ;;  %v1668_v25 = vpop.f32.mrf.mxu3 }
 0x3a2   :  { %v1669_v57 = vadd.f32 %v1668_v25, %v7866_v35 }
 0x3a6   :  { %2050 = vmatmul.f32.gmra.mxu3 %v7762_v62  ;;  %v7899_v62 = vpop.f32.mrf.mxu1  ;;  %v7913_v33 = vpop.f32.mrf.mxu0 }
 0x3a7   :  { %10830 = vst [vmem:[#allocation114_spill] sm:$0xff] %v7899_v62 }
 0x3a9   :  { %v7879_v6 = vpop.f32.mrf.mxu3  ;;  %v7881_v50 = vpop.f32.mrf.mxu2 }
 0x3aa   :  { %10823 = vst [vmem:[#allocation107_spill] sm:$0xff] %v7881_v50 }
 0x3ae   :  { %v7907_v3 = vpop.f32.mrf.mxu1  ;;  %v1736_v8 = vpop.f32.mrf.mxu0 }
 0x3af   :  { %10833 = vst [vmem:[#allocation117_spill] sm:$0xff] %v7907_v3 }
 0x3b1   :  { %v7887_v48 = vpop.f32.mrf.mxu2  ;;  %v7889_v13 = vpop.f32.mrf.mxu3 }
 0x3b2   :  { %10825 = vst [vmem:[#allocation109_spill] sm:$0xff] %v7887_v48 }
 0x3b3   :  { %10826 = vst [vmem:[#allocation110_spill] sm:$0xff] %v7889_v13 }
 0x3b6   :  { %v7919_v41 = vpop.f32.mrf.mxu1 }
 0x3b7   :  { %10838 = vst [vmem:[#allocation122_spill] sm:$0xff] %v7919_v41  ;;  %v1653_v41 = vadd.f32 %v7842_v37, %v7834_v15  ;;  %v10855_v37 = vld [vmem:[#allocation111_spill] sm:$0xff] }
 0x3b9   :  { %v7893_v54 = vpop.f32.mrf.mxu2  ;;  %v7895_v55 = vpop.f32.mrf.mxu3 }
 0x3ba   :  { %10828 = vst [vmem:[#allocation112_spill] sm:$0xff] %v7893_v54 }
 0x3bb   :  { %10829 = vst [vmem:[#allocation113_spill] sm:$0xff] %v7895_v55 }
 0x3be   :  { %v7925_v0 = vpop.f32.mrf.mxu1 }
 0x3c1   :  { %v7901_v52 = vpop.f32.mrf.mxu2  ;;  %v7903_v19 = vpop.f32.mrf.mxu3 }
 0x3c2   :  { %10831 = vst [vmem:[#allocation115_spill] sm:$0xff] %v7901_v52 }
 0x3c3   :  { %10832 = vst [vmem:[#allocation116_spill] sm:$0xff] %v7903_v19 }
 0x3c6   :  { %v7931_v13 = vpop.f32.mrf.mxu1 }
 0x3c9   :  { %v7909_v20 = vpop.f32.mrf.mxu2  ;;  %v7911_v26 = vpop.f32.mrf.mxu3 }
 0x3ca   :  { %10834 = vst [vmem:[#allocation118_spill] sm:$0xff] %v7909_v20 }
 0x3cb   :  { %10835 = vst [vmem:[#allocation119_spill] sm:$0xff] %v7911_v26  ;;  %v1741_v26 = vpop.f32.mrf.mxu0 }
 0x3cc   :  { %v1742_v47 = vadd.f32 %v1741_v26, %v1649_v14  ;;  %v1732_v26 = vadd.f32 %v7913_v33, %v7824_v58  ;;  %v10856_v14 = vld [vmem:[#allocation47_spill] sm:$0xff] }
 0x3d1   :  { %v7915_v54 = vpop.f32.mrf.mxu2  ;;  %v7917_v55 = vpop.f32.mrf.mxu3 }
 0x3d2   :  { %10836 = vst [vmem:[#allocation120_spill] sm:$0xff] %v7915_v54  ;;  %v1855_v54 = vpop.f32.mrf.mxu1 }
 0x3d3   :  { %10837 = vst [vmem:[#allocation121_spill] sm:$0xff] %v7917_v55  ;;  %v1746_v55 = vpop.f32.mrf.mxu0 }
 0x3d9   :  { %v7921_v52 = vpop.f32.mrf.mxu2  ;;  %v7923_v19 = vpop.f32.mrf.mxu3 }
 0x3da   :  { %10839 = vst [vmem:[#allocation123_spill] sm:$0xff] %v7921_v52  ;;  %v1861_v50 = vpop.f32.mrf.mxu1 }
 0x3db   :  { %10840 = vst [vmem:[#allocation124_spill] sm:$0xff] %v7923_v19  ;;  %v1751_v19 = vpop.f32.mrf.mxu0 }
 0x3e1   :  { %v7927_v21 = vpop.f32.mrf.mxu2  ;;  %v7929_v20 = vpop.f32.mrf.mxu3 }
 0x3e2   :  { %10841 = vst [vmem:[#allocation125_spill] sm:$0xff] %v7927_v21  ;;  %v1867_v39 = vpop.f32.mrf.mxu1 }
 0x3e3   :  { %10842 = vst [vmem:[#allocation126_spill] sm:$0xff] %v7929_v20  ;;  %v1756_v56 = vpop.f32.mrf.mxu0 }
 0x3e9   :  { %v7933_v36 = vpop.f32.mrf.mxu2  ;;  %v7935_v18 = vpop.f32.mrf.mxu3 }
 0x3ea   :  { %10843 = vst [vmem:[#allocation127_spill] sm:$0xff] %v7933_v36 }
 0x3eb   :  { %10844 = vst [vmem:[#allocation128_spill] sm:$0xff] %v7935_v18  ;;  %v1761_v62 = vpop.f32.mrf.mxu0  ;;  %v1873_v18 = vpop.f32.mrf.mxu1 }
 0x3ec   :  { %v1762_v36 = vadd.f32 %v1761_v62, %v1665_v42  ;;  %v1702_v42 = vadd.f32 %v7860_v7, %v7798_v30  ;;  %v1707_v62 = vadd.f32 %v7868_v60, %v7802_v11 }
 0x3ee   :  { %v1802_v60 = vadd.f32 %v7862_v45, %v1702_v42  ;;  %v7974_v30 = vadd.f32 %v7872_v1, %v1707_v62  ;;  %v1850_v45 = vadd.f32 %v7931_v13, %v1742_v47  ;;  %v10851_v13 = vld [vmem:[#allocation108_spill] sm:$0xff]  ;;  %v10859_v42 = vld [vmem:[#allocation37_spill] sm:$0xff] }
 0x3f1   :  { %v7937_v48 = vpop.f32.mrf.mxu2  ;;  %v7939_v31 = vpop.f32.mrf.mxu3 }
 0x3f2   :  { %10845 = vst [vmem:[#allocation129_spill] sm:$0xff] %v7939_v31 }
 0x3f3   :  { %v1766_v12 = vpop.f32.mrf.mxu0  ;;  %v1879_v25 = vpop.f32.mrf.mxu1 }
 0x3f4   :  { %v1767_v2 = vadd.f32 %v1766_v12, %v1669_v57 }
 0x3f6   :  { %v1880_v11 = vadd.f32 %v1879_v25, %v1767_v2  ;;  %v10861_v25 = vld [vmem:[#allocation117_spill] sm:$0xff] }
 0x3f9   :  { %v1949_v24 = vpop.f32.mrf.mxu2  ;;  %v7941_v52 = vpop.f32.mrf.mxu3 }
 0x3fa   :  { %10846 = vst [vmem:[#allocation130_spill] sm:$0xff] %v7941_v52  ;;  %v1657_v52 = vadd.f32 %v7850_v32, %v7840_v38  ;;  %v1874_v32 = vadd.f32 %v1873_v18, %v1762_v36  ;;  %v1796_v36 = vadd.f32 %v7852_v61, %v1697_v22 }
 0x3fb   :  { %v1771_v12 = vpop.f32.mrf.mxu0 }
 0x3fc   :  { %v1752_v59 = vadd.f32 %v1751_v19, %v1657_v52 }
 0x3fe   :  { %v1862_v18 = vadd.f32 %v1861_v50, %v1752_v59  ;;  %v10857_v59 = vld [vmem:[#allocation53_spill] sm:$0xff] }
 0x401   :  { %v1953_v20 = vpop.f32.mrf.mxu2  ;;  %v7943_v5 = vpop.f32.mrf.mxu3 }
 0x402   :  { %10847 = vst [vmem:[#allocation131_spill] sm:$0xff] %v7943_v5  ;;  %v1757_v5 = vadd.f32 %v1756_v56, %v1661_v51  ;;  %v1645_v56 = vadd.f32 %v7830_v28, %v7822_v9  ;;  %v1747_v51 = vadd.f32 %v1746_v55, %v1653_v41  ;;  %v1954_v57 = vadd.f32 %v1953_v20, %v1862_v18 }
 0x403   :  { %v1727_v20 = vadd.f32 %v7905_v40, %v7818_v34  ;;  %v10854_v40 = vld [vmem:[#allocation130_spill] sm:$0xff] }
 0x404   :  { %v1868_v15 = vadd.f32 %v1867_v39, %v1757_v5  ;;  %v1737_v41 = vadd.f32 %v1736_v8, %v1645_v56  ;;  %v1856_v55 = vadd.f32 %v1855_v54, %v1747_v51  ;;  %v1673_v5 = vadd.f32 %v7879_v6, %v7874_v43  ;;  %v2165_v8 = vpop.permute.xlu2 %2164  ;;  %v10860_v56 = vld [vmem:[#allocation114_spill] sm:$0xff] }
 0x405   :  { %v1712_v39 = vadd.f32 %v7876_v63, %v7806_v29  ;;  %v10852_v29 = vld [vmem:[#allocation122_spill] sm:$0xff] }
 0x406   :  { %v1950_v54 = vadd.f32 %v1949_v24, %v1856_v55  ;;  %v1844_v63 = vadd.f32 %v7925_v0, %v1737_v41  ;;  %v1772_v43 = vadd.f32 %v1771_v12, %v1673_v5  ;;  %v10850_v24 = vld [vmem:[#allocation49_spill] sm:$0xff]  ;;  %v1838_v9 = vadd.f32 %v10852_v29, %v1732_v26  ;;  %v2155_v0 = vpop.permute.xlu1 %2154  ;;  %v10865_v41 = vld [vmem:[#allocation54_spill] sm:$0xff]  ;;  %v10871_v26 = vld [vmem:[#allocation128_spill] sm:$0xff] }
 0x407   :  { %v10872_v12 = vld [vmem:[#allocation46_spill] sm:$0xff] }
 0x409   :  { %v1957_v21 = vpop.f32.mrf.mxu2  ;;  %v2035_v3 = vpop.f32.mrf.mxu3  ;;  %v10849_v58 = vld [vmem:[#allocation131_spill] sm:$0xff] }
 0x40a   :  { %v1958_v19 = vadd.f32 %v1957_v21, %v1868_v15  ;;  %v1717_v21 = vadd.f32 %v7885_v23, %v7810_v16  ;;  %v2036_v61 = vadd.f32 %v2035_v3, %v1954_v57  ;;  %v1946_v23 = vadd.f32 %v7937_v48, %v1850_v45  ;;  %v2160_v16 = vpop.permute.xlu0 %2159  ;;  %v10862_v15 = vld [vmem:[#allocation125_spill] sm:$0xff]  ;;  %v10869_v57 = vld [vmem:[#allocation107_spill] sm:$0xff] }
 0x40b   :  { %v2032_v50 = vadd.f32 %v10849_v58, %v1950_v54  ;;  %v1938_v2 = vadd.f32 %v10862_v15, %v1838_v9  ;;  %v10893_v15 = vld [vmem:[#allocation121_spill] sm:$0xff] }
 0x40c   :  { %v2028_v34 = vadd.f32 %v10854_v40, %v1946_v23  ;;  %v1820_v48 = vadd.f32 %v10855_v37, %v1717_v21  ;;  %v2065_v22 = vmul.f32 %v2036_v61, %v10856_v14  ;;  %v10873_v61 = vld [vmem:[#allocation17_spill] sm:$0xff]  ;;  %v10878_v23 = vld [vmem:[#allocation120_spill] sm:$0xff]  ;;  %v10887_v37 = vld [vmem:[#allocation34_spill] sm:$0xff] }
 0x40d   :  { %v2020_v45 = vadd.f32 %v10871_v26, %v1938_v2  ;;  %v10886_v40 = vld [vmem:[#allocation124_spill] sm:$0xff] }
 0x40e   :  { %v2063_v54 = vmul.f32 %v2028_v34, %v10872_v12  ;;  %v10894_v2 = vld [vmem:[#allocation48_spill] sm:$0xff] }
 0x40f   :  { %v2061_v14 = vmul.f32 %v2020_v45, %v10887_v37  ;;  %v10903_v45 = vld [vmem:[#allocation39_spill] sm:$0xff] }
 0x411   :  { %v1961_v49 = vpop.f32.mrf.mxu2  ;;  %v2039_v31 = vpop.f32.mrf.mxu3  ;;  %v8078_v12 = vadd.f32 %v2061_v14, %v10903_v45 }
 0x412   :  { %v1962_v38 = vadd.f32 %v1961_v49, %v1874_v32  ;;  %v2040_v49 = vadd.f32 %v2039_v31, %v1958_v19  ;;  %v1722_v31 = vadd.f32 %v7897_v53, %v7814_v10  ;;  %v1885_v53 = vpop.f32.mrf.mxu1  ;;  %v10853_v10 = vld [vmem:[#allocation127_spill] sm:$0xff]  ;;  %v10864_v19 = vld [vmem:[#allocation16_spill] sm:$0xff] }
 0x413   :  { %v1942_v28 = vadd.f32 %v10853_v10, %v1844_v63  ;;  %v1886_v18 = vadd.f32 %v1885_v53, %v1772_v43  ;;  %v10877_v63 = vld [vmem:[#allocation109_spill] sm:$0xff]  ;;  %v10879_v43 = vld [vmem:[#allocation126_spill] sm:$0xff] }
 0x414   :  { %v2066_v3 = vmul.f32 %v2040_v49, %v10850_v24  ;;  %v1826_v51 = vadd.f32 %v10860_v56, %v1722_v31  ;;  %v1910_v49 = vadd.f32 %v10869_v57, %v1796_v36  ;;  %v1914_v36 = vadd.f32 %v10877_v63, %v1802_v60  ;;  %v10884_v60 = vld [vmem:[#allocation110_spill] sm:$0xff] }
 0x415   :  { %v10885_v10 = vld [vmem:[#allocation118_spill] sm:$0xff] }
 0x416   :  { %v8010_v55 = vadd.f32 %v2066_v3, %v10865_v41  ;;  %v1992_v53 = vadd.f32 %v10884_v60, %v1910_v49  ;;  %v10901_v49 = vld [vmem:[#allocation119_spill] sm:$0xff] }
 0x418   :  { %10866 = vst [vmem:[#allocation49_spill] sm:$0xff] %v8010_v55 }
 0x419   :  { %v2043_v35 = vpop.f32.mrf.mxu3  ;;  %v1965_v52 = vpop.f32.mrf.mxu2 }
 0x41a   :  { %v2044_v7 = vadd.f32 %v2043_v35, %v1962_v38  ;;  %v1966_v1 = vadd.f32 %v1965_v52, %v1880_v11  ;;  %v1832_v35 = vadd.f32 %v10861_v25, %v1727_v20  ;;  %v10863_v38 = vld [vmem:[#allocation129_spill] sm:$0xff]  ;;  %v10867_v11 = vld [vmem:[#allocation55_spill] sm:$0xff] }
 0x41b   :  { %v2024_v47 = vadd.f32 %v10863_v38, %v1942_v28  ;;  %v1926_v28 = vadd.f32 %v10885_v10, %v1820_v48  ;;  %v10892_v25 = vld [vmem:[#allocation115_spill] sm:$0xff]  ;;  %10904 = vst [vmem:[#allocation129_spill] sm:$0xff] %v8078_v12  ;;  %v10914_v10 = vld [vmem:[#allocation45_spill] sm:$0xff] }
 0x41c   :  { %v2067_v6 = vmul.f32 %v2044_v7, %v7071_v17  ;;  %v1814_v17 = vadd.f32 %v10851_v13, %v1712_v39  ;;  %v2064_v7 = vmul.f32 %v2032_v50, %v10864_v19  ;;  %v10870_v39 = vld [vmem:[#allocation123_spill] sm:$0xff]  ;;  %v10881_v13 = vld [vmem:[#allocation42_spill] sm:$0xff] }
 0x41d   :  { %v1934_v21 = vadd.f32 %v10870_v39, %v1832_v35  ;;  %v10880_v50 = vld [vmem:[#allocation15_spill] sm:$0xff]  ;;  %v2008_v48 = vadd.f32 %v10893_v15, %v1926_v28 }
 0x41e   :  { %v8001_v32 = vadd.f32 %v2067_v6, %v10857_v59  ;;  %v2062_v24 = vmul.f32 %v2024_v47, %v10880_v50  ;;  %v8035_v29 = vadd.f32 %v2064_v7, %v10881_v13  ;;  %v10888_v59 = vld [vmem:[#allocation52_spill] sm:$0xff]  ;;  %v1922_v35 = vadd.f32 %v10892_v25, %v1814_v17  ;;  %v10895_v47 = vld [vmem:[#allocation10_spill] sm:$0xff]  ;;  %v10900_v17 = vld [vmem:[#allocation25_spill] sm:$0xff] }
 0x41f   :  { %v2016_v58 = vadd.f32 %v10879_v43, %v1934_v21  ;;  %v8073_v57 = vmul.f32 %v1992_v53, %v10900_v17  ;;  %v10902_v21 = vld [vmem:[#allocation24_spill] sm:$0xff]  ;;  %v10909_v43 = vld [vmem:[#allocation41_spill] sm:$0xff]  ;;  %v10910_v50 = vld [vmem:[#allocation11_spill] sm:$0xff] }
 0x420   :  { %10858 = vst [vmem:[#allocation131_spill] sm:$0xff] %v8001_v32  ;;  %v8024_v6 = vsub.f32 %v8001_v32, %v7959_v44  ;;  %v8039_v44 = vsub.f32 %v8010_v55, %v7969_v4  ;;  %v10891_v4 = vld [vmem:[#allocation50_spill] sm:$0xff]  ;;  %v8063_v19 = vsub.f32 %v8035_v29, %v2160_v16  ;;  %v2004_v39 = vadd.f32 %v10901_v49, %v1922_v35  ;;  %v10919_v35 = vld [vmem:[#allocation44_spill] sm:$0xff] }
 0x421   :  { %v2047_v33 = vpop.f32.mrf.mxu3  ;;  %v1969_v52 = vpop.f32.mrf.mxu2  ;;  %10882 = vst [vmem:[#allocation111_spill] sm:$0xff] %v8035_v29  ;;  %v2060_v38 = vmul.f32 %v2016_v58, %v10894_v2  ;;  %v2058_v58 = vmul.f32 %v2008_v48, %v10909_v43  ;;  %v10923_v17 = vld [vmem:[#allocation12_spill] sm:$0xff] }
 0x422   :  { %v2048_v27 = vadd.f32 %v2047_v33, %v1966_v1  ;;  %v8020_v1 = vadd.f32 %v2065_v22, %v10873_v61  ;;  %10875 = vst [vmem:[#allocation127_spill] sm:$0xff] %v8024_v6  ;;  %v1970_v31 = vadd.f32 %v1969_v52, %v1886_v18  ;;  %v1930_v33 = vadd.f32 %v10878_v23, %v1826_v51  ;;  %v2145_v22 = vpop.permute.xlu0 %2144  ;;  %v2140_v18 = vpop.permute.xlu1 %2139  ;;  %v10908_v23 = vld [vmem:[#allocation112_spill] sm:$0xff] }
 0x423   :  { %10883 = vst [vmem:[#allocation47_spill] sm:$0xff] %v8039_v44  ;;  %v2216_v51 = vmul.f32 %v8024_v6, %v8024_v6  ;;  %v8060_v52 = vadd.f32 %v2062_v24, %v10895_v47  ;;  %v8095_v24 = vadd.f32 %v2060_v38, %v10910_v50  ;;  %v2213_v60 = vmul.f32 %v8063_v19, %v8063_v19 }
 0x424   :  { %v2068_v62 = vmul.f32 %v2048_v27, %v10859_v42  ;;  %10874 = vst [vmem:[#allocation122_spill] sm:$0xff] %v8020_v1  ;;  %v2150_v27 = vpop.permute.xlu2 %2149  ;;  %v2012_v34 = vadd.f32 %v10886_v40, %v1930_v33  ;;  %v8048_v42 = vadd.f32 %v2063_v54, %v10888_v59  ;;  %v10906_v54 = vld [vmem:[#allocation132_spill] sm:$0xff]  ;;  %v1918_v33 = vadd.f32 %v10908_v23, %v7974_v30 }
 0x425   :  { %10896 = vst [vmem:[#allocation114_spill] sm:$0xff] %v8060_v52  ;;  %v10913_v30 = vld [vmem:[#allocation116_spill] sm:$0xff]  ;;  %v2057_v28 = vmul.f32 %v2004_v39, %v10914_v10  ;;  %v8128_v15 = vadd.f32 %v2058_v58, %v10919_v35  ;;  %v8131_v48 = vsub.f32 %v8095_v24, %v2140_v18  ;;  %v10922_v18 = vld [vmem:[#allocation51_spill] sm:$0xff] }
 0x426   :  { %v8013_v5 = vadd.f32 %v2068_v62, %v10867_v11  ;;  %10889 = vst [vmem:[#allocation53_spill] sm:$0xff] %v8048_v42  ;;  %v8051_v62 = vsub.f32 %v8020_v1, %v2165_v8  ;;  %v10898_v8 = vld [vmem:[#allocation32_spill] sm:$0xff]  ;;  %v2215_v11 = vmul.f32 %v8039_v44, %v8039_v44  ;;  %v2059_v26 = vmul.f32 %v2012_v34, %v10902_v21 }
 0x427   :  { %10897 = vst [vmem:[#allocation117_spill] sm:$0xff] %v8063_v19  ;;  %v8081_v16 = vsub.f32 %v8048_v42, %v2155_v0  ;;  %v8098_v0 = vsub.f32 %v8060_v52, %v2150_v27  ;;  %v2000_v53 = vadd.f32 %v10913_v30, %v1918_v33  ;;  %v10915_v40 = vld [vmem:[#allocation28_spill] sm:$0xff]  ;;  %v8115_v27 = vsub.f32 %v8078_v12, %v2145_v22  ;;  %v10926_v33 = vld [vmem:[#allocation19_spill] sm:$0xff] }
 0x428   :  { %10868 = vst [vmem:[#allocation108_spill] sm:$0xff] %v8013_v5  ;;  %v8028_v20 = vsub.f32 %v8013_v5, %v7954_v46  ;;  %v2214_v63 = vmul.f32 %v8051_v62, %v8051_v62  ;;  %v8112_v34 = vadd.f32 %v2059_v26, %v10915_v40  ;;  %v8148_v49 = vadd.f32 %v2057_v28, %v10923_v17  ;;  %v10928_v28 = vld [vmem:[#allocation29_spill] sm:$0xff] }
 0x429   :  { %v2051_v3 = vpop.f32.mrf.mxu3  ;;  %10890 = vst [vmem:[#allocation37_spill] sm:$0xff] %v8051_v62  ;;  %v2211_v22 = vmul.f32 %v8098_v0, %v8098_v0  ;;  %v2210_v21 = vmul.f32 %v8115_v27, %v8115_v27 }
 0x42a   :  { %10876 = vst [vmem:[#allocation130_spill] sm:$0xff] %v8028_v20  ;;  %v2052_v9 = vadd.f32 %v2051_v3, %v1970_v31  ;;  %v2217_v46 = vmul.f32 %v8028_v20, %v8028_v20  ;;  %v8087_v31 = vand.u32 4294901760, %v2216_v51  ;;  %v8122_v59 = vand.u32 4294901760, %v2214_v63  ;;  %v2130_v2 = vpop.permute.xlu0 %2129  ;;  %v2125_v26 = vpop.permute.xlu1 %2124 }
 0x42b   :  { %10905 = vst [vmem:[#allocation16_spill] sm:$0xff] %v8081_v16  ;;  %v8166_v58 = vsub.f32 %v8128_v15, %v2130_v2  ;;  %v8169_v50 = vand.u32 4294901760, %v2211_v22 }
 0x42c   :  { %v2069_v56 = vmul.f32 %v2052_v9, %v10891_v4  ;;  %v8068_v41 = vand.u32 4294901760, %v2217_v46  ;;  %10911 = vst [vmem:[#allocation55_spill] sm:$0xff] %v8095_v24  ;;  %v8105_v9 = vand.u32 4294901760, %v2215_v11  ;;  %v2135_v37 = vpop.permute.xlu2 %2134  ;;  %v2212_v4 = vmul.f32 %v8081_v16, %v8081_v16 }
 0x42d   :  { %10912 = vst [vmem:[#allocation107_spill] sm:$0xff] %v8098_v0  ;;  %v8151_v39 = vsub.f32 %v8112_v34, %v2135_v37  ;;  %v8159_v45 = vsub.f32 %v2214_v63, %v8122_v59  ;;  %v8189_v37 = vsub.f32 %v8148_v49, %v2125_v26 }
 0x42e   :  { %v8066_v7 = vadd.f32 %v2069_v56, %v10898_v8  ;;  %v8103_v13 = vsub.f32 %v2217_v46, %v8068_v41  ;;  %10916 = vst [vmem:[#allocation123_spill] sm:$0xff] %v8112_v34  ;;  %v8120_v46 = vsub.f32 %v2216_v51, %v8087_v31  ;;  %v10918_v56 = vld [vmem:[#allocation113_spill] sm:$0xff]  ;;  %v8141_v38 = vsub.f32 %v2215_v11, %v8105_v9 }
 0x42f   :  { %10917 = vst [vmem:[#allocation128_spill] sm:$0xff] %v8115_v27  ;;  %v1996_v25 = vadd.f32 %v10918_v56, %v1914_v36  ;;  %v8143_v36 = vand.u32 4294901760, %v2213_v60  ;;  %v2056_v8 = vmul.f32 %v2000_v53, %v10922_v18  ;;  %v8192_v56 = vand.u32 4294901760, %v2210_v21 }
 0x430   :  { %10899 = vst [vmem:[#allocation125_spill] sm:$0xff] %v8066_v7  ;;  %v8085_v61 = vsub.f32 %v8066_v7, %v10906_v54  ;;  %v10482_v47 = vand.u32 4294901760, %v8103_v13  ;;  %v8161_v54 = vand.u32 4294901760, %v2212_v4  ;;  %v10481_v23 = vand.u32 4294901760, %v8120_v46 }
 0x431   :  { %10920 = vst [vmem:[#allocation46_spill] sm:$0xff] %v8128_v15  ;;  %v2055_v43 = vmul.f32 %v1996_v25, %v10926_v33  ;;  %v8182_v53 = vsub.f32 %v2213_v60, %v8143_v36  ;;  %v10484_v10 = vand.u32 4294901760, %v8141_v38  ;;  %v8186_v40 = vadd.f32 %v2056_v8, %v10928_v28  ;;  %v6122_v8 = vld [vmem:[#allocation6 + $0x8] sm:$0xff] }
 0x432   :  { %10907 = vst [vmem:[#allocation54_spill] sm:$0xff] %v8085_v61  ;;  %v2218_v3 = vmul.f32 %v8085_v61, %v8085_v61  ;;  %v2269_v30 = vsub.f32 %v8103_v13, %v10482_v47  ;;  %v2208_v25 = vmul.f32 %v8151_v39, %v8151_v39  ;;  %v2275_v35 = vsub.f32 %v8120_v46, %v10481_v23 }
 0x433   :  { %10921 = vst [vmem:[#allocation17_spill] sm:$0xff] %v8131_v48  ;;  %v8202_v2 = vsub.f32 %v2212_v4, %v8161_v54  ;;  %v10486_v18 = vand.u32 4294901760, %v8159_v45  ;;  %v8205_v17 = vadd.f32 %v6122_v8, %v2055_v43  ;;  %v2207_v33 = vmul.f32 %v8166_v58, %v8166_v58  ;;  %v6123_v8 = vld [vmem:[#allocation6] sm:$0xff] }
 0x434   :  { %v8117_v14 = vand.u32 4294901760, %v2218_v3  ;;  %10924 = vst [vmem:[#allocation109_spill] sm:$0xff] %v8148_v49  ;;  %v2270_v28 = vand.u32 4294901760, %v2269_v30  ;;  %v2281_v4 = vsub.f32 %v8141_v38, %v10484_v10  ;;  %v8217_v23 = vsub.f32 %v2211_v22, %v8169_v50  ;;  %v2115_v22 = vpop.permute.xlu0 %2114 }
 0x435   :  { %10925 = vst [vmem:[#allocation120_spill] sm:$0xff] %v8151_v39  ;;  %v8221_v47 = vadd.f32 %v6123_v8, %v8073_v57  ;;  %v8228_v30 = vand.u32 4294901760, %v2208_v25  ;;  %v2276_v10 = vand.u32 4294901760, %v2275_v35  ;;  %v2287_v57 = vsub.f32 %v8159_v45, %v10486_v18 }
 0x436   :  { %2220 = vmatpush.msrb.mxu2 %v8117_v14  ;;  %2416 = vmatpush.msrb.mxu1 %v8117_v14  ;;  %v8138_v51 = vsub.f32 %v2218_v3, %v8117_v14  ;;  %10927 = vst [vmem:[#allocation126_spill] sm:$0xff] %v8166_v58  ;;  %v2209_v3 = vmul.f32 %v8131_v48, %v8131_v48  ;;  %v2282_v35 = vand.u32 4294901760, %v2281_v4  ;;  %v10935_v18 = vand.u32 4294901760, %v8182_v53 }
 0x437   :  { %10929 = vst [vmem:[#allocation15_spill] sm:$0xff] %v8186_v40  ;;  %v8241_v43 = vsub.f32 %v8205_v17, %v2115_v22 }
 0x438   :  { %2222 = vmatpush.msrb.mxu2 %v8068_v41  ;;  %2363 = vmatpush.msrb.mxu0 %v8138_v51  ;;  %v10483_v11 = vand.u32 4294901760, %v8138_v51  ;;  %10930 = vst [vmem:[#allocation42_spill] sm:$0xff] %v8189_v37  ;;  %v8208_v26 = vand.u32 4294901760, %v2209_v3  ;;  %v10945_v58 = vand.u32 4294901760, %v8138_v51 }
 0x439   :  { %2418 = vmatpush.msrb.mxu1 %v8068_v41  ;;  %10931 = vst [vmem:[#allocation110_spill] sm:$0xff] %v8205_v17 }
 0x43a   :  { %2224 = vmatpush.msrb.mxu2 %v8087_v31  ;;  %2366 = vmatpush.msrb.mxu0 %v8103_v13  ;;  %v2263_v63 = vsub.f32 %v8138_v51, %v10483_v11  ;;  %10932 = vst [vmem:[#allocation118_spill] sm:$0xff] %v8221_v47  ;;  %v8252_v8 = vsub.f32 %v2209_v3, %v8208_v26  ;;  %v10937_v3 = vand.u32 4294901760, %v8202_v2 }
 0x43b   :  { %2420 = vmatpush.msrb.mxu1 %v8087_v31  ;;  %10934 = vst [vmem:[#allocation34_spill] sm:$0xff] %v8241_v43 }
 0x43c   :  { %2226 = vmatpush.msrb.mxu2 %v8105_v9  ;;  %2369 = vmatpush.msrb.mxu0 %v8120_v46  ;;  %v2264_v60 = vand.u32 4294901760, %v2263_v63  ;;  %v2120_v63 = vpop.permute.xlu2 %2119  ;;  %v2299_v4 = vsub.f32 %v8202_v2, %v10937_v3  ;;  %v10957_v51 = vand.u32 4294901760, %v8252_v8 }
 0x43d   :  { %2422 = vmatpush.msrb.mxu1 %v8105_v9  ;;  %v8224_v11 = vsub.f32 %v8186_v40, %v2120_v63  ;;  %v8237_v63 = vsub.f32 %v2210_v21, %v8192_v56  ;;  %v8245_v40 = vand.u32 4294901760, %v2207_v33  ;;  %v2293_v21 = vsub.f32 %v8182_v53, %v10935_v18 }
 0x43e   :  { %2228 = vmatpush.msrb.mxu2 %v8122_v59  ;;  %2265 = vmatpush.msrb.mxu3 %v2264_v60  ;;  %v2206_v60 = vmul.f32 %v8189_v37, %v8189_v37  ;;  %v2288_v18 = vand.u32 4294901760, %v2287_v57 }
 0x43f   :  { %10933 = vst [vmem:[#allocation124_spill] sm:$0xff] %v8224_v11  ;;  %2372 = vmatpush.msrb.mxu0 %v8141_v38  ;;  %2424 = vmatpush.msrb.mxu1 %v8122_v59  ;;  %v2294_v57 = vand.u32 4294901760, %v2293_v21  ;;  %v2300_v21 = vand.u32 4294901760, %v2299_v4  ;;  %v10940_v4 = vand.u32 4294901760, %v8252_v8 }
 0x440   :  { %2230 = vmatpush.msrb.mxu2 %v8143_v36  ;;  %2271 = vmatpush.msrb.mxu3 %v2270_v28  ;;  %v2110_v28 = vpop.permute.xlu1 %2109  ;;  %v8260_v49 = vand.u32 4294901760, %v2206_v60 }
 0x441   :  { %2375 = vmatpush.msrb.mxu0 %v8159_v45  ;;  %2426 = vmatpush.msrb.mxu1 %v8143_v36  ;;  %v8256_v17 = vsub.f32 %v8221_v47, %v2110_v28  ;;  %v8269_v28 = vsub.f32 %v2208_v25, %v8228_v30  ;;  %v2204_v47 = vmul.f32 %v8241_v43, %v8241_v43 }
 0x442   :  { %2232 = vmatpush.msrb.mxu2 %v8161_v54  ;;  %2277 = vmatpush.msrb.mxu3 %v2276_v10  ;;  %v2205_v10 = vmul.f32 %v8224_v11, %v8224_v11  ;;  %v8281_v25 = vsub.f32 %v2207_v33, %v8245_v40  ;;  %v2317_v34 = vsub.f32 %v8252_v8, %v10940_v4 }
 0x443   :  { %10936 = vst [vmem:[#allocation52_spill] sm:$0xff] %v8256_v17  ;;  %2378 = vmatpush.msrb.mxu0 %v8182_v53  ;;  %2428 = vmatpush.msrb.mxu1 %v8161_v54  ;;  %v2203_v43 = vmul.f32 %v8256_v17, %v8256_v17  ;;  %v8300_v11 = vand.u32 4294901760, %v2204_v47 }
 0x444   :  { %2234 = vmatpush.msrb.mxu2 %v8169_v50  ;;  %2283 = vmatpush.msrb.mxu3 %v2282_v35  ;;  %v10938_v35 = vand.u32 4294901760, %v8217_v23  ;;  %v8286_v15 = vand.u32 4294901760, %v2205_v10 }
 0x445   :  { %2381 = vmatpush.msrb.mxu0 %v8202_v2  ;;  %2430 = vmatpush.msrb.mxu1 %v8169_v50  ;;  %v8312_v22 = vand.u32 4294901760, %v2203_v43 }
 0x446   :  { %2236 = vmatpush.msrb.mxu2 %v8192_v56  ;;  %2289 = vmatpush.msrb.mxu3 %v2288_v18  ;;  %v2305_v3 = vsub.f32 %v8217_v23, %v10938_v35  ;;  %v10939_v18 = vand.u32 4294901760, %v8237_v63  ;;  %v8295_v35 = vsub.f32 %v2206_v60, %v8260_v49  ;;  %v8310_v60 = vsub.f32 %v2205_v10, %v8286_v15 }
 0x447   :  { %2384 = vmatpush.msrb.mxu0 %v8217_v23  ;;  %2432 = vmatpush.msrb.mxu1 %v8192_v56  ;;  %v2318_v10 = vand.u32 4294901760, %v2317_v34 }
 0x448   :  { %2238 = vmatpush.msrb.mxu2 %v8208_v26  ;;  %2295 = vmatpush.msrb.mxu3 %v2294_v57  ;;  %v2311_v33 = vsub.f32 %v8237_v63, %v10939_v18  ;;  %v2306_v57 = vand.u32 4294901760, %v2305_v3  ;;  %v10941_v3 = vand.u32 4294901760, %v8269_v28  ;;  %v8322_v18 = vsub.f32 %v2204_v47, %v8300_v11 }
 0x449   :  { %2387 = vmatpush.msrb.mxu0 %v8237_v63  ;;  %2434 = vmatpush.msrb.mxu1 %v8208_v26  ;;  %v2340_v4 = vand.u32 4294901760, %v8310_v60 }
 0x44a   :  { %2240 = vmatpush.msrb.mxu2 %v8228_v30  ;;  %2301 = vmatpush.msrb.mxu3 %v2300_v21  ;;  %v2312_v21 = vand.u32 4294901760, %v2311_v33  ;;  %v2323_v37 = vsub.f32 %v8269_v28, %v10941_v3  ;;  %v8331_v3 = vsub.f32 %v2203_v43, %v8312_v22 }
 0x44b   :  { %2390 = vmatpush.msrb.mxu0 %v8252_v8  ;;  %2436 = vmatpush.msrb.mxu1 %v8228_v30 }
 0x44c   :  { %2242 = vmatpush.msrb.mxu2 %v8245_v40  ;;  %2307 = vmatpush.msrb.mxu3 %v2306_v57  ;;  %v10942_v57 = vand.u32 4294901760, %v8281_v25  ;;  %v2324_v47 = vand.u32 4294901760, %v2323_v37  ;;  %v2341_v37 = vsub.f32 %v8310_v60, %v2340_v4 }
 0x44d   :  { %2393 = vmatpush.msrb.mxu0 %v8269_v28  ;;  %2438 = vmatpush.msrb.mxu1 %v8245_v40 }
 0x44e   :  { %2244 = vmatpush.msrb.mxu2 %v8260_v49  ;;  %2313 = vmatpush.msrb.mxu3 %v2312_v21  ;;  %v2329_v33 = vsub.f32 %v8281_v25, %v10942_v57  ;;  %v10943_v21 = vand.u32 4294901760, %v8295_v35  ;;  %v2346_v57 = vand.u32 4294901760, %v8322_v18 }
 0x44f   :  { %2396 = vmatpush.msrb.mxu0 %v8281_v25  ;;  %2440 = vmatpush.msrb.mxu1 %v8260_v49 }
 0x450   :  { %2246 = vmatpush.msrb.mxu2 %v8286_v15  ;;  %2319 = vmatpush.msrb.mxu3 %v2318_v10  ;;  %v2335_v34 = vsub.f32 %v8295_v35, %v10943_v21  ;;  %v2330_v43 = vand.u32 4294901760, %v2329_v33  ;;  %v2352_v10 = vand.u32 4294901760, %v8331_v3  ;;  %v2347_v24 = vsub.f32 %v8322_v18, %v2346_v57 }
 0x451   :  { %2399 = vmatpush.msrb.mxu0 %v8295_v35  ;;  %2442 = vmatpush.msrb.mxu1 %v8286_v15  ;;  %v2342_v33 = vand.u32 4294901760, %v2341_v37  ;;  %v10948_v37 = vld [vmem:[#allocation13_spill] sm:$0xff] }
 0x452   :  { %2248 = vmatpush.msrb.mxu2 %v8300_v11  ;;  %2325 = vmatpush.msrb.mxu3 %v2324_v47  ;;  %v2336_v21 = vand.u32 4294901760, %v2335_v34  ;;  %v10944_v47 = vld [vmem:[#allocation9_spill] sm:$0xff]  ;;  %v2348_v34 = vand.u32 4294901760, %v2347_v24  ;;  %v10951_v24 = vld [vmem:[#allocation38_spill] sm:$0xff] }
 0x453   :  { %2402 = vmatpush.msrb.mxu0 %v8310_v60  ;;  %2444 = vmatpush.msrb.mxu1 %v8300_v11  ;;  %v2353_v60 = vsub.f32 %v8331_v3, %v2352_v10 }
 0x454   :  { %2250 = vmatpush.msrb.mxu2 %v8312_v22  ;;  %2331 = vmatpush.msrb.mxu3 %v2330_v43  ;;  %v10946_v43 = vld [vmem:[#allocation43_spill] sm:$0xff] }
 0x455   :  { %2405 = vmatpush.msrb.mxu0 %v8322_v18  ;;  %2446 = vmatpush.msrb.mxu1 %v8312_v22  ;;  %v10947_v18 = vand.u32 4294901760, %v8103_v13  ;;  %v10952_v13 = vand.u32 4294901760, %v8159_v45  ;;  %v10960_v45 = vand.u32 4294901760, %v8295_v35 }
 0x456   :  { %2337 = vmatpush.msrb.mxu3 %v2336_v21  ;;  %2256 = vmatmul.f32.vlgmr.msrb.gmra.mxu2 %v10944_v47 }
 0x457   :  { %2524 = vmatpush.msra.mxu1 %v8117_v14  ;;  %2408 = vmatpush.msrb.mxu0 %v8331_v3  ;;  %v2354_v14 = vand.u32 4294901760, %v2353_v60  ;;  %v10949_v3 = vand.u32 4294901760, %v8120_v46  ;;  %v10955_v46 = vand.u32 4294901760, %v8217_v23 }
 0x458   :  { %2343 = vmatpush.msrb.mxu3 %v2342_v33  ;;  %2411 = vmatmul.f32.vlgmr.msrb.gmra.mxu0 %v10946_v43 }
 0x459   :  { %2457 = vmatpush.msra.mxu0 %v10945_v58  ;;  %2526 = vmatpush.msra.mxu1 %v8068_v41  ;;  %v10950_v41 = vand.u32 4294901760, %v8141_v38  ;;  %v10958_v38 = vand.u32 4294901760, %v8269_v28 }
 0x45a   :  { %2349 = vmatpush.msrb.mxu3 %v2348_v34  ;;  %2450 = vmatmul.f32.vlgmr.msrb.gmra.mxu1 %v10948_v37 }
 0x45b   :  { %2461 = vmatpush.msra.mxu0 %v10947_v18  ;;  %2528 = vmatpush.msra.mxu1 %v8087_v31  ;;  %v10953_v31 = vand.u32 4294901760, %v8182_v53 }
 0x45c   :  { %2355 = vmatpush.msrb.mxu3 %v2354_v14 }
 0x45d   :  { %2465 = vmatpush.msra.mxu0 %v10949_v3  ;;  %2530 = vmatpush.msra.mxu1 %v8105_v9  ;;  %v10954_v9 = vand.u32 4294901760, %v8202_v2 }
 0x45e   :  { %2357 = vmatmul.f32.vlgmr.msrb.gmra.mxu3 %v10951_v24 }
 0x45f   :  { %2469 = vmatpush.msra.mxu0 %v10950_v41  ;;  %2532 = vmatpush.msra.mxu1 %v8122_v59  ;;  %v10956_v59 = vand.u32 4294901760, %v8237_v63 }
 0x461   :  { %2473 = vmatpush.msra.mxu0 %v10952_v13  ;;  %2534 = vmatpush.msra.mxu1 %v8143_v36  ;;  %v10959_v36 = vand.u32 4294901760, %v8281_v25  ;;  %v2596_v13 = vpop.permute.xlu0 %2595 }
 0x463   :  { %2477 = vmatpush.msra.mxu0 %v10953_v31  ;;  %2536 = vmatpush.msra.mxu1 %v8161_v54 }
 0x465   :  { %2481 = vmatpush.msra.mxu0 %v10954_v9  ;;  %2538 = vmatpush.msra.mxu1 %v8169_v50 }
 0x467   :  { %2485 = vmatpush.msra.mxu0 %v10955_v46  ;;  %2540 = vmatpush.msra.mxu1 %v8192_v56 }
 0x469   :  { %2489 = vmatpush.msra.mxu0 %v10956_v59  ;;  %2542 = vmatpush.msra.mxu1 %v8208_v26 }
 0x46b   :  { %2493 = vmatpush.msra.mxu0 %v10957_v51  ;;  %2544 = vmatpush.msra.mxu1 %v8228_v30 }
 0x46d   :  { %2497 = vmatpush.msra.mxu0 %v10958_v38  ;;  %2546 = vmatpush.msra.mxu1 %v8245_v40 }
 0x46f   :  { %2501 = vmatpush.msra.mxu0 %v10959_v36  ;;  %2548 = vmatpush.msra.mxu1 %v8260_v49 }
 0x471   :  { %2505 = vmatpush.msra.mxu0 %v10960_v45  ;;  %2550 = vmatpush.msra.mxu1 %v8286_v15 }
 0x473   :  { %2509 = vmatpush.msra.mxu0 %v2340_v4  ;;  %2552 = vmatpush.msra.mxu1 %v8300_v11 }
 0x475   :  { %2513 = vmatpush.msra.mxu0 %v2346_v57  ;;  %2554 = vmatpush.msra.mxu1 %v8312_v22  ;;  %v2575_v57 = vpop.permute.xlu2 %2574 }
 0x476   :  { %2556 = vmatmul.f32.vlgmr.msra.gmra.mxu1 %v10951_v24 }
 0x477   :  { %2517 = vmatpush.msra.mxu0 %v2352_v10 }
 0x478   :  { %2519 = vmatmul.f32.vlgmr.msra.gmra.mxu0 %v10951_v24 }
 0x4d5   :  { %v2412_v58 = vpop.f32.mrf.mxu0 }
 0x4d7   :  { %v2451_v49 = vpop.f32.mrf.mxu1 }
 0x4d9   :  { %v2257_v54 = vpop.f32.mrf.mxu2 }
 0x4e1   :  { %v2358_v23 = vpop.f32.mrf.mxu3 }
 0x4e2   :  { %v2359_v50 = vadd.f32 %v2358_v23, %v2257_v54 }
 0x4e4   :  { %v2413_v53 = vadd.f32 %v2412_v58, %v2359_v50  ;;  %v10962_v50 = vld [vmem:[#allocation40_spill] sm:$0xff] }
 0x4e6   :  { %v2452_v40 = vadd.f32 %v2451_v49, %v2413_v53  ;;  %v10961_v49 = vld [vmem:[#allocation31_spill] sm:$0xff] }
 0x4f3   :  { %v2557_v15 = vpop.f32.mrf.mxu1 }
 0x4f5   :  { %v2520_v56 = vpop.f32.mrf.mxu0 }
 0x4f6   :  { %v2521_v2 = vadd.f32 %v2520_v56, %v2452_v40  ;;  %v10963_v56 = vld [vmem:[#allocation35_spill] sm:$0xff] }
 0x4f8   :  { %v2558_v26 = vadd.f32 %v2557_v15, %v2521_v2 }
 0x4fa   :  { %6096 = vrsqrt.f32 %v2558_v26  ;;  %vm2567_vm8 = vcmp.eq.f32.partialorder %v2558_v26, inf  ;;  %v2570_v35 = vand.u32 2147483648, %v2558_v26  ;;  %vm2569_vm9 = vcmp.eq.f32.partialorder %v2558_v26, 0.0 }
 0x500   :  { %v6097_v11 = vpop.eup %6096 }
 0x501   :  { %v2561_v30 = vmul.f32 %v6097_v11, %v2558_v26 }
 0x503   :  { %v2562_v63 = vmul.f32 %v6097_v11, %v2561_v30  ;;  %v10964_v30 = vld [vmem:[#allocation23_spill] sm:$0xff] }
 0x505   :  { %v2563_v8 = vmul.f32 0.5, %v2562_v63  ;;  %v10965_v63 = vld [vmem:[#allocation21_spill] sm:$0xff] }
 0x507   :  { %v2564_v22 = vsub.f32 1.5, %v2563_v8 }
 0x509   :  { %v2565_v28 = vmul.f32 %v6097_v11, %v2564_v22 }
 0x50b   :  { %v2566_v25 = vmul.f32 %v2565_v28, %v2558_v26  ;;  %v10966_v28 = vld [vmem:[#allocation36_spill] sm:$0xff] }
 0x50d   :  { %v2568_v4 = vsel %vm2567_vm8, %v2558_v26, %v2566_v25  ;;  %v10967_v25 = vld [vmem:[#allocation18_spill] sm:$0xff] }
 0x50e   :  { %v2571_v10 = vsel %vm2569_vm9, %v2570_v35, %v2568_v4  ;;  %v10968_v35 = vld [vmem:[#allocation58_spill] sm:$0xff] }
 0x50f   :  { %v2577_v21 = vadd.f32 %v2575_v57, %v2571_v10  ;;  %v2605_v46 = vmul.f32 %v2596_v13, %v2571_v10 }
 0x511   :  { %6098 = vrcp.f32 %v2577_v21  ;;  %v2589_v18 = vand.u32 2147483648, %v2577_v21  ;;  %v2587_v3 = vand.u32 2147483647, %v2577_v21  ;;  %vm2583_vm11 = vweird.f32 %v2577_v21 }
 0x513   :  { %v2590_v31 = vor.u32 1.1754944e-38, %v2589_v18  ;;  %vm2588_vm13 = vcmp.eq.f32.partialorder %v2587_v3, 8.507059e+37  ;;  %v10974_v18 = vld [vmem:[#allocation60_spill] sm:$0xff] }
 0x514   :  { %v10976_v3 = vld [vmem:[#allocation56_spill] sm:$0xff] }
 0x517   :  { %v6099_v33 = vpop.eup %6098 }
 0x518   :  { %v2579_v60 = vmul.f32 %v6099_v33, %v2577_v21  ;;  %vm2584_vm10 = vweird.f32 %v6099_v33  ;;  %v10970_v21 = vld [vmem:[#allocation20_spill] sm:$0xff] }
 0x519   :  { %vm2585_vm12 = vmor %vm2583_vm11, %vm2584_vm10 }
 0x51a   :  { %v2580_v34 = vsub.f32 1.0, %v2579_v60  ;;  %v10972_v60 = vld [vmem:[#allocation30_spill] sm:$0xff] }
 0x51c   :  { %v2581_v14 = vmul.f32 %v6099_v33, %v2580_v34  ;;  %v10973_v34 = vld [vmem:[#allocation33_spill] sm:$0xff] }
 0x51e   :  { %v2582_v41 = vadd.f32 %v6099_v33, %v2581_v14  ;;  %v10975_v14 = vld [vmem:[#allocation27_spill] sm:$0xff] }
 0x520   :  { %v2586_v9 = vsel %vm2585_vm12, %v6099_v33, %v2582_v41  ;;  %v10971_v33 = vld [vmem:[#allocation14_spill] sm:$0xff] }
 0x521   :  { %v2591_v59 = vsel %vm2588_vm13, %v2590_v31, %v2586_v9  ;;  %v10977_v41 = vld [vmem:[#allocation22_spill] sm:$0xff]  ;;  %v10980_v9 = vld [vmem:[#allocation61_spill] sm:$0xff] }
 0x522   :  { %v2598_v51 = vmul.f32 %v2596_v13, %v2591_v59  ;;  %v2606_v38 = vmul.f32 %v2605_v46, %v2591_v59  ;;  %v10979_v31 = vld [vmem:[#allocation26_spill] sm:$0xff]  ;;  %v10981_v46 = vld [vmem:[#allocation59_spill] sm:$0xff] }
 0x524   :  { %v2599_v36 = vadd.f32 1.0, %v2598_v51  ;;  %v2607_v45 = vmul.f32 %v2606_v38, %v2591_v59  ;;  %v2627_v54 = vand.u32 4294901760, %v2598_v51  ;;  %v10982_v59 = vld [vmem:[#allocation68_spill] sm:$0xff]  ;;  %v10984_v38 = vld [vmem:[#allocation65_spill] sm:$0xff] }
 0x526   :  { %6100 = vlog2.f32 %v2599_v36  ;;  %v2604_v23 = vadd.f32 %v2599_v36, %v2596_v13  ;;  %2628 = vmatpush.msrb.mxu0 %v2627_v54  ;;  %2959 = vmatpush.msra.mxu3 %v2627_v54  ;;  %v2774_v58 = vsub.f32 %v2598_v51, %v2627_v54  ;;  %v10978_v13 = vld [vmem:[#allocation64_spill] sm:$0xff]  ;;  %v10983_v51 = vld [vmem:[#allocation57_spill] sm:$0xff]  ;;  %v10985_v36 = vld [vmem:[#allocation63_spill] sm:$0xff] }
 0x527   :  { %2634 = vmatmul.f32.vlgmr.msrb.gmra.mxu0 %v10961_v49  ;;  %2963 = vmatmul.f32.vlgmr.msra.gmra.mxu3 %v10962_v50 }
 0x528   :  { %2861 = vmatpush.msra.mxu2 %v2774_v58  ;;  %v2775_v53 = vand.u32 4294901760, %v2774_v58  ;;  %v2608_v40 = vsub.f32 %v2604_v23, %v2607_v45  ;;  %v10986_v45 = vld [vmem:[#allocation72_spill] sm:$0xff]  ;;  %v10988_v23 = vld [vmem:[#allocation69_spill] sm:$0xff] }
 0x529   :  { %2864 = vmatmul.f32.vlgmr.msra.gmra.mxu2 %v10963_v56 }
 0x52a   :  { %3075 = vmatpush.msra.mxu0 %v2775_v53  ;;  %v2776_v15 = vsub.f32 %v2774_v58, %v2775_v53  ;;  %6102 = vlog2.f32 %v2608_v40  ;;  %v10989_v58 = vld [vmem:[#allocation67_spill] sm:$0xff]  ;;  %v10990_v53 = vld [vmem:[#allocation76_spill] sm:$0xff]  ;;  %v10991_v40 = vld [vmem:[#allocation66_spill] sm:$0xff] }
 0x52c   :  { %v6101_v2 = vpop.eup %6100  ;;  %v2777_v26 = vand.u32 4294901760, %v2776_v15  ;;  %v10992_v15 = vld [vmem:[#allocation73_spill] sm:$0xff] }
 0x52d   :  { %v2601_v11 = vmul.f32 0.6931472, %v6101_v2  ;;  %v10993_v2 = vld [vmem:[#allocation71_spill] sm:$0xff] }
 0x52e   :  { %2778 = vmatpush.msrb.mxu1 %v2777_v26  ;;  %v10994_v26 = vld [vmem:[#allocation80_spill] sm:$0xff] }
 0x52f   :  { %2642 = vmatmul.f32.gmra.mxu0 %v10964_v30  ;;  %2780 = vmatmul.f32.vlgmr.msrb.gmra.mxu1 %v10965_v63  ;;  %v2602_v8 = vmul.f32 15.0, %v2601_v11  ;;  %v10995_v11 = vld [vmem:[#allocation70_spill] sm:$0xff] }
 0x530   :  { %v6103_v22 = vpop.eup %6102  ;;  %3157 = vmatpush.msra.mxu1 %v2627_v54  ;;  %2969 = vmatmul.f32.gmra.mxu3 %v10966_v28  ;;  %v10987_v54 = vld [vmem:[#allocation62_spill] sm:$0xff] }
 0x531   :  { %2869 = vmatmul.f32.gmra.mxu2 %v10967_v25  ;;  %v2603_v4 = vadd.f32 %v2602_v8, %v10968_v35  ;;  %v2610_v57 = vmul.f32 0.6931472, %v6103_v22  ;;  %v10996_v8 = vld [vmem:[#allocation77_spill] sm:$0xff]  ;;  %v10997_v22 = vld [vmem:[#allocation75_spill] sm:$0xff]  ;;  %v10998_v35 = vld [vmem:[#allocation84_spill] sm:$0xff] }
 0x533   :  { %v8408_v10 = vadd.f32 %v2610_v57, %v2603_v4  ;;  %v10999_v4 = vld [vmem:[#allocation74_spill] sm:$0xff]  ;;  %v11000_v57 = vld [vmem:[#allocation81_spill] sm:$0xff] }
 0x535   :  { %10969 = vst [vmem:[#allocation50_spill] sm:$0xff] %v8408_v10 }
 0x537   :  { %2650 = vmatmul.f32.gmra.mxu0 %v10970_v21  ;;  %2784 = vmatmul.f32.gmra.mxu1 %v10971_v33 }
 0x538   :  { %2975 = vmatmul.f32.gmra.mxu3 %v10972_v60 }
 0x539   :  { %2874 = vmatmul.f32.gmra.mxu2 %v10973_v34 }
 0x53f   :  { %2658 = vmatmul.f32.gmra.mxu0 %v10974_v18  ;;  %2788 = vmatmul.f32.gmra.mxu1 %v10975_v14 }
 0x540   :  { %2981 = vmatmul.f32.gmra.mxu3 %v10976_v3 }
 0x541   :  { %2879 = vmatmul.f32.gmra.mxu2 %v10977_v41 }
 0x547   :  { %2666 = vmatmul.f32.gmra.mxu0 %v10978_v13  ;;  %2792 = vmatmul.f32.gmra.mxu1 %v10979_v31 }
 0x548   :  { %2987 = vmatmul.f32.gmra.mxu3 %v10980_v9 }
 0x549   :  { %2884 = vmatmul.f32.gmra.mxu2 %v10981_v46 }
 0x54f   :  { %2674 = vmatmul.f32.gmra.mxu0 %v10982_v59  ;;  %2796 = vmatmul.f32.gmra.mxu1 %v10983_v51  ;;  %v11022_v59 = vld [vmem:[#allocation106_spill] sm:$0xff] }
 0x550   :  { %2993 = vmatmul.f32.gmra.mxu3 %v10984_v38  ;;  %v11018_v38 = vld [vmem:[#allocation104_spill] sm:$0xff] }
 0x551   :  { %2889 = vmatmul.f32.gmra.mxu2 %v10985_v36  ;;  %v11014_v36 = vld [vmem:[#allocation100_spill] sm:$0xff] }
 0x557   :  { %2682 = vmatmul.f32.gmra.mxu0 %v10986_v45  ;;  %2800 = vmatmul.f32.gmra.mxu1 %v10987_v54  ;;  %v11010_v45 = vld [vmem:[#allocation96_spill] sm:$0xff] }
 0x558   :  { %2999 = vmatmul.f32.gmra.mxu3 %v10988_v23  ;;  %v11006_v23 = vld [vmem:[#allocation92_spill] sm:$0xff] }
 0x559   :  { %2894 = vmatmul.f32.gmra.mxu2 %v10989_v58  ;;  %v11002_v58 = vld [vmem:[#allocation88_spill] sm:$0xff] }
 0x55f   :  { %2690 = vmatmul.f32.gmra.mxu0 %v10990_v53  ;;  %2804 = vmatmul.f32.gmra.mxu1 %v10991_v40  ;;  %v11001_v53 = vld [vmem:[#allocation79_spill] sm:$0xff] }
 0x560   :  { %3005 = vmatmul.f32.gmra.mxu3 %v10992_v15  ;;  %v11003_v15 = vld [vmem:[#allocation78_spill] sm:$0xff] }
 0x561   :  { %2899 = vmatmul.f32.gmra.mxu2 %v10993_v2  ;;  %v11004_v2 = vld [vmem:[#allocation85_spill] sm:$0xff] }
 0x567   :  { %2698 = vmatmul.f32.gmra.mxu0 %v10994_v26  ;;  %2808 = vmatmul.f32.gmra.mxu1 %v10995_v11  ;;  %v11005_v26 = vld [vmem:[#allocation83_spill] sm:$0xff] }
 0x568   :  { %3011 = vmatmul.f32.gmra.mxu3 %v10996_v8  ;;  %v11007_v8 = vld [vmem:[#allocation82_spill] sm:$0xff] }
 0x569   :  { %2904 = vmatmul.f32.gmra.mxu2 %v10997_v22  ;;  %v11008_v22 = vld [vmem:[#allocation89_spill] sm:$0xff] }
 0x56f   :  { %2706 = vmatmul.f32.gmra.mxu0 %v10998_v35  ;;  %2812 = vmatmul.f32.gmra.mxu1 %v10999_v4  ;;  %v11009_v35 = vld [vmem:[#allocation87_spill] sm:$0xff] }
 0x570   :  { %3017 = vmatmul.f32.gmra.mxu3 %v11000_v57  ;;  %v11011_v57 = vld [vmem:[#allocation86_spill] sm:$0xff] }
 0x571   :  { %2909 = vmatmul.f32.gmra.mxu2 %v11001_v53  ;;  %v11012_v53 = vld [vmem:[#allocation93_spill] sm:$0xff] }
 0x577   :  { %2714 = vmatmul.f32.gmra.mxu0 %v11002_v58  ;;  %2816 = vmatmul.f32.gmra.mxu1 %v11003_v15  ;;  %v11013_v58 = vld [vmem:[#allocation91_spill] sm:$0xff] }
 0x578   :  { %3023 = vmatmul.f32.gmra.mxu3 %v11004_v2  ;;  %v11015_v2 = vld [vmem:[#allocation90_spill] sm:$0xff] }
 0x579   :  { %2914 = vmatmul.f32.gmra.mxu2 %v11005_v26  ;;  %v11016_v26 = vld [vmem:[#allocation97_spill] sm:$0xff] }
 0x57f   :  { %2722 = vmatmul.f32.gmra.mxu0 %v11006_v23  ;;  %2820 = vmatmul.f32.gmra.mxu1 %v11007_v8  ;;  %v11017_v23 = vld [vmem:[#allocation95_spill] sm:$0xff] }
 0x580   :  { %3029 = vmatmul.f32.gmra.mxu3 %v11008_v22  ;;  %v11019_v22 = vld [vmem:[#allocation94_spill] sm:$0xff] }
 0x581   :  { %2919 = vmatmul.f32.gmra.mxu2 %v11009_v35  ;;  %v11020_v35 = vld [vmem:[#allocation101_spill] sm:$0xff] }
 0x587   :  { %2730 = vmatmul.f32.gmra.mxu0 %v11010_v45  ;;  %2824 = vmatmul.f32.gmra.mxu1 %v11011_v57  ;;  %v11021_v45 = vld [vmem:[#allocation99_spill] sm:$0xff] }
 0x588   :  { %3035 = vmatmul.f32.gmra.mxu3 %v11012_v53  ;;  %v11023_v53 = vld [vmem:[#allocation98_spill] sm:$0xff] }
 0x589   :  { %2924 = vmatmul.f32.gmra.mxu2 %v11013_v58  ;;  %v11024_v58 = vld [vmem:[#allocation105_spill] sm:$0xff] }
 0x58f   :  { %2738 = vmatmul.f32.gmra.mxu0 %v11014_v36  ;;  %2828 = vmatmul.f32.gmra.mxu1 %v11015_v2  ;;  %v11025_v36 = vld [vmem:[#allocation103_spill] sm:$0xff] }
 0x590   :  { %3041 = vmatmul.f32.gmra.mxu3 %v11016_v26  ;;  %v11026_v26 = vld [vmem:[#allocation102_spill] sm:$0xff] }
 0x591   :  { %2929 = vmatmul.f32.gmra.mxu2 %v11017_v23 }
 0x597   :  { %2746 = vmatmul.f32.gmra.mxu0 %v11018_v38  ;;  %2832 = vmatmul.f32.gmra.mxu1 %v11019_v22 }
 0x598   :  { %3047 = vmatmul.f32.gmra.mxu3 %v11020_v35 }
 0x599   :  { %2934 = vmatmul.f32.gmra.mxu2 %v11021_v45 }
 0x59f   :  { %2754 = vmatmul.f32.gmra.mxu0 %v11022_v59  ;;  %2836 = vmatmul.f32.gmra.mxu1 %v11023_v53 }
 0x5a0   :  { %3053 = vmatmul.f32.gmra.mxu3 %v11024_v58 }
 0x5a1   :  { %2939 = vmatmul.f32.gmra.mxu2 %v11025_v36 }
 0x5a4   :  { %v8466_v46 = vpop.f32.mrf.mxu0 }
 0x5a7   :  { %2840 = vmatmul.f32.gmra.mxu1 %v11026_v26  ;;  %3077 = vmatmul.f32.vlgmr.msra.gmra.mxu0 %v10965_v63 }
 0x5aa   :  { %v8542_v28 = vpop.f32.mrf.mxu3 }
 0x5ac   :  { %v8470_v38 = vpop.f32.mrf.mxu0  ;;  %v8472_v23 = vpop.f32.mrf.mxu1 }
 0x5af   :  { %3081 = vmatmul.f32.gmra.mxu0 %v10971_v33  ;;  %3159 = vmatmul.f32.vlgmr.msra.gmra.mxu1 %v10965_v63 }
 0x5b4   :  { %v8476_v59 = vpop.f32.mrf.mxu0  ;;  %v8478_v45 = vpop.f32.mrf.mxu1 }
 0x5b7   :  { %3085 = vmatmul.f32.gmra.mxu0 %v10975_v14  ;;  %3163 = vmatmul.f32.gmra.mxu1 %v10971_v33 }
 0x5bc   :  { %v8482_v36 = vpop.f32.mrf.mxu0  ;;  %v8484_v58 = vpop.f32.mrf.mxu1 }
 0x5bf   :  { %3089 = vmatmul.f32.gmra.mxu0 %v10979_v31  ;;  %3167 = vmatmul.f32.gmra.mxu1 %v10975_v14 }
 0x5c4   :  { %v8488_v35 = vpop.f32.mrf.mxu0  ;;  %v8490_v9 = vpop.f32.mrf.mxu1 }
 0x5c7   :  { %3093 = vmatmul.f32.gmra.mxu0 %v10983_v51  ;;  %3171 = vmatmul.f32.gmra.mxu1 %v10979_v31 }
 0x5cc   :  { %v8494_v13 = vpop.f32.mrf.mxu0  ;;  %v8496_v41 = vpop.f32.mrf.mxu1 }
 0x5cf   :  { %3097 = vmatmul.f32.gmra.mxu0 %v10987_v54  ;;  %3175 = vmatmul.f32.gmra.mxu1 %v10983_v51 }
 0x5d4   :  { %v8500_v3 = vpop.f32.mrf.mxu0  ;;  %v8502_v18 = vpop.f32.mrf.mxu1 }
 0x5d7   :  { %3101 = vmatmul.f32.gmra.mxu0 %v10991_v40  ;;  %3179 = vmatmul.f32.gmra.mxu1 %v10987_v54 }
 0x5dc   :  { %v8506_v14 = vpop.f32.mrf.mxu0  ;;  %v8508_v34 = vpop.f32.mrf.mxu1 }
 0x5df   :  { %3105 = vmatmul.f32.gmra.mxu0 %v10995_v11  ;;  %3183 = vmatmul.f32.gmra.mxu1 %v10991_v40 }
 0x5e4   :  { %v8512_v31 = vpop.f32.mrf.mxu0  ;;  %v8514_v60 = vpop.f32.mrf.mxu1 }
 0x5e7   :  { %3109 = vmatmul.f32.gmra.mxu0 %v10999_v4  ;;  %3187 = vmatmul.f32.gmra.mxu1 %v10995_v11  ;;  %v8536_v11 = vpop.f32.mrf.mxu2 }
 0x5ec   :  { %v8518_v51 = vpop.f32.mrf.mxu0  ;;  %v8520_v33 = vpop.f32.mrf.mxu1 }
 0x5ef   :  { %3113 = vmatmul.f32.gmra.mxu0 %v11003_v15  ;;  %3191 = vmatmul.f32.gmra.mxu1 %v10999_v4  ;;  %v8550_v30 = vpop.f32.mrf.mxu2 }
 0x5f4   :  { %v8524_v54 = vpop.f32.mrf.mxu0  ;;  %v8526_v21 = vpop.f32.mrf.mxu1 }
 0x5f7   :  { %3117 = vmatmul.f32.gmra.mxu0 %v11007_v8  ;;  %3195 = vmatmul.f32.gmra.mxu1 %v11003_v15  ;;  %v8558_v49 = vpop.f32.mrf.mxu2 }
 0x5fc   :  { %v8530_v40 = vpop.f32.mrf.mxu0  ;;  %v8532_v10 = vpop.f32.mrf.mxu1 }
 0x5ff   :  { %3121 = vmatmul.f32.gmra.mxu0 %v11011_v57  ;;  %3199 = vmatmul.f32.gmra.mxu1 %v11007_v8  ;;  %v8554_v8 = vpop.f32.mrf.mxu3 }
 0x604   :  { %v8538_v25 = vpop.f32.mrf.mxu0  ;;  %v8540_v4 = vpop.f32.mrf.mxu1 }
 0x607   :  { %3125 = vmatmul.f32.gmra.mxu0 %v11015_v2  ;;  %3203 = vmatmul.f32.gmra.mxu1 %v11011_v57  ;;  %v8562_v57 = vpop.f32.mrf.mxu3 }
 0x60c   :  { %v8546_v15 = vpop.f32.mrf.mxu0  ;;  %v8548_v63 = vpop.f32.mrf.mxu1 }
 0x60f   :  { %3129 = vmatmul.f32.gmra.mxu0 %v11019_v22  ;;  %3207 = vmatmul.f32.gmra.mxu1 %v11015_v2  ;;  %v8570_v2 = vpop.f32.mrf.mxu2  ;;  %v8576_v12 = vpop.f32.mrf.mxu3 }
 0x610   :  { %11028 = vst [vmem:[#allocation121_spill] sm:$0xff] %v8576_v12 }
 0x614   :  { %v8556_v56 = vpop.f32.mrf.mxu0  ;;  %v2833_v50 = vpop.f32.mrf.mxu1 }
 0x617   :  { %3133 = vmatmul.f32.gmra.mxu0 %v11023_v53  ;;  %3211 = vmatmul.f32.gmra.mxu1 %v11019_v22  ;;  %v8579_v22 = vpop.f32.mrf.mxu2  ;;  %v8585_v52 = vpop.f32.mrf.mxu3 }
 0x618   :  { %11031 = vst [vmem:[#allocation32_spill] sm:$0xff] %v8585_v52 }
 0x61c   :  { %v8564_v37 = vpop.f32.mrf.mxu0  ;;  %v8566_v43 = vpop.f32.mrf.mxu1 }
 0x61f   :  { %3137 = vmatmul.f32.gmra.mxu0 %v11026_v26  ;;  %3215 = vmatmul.f32.gmra.mxu1 %v11023_v53  ;;  %v8591_v61 = vpop.f32.mrf.mxu2  ;;  %v8593_v42 = vpop.f32.mrf.mxu3 }
 0x620   :  { %11034 = vst [vmem:[#allocation24_spill] sm:$0xff] %v8593_v42 }
 0x624   :  { %v8572_v24 = vpop.f32.mrf.mxu1  ;;  %v8574_v47 = vpop.f32.mrf.mxu0 }
 0x625   :  { %11027 = vst [vmem:[#allocation115_spill] sm:$0xff] %v8574_v47 }
 0x627   :  { %3219 = vmatmul.f32.gmra.mxu1 %v11026_v26  ;;  %v8599_v26 = vpop.f32.mrf.mxu2  ;;  %v8601_v29 = vpop.f32.mrf.mxu3 }
 0x628   :  { %11037 = vst [vmem:[#allocation112_spill] sm:$0xff] %v8599_v26 }
 0x629   :  { %11038 = vst [vmem:[#allocation41_spill] sm:$0xff] %v8601_v29 }
 0x62c   :  { %v8581_v39 = vpop.f32.mrf.mxu0  ;;  %v8583_v7 = vpop.f32.mrf.mxu1 }
 0x62d   :  { %11029 = vst [vmem:[#allocation48_spill] sm:$0xff] %v8581_v39 }
 0x62e   :  { %11030 = vst [vmem:[#allocation10_spill] sm:$0xff] %v8583_v7 }
 0x62f   :  { %v8607_v1 = vpop.f32.mrf.mxu2  ;;  %v8613_v16 = vpop.f32.mrf.mxu3 }
 0x630   :  { %11041 = vst [vmem:[#allocation45_spill] sm:$0xff] %v8607_v1  ;;  %v8661_v1 = vpop.permute.xlu0 %3343 }
 0x631   :  { %11044 = vst [vmem:[#allocation44_spill] sm:$0xff] %v8613_v16 }
 0x634   :  { %v8587_v48 = vpop.f32.mrf.mxu0  ;;  %v8589_v53 = vpop.f32.mrf.mxu1 }
 0x635   :  { %11032 = vst [vmem:[#allocation25_spill] sm:$0xff] %v8587_v48 }
 0x636   :  { %11033 = vst [vmem:[#allocation119_spill] sm:$0xff] %v8589_v53 }
 0x637   :  { %v8615_v7 = vpop.f32.mrf.mxu2  ;;  %v8621_v5 = vpop.f32.mrf.mxu3 }
 0x638   :  { %11047 = vst [vmem:[#allocation19_spill] sm:$0xff] %v8621_v5  ;;  %v8643_v5 = vpop.permute.xlu1 %3353 }
 0x639   :  { %11058 = vst [vmem:[#allocation141_spill] sm:$0xff] %v8643_v5  ;;  %v2826_v5 = vadd.f32 %v8540_v4, %v8530_v40 }
 0x63c   :  { %v8595_v27 = vpop.f32.mrf.mxu0  ;;  %v8597_v17 = vpop.f32.mrf.mxu1 }
 0x63d   :  { %11035 = vst [vmem:[#allocation39_spill] sm:$0xff] %v8595_v27 }
 0x63e   :  { %11036 = vst [vmem:[#allocation132_spill] sm:$0xff] %v8597_v17 }
 0x63f   :  { %v8627_v19 = vpop.f32.mrf.mxu3 }
 0x640   :  { %11050 = vst [vmem:[#allocation133_spill] sm:$0xff] %v8627_v19  ;;  %v2790_v19 = vadd.f32 %v8484_v58, %v8476_v59  ;;  %v2818_v59 = vadd.f32 %v8526_v21, %v8518_v51 }
 0x644   :  { %v8603_v0 = vpop.f32.mrf.mxu0  ;;  %v8605_v39 = vpop.f32.mrf.mxu1 }
 0x645   :  { %11039 = vst [vmem:[#allocation11_spill] sm:$0xff] %v8603_v0 }
 0x646   :  { %11040 = vst [vmem:[#allocation116_spill] sm:$0xff] %v8605_v39  ;;  %v2910_v39 = vpop.f32.mrf.mxu2 }
 0x647   :  { %v3024_v29 = vpop.f32.mrf.mxu3 }
 0x64c   :  { %v8609_v48 = vpop.f32.mrf.mxu0  ;;  %v8611_v53 = vpop.f32.mrf.mxu1 }
 0x64d   :  { %11042 = vst [vmem:[#allocation28_spill] sm:$0xff] %v8609_v48 }
 0x64e   :  { %11043 = vst [vmem:[#allocation113_spill] sm:$0xff] %v8611_v53  ;;  %v2915_v47 = vpop.f32.mrf.mxu2 }
 0x654   :  { %v8617_v27 = vpop.f32.mrf.mxu0  ;;  %v8619_v17 = vpop.f32.mrf.mxu1 }
 0x655   :  { %11045 = vst [vmem:[#allocation51_spill] sm:$0xff] %v8617_v27 }
 0x656   :  { %11046 = vst [vmem:[#allocation12_spill] sm:$0xff] %v8619_v17  ;;  %v2920_v17 = vpop.f32.mrf.mxu2 }
 0x65c   :  { %v8623_v55 = vpop.f32.mrf.mxu0  ;;  %v8625_v0 = vpop.f32.mrf.mxu1 }
 0x65d   :  { %11048 = vst [vmem:[#allocation29_spill] sm:$0xff] %v8623_v55  ;;  %v3030_v55 = vpop.f32.mrf.mxu3 }
 0x65e   :  { %11049 = vst [vmem:[#allocation58_spill] sm:$0xff] %v8625_v0  ;;  %v2925_v0 = vpop.f32.mrf.mxu2 }
 0x664   :  { %v8629_v48 = vpop.f32.mrf.mxu0  ;;  %v8631_v53 = vpop.f32.mrf.mxu1 }
 0x665   :  { %11051 = vst [vmem:[#allocation134_spill] sm:$0xff] %v8629_v48  ;;  %v3036_v52 = vpop.f32.mrf.mxu3 }
 0x666   :  { %11052 = vst [vmem:[#allocation135_spill] sm:$0xff] %v8631_v53  ;;  %v2930_v53 = vpop.f32.mrf.mxu2 }
 0x66c   :  { %v8633_v20 = vpop.f32.mrf.mxu0  ;;  %v8635_v27 = vpop.f32.mrf.mxu1 }
 0x66d   :  { %11053 = vst [vmem:[#allocation136_spill] sm:$0xff] %v8633_v20  ;;  %v3042_v26 = vpop.f32.mrf.mxu3  ;;  %v2834_v20 = vadd.f32 %v2833_v50, %v8546_v15 }
 0x66e   :  { %11054 = vst [vmem:[#allocation137_spill] sm:$0xff] %v8635_v27  ;;  %v2782_v27 = vadd.f32 %v8472_v23, %v8466_v46  ;;  %v2822_v46 = vadd.f32 %v8532_v10, %v8524_v54  ;;  %v2935_v23 = vpop.f32.mrf.mxu2  ;;  %v2794_v54 = vadd.f32 %v8490_v9, %v8482_v36 }
 0x66f   :  { %v2931_v50 = vadd.f32 %v2930_v53, %v2834_v20  ;;  %v2876_v20 = vadd.f32 %v8558_v49, %v2790_v19  ;;  %v2802_v19 = vadd.f32 %v8502_v18, %v8494_v13  ;;  %v2911_v49 = vadd.f32 %v2910_v39, %v2818_v59  ;;  %v11059_v53 = vld [vmem:[#allocation45_spill] sm:$0xff] }
 0x670   :  { %v2866_v15 = vadd.f32 %v8536_v11, %v2782_v27  ;;  %v2921_v27 = vadd.f32 %v2920_v17, %v2826_v5  ;;  %v2798_v5 = vadd.f32 %v8496_v41, %v8488_v35  ;;  %v2810_v17 = vadd.f32 %v8514_v60, %v8506_v14  ;;  %v11062_v35 = vld [vmem:[#allocation127_spill] sm:$0xff] }
 0x671   :  { %v3043_v58 = vadd.f32 %v3042_v26, %v2931_v50  ;;  %v2842_v39 = vadd.f32 %v8572_v24, %v8564_v37  ;;  %v11063_v37 = vld [vmem:[#allocation121_spill] sm:$0xff] }
 0x672   :  { %v2965_v10 = vadd.f32 %v8542_v28, %v2866_v15  ;;  %v2901_v40 = vadd.f32 %v11059_v53, %v2810_v17  ;;  %v11075_v17 = vld [vmem:[#allocation131_spill] sm:$0xff] }
 0x674   :  { %v8637_v32 = vpop.f32.mrf.mxu0  ;;  %v8639_v62 = vpop.f32.mrf.mxu1 }
 0x675   :  { %11055 = vst [vmem:[#allocation138_spill] sm:$0xff] %v8637_v32  ;;  %v8652_v32 = vpop.permute.xlu2 %3348 }
 0x676   :  { %11056 = vst [vmem:[#allocation139_spill] sm:$0xff] %v8639_v62  ;;  %v2786_v62 = vadd.f32 %v8478_v45, %v8470_v38  ;;  %v8668_v45 = vpop.permute.xlu1 %3338 }
 0x678   :  { %v2871_v38 = vadd.f32 %v8550_v30, %v2786_v62  ;;  %v2814_v62 = vadd.f32 %v8520_v33, %v8512_v31  ;;  %v3031_v33 = vadd.f32 %v3030_v55, %v2921_v27  ;;  %v2886_v55 = vadd.f32 %v8579_v22, %v2798_v5  ;;  %v11065_v22 = vld [vmem:[#allocation19_spill] sm:$0xff]  ;;  %v11074_v5 = vld [vmem:[#allocation37_spill] sm:$0xff] }
 0x67a   :  { %v2906_v41 = vadd.f32 %v8615_v7, %v2814_v62 }
 0x67c   :  { %v3122_v42 = vpop.f32.mrf.mxu0  ;;  %v8641_v16 = vpop.f32.mrf.mxu1 }
 0x67d   :  { %11057 = vst [vmem:[#allocation140_spill] sm:$0xff] %v8641_v16  ;;  %v2830_v16 = vadd.f32 %v8548_v63, %v8538_v25  ;;  %v2838_v25 = vadd.f32 %v8566_v43, %v8556_v56  ;;  %v8677_v56 = vadd.f32 %v8554_v8, %v2871_v38  ;;  %v8692_v18 = vpop.permute.xlu2 %3333  ;;  %v3123_v60 = vadd.f32 %v3122_v42, %v3031_v33 }
 0x67f   :  { %v2926_v63 = vadd.f32 %v2925_v0, %v2830_v16  ;;  %v2916_v16 = vadd.f32 %v2915_v47, %v2822_v46  ;;  %v3048_v0 = vpop.f32.mrf.mxu3  ;;  %v2936_v21 = vadd.f32 %v2935_v23, %v2838_v25  ;;  %v8686_v47 = vadd.f32 %v8562_v57, %v2876_v20  ;;  %v8708_v46 = vpop.permute.xlu1 %3323  ;;  %v11068_v25 = vld [vmem:[#allocation47_spill] sm:$0xff]  ;;  %v11069_v20 = vld [vmem:[#allocation32_spill] sm:$0xff] }
 0x680   :  { %v3013_v57 = vadd.f32 %v11065_v22, %v2906_v41  ;;  %v2989_v27 = vadd.f32 %v11069_v20, %v2886_v55  ;;  %v11080_v41 = vld [vmem:[#allocation29_spill] sm:$0xff] }
 0x681   :  { %v3037_v30 = vadd.f32 %v3036_v52, %v2926_v63  ;;  %v2881_v52 = vadd.f32 %v8570_v2, %v2794_v54  ;;  %v3025_v36 = vadd.f32 %v3024_v29, %v2916_v16  ;;  %v3049_v13 = vadd.f32 %v3048_v0, %v2936_v21  ;;  %v11060_v2 = vld [vmem:[#allocation133_spill] sm:$0xff]  ;;  %v11061_v29 = vld [vmem:[#allocation138_spill] sm:$0xff]  ;;  %v11073_v21 = vld [vmem:[#allocation24_spill] sm:$0xff] }
 0x682   :  { %v3019_v26 = vadd.f32 %v11060_v2, %v2911_v49  ;;  %v11071_v16 = vld [vmem:[#allocation134_spill] sm:$0xff]  ;;  %v11082_v55 = vld [vmem:[#allocation117_spill] sm:$0xff]  ;;  %v11085_v2 = vld [vmem:[#allocation108_spill] sm:$0xff] }
 0x683   :  { %v3119_v7 = vadd.f32 %v11061_v29, %v3025_v36  ;;  %v2983_v42 = vadd.f32 %v11063_v37, %v2881_v52  ;;  %v3111_v0 = vadd.f32 %v11071_v16, %v3013_v57  ;;  %v11079_v52 = vld [vmem:[#allocation115_spill] sm:$0xff] }
 0x684   :  { %v3126_v48 = vpop.f32.mrf.mxu0  ;;  %v3204_v44 = vpop.f32.mrf.mxu1  ;;  %v11067_v38 = vld [vmem:[#allocation140_spill] sm:$0xff] }
 0x685   :  { %v3127_v31 = vadd.f32 %v3126_v48, %v3037_v30  ;;  %v2891_v48 = vadd.f32 %v8591_v61, %v2802_v19  ;;  %v3205_v11 = vadd.f32 %v3204_v44, %v3123_v60  ;;  %v11066_v61 = vld [vmem:[#allocation136_spill] sm:$0xff]  ;;  %v3201_v63 = vadd.f32 %v11067_v38, %v3119_v7  ;;  %v11088_v7 = vld [vmem:[#allocation51_spill] sm:$0xff]  ;;  %v3319_v37 = vpop.permute.xlu2 %3318 }
 0x686   :  { %v3115_v50 = vadd.f32 %v11066_v61, %v3019_v26 }
 0x687   :  { %v3054_v62 = vpop.f32.mrf.mxu3  ;;  %v3234_v19 = vmul.f32 %v3205_v11, %v11074_v5  ;;  %v3233_v53 = vmul.f32 %v3201_v63, %v11082_v55  ;;  %v11096_v63 = vld [vmem:[#allocation58_spill] sm:$0xff]  ;;  %v11104_v5 = vld [vmem:[#allocation128_spill] sm:$0xff] }
 0x68c   :  { %v3130_v12 = vpop.f32.mrf.mxu0  ;;  %v3208_v6 = vpop.f32.mrf.mxu1 }
 0x68d   :  { %v3131_v51 = vadd.f32 %v3130_v12, %v3043_v58  ;;  %v2806_v12 = vadd.f32 %v8508_v34, %v8500_v3  ;;  %v3209_v14 = vadd.f32 %v3208_v6, %v3127_v31  ;;  %v2940_v34 = vpop.f32.mrf.mxu2  ;;  %v8700_v3 = vpop.permute.xlu0 %3328  ;;  %v11064_v6 = vld [vmem:[#allocation112_spill] sm:$0xff]  ;;  %v11078_v31 = vld [vmem:[#allocation41_spill] sm:$0xff] }
 0x68e   :  { %v2941_v23 = vadd.f32 %v2940_v34, %v2842_v39  ;;  %v11070_v58 = vld [vmem:[#allocation44_spill] sm:$0xff]  ;;  %v11087_v34 = vld [vmem:[#allocation10_spill] sm:$0xff] }
 0x68f   :  { %v2896_v24 = vadd.f32 %v11064_v6, %v2806_v12  ;;  %v3235_v59 = vmul.f32 %v3209_v14, %v11068_v25  ;;  %v3007_v54 = vadd.f32 %v11070_v58, %v2901_v40  ;;  %v3079_v12 = vadd.f32 %v11079_v52, %v2965_v10  ;;  %v11091_v6 = vld [vmem:[#allocation122_spill] sm:$0xff] }
 0x690   :  { %v3055_v14 = vadd.f32 %v3054_v62, %v2941_v23  ;;  %v11095_v23 = vld [vmem:[#allocation28_spill] sm:$0xff] }
 0x691   :  { %v3107_v36 = vadd.f32 %v11080_v41, %v3007_v54  ;;  %v3161_v29 = vadd.f32 %v11087_v34, %v3079_v12  ;;  %v11098_v54 = vld [vmem:[#allocation111_spill] sm:$0xff] }
 0x692   :  { %v8754_v62 = vadd.f32 %v3233_v53, %v11098_v54  ;;  %v11109_v12 = vld [vmem:[#allocation39_spill] sm:$0xff] }
 0x693   :  { %v3091_v41 = vadd.f32 %v11109_v12, %v2983_v42  ;;  %v11117_v42 = vld [vmem:[#allocation25_spill] sm:$0xff] }
 0x694   :  { %v3212_v43 = vpop.f32.mrf.mxu1  ;;  %v3134_v28 = vpop.f32.mrf.mxu0  ;;  %11099 = vst [vmem:[#allocation112_spill] sm:$0xff] %v8754_v62  ;;  %v8786_v55 = vsub.f32 %v8754_v62, %v8700_v3  ;;  %v3087_v34 = vadd.f32 %v11117_v42, %v8686_v47 }
 0x695   :  { %v3213_v9 = vadd.f32 %v3212_v43, %v3131_v51  ;;  %v3135_v8 = vadd.f32 %v3134_v28, %v3049_v13  ;;  %v11072_v43 = vld [vmem:[#allocation139_spill] sm:$0xff]  ;;  %v2995_v51 = vadd.f32 %v11073_v21, %v2891_v48  ;;  %v11077_v28 = vld [vmem:[#allocation130_spill] sm:$0xff]  ;;  %v11081_v13 = vld [vmem:[#allocation137_spill] sm:$0xff]  ;;  %v3314_v58 = vpop.permute.xlu0 %3313 }
 0x696   :  { %v3197_v30 = vadd.f32 %v11072_v43, %v3115_v50  ;;  %v3193_v39 = vadd.f32 %v11081_v13, %v3111_v0  ;;  %v11083_v48 = vld [vmem:[#allocation49_spill] sm:$0xff]  ;;  %v11094_v50 = vld [vmem:[#allocation48_spill] sm:$0xff]  ;;  %v11102_v43 = vld [vmem:[#allocation11_spill] sm:$0xff]  ;;  %11114 = vst [vmem:[#allocation32_spill] sm:$0xff] %v8786_v55 }
 0x697   :  { %v3236_v4 = vmul.f32 %v3213_v9, %v11062_v35  ;;  %v3001_v9 = vadd.f32 %v11078_v31, %v2896_v24  ;;  %v8728_v40 = vadd.f32 %v3235_v59, %v11083_v48  ;;  %v11090_v35 = vld [vmem:[#allocation16_spill] sm:$0xff]  ;;  %v8738_v24 = vadd.f32 %v3234_v19, %v11091_v6  ;;  %v11097_v59 = vld [vmem:[#allocation107_spill] sm:$0xff]  ;;  %v11108_v31 = vld [vmem:[#allocation54_spill] sm:$0xff] }
 0x698   :  { %v3099_v38 = vadd.f32 %v11095_v23, %v2995_v51  ;;  %v11103_v21 = vld [vmem:[#allocation12_spill] sm:$0xff]  ;;  %v11111_v13 = vld [vmem:[#allocation17_spill] sm:$0xff] }
 0x699   :  { %v8719_v49 = vadd.f32 %v3236_v4, %v11075_v17  ;;  %11084 = vst [vmem:[#allocation133_spill] sm:$0xff] %v8728_v40  ;;  %v3103_v11 = vadd.f32 %v11088_v7, %v3001_v9  ;;  %v3232_v4 = vmul.f32 %v3197_v30, %v11090_v35  ;;  %v3095_v30 = vadd.f32 %v11102_v43, %v2989_v27  ;;  %v3309_v17 = vpop.permute.xlu1 %3308  ;;  %v11110_v27 = vld [vmem:[#allocation113_spill] sm:$0xff]  ;;  %v11130_v43 = vld [vmem:[#allocation119_spill] sm:$0xff] }
 0x69a   :  { %11092 = vst [vmem:[#allocation127_spill] sm:$0xff] %v8738_v24  ;;  %v3181_v51 = vadd.f32 %v11103_v21, %v3099_v38  ;;  %v11126_v38 = vld [vmem:[#allocation126_spill] sm:$0xff] }
 0x69b   :  { %11076 = vst [vmem:[#allocation45_spill] sm:$0xff] %v8719_v49  ;;  %v8742_v22 = vsub.f32 %v8719_v49, %v8661_v1  ;;  %v3185_v25 = vadd.f32 %v11096_v63, %v3103_v11  ;;  %v8758_v1 = vsub.f32 %v8728_v40, %v8668_v45  ;;  %v8773_v45 = vsub.f32 %v8738_v24, %v8692_v18  ;;  %v11115_v18 = vld [vmem:[#allocation125_spill] sm:$0xff]  ;;  %v11119_v11 = vld [vmem:[#allocation120_spill] sm:$0xff]  ;;  %v11131_v21 = vld [vmem:[#allocation42_spill] sm:$0xff] }
 0x69c   :  { %v3216_v15 = vpop.f32.mrf.mxu1  ;;  %v3138_v60 = vpop.f32.mrf.mxu0 }
 0x69d   :  { %v3217_v44 = vadd.f32 %v3216_v15, %v3135_v8  ;;  %v11089_v8 = vld [vmem:[#allocation135_spill] sm:$0xff]  ;;  %v3139_v57 = vadd.f32 %v3138_v60, %v3055_v14  ;;  %v3083_v15 = vadd.f32 %v11094_v50, %v8677_v56  ;;  %11100 = vst [vmem:[#allocation19_spill] sm:$0xff] %v8758_v1  ;;  %v11101_v56 = vld [vmem:[#allocation52_spill] sm:$0xff]  ;;  %v3385_v52 = vmul.f32 %v8742_v22, %v8742_v22  ;;  %v11112_v60 = vld [vmem:[#allocation114_spill] sm:$0xff] }
 0x69e   :  { %v3189_v10 = vadd.f32 %v11089_v8, %v3107_v36  ;;  %v8763_v0 = vmul.f32 %v3161_v29, %v11101_v56  ;;  %11107 = vst [vmem:[#allocation140_spill] sm:$0xff] %v8773_v45  ;;  %v3177_v36 = vadd.f32 %v11110_v27, %v3095_v30  ;;  %v11118_v29 = vld [vmem:[#allocation116_spill] sm:$0xff]  ;;  %v3228_v8 = vmul.f32 %v3181_v51, %v11119_v11  ;;  %v11136_v27 = vld [vmem:[#allocation46_spill] sm:$0xff] }
 0x69f   :  { %v3237_v33 = vmul.f32 %v3217_v44, %v11077_v28  ;;  %v3231_v44 = vmul.f32 %v3193_v39, %v11097_v59  ;;  %v11105_v28 = vld [vmem:[#allocation53_spill] sm:$0xff]  ;;  %v3229_v39 = vmul.f32 %v3185_v25, %v11111_v13  ;;  %v3173_v7 = vadd.f32 %v11118_v29, %v3091_v41  ;;  %v11125_v50 = vld [vmem:[#allocation132_spill] sm:$0xff]  ;;  %v11127_v25 = vld [vmem:[#allocation55_spill] sm:$0xff] }
 0x6a0   :  { %v3230_v19 = vmul.f32 %v3189_v10, %v11104_v5  ;;  %v11120_v10 = vld [vmem:[#allocation129_spill] sm:$0xff]  ;;  %v3383_v47 = vmul.f32 %v8773_v45, %v8773_v45  ;;  %v3169_v23 = vadd.f32 %v11125_v50, %v3087_v34  ;;  %v3227_v63 = vmul.f32 %v3177_v36, %v11126_v38  ;;  %v11132_v5 = vld [vmem:[#allocation123_spill] sm:$0xff]  ;;  %v11139_v34 = vld [vmem:[#allocation34_spill] sm:$0xff] }
 0x6a1   :  { %v8731_v26 = vadd.f32 %v3237_v33, %v11085_v2  ;;  %v8769_v33 = vadd.f32 %v3232_v4, %v11105_v28  ;;  %v8782_v14 = vadd.f32 %v3231_v44, %v11112_v60  ;;  %v3384_v2 = vmul.f32 %v8758_v1, %v8758_v1  ;;  %v11123_v4 = vld [vmem:[#allocation141_spill] sm:$0xff]  ;;  %v3299_v28 = vpop.permute.xlu0 %3298 }
 0x6a2   :  { %v8800_v35 = vadd.f32 %v3230_v19, %v11120_v10  ;;  %v8817_v59 = vadd.f32 %v3229_v39, %v11127_v25  ;;  %v3165_v30 = vadd.f32 %v11130_v43, %v3083_v15  ;;  %v3226_v51 = vmul.f32 %v3173_v7, %v11131_v21  ;;  %v11135_v15 = vld [vmem:[#allocation124_spill] sm:$0xff]  ;;  %v3294_v39 = vpop.permute.xlu1 %3293  ;;  %v11146_v21 = vld [vmem:[#allocation110_spill] sm:$0xff] }
 0x6a3   :  { %11086 = vst [vmem:[#allocation138_spill] sm:$0xff] %v8731_v26  ;;  %v8746_v61 = vsub.f32 %v8731_v26, %v8652_v32  ;;  %v8804_v3 = vsub.f32 %v8769_v33, %v8708_v46  ;;  %v8820_v44 = vsub.f32 %v8782_v14, %v3319_v37  ;;  %v3304_v46 = vpop.permute.xlu2 %3303  ;;  %v8824_v54 = vand.u32 4294901760, %v3384_v2 }
 0x6a4   :  { %v3220_v20 = vpop.f32.mrf.mxu1  ;;  %11106 = vst [vmem:[#allocation136_spill] sm:$0xff] %v8769_v33  ;;  %v8834_v19 = vadd.f32 %v3228_v8, %v11132_v5  ;;  %v8837_v37 = vsub.f32 %v8800_v35, %v3314_v58  ;;  %v3225_v41 = vmul.f32 %v3169_v23, %v11135_v15  ;;  %v8850_v36 = vadd.f32 %v3227_v63, %v11136_v27  ;;  %v11143_v23 = vld [vmem:[#allocation15_spill] sm:$0xff] }
 0x6a5   :  { %11093 = vst [vmem:[#allocation121_spill] sm:$0xff] %v8746_v61  ;;  %v3221_v32 = vadd.f32 %v3220_v20, %v3139_v57  ;;  %v3386_v16 = vmul.f32 %v8746_v61, %v8746_v61  ;;  %v8810_v57 = vand.u32 4294901760, %v3385_v52  ;;  %v3381_v12 = vmul.f32 %v8804_v3, %v8804_v3 }
 0x6a6   :  { %11113 = vst [vmem:[#allocation47_spill] sm:$0xff] %v8782_v14  ;;  %v8853_v13 = vsub.f32 %v8817_v59, %v3309_v17  ;;  %v3380_v58 = vmul.f32 %v8820_v44, %v8820_v44  ;;  %v8865_v42 = vsub.f32 %v3384_v2, %v8824_v54  ;;  %v3224_v29 = vmul.f32 %v3165_v30, %v11139_v34  ;;  %v11140_v17 = vld [vmem:[#allocation109_spill] sm:$0xff] }
 0x6a7   :  { %v3238_v9 = vmul.f32 %v3221_v32, %v11108_v31  ;;  %v8791_v48 = vand.u32 4294901760, %v3386_v16  ;;  %11121 = vst [vmem:[#allocation134_spill] sm:$0xff] %v8800_v35  ;;  %v3382_v32 = vmul.f32 %v8786_v55, %v8786_v55  ;;  %v8869_v7 = vadd.f32 %v3226_v51, %v11140_v17 }
 0x6a8   :  { %11122 = vst [vmem:[#allocation139_spill] sm:$0xff] %v8804_v3  ;;  %v8872_v11 = vsub.f32 %v8834_v19, %v3304_v46  ;;  %v3379_v8 = vmul.f32 %v8837_v37, %v8837_v37  ;;  %v8885_v38 = vadd.f32 %v3225_v41, %v11143_v23  ;;  %v8888_v63 = vsub.f32 %v8850_v36, %v3299_v28 }
 0x6a9   :  { %v8789_v53 = vadd.f32 %v3238_v9, %v11115_v18  ;;  %11128 = vst [vmem:[#allocation37_spill] sm:$0xff] %v8817_v59  ;;  %v8829_v56 = vsub.f32 %v3386_v16, %v8791_v48  ;;  %v8841_v9 = vand.u32 4294901760, %v3383_v47  ;;  %v8846_v16 = vsub.f32 %v3385_v52, %v8810_v57 }
 0x6aa   :  { %11129 = vst [vmem:[#allocation131_spill] sm:$0xff] %v8820_v44  ;;  %v8861_v18 = vand.u32 4294901760, %v3382_v32  ;;  %v8890_v25 = vand.u32 4294901760, %v3380_v58  ;;  %v3378_v46 = vmul.f32 %v8853_v13, %v8853_v13  ;;  %v10539_v43 = vand.u32 4294901760, %v8865_v42 }
 0x6ab   :  { %11116 = vst [vmem:[#allocation44_spill] sm:$0xff] %v8789_v53  ;;  %v8808_v6 = vsub.f32 %v8789_v53, %v11123_v4  ;;  %v10535_v52 = vand.u32 4294901760, %v8829_v56  ;;  %v8878_v4 = vand.u32 4294901760, %v3381_v12  ;;  %v10536_v2 = vand.u32 4294901760, %v8846_v16  ;;  %v3289_v41 = vpop.permute.xlu2 %3288 }
 0x6ac   :  { %11133 = vst [vmem:[#allocation130_spill] sm:$0xff] %v8834_v19  ;;  %v8882_v50 = vsub.f32 %v3383_v47, %v8841_v9  ;;  %v8903_v30 = vsub.f32 %v3382_v32, %v8861_v18  ;;  %v8906_v51 = vadd.f32 %v3224_v29, %v11146_v21  ;;  %v8909_v5 = vsub.f32 %v8869_v7, %v3294_v39  ;;  %v11149_v39 = vld [vmem:[#allocation118_spill] sm:$0xff] }
 0x6ad   :  { %11124 = vst [vmem:[#allocation24_spill] sm:$0xff] %v8808_v6  ;;  %v3387_v20 = vmul.f32 %v8808_v6, %v8808_v6  ;;  %v3438_v47 = vsub.f32 %v8829_v56, %v10535_v52  ;;  %v8911_v28 = vand.u32 4294901760, %v3379_v8  ;;  %v3377_v15 = vmul.f32 %v8872_v11, %v8872_v11  ;;  %v3284_v52 = vpop.permute.xlu0 %3283 }
 0x6ae   :  { %11134 = vst [vmem:[#allocation41_spill] sm:$0xff] %v8837_v37  ;;  %v3444_v32 = vsub.f32 %v8846_v16, %v10536_v2  ;;  %v8921_v29 = vsub.f32 %v3381_v12, %v8878_v4  ;;  %v8925_v17 = vadd.f32 %v8763_v0, %v11149_v39  ;;  %v8928_v23 = vsub.f32 %v8885_v38, %v3289_v41 }
 0x6af   :  { %v8839_v31 = vand.u32 4294901760, %v3387_v20  ;;  %11137 = vst [vmem:[#allocation115_spill] sm:$0xff] %v8850_v36  ;;  %v8930_v21 = vand.u32 4294901760, %v3378_v46  ;;  %v3439_v2 = vand.u32 4294901760, %v3438_v47  ;;  %v3450_v12 = vsub.f32 %v8865_v42, %v10539_v43 }
 0x6b0   :  { %11138 = vst [vmem:[#allocation29_spill] sm:$0xff] %v8853_v13  ;;  %v8940_v39 = vsub.f32 %v3380_v58, %v8890_v25  ;;  %v8943_v41 = vsub.f32 %v8906_v51, %v3284_v52  ;;  %v3375_v34 = vmul.f32 %v8909_v5, %v8909_v5  ;;  %v3445_v47 = vand.u32 4294901760, %v3444_v32 }
 0x6b1   :  { %3389 = vmatpush.msrb.mxu2 %v8839_v31  ;;  %v8859_v60 = vsub.f32 %v3387_v20, %v8839_v31  ;;  %11141 = vst [vmem:[#allocation137_spill] sm:$0xff] %v8869_v7  ;;  %v8955_v0 = vsub.f32 %v3379_v8, %v8911_v28  ;;  %v3374_v7 = vmul.f32 %v8928_v23, %v8928_v23  ;;  %v11155_v32 = vand.u32 4294901760, %v8903_v30 }
 0x6b2   :  { %11142 = vst [vmem:[#allocation117_spill] sm:$0xff] %v8872_v11  ;;  %v8970_v8 = vsub.f32 %v3378_v46, %v8930_v21 }
 0x6b3   :  { %3391 = vmatpush.msrb.mxu2 %v8791_v48  ;;  %v10537_v10 = vand.u32 4294901760, %v8859_v60  ;;  %11144 = vst [vmem:[#allocation49_spill] sm:$0xff] %v8885_v38  ;;  %v3279_v38 = vpop.permute.xlu1 %3278  ;;  %v8984_v46 = vand.u32 4294901760, %v3374_v7 }
 0x6b4   :  { %11145 = vst [vmem:[#allocation108_spill] sm:$0xff] %v8888_v63  ;;  %v8958_v52 = vsub.f32 %v8925_v17, %v3279_v38  ;;  %v8972_v38 = vand.u32 4294901760, %v3375_v34 }
 0x6b5   :  { %3393 = vmatpush.msrb.mxu2 %v8810_v57  ;;  %v3432_v20 = vsub.f32 %v8859_v60, %v10537_v10  ;;  %11147 = vst [vmem:[#allocation10_spill] sm:$0xff] %v8906_v51  ;;  %v8945_v10 = vand.u32 4294901760, %v3377_v15 }
 0x6b6   :  { %11148 = vst [vmem:[#allocation51_spill] sm:$0xff] %v8909_v5  ;;  %v11158_v5 = vand.u32 4294901760, %v8955_v0  ;;  %v9004_v59 = vsub.f32 %v3375_v34, %v8972_v38 }
 0x6b7   :  { %3395 = vmatpush.msrb.mxu2 %v8824_v54  ;;  %v3433_v27 = vand.u32 4294901760, %v3432_v20  ;;  %11150 = vst [vmem:[#allocation135_spill] sm:$0xff] %v8925_v17  ;;  %v3376_v20 = vmul.f32 %v8888_v63, %v8888_v63  ;;  %v3373_v17 = vmul.f32 %v8943_v41, %v8943_v41  ;;  %v8982_v58 = vsub.f32 %v3377_v15, %v8945_v10 }
 0x6b8   :  { %11151 = vst [vmem:[#allocation16_spill] sm:$0xff] %v8928_v23  ;;  %v3372_v23 = vmul.f32 %v8958_v52, %v8958_v52  ;;  %v9014_v63 = vsub.f32 %v3374_v7, %v8984_v46 }
 0x6b9   :  { %3397 = vmatpush.msrb.mxu2 %v8841_v9  ;;  %3434 = vmatpush.msrb.mxu3 %v3433_v27  ;;  %11152 = vst [vmem:[#allocation122_spill] sm:$0xff] %v8943_v41  ;;  %v11153_v27 = vand.u32 4294901760, %v8882_v50  ;;  %v8960_v51 = vand.u32 4294901760, %v3376_v20  ;;  %v8996_v15 = vand.u32 4294901760, %v3373_v17 }
 0x6ba   :  { %11154 = vst [vmem:[#allocation48_spill] sm:$0xff] %v8958_v52 }
 0x6bb   :  { %3399 = vmatpush.msrb.mxu2 %v8861_v18  ;;  %3440 = vmatpush.msrb.mxu3 %v3439_v2  ;;  %v3456_v43 = vsub.f32 %v8882_v50, %v11153_v27  ;;  %v3451_v2 = vand.u32 4294901760, %v3450_v12  ;;  %v3462_v27 = vsub.f32 %v8903_v30, %v11155_v32  ;;  %v11156_v12 = vand.u32 4294901760, %v8921_v29 }
 0x6bc   :  { %v8994_v32 = vsub.f32 %v3376_v20, %v8960_v51 }
 0x6bd   :  { %3401 = vmatpush.msrb.mxu2 %v8878_v4  ;;  %3446 = vmatpush.msrb.mxu3 %v3445_v47  ;;  %v3457_v36 = vand.u32 4294901760, %v3456_v43  ;;  %v3468_v47 = vsub.f32 %v8921_v29, %v11156_v12  ;;  %v3463_v41 = vand.u32 4294901760, %v3462_v27  ;;  %v11157_v43 = vand.u32 4294901760, %v8940_v39 }
 0x6be   :  { %v10550_v12 = vand.u32 4294901760, %v8970_v8  ;;  %v10551_v27 = vand.u32 4294901760, %v8982_v58 }
 0x6bf   :  { %3403 = vmatpush.msrb.mxu2 %v8890_v25  ;;  %3452 = vmatpush.msrb.mxu3 %v3451_v2  ;;  %v3474_v2 = vsub.f32 %v8940_v39, %v11157_v43  ;;  %v3469_v19 = vand.u32 4294901760, %v3468_v47  ;;  %v9006_v43 = vand.u32 4294901760, %v3372_v23  ;;  %v10552_v47 = vand.u32 4294901760, %v8994_v32 }
 0x6c0   :  { %v3492_v34 = vsub.f32 %v8982_v58, %v10551_v27 }
 0x6c1   :  { %3405 = vmatpush.msrb.mxu2 %v8911_v28  ;;  %3458 = vmatpush.msrb.mxu3 %v3457_v36  ;;  %v3480_v36 = vsub.f32 %v8955_v0, %v11158_v5  ;;  %v3475_v20 = vand.u32 4294901760, %v3474_v2  ;;  %v9022_v2 = vsub.f32 %v3373_v17, %v8996_v15  ;;  %v3498_v7 = vsub.f32 %v8994_v32, %v10552_v47 }
 0x6c2   :  { %v3493_v27 = vand.u32 4294901760, %v3492_v34 }
 0x6c3   :  { %3407 = vmatpush.msrb.mxu2 %v8930_v21  ;;  %3464 = vmatpush.msrb.mxu3 %v3463_v41  ;;  %v3486_v41 = vsub.f32 %v8970_v8, %v10550_v12  ;;  %v3481_v5 = vand.u32 4294901760, %v3480_v36  ;;  %v9030_v36 = vsub.f32 %v3372_v23, %v9006_v43 }
 0x6c5   :  { %3409 = vmatpush.msrb.mxu2 %v8945_v10  ;;  %3470 = vmatpush.msrb.mxu3 %v3469_v19  ;;  %v10553_v19 = vand.u32 4294901760, %v9004_v59  ;;  %v3487_v12 = vand.u32 4294901760, %v3486_v41  ;;  %v3499_v41 = vand.u32 4294901760, %v3498_v7  ;;  %v3521_v23 = vand.u32 4294901760, %v9030_v36  ;;  %v11159_v7 = vld [vmem:[#allocation9_spill] sm:$0xff] }
 0x6c7   :  { %3411 = vmatpush.msrb.mxu2 %v8960_v51  ;;  %3476 = vmatpush.msrb.mxu3 %v3475_v20  ;;  %v10554_v20 = vand.u32 4294901760, %v9014_v63  ;;  %v3504_v17 = vsub.f32 %v9004_v59, %v10553_v19 }
 0x6c9   :  { %3413 = vmatpush.msrb.mxu2 %v8972_v38  ;;  %3482 = vmatpush.msrb.mxu3 %v3481_v5  ;;  %v3515_v5 = vand.u32 4294901760, %v9022_v2  ;;  %v3510_v47 = vsub.f32 %v9014_v63, %v10554_v20 }
 0x6cb   :  { %3415 = vmatpush.msrb.mxu2 %v8984_v46  ;;  %3488 = vmatpush.msrb.mxu3 %v3487_v12  ;;  %v3505_v12 = vand.u32 4294901760, %v3504_v17  ;;  %v3516_v34 = vsub.f32 %v9022_v2, %v3515_v5  ;;  %v3511_v19 = vand.u32 4294901760, %v3510_v47  ;;  %v11160_v47 = vld [vmem:[#allocation38_spill] sm:$0xff] }
 0x6cd   :  { %3417 = vmatpush.msrb.mxu2 %v8996_v15  ;;  %3494 = vmatpush.msrb.mxu3 %v3493_v27  ;;  %v3522_v27 = vsub.f32 %v9030_v36, %v3521_v23  ;;  %v3517_v20 = vand.u32 4294901760, %v3516_v34  ;;  %v11165_v34 = vand.u32 4294901760, %v8865_v42 }
 0x6cf   :  { %3419 = vmatpush.msrb.mxu2 %v9006_v43  ;;  %3500 = vmatpush.msrb.mxu3 %v3499_v41  ;;  %v3523_v17 = vand.u32 4294901760, %v3522_v27  ;;  %v11163_v41 = vand.u32 4294901760, %v8829_v56  ;;  %v11167_v27 = vld [vmem:[#allocation13_spill] sm:$0xff] }
 0x6d0   :  { %3425 = vmatmul.f32.vlgmr.msrb.gmra.mxu2 %v11159_v7 }
 0x6d1   :  { %3532 = vmatpush.msra.mxu2 %v8859_v60  ;;  %3506 = vmatpush.msrb.mxu3 %v3505_v12  ;;  %v11164_v12 = vand.u32 4294901760, %v8846_v16 }
 0x6d3   :  { %3535 = vmatpush.msra.mxu2 %v8829_v56  ;;  %3512 = vmatpush.msrb.mxu3 %v3511_v19  ;;  %v11161_v19 = vand.u32 4294901760, %v8859_v60  ;;  %v11166_v60 = vand.u32 4294901760, %v8882_v50  ;;  %v11168_v56 = vand.u32 4294901760, %v8903_v30 }
 0x6d5   :  { %3538 = vmatpush.msra.mxu2 %v8846_v16  ;;  %3518 = vmatpush.msrb.mxu3 %v3517_v20  ;;  %v11162_v20 = vld [vmem:[#allocation43_spill] sm:$0xff]  ;;  %v11169_v16 = vand.u32 4294901760, %v8921_v29 }
 0x6d7   :  { %3541 = vmatpush.msra.mxu2 %v8865_v42  ;;  %3524 = vmatpush.msrb.mxu3 %v3523_v17  ;;  %v11170_v42 = vand.u32 4294901760, %v8940_v39 }
 0x6d8   :  { %3526 = vmatmul.f32.vlgmr.msrb.gmra.mxu3 %v11160_v47 }
 0x6d9   :  { %3544 = vmatpush.msra.mxu2 %v8882_v50  ;;  %3585 = vmatpush.msra.mxu3 %v8839_v31  ;;  %v11171_v50 = vand.u32 4294901760, %v8955_v0 }
 0x6db   :  { %3547 = vmatpush.msra.mxu2 %v8903_v30  ;;  %3587 = vmatpush.msra.mxu3 %v8791_v48 }
 0x6dd   :  { %3550 = vmatpush.msra.mxu2 %v8921_v29  ;;  %3589 = vmatpush.msra.mxu3 %v8810_v57 }
 0x6df   :  { %3553 = vmatpush.msra.mxu2 %v8940_v39  ;;  %3591 = vmatpush.msra.mxu3 %v8824_v54 }
 0x6e1   :  { %3556 = vmatpush.msra.mxu2 %v8955_v0  ;;  %3593 = vmatpush.msra.mxu3 %v8841_v9 }
 0x6e3   :  { %3559 = vmatpush.msra.mxu2 %v8970_v8  ;;  %3595 = vmatpush.msra.mxu3 %v8861_v18 }
 0x6e5   :  { %3562 = vmatpush.msra.mxu2 %v8982_v58  ;;  %3597 = vmatpush.msra.mxu3 %v8878_v4 }
 0x6e7   :  { %3565 = vmatpush.msra.mxu2 %v8994_v32  ;;  %3599 = vmatpush.msra.mxu3 %v8890_v25 }
 0x6e9   :  { %3568 = vmatpush.msra.mxu2 %v9004_v59  ;;  %3601 = vmatpush.msra.mxu3 %v8911_v28 }
 0x6eb   :  { %3571 = vmatpush.msra.mxu2 %v9014_v63  ;;  %3603 = vmatpush.msra.mxu3 %v8930_v21 }
 0x6ed   :  { %3574 = vmatpush.msra.mxu2 %v9022_v2  ;;  %3605 = vmatpush.msra.mxu3 %v8945_v10  ;;  %v3744_v2 = vpop.permute.xlu2 %3743 }
 0x6ef   :  { %3577 = vmatpush.msra.mxu2 %v9030_v36  ;;  %3607 = vmatpush.msra.mxu3 %v8960_v51 }
 0x6f0   :  { %3580 = vmatmul.f32.vlgmr.msra.gmra.mxu2 %v11162_v20 }
 0x6f1   :  { %3626 = vmatpush.msrb.mxu2 %v11161_v19  ;;  %3609 = vmatpush.msra.mxu3 %v8972_v38 }
 0x6f3   :  { %3630 = vmatpush.msrb.mxu2 %v11163_v41  ;;  %3611 = vmatpush.msra.mxu3 %v8984_v46 }
 0x6f5   :  { %3634 = vmatpush.msrb.mxu2 %v11164_v12  ;;  %3613 = vmatpush.msra.mxu3 %v8996_v15 }
 0x6f7   :  { %3638 = vmatpush.msrb.mxu2 %v11165_v34  ;;  %3615 = vmatpush.msra.mxu3 %v9006_v43 }
 0x6f8   :  { %3619 = vmatmul.f32.vlgmr.msra.gmra.mxu3 %v11167_v27 }
 0x6f9   :  { %3642 = vmatpush.msrb.mxu2 %v11166_v60  ;;  %3693 = vmatpush.msrb.mxu3 %v8839_v31  ;;  %v11172_v31 = vand.u32 4294901760, %v8970_v8 }
 0x6fb   :  { %3646 = vmatpush.msrb.mxu2 %v11168_v56  ;;  %3695 = vmatpush.msrb.mxu3 %v8791_v48  ;;  %v11173_v48 = vand.u32 4294901760, %v8982_v58  ;;  %v3765_v56 = vpop.permute.xlu0 %3764 }
 0x6fd   :  { %3650 = vmatpush.msrb.mxu2 %v11169_v16  ;;  %3697 = vmatpush.msrb.mxu3 %v8810_v57  ;;  %v11174_v57 = vand.u32 4294901760, %v8994_v32 }
 0x6ff   :  { %3654 = vmatpush.msrb.mxu2 %v11170_v42  ;;  %3699 = vmatpush.msrb.mxu3 %v8824_v54  ;;  %v11175_v54 = vand.u32 4294901760, %v9004_v59 }
 0x701   :  { %3658 = vmatpush.msrb.mxu2 %v11171_v50  ;;  %3701 = vmatpush.msrb.mxu3 %v8841_v9  ;;  %v11176_v9 = vand.u32 4294901760, %v9014_v63 }
 0x703   :  { %3662 = vmatpush.msrb.mxu2 %v11172_v31  ;;  %3703 = vmatpush.msrb.mxu3 %v8861_v18 }
 0x705   :  { %3666 = vmatpush.msrb.mxu2 %v11173_v48  ;;  %3705 = vmatpush.msrb.mxu3 %v8878_v4 }
 0x707   :  { %3670 = vmatpush.msrb.mxu2 %v11174_v57  ;;  %3707 = vmatpush.msrb.mxu3 %v8890_v25 }
 0x709   :  { %3674 = vmatpush.msrb.mxu2 %v11175_v54  ;;  %3709 = vmatpush.msrb.mxu3 %v8911_v28 }
 0x70b   :  { %3678 = vmatpush.msrb.mxu2 %v11176_v9  ;;  %3711 = vmatpush.msrb.mxu3 %v8930_v21 }
 0x70d   :  { %3682 = vmatpush.msrb.mxu2 %v3515_v5  ;;  %3713 = vmatpush.msrb.mxu3 %v8945_v10 }
 0x70f   :  { %3686 = vmatpush.msrb.mxu2 %v3521_v23  ;;  %3715 = vmatpush.msrb.mxu3 %v8960_v51 }
 0x710   :  { %3688 = vmatmul.f32.vlgmr.msrb.gmra.mxu2 %v11160_v47 }
 0x711   :  { %3717 = vmatpush.msrb.mxu3 %v8972_v38 }
 0x713   :  { %3719 = vmatpush.msrb.mxu3 %v8984_v46 }
 0x715   :  { %3721 = vmatpush.msrb.mxu3 %v8996_v15 }
 0x717   :  { %3723 = vmatpush.msrb.mxu3 %v9006_v43 }
 0x718   :  { %3725 = vmatmul.f32.vlgmr.msrb.gmra.mxu3 %v11160_v47 }
 0x753   :  { %v3426_v59 = vpop.f32.mrf.mxu2 }
 0x75b   :  { %v3527_v18 = vpop.f32.mrf.mxu3 }
 0x75c   :  { %v3528_v4 = vadd.f32 %v3527_v18, %v3426_v59 }
 0x773   :  { %v3581_v10 = vpop.f32.mrf.mxu2 }
 0x774   :  { %v3582_v25 = vadd.f32 %v3581_v10, %v3528_v4  ;;  %v11177_v4 = vld [vmem:[#allocation31_spill] sm:$0xff] }
 0x77b   :  { %v3620_v63 = vpop.f32.mrf.mxu3 }
 0x77c   :  { %v3621_v51 = vadd.f32 %v3620_v63, %v3582_v25  ;;  %v11178_v63 = vld [vmem:[#allocation40_spill] sm:$0xff] }
 0x793   :  { %v3689_v30 = vpop.f32.mrf.mxu2 }
 0x794   :  { %v3690_v28 = vadd.f32 %v3689_v30, %v3621_v51  ;;  %v11179_v51 = vld [vmem:[#allocation35_spill] sm:$0xff] }
 0x79b   :  { %v3726_v29 = vpop.f32.mrf.mxu3 }
 0x79c   :  { %v3727_v21 = vadd.f32 %v3726_v29, %v3690_v28 }
 0x79e   :  { %6104 = vrsqrt.f32 %v3727_v21  ;;  %vm3736_vm14 = vcmp.eq.f32.partialorder %v3727_v21, inf  ;;  %v3739_v15 = vand.u32 2147483648, %v3727_v21  ;;  %vm3738_vm15 = vcmp.eq.f32.partialorder %v3727_v21, 0.0 }
 0x7a4   :  { %v6105_v0 = vpop.eup %6104 }
 0x7a5   :  { %v3730_v39 = vmul.f32 %v6105_v0, %v3727_v21 }
 0x7a7   :  { %v3731_v58 = vmul.f32 %v6105_v0, %v3730_v39  ;;  %v11180_v39 = vld [vmem:[#allocation23_spill] sm:$0xff] }
 0x7a9   :  { %v3732_v8 = vmul.f32 0.5, %v3731_v58  ;;  %v11181_v58 = vld [vmem:[#allocation21_spill] sm:$0xff] }
 0x7ab   :  { %v3733_v38 = vsub.f32 1.5, %v3732_v8 }
 0x7ad   :  { %v3734_v32 = vmul.f32 %v6105_v0, %v3733_v38 }
 0x7af   :  { %v3735_v46 = vmul.f32 %v3734_v32, %v3727_v21  ;;  %v11182_v32 = vld [vmem:[#allocation36_spill] sm:$0xff] }
 0x7b1   :  { %v3737_v43 = vsel %vm3736_vm14, %v3727_v21, %v3735_v46  ;;  %v11183_v46 = vld [vmem:[#allocation18_spill] sm:$0xff] }
 0x7b2   :  { %v3740_v36 = vsel %vm3738_vm15, %v3739_v15, %v3737_v43  ;;  %v11184_v15 = vld [vmem:[#allocation50_spill] sm:$0xff] }
 0x7b3   :  { %v3746_v5 = vadd.f32 %v3744_v2, %v3740_v36  ;;  %v3774_v50 = vmul.f32 %v3765_v56, %v3740_v36 }
 0x7b5   :  { %6106 = vrcp.f32 %v3746_v5  ;;  %v3758_v41 = vand.u32 2147483648, %v3746_v5  ;;  %v3756_v34 = vand.u32 2147483647, %v3746_v5  ;;  %vm3752_vm1 = vweird.f32 %v3746_v5 }
 0x7b7   :  { %v3759_v16 = vor.u32 1.1754944e-38, %v3758_v41  ;;  %vm3757_vm3 = vcmp.eq.f32.partialorder %v3756_v34, 8.507059e+37  ;;  %v11190_v41 = vld [vmem:[#allocation60_spill] sm:$0xff] }
 0x7b8   :  { %v11192_v34 = vld [vmem:[#allocation56_spill] sm:$0xff] }
 0x7bb   :  { %v6107_v23 = vpop.eup %6106 }
 0x7bc   :  { %v3748_v17 = vmul.f32 %v6107_v23, %v3746_v5  ;;  %vm3753_vm0 = vweird.f32 %v6107_v23  ;;  %v11186_v5 = vld [vmem:[#allocation20_spill] sm:$0xff] }
 0x7bd   :  { %vm3754_vm2 = vmor %vm3752_vm1, %vm3753_vm0 }
 0x7be   :  { %v3749_v19 = vsub.f32 1.0, %v3748_v17  ;;  %v11188_v17 = vld [vmem:[#allocation30_spill] sm:$0xff] }
 0x7c0   :  { %v3750_v12 = vmul.f32 %v6107_v23, %v3749_v19  ;;  %v11189_v19 = vld [vmem:[#allocation33_spill] sm:$0xff] }
 0x7c2   :  { %v3751_v60 = vadd.f32 %v6107_v23, %v3750_v12  ;;  %v11191_v12 = vld [vmem:[#allocation27_spill] sm:$0xff] }
 0x7c4   :  { %v3755_v42 = vsel %vm3754_vm2, %v6107_v23, %v3751_v60  ;;  %v11187_v23 = vld [vmem:[#allocation14_spill] sm:$0xff] }
 0x7c5   :  { %v3760_v31 = vsel %vm3757_vm3, %v3759_v16, %v3755_v42  ;;  %v11193_v60 = vld [vmem:[#allocation22_spill] sm:$0xff]  ;;  %v11196_v42 = vld [vmem:[#allocation61_spill] sm:$0xff] }
 0x7c6   :  { %v3767_v48 = vmul.f32 %v3765_v56, %v3760_v31  ;;  %v3775_v57 = vmul.f32 %v3774_v50, %v3760_v31  ;;  %v11195_v16 = vld [vmem:[#allocation26_spill] sm:$0xff]  ;;  %v11197_v50 = vld [vmem:[#allocation59_spill] sm:$0xff] }
 0x7c8   :  { %v3768_v54 = vadd.f32 1.0, %v3767_v48  ;;  %v3796_v9 = vand.u32 4294901760, %v3767_v48  ;;  %v3776_v59 = vmul.f32 %v3775_v57, %v3760_v31  ;;  %v11198_v31 = vld [vmem:[#allocation68_spill] sm:$0xff]  ;;  %v11200_v57 = vld [vmem:[#allocation65_spill] sm:$0xff] }
 0x7ca   :  { %3797 = vmatpush.msra.mxu2 %v3796_v9  ;;  %4128 = vmatpush.msrb.mxu1 %v3796_v9  ;;  %v3943_v18 = vsub.f32 %v3767_v48, %v3796_v9  ;;  %6108 = vlog2.f32 %v3768_v54  ;;  %v3773_v10 = vadd.f32 %v3768_v54, %v3765_v56  ;;  %v11194_v56 = vld [vmem:[#allocation64_spill] sm:$0xff]  ;;  %v11199_v48 = vld [vmem:[#allocation57_spill] sm:$0xff]  ;;  %v11201_v54 = vld [vmem:[#allocation63_spill] sm:$0xff] }
 0x7cb   :  { %3803 = vmatmul.f32.vlgmr.msra.gmra.mxu2 %v11177_v4  ;;  %4132 = vmatmul.f32.vlgmr.msrb.gmra.mxu1 %v11178_v63 }
 0x7cc   :  { %4030 = vmatpush.msrb.mxu0 %v3943_v18  ;;  %v3944_v25 = vand.u32 4294901760, %v3943_v18  ;;  %v3777_v30 = vsub.f32 %v3773_v10, %v3776_v59  ;;  %v11203_v59 = vld [vmem:[#allocation62_spill] sm:$0xff]  ;;  %v11205_v10 = vld [vmem:[#allocation67_spill] sm:$0xff] }
 0x7cd   :  { %4033 = vmatmul.f32.vlgmr.msrb.gmra.mxu0 %v11179_v51 }
 0x7ce   :  { %4244 = vmatpush.msrb.mxu2 %v3944_v25  ;;  %v3945_v28 = vsub.f32 %v3943_v18, %v3944_v25  ;;  %6110 = vlog2.f32 %v3777_v30  ;;  %v11204_v18 = vld [vmem:[#allocation69_spill] sm:$0xff]  ;;  %v11206_v25 = vld [vmem:[#allocation76_spill] sm:$0xff]  ;;  %v11207_v30 = vld [vmem:[#allocation66_spill] sm:$0xff] }
 0x7d0   :  { %v6109_v29 = vpop.eup %6108  ;;  %v3946_v21 = vand.u32 4294901760, %v3945_v28  ;;  %v11208_v28 = vld [vmem:[#allocation73_spill] sm:$0xff] }
 0x7d1   :  { %v3770_v0 = vmul.f32 0.6931472, %v6109_v29  ;;  %v11209_v29 = vld [vmem:[#allocation71_spill] sm:$0xff] }
 0x7d2   :  { %3947 = vmatpush.msra.mxu3 %v3946_v21  ;;  %v11210_v21 = vld [vmem:[#allocation80_spill] sm:$0xff] }
 0x7d3   :  { %3811 = vmatmul.f32.gmra.mxu2 %v11180_v39  ;;  %3949 = vmatmul.f32.vlgmr.msra.gmra.mxu3 %v11181_v58  ;;  %v3771_v8 = vmul.f32 15.0, %v3770_v0  ;;  %v11211_v0 = vld [vmem:[#allocation70_spill] sm:$0xff] }
 0x7d4   :  { %v6111_v38 = vpop.eup %6110  ;;  %4326 = vmatpush.msrb.mxu3 %v3796_v9  ;;  %4138 = vmatmul.f32.gmra.mxu1 %v11182_v32  ;;  %v11202_v9 = vld [vmem:[#allocation72_spill] sm:$0xff] }
 0x7d5   :  { %4038 = vmatmul.f32.gmra.mxu0 %v11183_v46  ;;  %v3772_v43 = vadd.f32 %v3771_v8, %v11184_v15  ;;  %v3779_v2 = vmul.f32 0.6931472, %v6111_v38  ;;  %v11212_v8 = vld [vmem:[#allocation77_spill] sm:$0xff]  ;;  %v11213_v38 = vld [vmem:[#allocation75_spill] sm:$0xff]  ;;  %v11214_v15 = vld [vmem:[#allocation84_spill] sm:$0xff] }
 0x7d7   :  { %v9143_v36 = vadd.f32 %v3779_v2, %v3772_v43  ;;  %v11215_v43 = vld [vmem:[#allocation74_spill] sm:$0xff]  ;;  %v11216_v2 = vld [vmem:[#allocation81_spill] sm:$0xff] }
 0x7d9   :  { %11185 = vst [vmem:[#allocation28_spill] sm:$0xff] %v9143_v36 }
 0x7db   :  { %3819 = vmatmul.f32.gmra.mxu2 %v11186_v5  ;;  %3953 = vmatmul.f32.gmra.mxu3 %v11187_v23 }
 0x7dc   :  { %4144 = vmatmul.f32.gmra.mxu1 %v11188_v17 }
 0x7dd   :  { %4043 = vmatmul.f32.gmra.mxu0 %v11189_v19 }
 0x7e3   :  { %3827 = vmatmul.f32.gmra.mxu2 %v11190_v41  ;;  %3957 = vmatmul.f32.gmra.mxu3 %v11191_v12 }
 0x7e4   :  { %4150 = vmatmul.f32.gmra.mxu1 %v11192_v34 }
 0x7e5   :  { %4048 = vmatmul.f32.gmra.mxu0 %v11193_v60 }
 0x7eb   :  { %3835 = vmatmul.f32.gmra.mxu2 %v11194_v56  ;;  %3961 = vmatmul.f32.gmra.mxu3 %v11195_v16 }
 0x7ec   :  { %4156 = vmatmul.f32.gmra.mxu1 %v11196_v42 }
 0x7ed   :  { %4053 = vmatmul.f32.gmra.mxu0 %v11197_v50  ;;  %v11242_v50 = vld [vmem:[#allocation102_spill] sm:$0xff] }
 0x7f3   :  { %3843 = vmatmul.f32.gmra.mxu2 %v11198_v31  ;;  %3965 = vmatmul.f32.gmra.mxu3 %v11199_v48  ;;  %v11238_v31 = vld [vmem:[#allocation106_spill] sm:$0xff] }
 0x7f4   :  { %4162 = vmatmul.f32.gmra.mxu1 %v11200_v57  ;;  %v11234_v57 = vld [vmem:[#allocation104_spill] sm:$0xff] }
 0x7f5   :  { %4058 = vmatmul.f32.gmra.mxu0 %v11201_v54  ;;  %v11230_v54 = vld [vmem:[#allocation100_spill] sm:$0xff] }
 0x7fb   :  { %3851 = vmatmul.f32.gmra.mxu2 %v11202_v9  ;;  %3969 = vmatmul.f32.gmra.mxu3 %v11203_v59  ;;  %v11226_v9 = vld [vmem:[#allocation96_spill] sm:$0xff] }
 0x7fc   :  { %4168 = vmatmul.f32.gmra.mxu1 %v11204_v18  ;;  %v11222_v18 = vld [vmem:[#allocation92_spill] sm:$0xff] }
 0x7fd   :  { %4063 = vmatmul.f32.gmra.mxu0 %v11205_v10  ;;  %v11218_v10 = vld [vmem:[#allocation88_spill] sm:$0xff] }
 0x803   :  { %3859 = vmatmul.f32.gmra.mxu2 %v11206_v25  ;;  %3973 = vmatmul.f32.gmra.mxu3 %v11207_v30  ;;  %v11217_v25 = vld [vmem:[#allocation79_spill] sm:$0xff] }
 0x804   :  { %4174 = vmatmul.f32.gmra.mxu1 %v11208_v28  ;;  %v11219_v28 = vld [vmem:[#allocation78_spill] sm:$0xff] }
 0x805   :  { %4068 = vmatmul.f32.gmra.mxu0 %v11209_v29  ;;  %v11220_v29 = vld [vmem:[#allocation85_spill] sm:$0xff] }
 0x80b   :  { %3867 = vmatmul.f32.gmra.mxu2 %v11210_v21  ;;  %3977 = vmatmul.f32.gmra.mxu3 %v11211_v0  ;;  %v11221_v21 = vld [vmem:[#allocation83_spill] sm:$0xff] }
 0x80c   :  { %4180 = vmatmul.f32.gmra.mxu1 %v11212_v8  ;;  %v11223_v8 = vld [vmem:[#allocation82_spill] sm:$0xff] }
 0x80d   :  { %4073 = vmatmul.f32.gmra.mxu0 %v11213_v38  ;;  %v11224_v38 = vld [vmem:[#allocation89_spill] sm:$0xff] }
 0x813   :  { %3875 = vmatmul.f32.gmra.mxu2 %v11214_v15  ;;  %3981 = vmatmul.f32.gmra.mxu3 %v11215_v43  ;;  %v11225_v15 = vld [vmem:[#allocation87_spill] sm:$0xff] }
 0x814   :  { %4186 = vmatmul.f32.gmra.mxu1 %v11216_v2  ;;  %v11227_v2 = vld [vmem:[#allocation86_spill] sm:$0xff] }
 0x815   :  { %4078 = vmatmul.f32.gmra.mxu0 %v11217_v25  ;;  %v11228_v25 = vld [vmem:[#allocation93_spill] sm:$0xff] }
 0x81b   :  { %3883 = vmatmul.f32.gmra.mxu2 %v11218_v10  ;;  %3985 = vmatmul.f32.gmra.mxu3 %v11219_v28  ;;  %v11229_v10 = vld [vmem:[#allocation91_spill] sm:$0xff] }
 0x81c   :  { %4192 = vmatmul.f32.gmra.mxu1 %v11220_v29  ;;  %v11231_v29 = vld [vmem:[#allocation90_spill] sm:$0xff] }
 0x81d   :  { %4083 = vmatmul.f32.gmra.mxu0 %v11221_v21  ;;  %v11232_v21 = vld [vmem:[#allocation97_spill] sm:$0xff] }
 0x823   :  { %3891 = vmatmul.f32.gmra.mxu2 %v11222_v18  ;;  %3989 = vmatmul.f32.gmra.mxu3 %v11223_v8  ;;  %v11233_v18 = vld [vmem:[#allocation95_spill] sm:$0xff] }
 0x824   :  { %4198 = vmatmul.f32.gmra.mxu1 %v11224_v38  ;;  %v11235_v38 = vld [vmem:[#allocation94_spill] sm:$0xff] }
 0x825   :  { %4088 = vmatmul.f32.gmra.mxu0 %v11225_v15  ;;  %v11236_v15 = vld [vmem:[#allocation101_spill] sm:$0xff] }
 0x82b   :  { %3899 = vmatmul.f32.gmra.mxu2 %v11226_v9  ;;  %3993 = vmatmul.f32.gmra.mxu3 %v11227_v2  ;;  %v11237_v9 = vld [vmem:[#allocation99_spill] sm:$0xff] }
 0x82c   :  { %4204 = vmatmul.f32.gmra.mxu1 %v11228_v25  ;;  %v11239_v25 = vld [vmem:[#allocation98_spill] sm:$0xff] }
 0x82d   :  { %4093 = vmatmul.f32.gmra.mxu0 %v11229_v10  ;;  %v11240_v10 = vld [vmem:[#allocation105_spill] sm:$0xff] }
 0x833   :  { %3907 = vmatmul.f32.gmra.mxu2 %v11230_v54  ;;  %3997 = vmatmul.f32.gmra.mxu3 %v11231_v29  ;;  %v11241_v54 = vld [vmem:[#allocation103_spill] sm:$0xff] }
 0x834   :  { %4210 = vmatmul.f32.gmra.mxu1 %v11232_v21 }
 0x835   :  { %4098 = vmatmul.f32.gmra.mxu0 %v11233_v18 }
 0x83b   :  { %3915 = vmatmul.f32.gmra.mxu2 %v11234_v57  ;;  %4001 = vmatmul.f32.gmra.mxu3 %v11235_v38 }
 0x83c   :  { %4216 = vmatmul.f32.gmra.mxu1 %v11236_v15 }
 0x83d   :  { %4103 = vmatmul.f32.gmra.mxu0 %v11237_v9 }
 0x843   :  { %3923 = vmatmul.f32.gmra.mxu2 %v11238_v31  ;;  %4005 = vmatmul.f32.gmra.mxu3 %v11239_v25 }
 0x844   :  { %4222 = vmatmul.f32.gmra.mxu1 %v11240_v10 }
 0x845   :  { %4108 = vmatmul.f32.gmra.mxu0 %v11241_v54 }
 0x84b   :  { %4009 = vmatmul.f32.gmra.mxu3 %v11242_v50  ;;  %4246 = vmatmul.f32.vlgmr.msrb.gmra.mxu2 %v11181_v58 }
 0x84e   :  { %v3804_v18 = vpop.f32.mrf.mxu2 }
 0x853   :  { %4250 = vmatmul.f32.gmra.mxu2 %v11187_v23  ;;  %4328 = vmatmul.f32.vlgmr.msrb.gmra.mxu3 %v11181_v58 }
 0x856   :  { %v3812_v15 = vpop.f32.mrf.mxu2  ;;  %v3950_v57 = vpop.f32.mrf.mxu3 }
 0x857   :  { %v9205_v9 = vadd.f32 %v3950_v57, %v3804_v18 }
 0x85b   :  { %4254 = vmatmul.f32.gmra.mxu2 %v11191_v12  ;;  %4332 = vmatmul.f32.gmra.mxu3 %v11187_v23 }
 0x85e   :  { %v3820_v10 = vpop.f32.mrf.mxu2  ;;  %v3954_v31 = vpop.f32.mrf.mxu3 }
 0x85f   :  { %v9209_v54 = vadd.f32 %v3954_v31, %v3812_v15 }
 0x863   :  { %4258 = vmatmul.f32.gmra.mxu2 %v11195_v16  ;;  %4336 = vmatmul.f32.gmra.mxu3 %v11191_v12 }
 0x866   :  { %v3828_v21 = vpop.f32.mrf.mxu2  ;;  %v3958_v42 = vpop.f32.mrf.mxu3 }
 0x867   :  { %v9213_v56 = vadd.f32 %v3958_v42, %v3820_v10 }
 0x86b   :  { %4262 = vmatmul.f32.gmra.mxu2 %v11199_v48  ;;  %4340 = vmatmul.f32.gmra.mxu3 %v11195_v16 }
 0x86e   :  { %v3836_v57 = vpop.f32.mrf.mxu2  ;;  %v3962_v18 = vpop.f32.mrf.mxu3 }
 0x86f   :  { %v9217_v60 = vadd.f32 %v3962_v18, %v3828_v21 }
 0x873   :  { %4266 = vmatmul.f32.gmra.mxu2 %v11203_v59  ;;  %4344 = vmatmul.f32.gmra.mxu3 %v11199_v48 }
 0x876   :  { %v3844_v31 = vpop.f32.mrf.mxu2  ;;  %v3966_v15 = vpop.f32.mrf.mxu3 }
 0x877   :  { %v9221_v34 = vadd.f32 %v3966_v15, %v3836_v57 }
 0x87b   :  { %4270 = vmatmul.f32.gmra.mxu2 %v11207_v30  ;;  %4348 = vmatmul.f32.gmra.mxu3 %v11203_v59 }
 0x87e   :  { %v3852_v42 = vpop.f32.mrf.mxu2  ;;  %v3970_v10 = vpop.f32.mrf.mxu3 }
 0x87f   :  { %v9225_v12 = vadd.f32 %v3970_v10, %v3844_v31 }
 0x883   :  { %4274 = vmatmul.f32.gmra.mxu2 %v11211_v0  ;;  %4352 = vmatmul.f32.gmra.mxu3 %v11207_v30  ;;  %v9263_v30 = vpop.f32.mrf.mxu1 }
 0x886   :  { %v3860_v21 = vpop.f32.mrf.mxu2  ;;  %v3974_v18 = vpop.f32.mrf.mxu3 }
 0x887   :  { %v9229_v16 = vadd.f32 %v3974_v18, %v3852_v42 }
 0x88b   :  { %4278 = vmatmul.f32.gmra.mxu2 %v11215_v43  ;;  %4356 = vmatmul.f32.gmra.mxu3 %v11211_v0  ;;  %v9273_v19 = vpop.f32.mrf.mxu1 }
 0x88e   :  { %v9233_v57 = vpop.f32.mrf.mxu2  ;;  %v3978_v15 = vpop.f32.mrf.mxu3 }
 0x88f   :  { %v9235_v59 = vadd.f32 %v3978_v15, %v3860_v21 }
 0x893   :  { %4282 = vmatmul.f32.gmra.mxu2 %v11219_v28  ;;  %4360 = vmatmul.f32.gmra.mxu3 %v11215_v43  ;;  %v9257_v43 = vpop.f32.mrf.mxu0 }
 0x896   :  { %v9239_v31 = vpop.f32.mrf.mxu2  ;;  %v9241_v10 = vpop.f32.mrf.mxu3 }
 0x89b   :  { %4286 = vmatmul.f32.gmra.mxu2 %v11223_v8  ;;  %4364 = vmatmul.f32.gmra.mxu3 %v11219_v28  ;;  %v9271_v41 = vpop.f32.mrf.mxu0 }
 0x89e   :  { %v9245_v42 = vpop.f32.mrf.mxu2  ;;  %v9247_v18 = vpop.f32.mrf.mxu3 }
 0x8a3   :  { %4290 = vmatmul.f32.gmra.mxu2 %v11227_v2  ;;  %4368 = vmatmul.f32.gmra.mxu3 %v11223_v8  ;;  %v9279_v23 = vpop.f32.mrf.mxu0 }
 0x8a6   :  { %v9251_v21 = vpop.f32.mrf.mxu2  ;;  %v9253_v15 = vpop.f32.mrf.mxu3 }
 0x8a7   :  { %v3991_v1 = vadd.f32 %v9253_v15, %v9245_v42  ;;  %v4045_v42 = vadd.f32 %v9279_v23, %v9213_v56 }
 0x8ab   :  { %4294 = vmatmul.f32.gmra.mxu2 %v11231_v29  ;;  %4372 = vmatmul.f32.gmra.mxu3 %v11227_v2  ;;  %v9287_v46 = vpop.f32.mrf.mxu0 }
 0x8ae   :  { %v9259_v0 = vpop.f32.mrf.mxu2  ;;  %v9261_v28 = vpop.f32.mrf.mxu3 }
 0x8b3   :  { %4298 = vmatmul.f32.gmra.mxu2 %v11235_v38  ;;  %4376 = vmatmul.f32.gmra.mxu3 %v11231_v29  ;;  %v9283_v29 = vpop.f32.mrf.mxu1  ;;  %v9296_v39 = vpop.f32.mrf.mxu0 }
 0x8b6   :  { %v9267_v8 = vpop.f32.mrf.mxu2  ;;  %v9269_v48 = vpop.f32.mrf.mxu3 }
 0x8bb   :  { %4302 = vmatmul.f32.gmra.mxu2 %v11239_v25  ;;  %4380 = vmatmul.f32.gmra.mxu3 %v11235_v38  ;;  %v9294_v58 = vpop.f32.mrf.mxu1  ;;  %v9308_v20 = vpop.f32.mrf.mxu0 }
 0x8be   :  { %v9277_v2 = vpop.f32.mrf.mxu2  ;;  %v4002_v17 = vpop.f32.mrf.mxu3 }
 0x8bf   :  { %v4003_v45 = vadd.f32 %v4002_v17, %v9267_v8  ;;  %v4035_v8 = vadd.f32 %v9257_v43, %v9205_v9 }
 0x8c3   :  { %4306 = vmatmul.f32.gmra.mxu2 %v11242_v50  ;;  %4384 = vmatmul.f32.gmra.mxu3 %v11239_v25  ;;  %v9302_v63 = vpop.f32.mrf.mxu1  ;;  %v9316_v35 = vpop.f32.mrf.mxu0 }
 0x8c4   :  { %11246 = vst [vmem:[#allocation52_spill] sm:$0xff] %v9302_v63 }
 0x8c6   :  { %v9285_v5 = vpop.f32.mrf.mxu2  ;;  %v4006_v36 = vpop.f32.mrf.mxu3 }
 0x8c7   :  { %v4007_v17 = vadd.f32 %v4006_v36, %v9277_v2 }
 0x8cb   :  { %4388 = vmatmul.f32.gmra.mxu3 %v11242_v50  ;;  %v9310_v50 = vpop.f32.mrf.mxu1  ;;  %v9324_v13 = vpop.f32.mrf.mxu0 }
 0x8cc   :  { %11249 = vst [vmem:[#allocation128_spill] sm:$0xff] %v9310_v50 }
 0x8ce   :  { %v9290_v32 = vpop.f32.mrf.mxu3  ;;  %v9292_v38 = vpop.f32.mrf.mxu2 }
 0x8cf   :  { %11243 = vst [vmem:[#allocation58_spill] sm:$0xff] %v9292_v38 }
 0x8d3   :  { %v9318_v11 = vpop.f32.mrf.mxu1  ;;  %v4074_v33 = vpop.f32.mrf.mxu0 }
 0x8d4   :  { %11252 = vst [vmem:[#allocation39_spill] sm:$0xff] %v9318_v11 }
 0x8d6   :  { %v9298_v51 = vpop.f32.mrf.mxu2  ;;  %v9300_v25 = vpop.f32.mrf.mxu3 }
 0x8d7   :  { %11244 = vst [vmem:[#allocation107_spill] sm:$0xff] %v9298_v51 }
 0x8d8   :  { %11245 = vst [vmem:[#allocation111_spill] sm:$0xff] %v9300_v25 }
 0x8db   :  { %v9330_v6 = vpop.f32.mrf.mxu1 }
 0x8dc   :  { %11257 = vst [vmem:[#allocation25_spill] sm:$0xff] %v9330_v6  ;;  %v3995_v6 = vadd.f32 %v9261_v28, %v9251_v21 }
 0x8de   :  { %v9304_v4 = vpop.f32.mrf.mxu2  ;;  %v9306_v27 = vpop.f32.mrf.mxu3 }
 0x8df   :  { %11247 = vst [vmem:[#allocation11_spill] sm:$0xff] %v9304_v4 }
 0x8e0   :  { %11248 = vst [vmem:[#allocation12_spill] sm:$0xff] %v9306_v27 }
 0x8e3   :  { %v9336_v37 = vpop.f32.mrf.mxu1 }
 0x8e6   :  { %v9312_v47 = vpop.f32.mrf.mxu2  ;;  %v9314_v7 = vpop.f32.mrf.mxu3 }
 0x8e7   :  { %11250 = vst [vmem:[#allocation53_spill] sm:$0xff] %v9312_v47 }
 0x8e8   :  { %11251 = vst [vmem:[#allocation54_spill] sm:$0xff] %v9314_v7 }
 0x8eb   :  { %v9342_v62 = vpop.f32.mrf.mxu1 }
 0x8ee   :  { %v9320_v53 = vpop.f32.mrf.mxu2  ;;  %v9322_v14 = vpop.f32.mrf.mxu3 }
 0x8ef   :  { %11253 = vst [vmem:[#allocation113_spill] sm:$0xff] %v9320_v53 }
 0x8f0   :  { %11254 = vst [vmem:[#allocation17_spill] sm:$0xff] %v9322_v14  ;;  %v4079_v14 = vpop.f32.mrf.mxu0 }
 0x8f3   :  { %v4193_v51 = vpop.f32.mrf.mxu1 }
 0x8f6   :  { %v9326_v4 = vpop.f32.mrf.mxu2  ;;  %v9328_v27 = vpop.f32.mrf.mxu3 }
 0x8f7   :  { %11255 = vst [vmem:[#allocation114_spill] sm:$0xff] %v9326_v4 }
 0x8f8   :  { %11256 = vst [vmem:[#allocation125_spill] sm:$0xff] %v9328_v27  ;;  %v4084_v27 = vpop.f32.mrf.mxu0 }
 0x8fb   :  { %v4199_v26 = vpop.f32.mrf.mxu1 }
 0x8fe   :  { %v9332_v47 = vpop.f32.mrf.mxu2  ;;  %v9334_v7 = vpop.f32.mrf.mxu3 }
 0x8ff   :  { %11258 = vst [vmem:[#allocation116_spill] sm:$0xff] %v9332_v47 }
 0x900   :  { %11259 = vst [vmem:[#allocation120_spill] sm:$0xff] %v9334_v7  ;;  %v4089_v7 = vpop.f32.mrf.mxu0 }
 0x906   :  { %v9338_v52 = vpop.f32.mrf.mxu2  ;;  %v9340_v53 = vpop.f32.mrf.mxu3 }
 0x907   :  { %11260 = vst [vmem:[#allocation129_spill] sm:$0xff] %v9338_v52  ;;  %v4205_v52 = vpop.f32.mrf.mxu1 }
 0x908   :  { %11261 = vst [vmem:[#allocation141_spill] sm:$0xff] %v9340_v53  ;;  %v4094_v40 = vpop.f32.mrf.mxu0 }
 0x90e   :  { %v9344_v44 = vpop.f32.mrf.mxu2  ;;  %v9346_v4 = vpop.f32.mrf.mxu3 }
 0x90f   :  { %11262 = vst [vmem:[#allocation132_spill] sm:$0xff] %v9344_v44  ;;  %v4211_v49 = vpop.f32.mrf.mxu1  ;;  %v3999_v44 = vadd.f32 %v9269_v48, %v9259_v0  ;;  %v3987_v48 = vadd.f32 %v9247_v18, %v9239_v31  ;;  %v4134_v31 = vadd.f32 %v9263_v30, %v4035_v8  ;;  %v11276_v8 = vld [vmem:[#allocation128_spill] sm:$0xff] }
 0x910   :  { %11263 = vst [vmem:[#allocation126_spill] sm:$0xff] %v9346_v4  ;;  %v4099_v61 = vpop.f32.mrf.mxu0  ;;  %v9356_v4 = vpop.permute.xlu1 %4522 }
 0x911   :  { %11268 = vst [vmem:[#allocation124_spill] sm:$0xff] %v9356_v4  ;;  %v4100_v63 = vadd.f32 %v4099_v61, %v4003_v45  ;;  %v4095_v4 = vadd.f32 %v4094_v40, %v3999_v44  ;;  %v4040_v61 = vadd.f32 %v9271_v41, %v9209_v54  ;;  %v4090_v45 = vadd.f32 %v4089_v7, %v3995_v6 }
 0x912   :  { %v3983_v40 = vadd.f32 %v9241_v10, %v9233_v57  ;;  %v4085_v44 = vadd.f32 %v4084_v27, %v3991_v1  ;;  %v4080_v18 = vadd.f32 %v4079_v14, %v3987_v48  ;;  %v4050_v1 = vadd.f32 %v9287_v46, %v9217_v60  ;;  %v11273_v57 = vld [vmem:[#allocation25_spill] sm:$0xff] }
 0x913   :  { %v4212_v28 = vadd.f32 %v4211_v49, %v4100_v63  ;;  %v4206_v9 = vadd.f32 %v4205_v52, %v4095_v4  ;;  %v4140_v41 = vadd.f32 %v9273_v19, %v4040_v61  ;;  %v4200_v6 = vadd.f32 %v4199_v26, %v4090_v45  ;;  %v11277_v61 = vld [vmem:[#allocation140_spill] sm:$0xff] }
 0x914   :  { %v9385_v63 = vadd.f32 %v9283_v29, %v4045_v42  ;;  %v4075_v27 = vadd.f32 %v4074_v33, %v3983_v40  ;;  %v4194_v23 = vadd.f32 %v4193_v51, %v4085_v44  ;;  %v4011_v14 = vadd.f32 %v9290_v32, %v9285_v5  ;;  %v11279_v40 = vld [vmem:[#allocation121_spill] sm:$0xff] }
 0x915   :  { %v4055_v26 = vadd.f32 %v9296_v39, %v9221_v34  ;;  %v4060_v19 = vadd.f32 %v9308_v20, %v9225_v12  ;;  %v4188_v33 = vadd.f32 %v9342_v62, %v4080_v18  ;;  %v4065_v39 = vadd.f32 %v9316_v35, %v9229_v16 }
 0x916   :  { %v9348_v24 = vpop.f32.mrf.mxu2  ;;  %v9350_v3 = vpop.f32.mrf.mxu3  ;;  %v4182_v20 = vadd.f32 %v9336_v37, %v4075_v27 }
 0x917   :  { %11264 = vst [vmem:[#allocation55_spill] sm:$0xff] %v9348_v24  ;;  %v9367_v24 = vpop.permute.xlu0 %4512  ;;  %v4217_v36 = vpop.f32.mrf.mxu1  ;;  %v4164_v48 = vadd.f32 %v11276_v8, %v4060_v19  ;;  %v11288_v19 = vld [vmem:[#allocation116_spill] sm:$0xff] }
 0x918   :  { %11265 = vst [vmem:[#allocation119_spill] sm:$0xff] %v9350_v3  ;;  %v9374_v0 = vpop.permute.xlu1 %4507  ;;  %v11299_v8 = vld [vmem:[#allocation120_spill] sm:$0xff] }
 0x91e   :  { %v4287_v47 = vpop.f32.mrf.mxu2  ;;  %v9352_v25 = vpop.f32.mrf.mxu3  ;;  %v11269_v32 = vld [vmem:[#allocation55_spill] sm:$0xff] }
 0x91f   :  { %11266 = vst [vmem:[#allocation42_spill] sm:$0xff] %v9352_v25  ;;  %v9361_v25 = vpop.permute.xlu2 %4517  ;;  %v9400_v46 = vpop.permute.xlu0 %4497  ;;  %v4288_v60 = vadd.f32 %v4287_v47, %v4194_v23  ;;  %v4284_v5 = vadd.f32 %v11269_v32, %v4188_v33  ;;  %v11271_v47 = vld [vmem:[#allocation19_spill] sm:$0xff]  ;;  %v11285_v23 = vld [vmem:[#allocation133_spill] sm:$0xff]  ;;  %v11289_v33 = vld [vmem:[#allocation126_spill] sm:$0xff] }
 0x920   :  { %v9408_v12 = vpop.permute.xlu1 %4492  ;;  %v4223_v10 = vpop.f32.mrf.mxu1 }
 0x926   :  { %v4291_v53 = vpop.f32.mrf.mxu2  ;;  %v9354_v55 = vpop.f32.mrf.mxu3  ;;  %v11275_v16 = vld [vmem:[#allocation42_spill] sm:$0xff] }
 0x927   :  { %11267 = vst [vmem:[#allocation123_spill] sm:$0xff] %v9354_v55  ;;  %v4104_v55 = vpop.f32.mrf.mxu0  ;;  %v9389_v52 = vpop.permute.xlu2 %4502  ;;  %v4292_v4 = vadd.f32 %v4291_v53, %v4200_v6  ;;  %v4366_v37 = vadd.f32 %v11275_v16, %v4284_v5  ;;  %v11292_v5 = vld [vmem:[#allocation107_spill] sm:$0xff]  ;;  %v11298_v16 = vld [vmem:[#allocation113_spill] sm:$0xff] }
 0x928   :  { %v4105_v43 = vadd.f32 %v4104_v55, %v4007_v17  ;;  %v11274_v17 = vld [vmem:[#allocation132_spill] sm:$0xff] }
 0x929   :  { %v4280_v35 = vadd.f32 %v11274_v17, %v4182_v20 }
 0x92a   :  { %v4218_v55 = vadd.f32 %v4217_v36, %v4105_v43  ;;  %v11280_v36 = vld [vmem:[#allocation39_spill] sm:$0xff] }
 0x92e   :  { %v4295_v38 = vpop.f32.mrf.mxu2  ;;  %v4373_v11 = vpop.f32.mrf.mxu3  ;;  %v11270_v34 = vld [vmem:[#allocation123_spill] sm:$0xff] }
 0x92f   :  { %v4296_v49 = vadd.f32 %v4295_v38, %v4206_v9  ;;  %v4109_v51 = vpop.f32.mrf.mxu0  ;;  %v4374_v54 = vadd.f32 %v4373_v11, %v4292_v4  ;;  %v11272_v38 = vld [vmem:[#allocation52_spill] sm:$0xff]  ;;  %v11281_v9 = vld [vmem:[#allocation58_spill] sm:$0xff] }
 0x930   :  { %v4110_v62 = vadd.f32 %v4109_v51, %v4011_v14  ;;  %v4248_v43 = vadd.f32 %v11281_v9, %v4134_v31  ;;  %v11286_v14 = vld [vmem:[#allocation138_spill] sm:$0xff]  ;;  %v11290_v51 = vld [vmem:[#allocation139_spill] sm:$0xff] }
 0x931   :  { %v4403_v45 = vmul.f32 %v4374_v54, %v11277_v61  ;;  %v4488_v54 = vpop.permute.xlu2 %4487  ;;  %v11300_v61 = vld [vmem:[#allocation41_spill] sm:$0xff] }
 0x936   :  { %v4299_v50 = vpop.f32.mrf.mxu2  ;;  %v4377_v3 = vpop.f32.mrf.mxu3 }
 0x937   :  { %v4300_v21 = vadd.f32 %v4299_v50, %v4212_v28  ;;  %v4378_v56 = vadd.f32 %v4377_v3, %v4296_v49  ;;  %v4070_v50 = vadd.f32 %v9324_v13, %v9235_v59  ;;  %v4152_v3 = vadd.f32 %v9294_v58, %v4050_v1  ;;  %v11278_v28 = vld [vmem:[#allocation45_spill] sm:$0xff]  ;;  %v11284_v1 = vld [vmem:[#allocation32_spill] sm:$0xff] }
 0x938   :  { %v4370_v59 = vadd.f32 %v11270_v34, %v4288_v60  ;;  %v4401_v60 = vmul.f32 %v4366_v37, %v11290_v51 }
 0x939   :  { %v4404_v11 = vmul.f32 %v4378_v56, %v11271_v47  ;;  %v4176_v58 = vadd.f32 %v11273_v57, %v4070_v50  ;;  %v11287_v56 = vld [vmem:[#allocation111_spill] sm:$0xff]  ;;  %v4483_v57 = vpop.permute.xlu0 %4482 }
 0x93a   :  { %v4402_v27 = vmul.f32 %v4370_v59, %v11284_v1  ;;  %v11294_v59 = vld [vmem:[#allocation141_spill] sm:$0xff] }
 0x93e   :  { %v4381_v2 = vpop.f32.mrf.mxu3  ;;  %v4303_v15 = vpop.f32.mrf.mxu2 }
 0x93f   :  { %v4382_v7 = vadd.f32 %v4381_v2, %v4300_v21  ;;  %v4304_v30 = vadd.f32 %v4303_v15, %v4218_v55  ;;  %v4170_v2 = vadd.f32 %v11280_v36, %v4065_v39  ;;  %v11282_v21 = vld [vmem:[#allocation129_spill] sm:$0xff]  ;;  %v11283_v15 = vld [vmem:[#allocation119_spill] sm:$0xff]  ;;  %v9428_v55 = vadd.f32 %v4404_v11, %v11285_v23 }
 0x940   :  { %v4276_v18 = vadd.f32 %v11282_v21, %v4176_v58  ;;  %v4362_v6 = vadd.f32 %v11283_v15, %v4280_v35  ;;  %v11295_v11 = vld [vmem:[#allocation131_spill] sm:$0xff]  ;;  %v11296_v58 = vld [vmem:[#allocation112_spill] sm:$0xff]  ;;  %v11305_v15 = vld [vmem:[#allocation29_spill] sm:$0xff] }
 0x941   :  { %v4405_v53 = vmul.f32 %v4382_v7, %v8742_v22  ;;  %v4158_v22 = vadd.f32 %v11272_v38, %v4055_v26  ;;  %v4224_v7 = vadd.f32 %v4223_v10, %v4110_v62  ;;  %v4330_v26 = vadd.f32 %v11287_v56, %v4248_v43  ;;  %v11293_v62 = vld [vmem:[#allocation114_spill] sm:$0xff]  ;;  %v11303_v43 = vld [vmem:[#allocation53_spill] sm:$0xff] }
 0x942   :  { %v4272_v50 = vadd.f32 %v11288_v19, %v4170_v2  ;;  %v4358_v31 = vadd.f32 %v11289_v33, %v4276_v18  ;;  %v4268_v34 = vadd.f32 %v11293_v62, %v4164_v48  ;;  %v9453_v10 = vadd.f32 %v4402_v27, %v11296_v58  ;;  %v11302_v2 = vld [vmem:[#allocation24_spill] sm:$0xff] }
 0x943   :  { %v9419_v42 = vadd.f32 %v4405_v53, %v11278_v28  ;;  %v4264_v37 = vadd.f32 %v11298_v16, %v4158_v22  ;;  %v4478_v28 = vpop.permute.xlu1 %4477  ;;  %v4260_v21 = vadd.f32 %v11303_v43, %v4152_v3  ;;  %v11304_v22 = vld [vmem:[#allocation125_spill] sm:$0xff]  ;;  %v11308_v27 = vld [vmem:[#allocation44_spill] sm:$0xff]  ;;  %v11309_v3 = vld [vmem:[#allocation11_spill] sm:$0xff] }
 0x944   :  { %v4354_v47 = vadd.f32 %v11294_v59, %v4272_v50  ;;  %v4350_v48 = vadd.f32 %v11299_v8, %v4268_v34  ;;  %v9485_v1 = vsub.f32 %v9453_v10, %v9400_v46  ;;  %v4256_v56 = vadd.f32 %v11309_v3, %v9385_v63  ;;  %v11311_v50 = vld [vmem:[#allocation117_spill] sm:$0xff]  ;;  %v11315_v63 = vld [vmem:[#allocation54_spill] sm:$0xff]  ;;  %v11316_v34 = vld [vmem:[#allocation108_spill] sm:$0xff] }
 0x945   :  { %v9442_v39 = vsub.f32 %v9419_v42, %v9367_v24  ;;  %v9457_v24 = vsub.f32 %v9428_v55, %v9374_v0  ;;  %v4346_v18 = vadd.f32 %v11304_v22, %v4264_v37  ;;  %v11319_v16 = vld [vmem:[#allocation12_spill] sm:$0xff]  ;;  %v11320_v8 = vld [vmem:[#allocation51_spill] sm:$0xff] }
 0x946   :  { %v4385_v13 = vpop.f32.mrf.mxu3  ;;  %v4307_v49 = vpop.f32.mrf.mxu2  ;;  %v4397_v33 = vmul.f32 %v4350_v48, %v11311_v50  ;;  %v4338_v62 = vadd.f32 %v11315_v63, %v4256_v56  ;;  %v11324_v22 = vld [vmem:[#allocation115_spill] sm:$0xff]  ;;  %v11326_v56 = vld [vmem:[#allocation122_spill] sm:$0xff] }
 0x947   :  { %v4386_v29 = vadd.f32 %v4385_v13, %v4304_v30  ;;  %v11291_v30 = vld [vmem:[#allocation127_spill] sm:$0xff]  ;;  %v4308_v20 = vadd.f32 %v4307_v49, %v4224_v7  ;;  %v4252_v13 = vadd.f32 %v11292_v5, %v4140_v41  ;;  %v11297_v41 = vld [vmem:[#allocation48_spill] sm:$0xff]  ;;  %v4554_v36 = vmul.f32 %v9442_v39, %v9442_v39 }
 0x948   :  { %v9438_v53 = vadd.f32 %v4403_v45, %v11291_v30  ;;  %v9462_v35 = vmul.f32 %v4330_v26, %v11297_v41  ;;  %v4399_v45 = vmul.f32 %v4358_v31, %v11300_v61  ;;  %v11306_v49 = vld [vmem:[#allocation47_spill] sm:$0xff]  ;;  %v11310_v26 = vld [vmem:[#allocation17_spill] sm:$0xff]  ;;  %v11312_v31 = vld [vmem:[#allocation134_spill] sm:$0xff]  ;;  %v4396_v59 = vmul.f32 %v4346_v18, %v11316_v34 }
 0x949   :  { %v4406_v44 = vmul.f32 %v4386_v29, %v11279_v40  ;;  %v4400_v29 = vmul.f32 %v4362_v6, %v11295_v11  ;;  %v11301_v40 = vld [vmem:[#allocation136_spill] sm:$0xff]  ;;  %v4398_v6 = vmul.f32 %v4354_v47, %v11305_v15  ;;  %v4342_v19 = vadd.f32 %v11310_v26, %v4260_v21  ;;  %v11317_v47 = vld [vmem:[#allocation37_spill] sm:$0xff]  ;;  %v11321_v61 = vld [vmem:[#allocation130_spill] sm:$0xff] }
 0x94a   :  { %v9472_v0 = vsub.f32 %v9438_v53, %v9389_v52  ;;  %v4553_v52 = vmul.f32 %v9457_v24, %v9457_v24  ;;  %v9499_v51 = vadd.f32 %v4399_v45, %v11312_v31  ;;  %v11314_v30 = vld [vmem:[#allocation124_spill] sm:$0xff]  ;;  %v9511_v5 = vand.u32 4294901760, %v4554_v36 }
 0x94b   :  { %v9431_v4 = vadd.f32 %v4406_v44, %v11286_v14  ;;  %v9468_v44 = vadd.f32 %v4401_v60, %v11301_v40  ;;  %v9481_v7 = vadd.f32 %v4400_v29, %v11306_v49  ;;  %v9516_v11 = vadd.f32 %v4398_v6, %v11317_v47  ;;  %v4468_v40 = vpop.permute.xlu0 %4467  ;;  %v4463_v6 = vpop.permute.xlu1 %4462 }
 0x94c   :  { %11313 = vst [vmem:[#allocation34_spill] sm:$0xff] %v9499_v51  ;;  %v4552_v60 = vmul.f32 %v9472_v0, %v9472_v0  ;;  %v9523_v58 = vand.u32 4294901760, %v4553_v52  ;;  %v4334_v37 = vadd.f32 %v11319_v16, %v4252_v13  ;;  %v4395_v48 = vmul.f32 %v4342_v19, %v11320_v8  ;;  %v11323_v13 = vld [vmem:[#allocation16_spill] sm:$0xff]  ;;  %v11333_v8 = vld [vmem:[#allocation10_spill] sm:$0xff] }
 0x94d   :  { %v9446_v32 = vsub.f32 %v9431_v4, %v9361_v25  ;;  %11307 = vst [vmem:[#allocation46_spill] sm:$0xff] %v9481_v7  ;;  %v9503_v46 = vsub.f32 %v9468_v44, %v9408_v12  ;;  %v9519_v29 = vsub.f32 %v9481_v7, %v4488_v54  ;;  %v4473_v12 = vpop.permute.xlu2 %4472  ;;  %v9533_v45 = vadd.f32 %v4397_v33, %v11321_v61 }
 0x94e   :  { %v4389_v38 = vpop.f32.mrf.mxu3  ;;  %11318 = vst [vmem:[#allocation109_spill] sm:$0xff] %v9516_v11  ;;  %v9536_v54 = vsub.f32 %v9499_v51, %v4483_v57  ;;  %v4394_v21 = vmul.f32 %v4338_v62, %v11323_v13  ;;  %v9549_v18 = vadd.f32 %v4396_v59, %v11324_v22  ;;  %v9552_v15 = vsub.f32 %v9516_v11, %v4478_v28  ;;  %v11327_v28 = vld [vmem:[#allocation137_spill] sm:$0xff] }
 0x94f   :  { %v4555_v25 = vmul.f32 %v9446_v32, %v9446_v32  ;;  %v4390_v17 = vadd.f32 %v4389_v38, %v4308_v20  ;;  %11322 = vst [vmem:[#allocation15_spill] sm:$0xff] %v9533_v45  ;;  %v4550_v43 = vmul.f32 %v9503_v46, %v9503_v46  ;;  %v4549_v57 = vmul.f32 %v9519_v29, %v9519_v29  ;;  %v11330_v62 = vld [vmem:[#allocation49_spill] sm:$0xff] }
 0x950   :  { %11325 = vst [vmem:[#allocation110_spill] sm:$0xff] %v9549_v18  ;;  %v9564_v3 = vsub.f32 %v4553_v52, %v9523_v58  ;;  %v4393_v26 = vmul.f32 %v4334_v37, %v11326_v56  ;;  %v9568_v19 = vadd.f32 %v4395_v48, %v11327_v28  ;;  %v9571_v50 = vsub.f32 %v9533_v45, %v4473_v12 }
 0x951   :  { %v4407_v9 = vmul.f32 %v4390_v17, %v11302_v2  ;;  %v9492_v14 = vand.u32 4294901760, %v4555_v25  ;;  %v4551_v17 = vmul.f32 %v9485_v1, %v9485_v1  ;;  %v4548_v33 = vmul.f32 %v9536_v54, %v9536_v54 }
 0x952   :  { %11328 = vst [vmem:[#allocation118_spill] sm:$0xff] %v9568_v19  ;;  %v9584_v34 = vadd.f32 %v4394_v21, %v11330_v62  ;;  %v9587_v59 = vsub.f32 %v9549_v18, %v4468_v40  ;;  %v9589_v47 = vand.u32 4294901760, %v4549_v57  ;;  %v4547_v12 = vmul.f32 %v9552_v15, %v9552_v15 }
 0x953   :  { %v9490_v23 = vadd.f32 %v4407_v9, %v11308_v27  ;;  %v9528_v41 = vsub.f32 %v4555_v25, %v9492_v14  ;;  %v9540_v9 = vand.u32 4294901760, %v4552_v60  ;;  %v9545_v25 = vsub.f32 %v4554_v36, %v9511_v5  ;;  %11329 = vst [vmem:[#allocation50_spill] sm:$0xff] %v9571_v50 }
 0x954   :  { %v9560_v27 = vand.u32 4294901760, %v4551_v17  ;;  %11331 = vst [vmem:[#allocation55_spill] sm:$0xff] %v9584_v34  ;;  %v10596_v16 = vand.u32 4294901760, %v9564_v3  ;;  %v9605_v48 = vadd.f32 %v4393_v26, %v11333_v8  ;;  %v9608_v61 = vsub.f32 %v9568_v19, %v4463_v6  ;;  %v11336_v6 = vld [vmem:[#allocation135_spill] sm:$0xff] }
 0x955   :  { %v9509_v20 = vsub.f32 %v9490_v23, %v11314_v30  ;;  %v10592_v36 = vand.u32 4294901760, %v9528_v41  ;;  %v9577_v30 = vand.u32 4294901760, %v4550_v43  ;;  %v10593_v52 = vand.u32 4294901760, %v9545_v25  ;;  %11332 = vst [vmem:[#allocation123_spill] sm:$0xff] %v9587_v59  ;;  %v4458_v21 = vpop.permute.xlu2 %4457 }
 0x956   :  { %v9581_v63 = vsub.f32 %v4552_v60, %v9540_v9  ;;  %v9602_v37 = vsub.f32 %v4551_v17, %v9560_v27  ;;  %11334 = vst [vmem:[#allocation19_spill] sm:$0xff] %v9605_v48  ;;  %v9610_v40 = vand.u32 4294901760, %v4548_v33  ;;  %v4546_v13 = vmul.f32 %v9571_v50, %v9571_v50 }
 0x957   :  { %v4556_v38 = vmul.f32 %v9509_v20, %v9509_v20  ;;  %v4607_v60 = vsub.f32 %v9528_v41, %v10592_v36  ;;  %11335 = vst [vmem:[#allocation52_spill] sm:$0xff] %v9608_v61  ;;  %v4613_v17 = vsub.f32 %v9545_v25, %v10593_v52  ;;  %v9620_v26 = vsub.f32 %v4550_v43, %v9577_v30  ;;  %v4453_v36 = vpop.permute.xlu0 %4452 }
 0x958   :  { %v9624_v28 = vadd.f32 %v9462_v35, %v11336_v6  ;;  %v9627_v62 = vsub.f32 %v9584_v34, %v4458_v21  ;;  %v9629_v8 = vand.u32 4294901760, %v4547_v12  ;;  %v4619_v43 = vsub.f32 %v9564_v3, %v10596_v16  ;;  %v4448_v34 = vpop.permute.xlu1 %4447 }
 0x959   :  { %v9538_v2 = vand.u32 4294901760, %v4556_v38  ;;  %v4608_v52 = vand.u32 4294901760, %v4607_v60  ;;  %v9639_v6 = vsub.f32 %v4549_v57, %v9589_v47  ;;  %v9642_v21 = vsub.f32 %v9605_v48, %v4453_v36 }
 0x95a   :  { %11337 = vst [vmem:[#allocation25_spill] sm:$0xff] %v9624_v28  ;;  %v4544_v56 = vmul.f32 %v9608_v61, %v9608_v61  ;;  %v4614_v60 = vand.u32 4294901760, %v4613_v17  ;;  %v9654_v35 = vsub.f32 %v4548_v33, %v9610_v40  ;;  %v9657_v36 = vsub.f32 %v9624_v28, %v4448_v34 }
 0x95b   :  { %4558 = vmatpush.msra.mxu0 %v9538_v2  ;;  %v9558_v49 = vsub.f32 %v4556_v38, %v9538_v2  ;;  %11338 = vst [vmem:[#allocation132_spill] sm:$0xff] %v9627_v62  ;;  %v4543_v19 = vmul.f32 %v9627_v62, %v9627_v62  ;;  %v11342_v17 = vand.u32 4294901760, %v9602_v37  ;;  %v9669_v33 = vsub.f32 %v4547_v12, %v9629_v8 }
 0x95c   :  { %11339 = vst [vmem:[#allocation42_spill] sm:$0xff] %v9642_v21  ;;  %v9671_v34 = vand.u32 4294901760, %v4544_v56  ;;  %v4542_v28 = vmul.f32 %v9642_v21, %v9642_v21  ;;  %v4541_v62 = vmul.f32 %v9657_v36, %v9657_v36 }
 0x95d   :  { %4560 = vmatpush.msra.mxu0 %v9492_v14  ;;  %v10594_v31 = vand.u32 4294901760, %v9558_v49  ;;  %11341 = vst [vmem:[#allocation128_spill] sm:$0xff] %v9657_v36  ;;  %v9683_v12 = vand.u32 4294901760, %v4543_v19  ;;  %v11345_v36 = vand.u32 4294901760, %v9654_v35 }
 0x95e   :  { %v9703_v61 = vsub.f32 %v4544_v56, %v9671_v34 }
 0x95f   :  { %4562 = vmatpush.msra.mxu0 %v9511_v5  ;;  %v4601_v38 = vsub.f32 %v9558_v49, %v10594_v31  ;;  %v9644_v31 = vand.u32 4294901760, %v4546_v13  ;;  %v9713_v11 = vsub.f32 %v4543_v19, %v9683_v12 }
 0x961   :  { %4564 = vmatpush.msra.mxu0 %v9523_v58  ;;  %v4602_v22 = vand.u32 4294901760, %v4601_v38  ;;  %v4545_v38 = vmul.f32 %v9587_v59, %v9587_v59  ;;  %v9681_v57 = vsub.f32 %v4546_v13, %v9644_v31  ;;  %v9695_v13 = vand.u32 4294901760, %v4542_v28 }
 0x963   :  { %4566 = vmatpush.msra.mxu0 %v9540_v9  ;;  %4603 = vmatpush.msra.mxu1 %v4602_v22  ;;  %v11340_v22 = vand.u32 4294901760, %v9581_v63  ;;  %v9659_v48 = vand.u32 4294901760, %v4545_v38 }
 0x965   :  { %4568 = vmatpush.msra.mxu0 %v9560_v27  ;;  %4609 = vmatpush.msra.mxu1 %v4608_v52  ;;  %v4625_v16 = vsub.f32 %v9581_v63, %v11340_v22  ;;  %v4620_v52 = vand.u32 4294901760, %v4619_v43  ;;  %v4631_v22 = vsub.f32 %v9602_v37, %v11342_v17  ;;  %v11343_v43 = vand.u32 4294901760, %v9620_v26 }
 0x966   :  { %v9693_v17 = vsub.f32 %v4545_v38, %v9659_v48 }
 0x967   :  { %4570 = vmatpush.msra.mxu0 %v9577_v30  ;;  %4615 = vmatpush.msra.mxu1 %v4614_v60  ;;  %v4626_v18 = vand.u32 4294901760, %v4625_v16  ;;  %v4637_v60 = vsub.f32 %v9620_v26, %v11343_v43  ;;  %v4632_v21 = vand.u32 4294901760, %v4631_v22  ;;  %v11344_v16 = vand.u32 4294901760, %v9639_v6 }
 0x968   :  { %v10607_v43 = vand.u32 4294901760, %v9669_v33  ;;  %v10608_v22 = vand.u32 4294901760, %v9681_v57 }
 0x969   :  { %4572 = vmatpush.msra.mxu0 %v9589_v47  ;;  %4621 = vmatpush.msra.mxu1 %v4620_v52  ;;  %v4643_v52 = vsub.f32 %v9639_v6, %v11344_v16  ;;  %v4638_v45 = vand.u32 4294901760, %v4637_v60  ;;  %v9705_v16 = vand.u32 4294901760, %v4541_v62  ;;  %v10609_v60 = vand.u32 4294901760, %v9693_v17 }
 0x96b   :  { %4574 = vmatpush.msra.mxu0 %v9610_v40  ;;  %4627 = vmatpush.msra.mxu1 %v4626_v18  ;;  %v4649_v18 = vsub.f32 %v9654_v35, %v11345_v36  ;;  %v4644_v38 = vand.u32 4294901760, %v4643_v52  ;;  %v4661_v36 = vsub.f32 %v9681_v57, %v10608_v22  ;;  %v9721_v52 = vsub.f32 %v4542_v28, %v9695_v13 }
 0x96c   :  { %v4667_v19 = vsub.f32 %v9693_v17, %v10609_v60 }
 0x96d   :  { %4576 = vmatpush.msra.mxu0 %v9629_v8  ;;  %4633 = vmatpush.msra.mxu1 %v4632_v21  ;;  %v4655_v21 = vsub.f32 %v9669_v33, %v10607_v43  ;;  %v4650_v56 = vand.u32 4294901760, %v4649_v18  ;;  %v9729_v18 = vsub.f32 %v4541_v62, %v9705_v16  ;;  %v4662_v22 = vand.u32 4294901760, %v4661_v36 }
 0x96f   :  { %4578 = vmatpush.msra.mxu0 %v9644_v31  ;;  %4639 = vmatpush.msra.mxu1 %v4638_v45  ;;  %v10610_v45 = vand.u32 4294901760, %v9703_v61  ;;  %v4656_v43 = vand.u32 4294901760, %v4655_v21  ;;  %v4668_v21 = vand.u32 4294901760, %v4667_v19  ;;  %v4690_v62 = vand.u32 4294901760, %v9729_v18  ;;  %v11346_v19 = vld [vmem:[#allocation9_spill] sm:$0xff] }
 0x971   :  { %4580 = vmatpush.msra.mxu0 %v9659_v48  ;;  %4645 = vmatpush.msra.mxu1 %v4644_v38  ;;  %v10611_v38 = vand.u32 4294901760, %v9713_v11  ;;  %v4673_v28 = vsub.f32 %v9703_v61, %v10610_v45 }
 0x973   :  { %4582 = vmatpush.msra.mxu0 %v9671_v34  ;;  %4651 = vmatpush.msra.mxu1 %v4650_v56  ;;  %v4684_v56 = vand.u32 4294901760, %v9721_v52  ;;  %v4679_v60 = vsub.f32 %v9713_v11, %v10611_v38 }
 0x975   :  { %4584 = vmatpush.msra.mxu0 %v9683_v12  ;;  %4657 = vmatpush.msra.mxu1 %v4656_v43  ;;  %v4674_v43 = vand.u32 4294901760, %v4673_v28  ;;  %v4685_v36 = vsub.f32 %v9721_v52, %v4684_v56  ;;  %v4680_v45 = vand.u32 4294901760, %v4679_v60  ;;  %v11347_v60 = vld [vmem:[#allocation38_spill] sm:$0xff] }
 0x977   :  { %4586 = vmatpush.msra.mxu0 %v9695_v13  ;;  %4663 = vmatpush.msra.mxu1 %v4662_v22  ;;  %v4691_v22 = vsub.f32 %v9729_v18, %v4690_v62  ;;  %v4686_v38 = vand.u32 4294901760, %v4685_v36  ;;  %v11352_v36 = vand.u32 4294901760, %v9564_v3 }
 0x979   :  { %4588 = vmatpush.msra.mxu0 %v9705_v16  ;;  %4669 = vmatpush.msra.mxu1 %v4668_v21  ;;  %v4692_v28 = vand.u32 4294901760, %v4691_v22  ;;  %v11350_v21 = vand.u32 4294901760, %v9528_v41  ;;  %v11354_v22 = vld [vmem:[#allocation13_spill] sm:$0xff] }
 0x97a   :  { %4594 = vmatmul.f32.vlgmr.msra.gmra.mxu0 %v11346_v19 }
 0x97b   :  { %4701 = vmatpush.msrb.mxu0 %v9558_v49  ;;  %4675 = vmatpush.msra.mxu1 %v4674_v43  ;;  %v11351_v43 = vand.u32 4294901760, %v9545_v25 }
 0x97d   :  { %4704 = vmatpush.msrb.mxu0 %v9528_v41  ;;  %4681 = vmatpush.msra.mxu1 %v4680_v45  ;;  %v11348_v45 = vand.u32 4294901760, %v9558_v49  ;;  %v11353_v49 = vand.u32 4294901760, %v9581_v63  ;;  %v11355_v41 = vand.u32 4294901760, %v9602_v37 }
 0x97f   :  { %4707 = vmatpush.msrb.mxu0 %v9545_v25  ;;  %4687 = vmatpush.msra.mxu1 %v4686_v38  ;;  %v11349_v38 = vld [vmem:[#allocation43_spill] sm:$0xff]  ;;  %v11356_v25 = vand.u32 4294901760, %v9620_v26 }
 0x981   :  { %4710 = vmatpush.msrb.mxu0 %v9564_v3  ;;  %4693 = vmatpush.msra.mxu1 %v4692_v28  ;;  %v11357_v3 = vand.u32 4294901760, %v9639_v6 }
 0x982   :  { %4695 = vmatmul.f32.vlgmr.msra.gmra.mxu1 %v11347_v60 }
 0x983   :  { %4713 = vmatpush.msrb.mxu0 %v9581_v63  ;;  %4754 = vmatpush.msrb.mxu1 %v9538_v2  ;;  %v11358_v63 = vand.u32 4294901760, %v9654_v35 }
 0x985   :  { %4716 = vmatpush.msrb.mxu0 %v9602_v37  ;;  %4756 = vmatpush.msrb.mxu1 %v9492_v14 }
 0x987   :  { %4719 = vmatpush.msrb.mxu0 %v9620_v26  ;;  %4758 = vmatpush.msrb.mxu1 %v9511_v5 }
 0x989   :  { %4722 = vmatpush.msrb.mxu0 %v9639_v6  ;;  %4760 = vmatpush.msrb.mxu1 %v9523_v58 }
 0x98b   :  { %4725 = vmatpush.msrb.mxu0 %v9654_v35  ;;  %4762 = vmatpush.msrb.mxu1 %v9540_v9 }
 0x98d   :  { %4728 = vmatpush.msrb.mxu0 %v9669_v33  ;;  %4764 = vmatpush.msrb.mxu1 %v9560_v27 }
 0x98f   :  { %4731 = vmatpush.msrb.mxu0 %v9681_v57  ;;  %4766 = vmatpush.msrb.mxu1 %v9577_v30 }
 0x991   :  { %4734 = vmatpush.msrb.mxu0 %v9693_v17  ;;  %4768 = vmatpush.msrb.mxu1 %v9589_v47 }
 0x993   :  { %4737 = vmatpush.msrb.mxu0 %v9703_v61  ;;  %4770 = vmatpush.msrb.mxu1 %v9610_v40 }
 0x995   :  { %4740 = vmatpush.msrb.mxu0 %v9713_v11  ;;  %4772 = vmatpush.msrb.mxu1 %v9629_v8 }
 0x997   :  { %4743 = vmatpush.msrb.mxu0 %v9721_v52  ;;  %4774 = vmatpush.msrb.mxu1 %v9644_v31  ;;  %v4913_v52 = vpop.permute.xlu2 %4912 }
 0x999   :  { %4746 = vmatpush.msrb.mxu0 %v9729_v18  ;;  %4776 = vmatpush.msrb.mxu1 %v9659_v48  ;;  %v4934_v18 = vpop.permute.xlu0 %4933 }
 0x99a   :  { %4749 = vmatmul.f32.vlgmr.msrb.gmra.mxu0 %v11349_v38 }
 0x99b   :  { %4795 = vmatpush.msra.mxu0 %v11348_v45  ;;  %4778 = vmatpush.msrb.mxu1 %v9671_v34 }
 0x99d   :  { %4799 = vmatpush.msra.mxu0 %v11350_v21  ;;  %4780 = vmatpush.msrb.mxu1 %v9683_v12 }
 0x99f   :  { %4803 = vmatpush.msra.mxu0 %v11351_v43  ;;  %4782 = vmatpush.msrb.mxu1 %v9695_v13 }
 0x9a1   :  { %4807 = vmatpush.msra.mxu0 %v11352_v36  ;;  %4784 = vmatpush.msrb.mxu1 %v9705_v16 }
 0x9a2   :  { %4788 = vmatmul.f32.vlgmr.msrb.gmra.mxu1 %v11354_v22 }
 0x9a3   :  { %4811 = vmatpush.msra.mxu0 %v11353_v49  ;;  %4862 = vmatpush.msra.mxu1 %v9538_v2  ;;  %v11359_v2 = vand.u32 4294901760, %v9669_v33 }
 0x9a5   :  { %4815 = vmatpush.msra.mxu0 %v11355_v41  ;;  %4864 = vmatpush.msra.mxu1 %v9492_v14  ;;  %v11360_v14 = vand.u32 4294901760, %v9681_v57 }
 0x9a7   :  { %4819 = vmatpush.msra.mxu0 %v11356_v25  ;;  %4866 = vmatpush.msra.mxu1 %v9511_v5  ;;  %v11361_v5 = vand.u32 4294901760, %v9693_v17 }
 0x9a9   :  { %4823 = vmatpush.msra.mxu0 %v11357_v3  ;;  %4868 = vmatpush.msra.mxu1 %v9523_v58  ;;  %v11362_v58 = vand.u32 4294901760, %v9703_v61 }
 0x9ab   :  { %4827 = vmatpush.msra.mxu0 %v11358_v63  ;;  %4870 = vmatpush.msra.mxu1 %v9540_v9  ;;  %v11363_v9 = vand.u32 4294901760, %v9713_v11 }
 0x9ad   :  { %4831 = vmatpush.msra.mxu0 %v11359_v2  ;;  %4872 = vmatpush.msra.mxu1 %v9560_v27 }
 0x9af   :  { %4835 = vmatpush.msra.mxu0 %v11360_v14  ;;  %4874 = vmatpush.msra.mxu1 %v9577_v30 }
 0x9b1   :  { %4839 = vmatpush.msra.mxu0 %v11361_v5  ;;  %4876 = vmatpush.msra.mxu1 %v9589_v47 }
 0x9b3   :  { %4843 = vmatpush.msra.mxu0 %v11362_v58  ;;  %4878 = vmatpush.msra.mxu1 %v9610_v40 }
 0x9b5   :  { %4847 = vmatpush.msra.mxu0 %v11363_v9  ;;  %4880 = vmatpush.msra.mxu1 %v9629_v8 }
 0x9b7   :  { %4851 = vmatpush.msra.mxu0 %v4684_v56  ;;  %4882 = vmatpush.msra.mxu1 %v9644_v31 }
 0x9b9   :  { %4855 = vmatpush.msra.mxu0 %v4690_v62  ;;  %4884 = vmatpush.msra.mxu1 %v9659_v48 }
 0x9ba   :  { %4857 = vmatmul.f32.vlgmr.msra.gmra.mxu0 %v11347_v60 }
 0x9bb   :  { %4886 = vmatpush.msra.mxu1 %v9671_v34 }
 0x9bd   :  { %4888 = vmatpush.msra.mxu1 %v9683_v12 }
 0x9bf   :  { %4890 = vmatpush.msra.mxu1 %v9695_v13 }
 0x9c1   :  { %4892 = vmatpush.msra.mxu1 %v9705_v16 }
 0x9c2   :  { %4894 = vmatmul.f32.vlgmr.msra.gmra.mxu1 %v11347_v60 }
 0x9f7   :  { %v4595_v11 = vpop.f32.mrf.mxu0 }
 0x9ff   :  { %v4696_v27 = vpop.f32.mrf.mxu1 }
 0xa00   :  { %v4697_v30 = vadd.f32 %v4696_v27, %v4595_v11 }
 0xa17   :  { %v4750_v31 = vpop.f32.mrf.mxu0 }
 0xa18   :  { %v4751_v37 = vadd.f32 %v4750_v31, %v4697_v30  ;;  %v11364_v30 = vld [vmem:[#allocation31_spill] sm:$0xff] }
 0xa1f   :  { %v4789_v47 = vpop.f32.mrf.mxu1 }
 0xa20   :  { %v4790_v48 = vadd.f32 %v4789_v47, %v4751_v37  ;;  %v11365_v47 = vld [vmem:[#allocation40_spill] sm:$0xff] }
 0xa37   :  { %v4858_v61 = vpop.f32.mrf.mxu0 }
 0xa38   :  { %v4859_v40 = vadd.f32 %v4858_v61, %v4790_v48  ;;  %v11366_v48 = vld [vmem:[#allocation35_spill] sm:$0xff] }
 0xa3f   :  { %v4895_v26 = vpop.f32.mrf.mxu1 }
 0xa40   :  { %v4896_v8 = vadd.f32 %v4895_v26, %v4859_v40 }
 0xa42   :  { %6112 = vrsqrt.f32 %v4896_v8  ;;  %vm4905_vm4 = vcmp.eq.f32.partialorder %v4896_v8, inf  ;;  %v4908_v13 = vand.u32 2147483648, %v4896_v8  ;;  %vm4907_vm5 = vcmp.eq.f32.partialorder %v4896_v8, 0.0 }
 0xa48   :  { %v6113_v35 = vpop.eup %6112 }
 0xa49   :  { %v4899_v6 = vmul.f32 %v6113_v35, %v4896_v8 }
 0xa4b   :  { %v4900_v57 = vmul.f32 %v6113_v35, %v4899_v6  ;;  %v11367_v6 = vld [vmem:[#allocation23_spill] sm:$0xff] }
 0xa4d   :  { %v4901_v33 = vmul.f32 0.5, %v4900_v57  ;;  %v11368_v57 = vld [vmem:[#allocation21_spill] sm:$0xff] }
 0xa4f   :  { %v4902_v34 = vsub.f32 1.5, %v4901_v33 }
 0xa51   :  { %v4903_v17 = vmul.f32 %v6113_v35, %v4902_v34 }
 0xa53   :  { %v4904_v12 = vmul.f32 %v4903_v17, %v4896_v8  ;;  %v11369_v17 = vld [vmem:[#allocation36_spill] sm:$0xff] }
 0xa55   :  { %v4906_v16 = vsel %vm4905_vm4, %v4896_v8, %v4904_v12  ;;  %v11370_v12 = vld [vmem:[#allocation18_spill] sm:$0xff] }
 0xa56   :  { %v4909_v56 = vsel %vm4907_vm5, %v4908_v13, %v4906_v16  ;;  %v11371_v13 = vld [vmem:[#allocation28_spill] sm:$0xff] }
 0xa57   :  { %v4915_v62 = vadd.f32 %v4913_v52, %v4909_v56  ;;  %v4943_v28 = vmul.f32 %v4934_v18, %v4909_v56  ;;  %v11373_v56 = vld [vmem:[#allocation20_spill] sm:$0xff] }
 0xa59   :  { %6114 = vrcp.f32 %v4915_v62  ;;  %v4927_v36 = vand.u32 2147483648, %v4915_v62  ;;  %v4925_v41 = vand.u32 2147483647, %v4915_v62  ;;  %vm4921_vm7 = vweird.f32 %v4915_v62 }
 0xa5b   :  { %v4928_v3 = vor.u32 1.1754944e-38, %v4927_v36  ;;  %vm4926_vm9 = vcmp.eq.f32.partialorder %v4925_v41, 8.507059e+37  ;;  %v11379_v36 = vld [vmem:[#allocation56_spill] sm:$0xff] }
 0xa5c   :  { %v11381_v41 = vld [vmem:[#allocation64_spill] sm:$0xff] }
 0xa5f   :  { %v6115_v45 = vpop.eup %6114 }
 0xa60   :  { %v4917_v21 = vmul.f32 %v6115_v45, %v4915_v62  ;;  %vm4922_vm6 = vweird.f32 %v6115_v45  ;;  %v11374_v62 = vld [vmem:[#allocation14_spill] sm:$0xff] }
 0xa61   :  { %vm4923_vm8 = vmor %vm4921_vm7, %vm4922_vm6 }
 0xa62   :  { %v4918_v43 = vsub.f32 1.0, %v4917_v21  ;;  %v11377_v21 = vld [vmem:[#allocation60_spill] sm:$0xff] }
 0xa64   :  { %v4919_v49 = vmul.f32 %v6115_v45, %v4918_v43  ;;  %v11378_v43 = vld [vmem:[#allocation27_spill] sm:$0xff] }
 0xa66   :  { %v4920_v25 = vadd.f32 %v6115_v45, %v4919_v49  ;;  %v11380_v49 = vld [vmem:[#allocation22_spill] sm:$0xff] }
 0xa68   :  { %v4924_v63 = vsel %vm4923_vm8, %v6115_v45, %v4920_v25  ;;  %v11376_v45 = vld [vmem:[#allocation33_spill] sm:$0xff]  ;;  %v11382_v25 = vld [vmem:[#allocation26_spill] sm:$0xff] }
 0xa69   :  { %v4929_v2 = vsel %vm4926_vm9, %v4928_v3, %v4924_v63  ;;  %v11383_v3 = vld [vmem:[#allocation61_spill] sm:$0xff]  ;;  %v11384_v63 = vld [vmem:[#allocation59_spill] sm:$0xff] }
 0xa6a   :  { %v4936_v14 = vmul.f32 %v4934_v18, %v4929_v2  ;;  %v4944_v5 = vmul.f32 %v4943_v28, %v4929_v2  ;;  %v11375_v28 = vld [vmem:[#allocation30_spill] sm:$0xff] }
 0xa6c   :  { %v4965_v58 = vand.u32 4294901760, %v4936_v14  ;;  %v4937_v9 = vadd.f32 1.0, %v4936_v14  ;;  %v4945_v11 = vmul.f32 %v4944_v5, %v4929_v2  ;;  %v11385_v2 = vld [vmem:[#allocation68_spill] sm:$0xff]  ;;  %v11387_v5 = vld [vmem:[#allocation65_spill] sm:$0xff] }
 0xa6e   :  { %4966 = vmatpush.msrb.mxu0 %v4965_v58  ;;  %5297 = vmatpush.msra.mxu3 %v4965_v58  ;;  %v5112_v27 = vsub.f32 %v4936_v14, %v4965_v58  ;;  %6116 = vlog2.f32 %v4937_v9  ;;  %v4942_v31 = vadd.f32 %v4937_v9, %v4934_v18  ;;  %v11386_v14 = vld [vmem:[#allocation57_spill] sm:$0xff]  ;;  %v11389_v9 = vld [vmem:[#allocation72_spill] sm:$0xff] }
 0xa6f   :  { %4972 = vmatmul.f32.vlgmr.msrb.gmra.mxu0 %v11364_v30  ;;  %5301 = vmatmul.f32.vlgmr.msra.gmra.mxu3 %v11365_v47  ;;  %v11393_v30 = vld [vmem:[#allocation76_spill] sm:$0xff]  ;;  %v11394_v47 = vld [vmem:[#allocation66_spill] sm:$0xff] }
 0xa70   :  { %5199 = vmatpush.msra.mxu2 %v5112_v27  ;;  %v5113_v37 = vand.u32 4294901760, %v5112_v27  ;;  %v4946_v61 = vsub.f32 %v4942_v31, %v4945_v11  ;;  %v11390_v11 = vld [vmem:[#allocation62_spill] sm:$0xff]  ;;  %v11392_v31 = vld [vmem:[#allocation67_spill] sm:$0xff] }
 0xa71   :  { %5202 = vmatmul.f32.vlgmr.msra.gmra.mxu2 %v11366_v48  ;;  %v11397_v48 = vld [vmem:[#allocation80_spill] sm:$0xff] }
 0xa72   :  { %5413 = vmatpush.msra.mxu0 %v5113_v37  ;;  %v5114_v40 = vsub.f32 %v5112_v27, %v5113_v37  ;;  %6118 = vlog2.f32 %v4946_v61  ;;  %v11391_v27 = vld [vmem:[#allocation69_spill] sm:$0xff]  ;;  %v11396_v61 = vld [vmem:[#allocation71_spill] sm:$0xff] }
 0xa73   :  { %v11395_v37 = vld [vmem:[#allocation73_spill] sm:$0xff] }
 0xa74   :  { %v6117_v26 = vpop.eup %6116  ;;  %v5115_v8 = vand.u32 4294901760, %v5114_v40  ;;  %v11398_v40 = vld [vmem:[#allocation70_spill] sm:$0xff] }
 0xa75   :  { %v4939_v35 = vmul.f32 0.6931472, %v6117_v26  ;;  %v11399_v26 = vld [vmem:[#allocation77_spill] sm:$0xff] }
 0xa76   :  { %5116 = vmatpush.msrb.mxu1 %v5115_v8  ;;  %v11400_v8 = vld [vmem:[#allocation75_spill] sm:$0xff] }
 0xa77   :  { %4980 = vmatmul.f32.gmra.mxu0 %v11367_v6  ;;  %5118 = vmatmul.f32.vlgmr.msrb.gmra.mxu1 %v11368_v57  ;;  %v4940_v33 = vmul.f32 15.0, %v4939_v35  ;;  %v11401_v35 = vld [vmem:[#allocation84_spill] sm:$0xff]  ;;  %v11402_v6 = vld [vmem:[#allocation74_spill] sm:$0xff] }
 0xa78   :  { %v6119_v34 = vpop.eup %6118  ;;  %5495 = vmatpush.msra.mxu1 %v4965_v58  ;;  %5307 = vmatmul.f32.gmra.mxu3 %v11369_v17  ;;  %v11388_v58 = vld [vmem:[#allocation63_spill] sm:$0xff]  ;;  %v11405_v17 = vld [vmem:[#allocation88_spill] sm:$0xff] }
 0xa79   :  { %5207 = vmatmul.f32.gmra.mxu2 %v11370_v12  ;;  %v4941_v16 = vadd.f32 %v4940_v33, %v11371_v13  ;;  %v4948_v52 = vmul.f32 0.6931472, %v6119_v34  ;;  %v11403_v33 = vld [vmem:[#allocation81_spill] sm:$0xff]  ;;  %v11404_v34 = vld [vmem:[#allocation79_spill] sm:$0xff]  ;;  %v11406_v12 = vld [vmem:[#allocation78_spill] sm:$0xff] }
 0xa7a   :  { %v11407_v13 = vld [vmem:[#allocation85_spill] sm:$0xff] }
 0xa7b   :  { %v9842_v18 = vadd.f32 %v4948_v52, %v4941_v16  ;;  %v11408_v16 = vld [vmem:[#allocation83_spill] sm:$0xff]  ;;  %v11409_v52 = vld [vmem:[#allocation92_spill] sm:$0xff] }
 0xa7d   :  { %11372 = vst [vmem:[#allocation140_spill] sm:$0xff] %v9842_v18 }
 0xa7f   :  { %4988 = vmatmul.f32.gmra.mxu0 %v11373_v56  ;;  %5122 = vmatmul.f32.gmra.mxu1 %v11374_v62  ;;  %v11410_v56 = vld [vmem:[#allocation82_spill] sm:$0xff] }
 0xa80   :  { %5313 = vmatmul.f32.gmra.mxu3 %v11375_v28  ;;  %v11411_v28 = vld [vmem:[#allocation89_spill] sm:$0xff] }
 0xa81   :  { %5212 = vmatmul.f32.gmra.mxu2 %v11376_v45  ;;  %v11412_v45 = vld [vmem:[#allocation87_spill] sm:$0xff] }
 0xa87   :  { %4996 = vmatmul.f32.gmra.mxu0 %v11377_v21  ;;  %5126 = vmatmul.f32.gmra.mxu1 %v11378_v43  ;;  %v11413_v21 = vld [vmem:[#allocation96_spill] sm:$0xff] }
 0xa88   :  { %5319 = vmatmul.f32.gmra.mxu3 %v11379_v36  ;;  %v11414_v36 = vld [vmem:[#allocation86_spill] sm:$0xff] }
 0xa89   :  { %5217 = vmatmul.f32.gmra.mxu2 %v11380_v49  ;;  %v11415_v49 = vld [vmem:[#allocation93_spill] sm:$0xff] }
 0xa8f   :  { %5004 = vmatmul.f32.gmra.mxu0 %v11381_v41  ;;  %5130 = vmatmul.f32.gmra.mxu1 %v11382_v25  ;;  %v11416_v41 = vld [vmem:[#allocation91_spill] sm:$0xff] }
 0xa90   :  { %5325 = vmatmul.f32.gmra.mxu3 %v11383_v3  ;;  %v11417_v3 = vld [vmem:[#allocation100_spill] sm:$0xff] }
 0xa91   :  { %5222 = vmatmul.f32.gmra.mxu2 %v11384_v63  ;;  %v11418_v63 = vld [vmem:[#allocation90_spill] sm:$0xff] }
 0xa97   :  { %5012 = vmatmul.f32.gmra.mxu0 %v11385_v2  ;;  %5134 = vmatmul.f32.gmra.mxu1 %v11386_v14  ;;  %v11419_v2 = vld [vmem:[#allocation97_spill] sm:$0xff] }
 0xa98   :  { %5331 = vmatmul.f32.gmra.mxu3 %v11387_v5  ;;  %v11420_v5 = vld [vmem:[#allocation95_spill] sm:$0xff] }
 0xa99   :  { %5227 = vmatmul.f32.gmra.mxu2 %v11388_v58  ;;  %v11421_v58 = vld [vmem:[#allocation104_spill] sm:$0xff] }
 0xa9f   :  { %5020 = vmatmul.f32.gmra.mxu0 %v11389_v9  ;;  %5138 = vmatmul.f32.gmra.mxu1 %v11390_v11  ;;  %v11422_v9 = vld [vmem:[#allocation94_spill] sm:$0xff] }
 0xaa0   :  { %5337 = vmatmul.f32.gmra.mxu3 %v11391_v27  ;;  %v11423_v27 = vld [vmem:[#allocation101_spill] sm:$0xff] }
 0xaa1   :  { %5232 = vmatmul.f32.gmra.mxu2 %v11392_v31  ;;  %v11424_v31 = vld [vmem:[#allocation99_spill] sm:$0xff] }
 0xaa7   :  { %5028 = vmatmul.f32.gmra.mxu0 %v11393_v30  ;;  %5142 = vmatmul.f32.gmra.mxu1 %v11394_v47  ;;  %v11425_v30 = vld [vmem:[#allocation106_spill] sm:$0xff] }
 0xaa8   :  { %5343 = vmatmul.f32.gmra.mxu3 %v11395_v37  ;;  %v11426_v37 = vld [vmem:[#allocation98_spill] sm:$0xff] }
 0xaa9   :  { %5237 = vmatmul.f32.gmra.mxu2 %v11396_v61  ;;  %v11427_v61 = vld [vmem:[#allocation105_spill] sm:$0xff] }
 0xaaf   :  { %5036 = vmatmul.f32.gmra.mxu0 %v11397_v48  ;;  %5146 = vmatmul.f32.gmra.mxu1 %v11398_v40  ;;  %v11428_v48 = vld [vmem:[#allocation103_spill] sm:$0xff] }
 0xab0   :  { %5349 = vmatmul.f32.gmra.mxu3 %v11399_v26 }
 0xab1   :  { %5242 = vmatmul.f32.gmra.mxu2 %v11400_v8  ;;  %v11429_v8 = vld [vmem:[#allocation102_spill] sm:$0xff] }
 0xab7   :  { %5044 = vmatmul.f32.gmra.mxu0 %v11401_v35  ;;  %5150 = vmatmul.f32.gmra.mxu1 %v11402_v6 }
 0xab8   :  { %5355 = vmatmul.f32.gmra.mxu3 %v11403_v33 }
 0xab9   :  { %5247 = vmatmul.f32.gmra.mxu2 %v11404_v34 }
 0xabf   :  { %5052 = vmatmul.f32.gmra.mxu0 %v11405_v17  ;;  %5154 = vmatmul.f32.gmra.mxu1 %v11406_v12 }
 0xac0   :  { %5361 = vmatmul.f32.gmra.mxu3 %v11407_v13 }
 0xac1   :  { %5252 = vmatmul.f32.gmra.mxu2 %v11408_v16 }
 0xac7   :  { %5060 = vmatmul.f32.gmra.mxu0 %v11409_v52  ;;  %5158 = vmatmul.f32.gmra.mxu1 %v11410_v56 }
 0xac8   :  { %5367 = vmatmul.f32.gmra.mxu3 %v11411_v28 }
 0xac9   :  { %5257 = vmatmul.f32.gmra.mxu2 %v11412_v45 }
 0xacf   :  { %5068 = vmatmul.f32.gmra.mxu0 %v11413_v21  ;;  %5162 = vmatmul.f32.gmra.mxu1 %v11414_v36 }
 0xad0   :  { %5373 = vmatmul.f32.gmra.mxu3 %v11415_v49 }
 0xad1   :  { %5262 = vmatmul.f32.gmra.mxu2 %v11416_v41 }
 0xad7   :  { %5076 = vmatmul.f32.gmra.mxu0 %v11417_v3  ;;  %5166 = vmatmul.f32.gmra.mxu1 %v11418_v63 }
 0xad8   :  { %5379 = vmatmul.f32.gmra.mxu3 %v11419_v2 }
 0xad9   :  { %5267 = vmatmul.f32.gmra.mxu2 %v11420_v5 }
 0xadf   :  { %5084 = vmatmul.f32.gmra.mxu0 %v11421_v58  ;;  %5170 = vmatmul.f32.gmra.mxu1 %v11422_v9 }
 0xae0   :  { %5385 = vmatmul.f32.gmra.mxu3 %v11423_v27 }
 0xae1   :  { %5272 = vmatmul.f32.gmra.mxu2 %v11424_v31 }
 0xae7   :  { %5092 = vmatmul.f32.gmra.mxu0 %v11425_v30  ;;  %5174 = vmatmul.f32.gmra.mxu1 %v11426_v37 }
 0xae8   :  { %5391 = vmatmul.f32.gmra.mxu3 %v11427_v61 }
 0xae9   :  { %5277 = vmatmul.f32.gmra.mxu2 %v11428_v48 }
 0xaec   :  { %v4973_v26 = vpop.f32.mrf.mxu0 }
 0xaef   :  { %5178 = vmatmul.f32.gmra.mxu1 %v11429_v8  ;;  %5415 = vmatmul.f32.vlgmr.msra.gmra.mxu0 %v11368_v57 }
 0xaf2   :  { %v5302_v35 = vpop.f32.mrf.mxu3 }
 0xaf4   :  { %v4981_v33 = vpop.f32.mrf.mxu0  ;;  %v5119_v34 = vpop.f32.mrf.mxu1 }
 0xaf5   :  { %v5120_v17 = vadd.f32 %v5119_v34, %v4973_v26  ;;  %v5203_v13 = vpop.f32.mrf.mxu2 }
 0xaf7   :  { %v5204_v16 = vadd.f32 %v5203_v13, %v5120_v17  ;;  %5419 = vmatmul.f32.gmra.mxu0 %v11374_v62  ;;  %5497 = vmatmul.f32.vlgmr.msra.gmra.mxu1 %v11368_v57 }
 0xaf9   :  { %v9904_v52 = vadd.f32 %v5302_v35, %v5204_v16 }
 0xafb   :  { %v5308_v28 = vpop.f32.mrf.mxu3 }
 0xafc   :  { %v4989_v45 = vpop.f32.mrf.mxu0  ;;  %v5123_v21 = vpop.f32.mrf.mxu1 }
 0xafd   :  { %v5124_v49 = vadd.f32 %v5123_v21, %v4981_v33  ;;  %v5208_v41 = vpop.f32.mrf.mxu2 }
 0xaff   :  { %v5209_v3 = vadd.f32 %v5208_v41, %v5124_v49  ;;  %5423 = vmatmul.f32.gmra.mxu0 %v11378_v43  ;;  %5501 = vmatmul.f32.gmra.mxu1 %v11374_v62 }
 0xb01   :  { %v9908_v2 = vadd.f32 %v5308_v28, %v5209_v3 }
 0xb03   :  { %v5314_v5 = vpop.f32.mrf.mxu3 }
 0xb04   :  { %v4997_v58 = vpop.f32.mrf.mxu0  ;;  %v5127_v27 = vpop.f32.mrf.mxu1 }
 0xb05   :  { %v5128_v31 = vadd.f32 %v5127_v27, %v4989_v45  ;;  %v5213_v30 = vpop.f32.mrf.mxu2 }
 0xb07   :  { %v5214_v57 = vadd.f32 %v5213_v30, %v5128_v31  ;;  %5427 = vmatmul.f32.gmra.mxu0 %v11382_v25  ;;  %5505 = vmatmul.f32.gmra.mxu1 %v11378_v43 }
 0xb09   :  { %v9912_v61 = vadd.f32 %v5314_v5, %v5214_v57 }
 0xb0b   :  { %v5320_v48 = vpop.f32.mrf.mxu3 }
 0xb0c   :  { %v5005_v26 = vpop.f32.mrf.mxu0  ;;  %v5131_v35 = vpop.f32.mrf.mxu1 }
 0xb0d   :  { %v5132_v33 = vadd.f32 %v5131_v35, %v4997_v58  ;;  %v5218_v34 = vpop.f32.mrf.mxu2 }
 0xb0f   :  { %v5219_v62 = vadd.f32 %v5218_v34, %v5132_v33  ;;  %5431 = vmatmul.f32.gmra.mxu0 %v11386_v14  ;;  %5509 = vmatmul.f32.gmra.mxu1 %v11382_v25 }
 0xb11   :  { %v9916_v17 = vadd.f32 %v5320_v48, %v5219_v62 }
 0xb13   :  { %v5326_v13 = vpop.f32.mrf.mxu3 }
 0xb14   :  { %v5013_v16 = vpop.f32.mrf.mxu0  ;;  %v5135_v28 = vpop.f32.mrf.mxu1 }
 0xb15   :  { %v5136_v45 = vadd.f32 %v5135_v28, %v5005_v26  ;;  %v5223_v21 = vpop.f32.mrf.mxu2 }
 0xb17   :  { %v5224_v43 = vadd.f32 %v5223_v21, %v5136_v45  ;;  %5435 = vmatmul.f32.gmra.mxu0 %v11390_v11  ;;  %5513 = vmatmul.f32.gmra.mxu1 %v11386_v14 }
 0xb19   :  { %v9920_v49 = vadd.f32 %v5326_v13, %v5224_v43 }
 0xb1b   :  { %v5332_v41 = vpop.f32.mrf.mxu3 }
 0xb1c   :  { %v5021_v3 = vpop.f32.mrf.mxu0  ;;  %v5139_v5 = vpop.f32.mrf.mxu1 }
 0xb1d   :  { %v5140_v58 = vadd.f32 %v5139_v5, %v5013_v16  ;;  %v5228_v27 = vpop.f32.mrf.mxu2 }
 0xb1f   :  { %v5229_v25 = vadd.f32 %v5228_v27, %v5140_v58  ;;  %5439 = vmatmul.f32.gmra.mxu0 %v11394_v47  ;;  %5517 = vmatmul.f32.gmra.mxu1 %v11390_v11 }
 0xb21   :  { %v9924_v31 = vadd.f32 %v5332_v41, %v5229_v25 }
 0xb23   :  { %v5338_v30 = vpop.f32.mrf.mxu3 }
 0xb24   :  { %v5029_v57 = vpop.f32.mrf.mxu0  ;;  %v5143_v48 = vpop.f32.mrf.mxu1 }
 0xb25   :  { %v5144_v26 = vadd.f32 %v5143_v48, %v5021_v3  ;;  %v5233_v35 = vpop.f32.mrf.mxu2 }
 0xb27   :  { %v5234_v14 = vadd.f32 %v5233_v35, %v5144_v26  ;;  %5443 = vmatmul.f32.gmra.mxu0 %v11398_v40  ;;  %5521 = vmatmul.f32.gmra.mxu1 %v11394_v47 }
 0xb29   :  { %v9928_v33 = vadd.f32 %v5338_v30, %v5234_v14 }
 0xb2b   :  { %v5344_v34 = vpop.f32.mrf.mxu3 }
 0xb2c   :  { %v5037_v62 = vpop.f32.mrf.mxu0  ;;  %v5147_v13 = vpop.f32.mrf.mxu1 }
 0xb2d   :  { %v5148_v16 = vadd.f32 %v5147_v13, %v5029_v57  ;;  %v5238_v28 = vpop.f32.mrf.mxu2 }
 0xb2f   :  { %v5239_v11 = vadd.f32 %v5238_v28, %v5148_v16  ;;  %5447 = vmatmul.f32.gmra.mxu0 %v11402_v6  ;;  %5525 = vmatmul.f32.gmra.mxu1 %v11398_v40 }
 0xb31   :  { %v9932_v45 = vadd.f32 %v5344_v34, %v5239_v11 }
 0xb33   :  { %v5350_v5 = vpop.f32.mrf.mxu3 }
 0xb34   :  { %v5045_v21 = vpop.f32.mrf.mxu0  ;;  %v5151_v43 = vpop.f32.mrf.mxu1 }
 0xb35   :  { %v5152_v41 = vadd.f32 %v5151_v43, %v5037_v62  ;;  %v5243_v3 = vpop.f32.mrf.mxu2 }
 0xb37   :  { %v5244_v47 = vadd.f32 %v5243_v3, %v5152_v41  ;;  %5451 = vmatmul.f32.gmra.mxu0 %v11406_v12  ;;  %5529 = vmatmul.f32.gmra.mxu1 %v11402_v6 }
 0xb39   :  { %v9936_v58 = vadd.f32 %v5350_v5, %v5244_v47 }
 0xb3c   :  { %v5053_v27 = vpop.f32.mrf.mxu0  ;;  %v5155_v25 = vpop.f32.mrf.mxu1 }
 0xb3d   :  { %v9938_v30 = vadd.f32 %v5155_v25, %v5045_v21 }
 0xb3f   :  { %5455 = vmatmul.f32.gmra.mxu0 %v11410_v56  ;;  %5533 = vmatmul.f32.gmra.mxu1 %v11406_v12 }
 0xb44   :  { %v5061_v40 = vpop.f32.mrf.mxu0  ;;  %v5159_v57 = vpop.f32.mrf.mxu1 }
 0xb45   :  { %v9942_v48 = vadd.f32 %v5159_v57, %v5053_v27 }
 0xb47   :  { %5459 = vmatmul.f32.gmra.mxu0 %v11414_v36  ;;  %5537 = vmatmul.f32.gmra.mxu1 %v11410_v56 }
 0xb4c   :  { %v5069_v26 = vpop.f32.mrf.mxu0  ;;  %v5163_v6 = vpop.f32.mrf.mxu1 }
 0xb4d   :  { %v9946_v35 = vadd.f32 %v5163_v6, %v5061_v40 }
 0xb4f   :  { %5463 = vmatmul.f32.gmra.mxu0 %v11418_v63  ;;  %5541 = vmatmul.f32.gmra.mxu1 %v11414_v36 }
 0xb54   :  { %v5077_v14 = vpop.f32.mrf.mxu0  ;;  %v5167_v34 = vpop.f32.mrf.mxu1 }
 0xb55   :  { %v9950_v62 = vadd.f32 %v5167_v34, %v5069_v26 }
 0xb57   :  { %5467 = vmatmul.f32.gmra.mxu0 %v11422_v9  ;;  %5545 = vmatmul.f32.gmra.mxu1 %v11418_v63 }
 0xb5c   :  { %v5085_v12 = vpop.f32.mrf.mxu0  ;;  %v5171_v13 = vpop.f32.mrf.mxu1 }
 0xb5d   :  { %v9954_v16 = vadd.f32 %v5171_v13, %v5077_v14 }
 0xb5f   :  { %5471 = vmatmul.f32.gmra.mxu0 %v11426_v37  ;;  %5549 = vmatmul.f32.gmra.mxu1 %v11422_v9 }
 0xb64   :  { %v5093_v56 = vpop.f32.mrf.mxu0  ;;  %v5175_v28 = vpop.f32.mrf.mxu1 }
 0xb65   :  { %v9958_v11 = vadd.f32 %v5175_v28, %v5085_v12 }
 0xb67   :  { %5475 = vmatmul.f32.gmra.mxu0 %v11429_v8  ;;  %5553 = vmatmul.f32.gmra.mxu1 %v11426_v37 }
 0xb6c   :  { %v5179_v36 = vpop.f32.mrf.mxu1  ;;  %v5416_v21 = vpop.f32.mrf.mxu0 }
 0xb6d   :  { %v9962_v43 = vadd.f32 %v5179_v36, %v5093_v56  ;;  %v5417_v63 = vadd.f32 %v5416_v21, %v9904_v52 }
 0xb6f   :  { %5557 = vmatmul.f32.gmra.mxu1 %v11429_v8 }
 0xb74   :  { %v5420_v41 = vpop.f32.mrf.mxu0  ;;  %v5498_v3 = vpop.f32.mrf.mxu1 }
 0xb75   :  { %v5421_v9 = vadd.f32 %v5420_v41, %v9908_v2  ;;  %v9967_v5 = vadd.f32 %v5498_v3, %v5417_v63  ;;  %v5248_v41 = vpop.f32.mrf.mxu2 }
 0xb77   :  { %11430 = vst [vmem:[#allocation45_spill] sm:$0xff] %v9967_v5 }
 0xb7c   :  { %v5424_v47 = vpop.f32.mrf.mxu0  ;;  %v5502_v27 = vpop.f32.mrf.mxu1 }
 0xb7d   :  { %v5425_v25 = vadd.f32 %v5424_v47, %v9912_v61  ;;  %v9970_v40 = vadd.f32 %v5502_v27, %v5421_v9  ;;  %v5356_v9 = vpop.f32.mrf.mxu3 }
 0xb7f   :  { %11431 = vst [vmem:[#allocation121_spill] sm:$0xff] %v9970_v40 }
 0xb84   :  { %v5428_v37 = vpop.f32.mrf.mxu0  ;;  %v5506_v57 = vpop.f32.mrf.mxu1 }
 0xb85   :  { %v5429_v26 = vadd.f32 %v5428_v37, %v9916_v17  ;;  %v9973_v6 = vadd.f32 %v5506_v57, %v5425_v25  ;;  %v5253_v37 = vpop.f32.mrf.mxu2  ;;  %v5362_v57 = vpop.f32.mrf.mxu3 }
 0xb86   :  { %v5254_v40 = vadd.f32 %v5253_v37, %v9942_v48 }
 0xb87   :  { %11432 = vst [vmem:[#allocation39_spill] sm:$0xff] %v9973_v6 }
 0xb8c   :  { %v5432_v52 = vpop.f32.mrf.mxu0  ;;  %v5510_v8 = vpop.f32.mrf.mxu1 }
 0xb8d   :  { %v5433_v14 = vadd.f32 %v5432_v52, %v9920_v49  ;;  %v9976_v34 = vadd.f32 %v5510_v8, %v5429_v26  ;;  %v5258_v8 = vpop.f32.mrf.mxu2 }
 0xb8e   :  { %v5259_v38 = vadd.f32 %v5258_v8, %v9946_v35 }
 0xb8f   :  { %11433 = vst [vmem:[#allocation58_spill] sm:$0xff] %v9976_v34 }
 0xb94   :  { %v5436_v2 = vpop.f32.mrf.mxu0  ;;  %v5514_v12 = vpop.f32.mrf.mxu1 }
 0xb95   :  { %v5437_v13 = vadd.f32 %v5436_v2, %v9924_v31  ;;  %v9979_v56 = vadd.f32 %v5514_v12, %v5433_v14  ;;  %v5368_v12 = vpop.f32.mrf.mxu3 }
 0xb96   :  { %v5369_v59 = vadd.f32 %v5368_v12, %v5259_v38 }
 0xb97   :  { %11434 = vst [vmem:[#allocation129_spill] sm:$0xff] %v9979_v56  ;;  %v5249_v56 = vadd.f32 %v5248_v41, %v9938_v30 }
 0xb99   :  { %v5357_v35 = vadd.f32 %v5356_v9, %v5249_v56 }
 0xb9c   :  { %v5440_v61 = vpop.f32.mrf.mxu0  ;;  %v5518_v28 = vpop.f32.mrf.mxu1 }
 0xb9d   :  { %v5441_v36 = vadd.f32 %v5440_v61, %v9928_v33  ;;  %v9982_v21 = vadd.f32 %v5518_v28, %v5437_v13  ;;  %v5374_v28 = vpop.f32.mrf.mxu3 }
 0xb9f   :  { %11435 = vst [vmem:[#allocation119_spill] sm:$0xff] %v9982_v21 }
 0xba4   :  { %v5444_v17 = vpop.f32.mrf.mxu0  ;;  %v5522_v63 = vpop.f32.mrf.mxu1 }
 0xba5   :  { %v5445_v3 = vadd.f32 %v5444_v17, %v9932_v45  ;;  %v9985_v49 = vadd.f32 %v5522_v63, %v5441_v36  ;;  %v5263_v45 = vpop.f32.mrf.mxu2 }
 0xbac   :  { %v5448_v47 = vpop.f32.mrf.mxu0  ;;  %v5526_v27 = vpop.f32.mrf.mxu1 }
 0xbad   :  { %v5449_v31 = vadd.f32 %v5448_v47, %v9936_v58  ;;  %v9988_v25 = vadd.f32 %v5526_v27, %v5445_v3  ;;  %v5268_v63 = vpop.f32.mrf.mxu2  ;;  %v5380_v58 = vpop.f32.mrf.mxu3 }
 0xbae   :  { %v5269_v18 = vadd.f32 %v5268_v63, %v9954_v16 }
 0xbb0   :  { %v5381_v60 = vadd.f32 %v5380_v58, %v5269_v18 }
 0xbb4   :  { %v5452_v26 = vpop.f32.mrf.mxu0  ;;  %v5530_v33 = vpop.f32.mrf.mxu1 }
 0xbb5   :  { %v9990_v52 = vadd.f32 %v5530_v33, %v5449_v31  ;;  %v5273_v27 = vpop.f32.mrf.mxu2  ;;  %v5264_v31 = vadd.f32 %v5263_v45, %v9950_v62  ;;  %v5386_v33 = vpop.f32.mrf.mxu3  ;;  %v5363_v62 = vadd.f32 %v5362_v57, %v5254_v40  ;;  %v5453_v30 = vadd.f32 %v5452_v26, %v5357_v35  ;;  %v11444_v35 = vld [vmem:[#allocation58_spill] sm:$0xff] }
 0xbb6   :  { %v5274_v19 = vadd.f32 %v5273_v27, %v9958_v11 }
 0xbb7   :  { %v5375_v6 = vadd.f32 %v5374_v28, %v5264_v31 }
 0xbb8   :  { %v5387_v51 = vadd.f32 %v5386_v33, %v5274_v19 }
 0xbbc   :  { %v5456_v14 = vpop.f32.mrf.mxu0  ;;  %v5534_v2 = vpop.f32.mrf.mxu1 }
 0xbbd   :  { %v5278_v21 = vpop.f32.mrf.mxu2  ;;  %v5392_v8 = vpop.f32.mrf.mxu3  ;;  %v5457_v58 = vadd.f32 %v5456_v14, %v5363_v62 }
 0xbbe   :  { %v5279_v18 = vadd.f32 %v5278_v21, %v9962_v43 }
 0xbc0   :  { %v5393_v40 = vadd.f32 %v5392_v8, %v5279_v18 }
 0xbc4   :  { %v5460_v13 = vpop.f32.mrf.mxu0  ;;  %v5538_v61 = vpop.f32.mrf.mxu1 }
 0xbc5   :  { %v5461_v45 = vadd.f32 %v5460_v13, %v5369_v59  ;;  %v5539_v38 = vadd.f32 %v5538_v61, %v5457_v58  ;;  %v11439_v13 = vld [vmem:[#allocation34_spill] sm:$0xff] }
 0xbcc   :  { %v5464_v36 = vpop.f32.mrf.mxu0  ;;  %v5542_v17 = vpop.f32.mrf.mxu1 }
 0xbcd   :  { %v5465_v16 = vadd.f32 %v5464_v36, %v5375_v6  ;;  %v5543_v48 = vadd.f32 %v5542_v17, %v5461_v45  ;;  %v5535_v6 = vadd.f32 %v5534_v2, %v5453_v30  ;;  %v11441_v17 = vld [vmem:[#allocation129_spill] sm:$0xff]  ;;  %v11443_v45 = vld [vmem:[#allocation52_spill] sm:$0xff] }
 0xbce   :  { %v5564_v18 = vmul.f32 %v11444_v35, %v11443_v45 }
 0xbd4   :  { %v5468_v3 = vpop.f32.mrf.mxu0  ;;  %v5546_v47 = vpop.f32.mrf.mxu1 }
 0xbd5   :  { %v5469_v34 = vadd.f32 %v5468_v3, %v5381_v60  ;;  %v5547_v50 = vadd.f32 %v5546_v47, %v5465_v16  ;;  %v11442_v47 = vld [vmem:[#allocation109_spill] sm:$0xff] }
 0xbd7   :  { %v5573_v19 = vmul.f32 %v5547_v50, %v9457_v24  ;;  %v5570_v24 = vmul.f32 %v5535_v6, %v9503_v46 }
 0xbd9   :  { %v5586_v57 = vadd.f32 %v5570_v24, %v9468_v44  ;;  %v11451_v24 = vld [vmem:[#allocation118_spill] sm:$0xff] }
 0xbdb   :  { %v5602_v28 = vmul.f32 %v5586_v57, %v5586_v57  ;;  %v11453_v57 = vld [vmem:[#allocation45_spill] sm:$0xff] }
 0xbdc   :  { %v5550_v22 = vpop.f32.mrf.mxu1  ;;  %v5472_v5 = vpop.f32.mrf.mxu0 }
 0xbdd   :  { %v5551_v63 = vadd.f32 %v5550_v22, %v5469_v34  ;;  %v5473_v7 = vadd.f32 %v5472_v5, %v5387_v51  ;;  %v5572_v51 = vmul.f32 %v5543_v48, %v9472_v0  ;;  %v5571_v34 = vmul.f32 %v5539_v38, %v9485_v1  ;;  %v11446_v38 = vld [vmem:[#allocation132_spill] sm:$0xff] }
 0xbde   :  { %v5569_v0 = vmul.f32 %v9990_v52, %v9519_v29  ;;  %v5567_v29 = vmul.f32 %v9985_v49, %v9552_v15  ;;  %v11436_v52 = vld [vmem:[#allocation46_spill] sm:$0xff]  ;;  %v11440_v49 = vld [vmem:[#allocation123_spill] sm:$0xff]  ;;  %v10055_v48 = vand.u32 4294901760, %v5602_v28 }
 0xbdf   :  { %v5574_v60 = vmul.f32 %v5551_v63, %v9442_v39  ;;  %v5589_v39 = vadd.f32 %v5573_v19, %v9428_v55  ;;  %v5568_v55 = vmul.f32 %v9988_v25, %v9536_v54  ;;  %v11437_v54 = vld [vmem:[#allocation50_spill] sm:$0xff]  ;;  %v11438_v25 = vld [vmem:[#allocation119_spill] sm:$0xff]  ;;  %v5565_v3 = vmul.f32 %v11441_v17, %v11440_v49 }
 0xbe0   :  { %v5566_v44 = vmul.f32 %v11438_v25, %v11437_v54  ;;  %v5583_v27 = vadd.f32 %v5567_v29, %v11442_v47  ;;  %v11447_v19 = vld [vmem:[#allocation39_spill] sm:$0xff] }
 0xbe1   :  { %v5590_v43 = vadd.f32 %v5574_v60, %v9419_v42  ;;  %v5587_v42 = vadd.f32 %v5571_v34, %v9453_v10  ;;  %v5605_v9 = vmul.f32 %v5589_v39, %v5589_v39  ;;  %v5585_v10 = vadd.f32 %v5569_v0, %v11436_v52 }
 0xbe2   :  { %v5584_v61 = vadd.f32 %v5568_v55, %v11439_v13  ;;  %v5599_v6 = vmul.f32 %v5583_v27, %v5583_v27  ;;  %v10085_v0 = vsub.f32 %v5602_v28, %v10055_v48  ;;  %v11452_v55 = vld [vmem:[#allocation128_spill] sm:$0xff]  ;;  %v11456_v27 = vld [vmem:[#allocation25_spill] sm:$0xff] }
 0xbe3   :  { %v5606_v50 = vmul.f32 %v5590_v43, %v5590_v43  ;;  %v5603_v14 = vmul.f32 %v5587_v42, %v5587_v42  ;;  %v10024_v2 = vand.u32 4294901760, %v5605_v9  ;;  %v5601_v31 = vmul.f32 %v5585_v10, %v5585_v10 }
 0xbe4   :  { %v5554_v11 = vpop.f32.mrf.mxu1  ;;  %v5476_v59 = vpop.f32.mrf.mxu0  ;;  %v5600_v58 = vmul.f32 %v5584_v61, %v5584_v61  ;;  %v10095_v10 = vand.u32 4294901760, %v5599_v6  ;;  %v5688_v47 = vand.u32 4294901760, %v10085_v0 }
 0xbe5   :  { %v5555_v37 = vadd.f32 %v5554_v11, %v5473_v7  ;;  %v5477_v7 = vadd.f32 %v5476_v59, %v5393_v40  ;;  %v10018_v26 = vand.u32 4294901760, %v5606_v50  ;;  %v10042_v33 = vand.u32 4294901760, %v5603_v14  ;;  %v11445_v11 = vld [vmem:[#allocation15_spill] sm:$0xff]  ;;  %v11448_v40 = vld [vmem:[#allocation110_spill] sm:$0xff] }
 0xbe6   :  { %v10045_v16 = vsub.f32 %v5605_v9, %v10024_v2  ;;  %v5582_v8 = vadd.f32 %v5566_v44, %v11445_v11  ;;  %v5581_v59 = vadd.f32 %v5565_v3, %v11448_v40  ;;  %v11455_v44 = vld [vmem:[#allocation19_spill] sm:$0xff] }
 0xbe7   :  { %v5575_v22 = vmul.f32 %v5555_v37, %v9446_v32  ;;  %v5588_v32 = vadd.f32 %v5572_v51, %v9438_v53  ;;  %v10066_v51 = vand.u32 4294901760, %v5601_v31  ;;  %v10069_v43 = vsub.f32 %v5603_v14, %v10042_v33 }
 0xbe8   :  { %v5670_v39 = vand.u32 4294901760, %v10045_v16  ;;  %v5597_v52 = vmul.f32 %v5581_v59, %v5581_v59  ;;  %v5689_v59 = vsub.f32 %v10085_v0, %v5688_v47 }
 0xbe9   :  { %v5591_v5 = vadd.f32 %v5575_v22, %v9431_v4  ;;  %v5604_v46 = vmul.f32 %v5588_v32, %v5588_v32  ;;  %v5563_v22 = vmul.f32 %v11447_v19, %v11446_v38  ;;  %v5580_v32 = vadd.f32 %v5564_v18, %v11451_v24 }
 0xbea   :  { %v10098_v14 = vsub.f32 %v5601_v31, %v10066_v51  ;;  %v5671_v54 = vsub.f32 %v10045_v16, %v5670_v39  ;;  %v5682_v25 = vand.u32 4294901760, %v10069_v43  ;;  %v10117_v35 = vand.u32 4294901760, %v5597_v52 }
 0xbeb   :  { %v5607_v56 = vmul.f32 %v5591_v5, %v5591_v5  ;;  %v10032_v36 = vand.u32 4294901760, %v5604_v46  ;;  %v5596_v61 = vmul.f32 %v5580_v32, %v5580_v32  ;;  %v10120_v18 = vsub.f32 %v5599_v6, %v10095_v10 }
 0xbec   :  { %v5558_v21 = vpop.f32.mrf.mxu1  ;;  %v5672_v11 = vand.u32 4294901760, %v5671_v54 }
 0xbed   :  { %v5559_v41 = vadd.f32 %v5558_v21, %v5477_v7  ;;  %v10012_v4 = vand.u32 4294901760, %v5607_v56  ;;  %v10058_v60 = vsub.f32 %v5604_v46, %v10032_v36  ;;  %v11449_v7 = vld [vmem:[#allocation42_spill] sm:$0xff]  ;;  %v5561_v46 = vmul.f32 %v11453_v57, %v11452_v55 }
 0xbee   :  { %v10127_v19 = vand.u32 4294901760, %v5596_v61  ;;  %v5706_v24 = vand.u32 4294901760, %v10120_v18 }
 0xbef   :  { %v5576_v1 = vmul.f32 %v5559_v41, %v9509_v20  ;;  %v10027_v20 = vsub.f32 %v5607_v56, %v10012_v4  ;;  %v11450_v56 = vld [vmem:[#allocation121_spill] sm:$0xff]  ;;  %v10082_v41 = vand.u32 4294901760, %v5600_v58  ;;  %v5577_v31 = vadd.f32 %v5561_v46, %v11456_v27 }
 0xbf0   :  { %v5562_v21 = vmul.f32 %v11450_v56, %v11449_v7  ;;  %v10140_v7 = vsub.f32 %v5597_v52, %v10117_v35 }
 0xbf1   :  { %v5592_v53 = vadd.f32 %v5576_v1, %v9490_v23  ;;  %v10035_v23 = vsub.f32 %v5606_v50, %v10018_v26  ;;  %v5658_v62 = vand.u32 4294901760, %v10027_v20  ;;  %v5598_v50 = vmul.f32 %v5582_v8, %v5582_v8 }
 0xbf2   :  { %v5676_v1 = vand.u32 4294901760, %v10058_v60  ;;  %v5578_v13 = vadd.f32 %v5562_v21, %v11455_v44  ;;  %v10109_v49 = vsub.f32 %v5600_v58, %v10082_v41  ;;  %v5683_v8 = vsub.f32 %v10069_v43, %v5682_v25 }
 0xbf3   :  { %v5608_v12 = vmul.f32 %v5592_v53, %v5592_v53  ;;  %v5664_v30 = vand.u32 4294901760, %v10035_v23  ;;  %v5659_v34 = vsub.f32 %v10027_v20, %v5658_v62  ;;  %v11454_v53 = vld [vmem:[#allocation55_spill] sm:$0xff]  ;;  %v10106_v28 = vand.u32 4294901760, %v5598_v50 }
 0xbf4   :  { %v5579_v29 = vadd.f32 %v5563_v22, %v11454_v53  ;;  %v5677_v3 = vsub.f32 %v10058_v60, %v5676_v1  ;;  %v5694_v58 = vand.u32 4294901760, %v10098_v14  ;;  %v5594_v38 = vmul.f32 %v5578_v13, %v5578_v13 }
 0xbf5   :  { %v10037_v15 = vand.u32 4294901760, %v5608_v12  ;;  %v5665_v9 = vsub.f32 %v10035_v23, %v5664_v30  ;;  %v10130_v22 = vsub.f32 %v5598_v50, %v10106_v28  ;;  %v5700_v6 = vand.u32 4294901760, %v10109_v49 }
 0xbf6   :  { %v5595_v45 = vmul.f32 %v5579_v29, %v5579_v29  ;;  %v5678_v40 = vand.u32 4294901760, %v5677_v3  ;;  %v5684_v56 = vand.u32 4294901760, %v5683_v8  ;;  %v5695_v21 = vsub.f32 %v10098_v14, %v5694_v58 }
 0xbf7   :  { %v10048_v63 = vsub.f32 %v5608_v12, %v10037_v15  ;;  %5610 = vmatpush.msrb.mxu2 %v10037_v15  ;;  %v5660_v12 = vand.u32 4294901760, %v5659_v34  ;;  %v5666_v17 = vand.u32 4294901760, %v5665_v9  ;;  %v10147_v32 = vand.u32 4294901760, %v5594_v38 }
 0xbf8   :  { %v10137_v34 = vand.u32 4294901760, %v5595_v45  ;;  %v10150_v50 = vsub.f32 %v5596_v61, %v10127_v19  ;;  %v5701_v9 = vsub.f32 %v10109_v49, %v5700_v6  ;;  %v5712_v55 = vand.u32 4294901760, %v10130_v22 }
 0xbf9   :  { %5612 = vmatpush.msrb.mxu2 %v10012_v4  ;;  %v5652_v37 = vand.u32 4294901760, %v10048_v63  ;;  %v5696_v53 = vand.u32 4294901760, %v5695_v21  ;;  %v5707_v29 = vsub.f32 %v10120_v18, %v5706_v24  ;;  %v5718_v52 = vand.u32 4294901760, %v10140_v7 }
 0xbfa   :  { %v10160_v46 = vsub.f32 %v5595_v45, %v10137_v34  ;;  %v5702_v54 = vand.u32 4294901760, %v5701_v9  ;;  %v5713_v44 = vsub.f32 %v10130_v22, %v5712_v55  ;;  %v5724_v13 = vand.u32 4294901760, %v10150_v50 }
 0xbfb   :  { %5614 = vmatpush.msrb.mxu2 %v10018_v26  ;;  %v5653_v5 = vsub.f32 %v10048_v63, %v5652_v37  ;;  %v5719_v3 = vsub.f32 %v10140_v7, %v5718_v52 }
 0xbfc   :  { %v5730_v27 = vand.u32 4294901760, %v10160_v46  ;;  %v5725_v45 = vsub.f32 %v10150_v50, %v5724_v13 }
 0xbfd   :  { %5616 = vmatpush.msrb.mxu2 %v10024_v2  ;;  %v5654_v42 = vand.u32 4294901760, %v5653_v5  ;;  %v5593_v5 = vmul.f32 %v5577_v31, %v5577_v31  ;;  %v5714_v31 = vand.u32 4294901760, %v5713_v44  ;;  %v5720_v8 = vand.u32 4294901760, %v5719_v3 }
 0xbff   :  { %5618 = vmatpush.msrb.mxu2 %v10032_v36  ;;  %5655 = vmatpush.msrb.mxu3 %v5654_v42  ;;  %v5690_v42 = vand.u32 4294901760, %v5689_v59  ;;  %v10157_v57 = vand.u32 4294901760, %v5593_v5  ;;  %v5726_v59 = vand.u32 4294901760, %v5725_v45 }
 0xc01   :  { %5620 = vmatpush.msrb.mxu2 %v10042_v33  ;;  %5661 = vmatpush.msrb.mxu3 %v5660_v12  ;;  %v10168_v12 = vsub.f32 %v5594_v38, %v10147_v32  ;;  %v10176_v61 = vsub.f32 %v5593_v5, %v10157_v57  ;;  %v5731_v38 = vsub.f32 %v10160_v46, %v5730_v27 }
 0xc03   :  { %5622 = vmatpush.msrb.mxu2 %v10055_v48  ;;  %5667 = vmatpush.msrb.mxu3 %v5666_v17  ;;  %v5708_v17 = vand.u32 4294901760, %v5707_v29  ;;  %v11458_v29 = vld [vmem:[#allocation38_spill] sm:$0xff] }
 0xc05   :  { %5624 = vmatpush.msrb.mxu2 %v10066_v51  ;;  %5673 = vmatpush.msrb.mxu3 %v5672_v11  ;;  %v5736_v11 = vand.u32 4294901760, %v10168_v12 }
 0xc07   :  { %5626 = vmatpush.msrb.mxu2 %v10082_v41  ;;  %5679 = vmatpush.msrb.mxu3 %v5678_v40  ;;  %v5742_v40 = vand.u32 4294901760, %v10176_v61  ;;  %v5737_v5 = vsub.f32 %v10168_v12, %v5736_v11 }
 0xc09   :  { %5628 = vmatpush.msrb.mxu2 %v10095_v10  ;;  %5685 = vmatpush.msrb.mxu3 %v5684_v56  ;;  %v5732_v56 = vand.u32 4294901760, %v5731_v38  ;;  %v5743_v21 = vsub.f32 %v10176_v61, %v5742_v40  ;;  %v5738_v9 = vand.u32 4294901760, %v5737_v5 }
 0xc0b   :  { %5630 = vmatpush.msrb.mxu2 %v10106_v28  ;;  %5691 = vmatpush.msrb.mxu3 %v5690_v42  ;;  %v11457_v42 = vld [vmem:[#allocation9_spill] sm:$0xff] }
 0xc0d   :  { %5632 = vmatpush.msrb.mxu2 %v10117_v35  ;;  %5697 = vmatpush.msrb.mxu3 %v5696_v53  ;;  %v5744_v53 = vand.u32 4294901760, %v5743_v21 }
 0xc0f   :  { %5634 = vmatpush.msrb.mxu2 %v10127_v19  ;;  %5703 = vmatpush.msrb.mxu3 %v5702_v54  ;;  %v11459_v54 = vld [vmem:[#allocation43_spill] sm:$0xff] }
 0xc11   :  { %5636 = vmatpush.msrb.mxu2 %v10137_v34  ;;  %5709 = vmatpush.msrb.mxu3 %v5708_v17 }
 0xc13   :  { %5638 = vmatpush.msrb.mxu2 %v10147_v32  ;;  %5715 = vmatpush.msrb.mxu3 %v5714_v31 }
 0xc15   :  { %5640 = vmatpush.msrb.mxu2 %v10157_v57  ;;  %5721 = vmatpush.msrb.mxu3 %v5720_v8 }
 0xc16   :  { %5646 = vmatmul.f32.vlgmr.msrb.gmra.mxu2 %v11457_v42 }
 0xc17   :  { %5753 = vmatpush.msra.mxu2 %v10048_v63  ;;  %5727 = vmatpush.msrb.mxu3 %v5726_v59  ;;  %v11460_v63 = vld [vmem:[#allocation13_spill] sm:$0xff] }
 0xc19   :  { %5756 = vmatpush.msra.mxu2 %v10027_v20  ;;  %5733 = vmatpush.msrb.mxu3 %v5732_v56 }
 0xc1b   :  { %5759 = vmatpush.msra.mxu2 %v10035_v23  ;;  %5739 = vmatpush.msrb.mxu3 %v5738_v9 }
 0xc1d   :  { %5762 = vmatpush.msra.mxu2 %v10045_v16  ;;  %5745 = vmatpush.msrb.mxu3 %v5744_v53 }
 0xc1e   :  { %5747 = vmatmul.f32.vlgmr.msrb.gmra.mxu3 %v11458_v29 }
 0xc1f   :  { %5765 = vmatpush.msra.mxu2 %v10058_v60  ;;  %5806 = vmatpush.msra.mxu3 %v10037_v15 }
 0xc21   :  { %5768 = vmatpush.msra.mxu2 %v10069_v43  ;;  %5808 = vmatpush.msra.mxu3 %v10012_v4  ;;  %v5956_v43 = vpop.permute.xlu1 %5955 }
 0xc23   :  { %5771 = vmatpush.msra.mxu2 %v10085_v0  ;;  %5810 = vmatpush.msra.mxu3 %v10018_v26 }
 0xc25   :  { %5774 = vmatpush.msra.mxu2 %v10098_v14  ;;  %5812 = vmatpush.msra.mxu3 %v10024_v2 }
 0xc27   :  { %5777 = vmatpush.msra.mxu2 %v10109_v49  ;;  %5814 = vmatpush.msra.mxu3 %v10032_v36 }
 0xc29   :  { %5780 = vmatpush.msra.mxu2 %v10120_v18  ;;  %5816 = vmatpush.msra.mxu3 %v10042_v33 }
 0xc2b   :  { %5783 = vmatpush.msra.mxu2 %v10130_v22  ;;  %5818 = vmatpush.msra.mxu3 %v10055_v48 }
 0xc2d   :  { %5786 = vmatpush.msra.mxu2 %v10140_v7  ;;  %5820 = vmatpush.msra.mxu3 %v10066_v51 }
 0xc2f   :  { %5789 = vmatpush.msra.mxu2 %v10150_v50  ;;  %5822 = vmatpush.msra.mxu3 %v10082_v41 }
 0xc31   :  { %5792 = vmatpush.msra.mxu2 %v10160_v46  ;;  %5824 = vmatpush.msra.mxu3 %v10095_v10 }
 0xc33   :  { %5795 = vmatpush.msra.mxu2 %v10168_v12  ;;  %5826 = vmatpush.msra.mxu3 %v10106_v28 }
 0xc35   :  { %5798 = vmatpush.msra.mxu2 %v10176_v61  ;;  %5828 = vmatpush.msra.mxu3 %v10117_v35 }
 0xc36   :  { %5801 = vmatmul.f32.vlgmr.msra.gmra.mxu2 %v11459_v54 }
 0xc37   :  { %5847 = vmatpush.msrb.mxu2 %v5652_v37  ;;  %5830 = vmatpush.msra.mxu3 %v10127_v19 }
 0xc39   :  { %5851 = vmatpush.msrb.mxu2 %v5658_v62  ;;  %5832 = vmatpush.msra.mxu3 %v10137_v34 }
 0xc3b   :  { %5855 = vmatpush.msrb.mxu2 %v5664_v30  ;;  %5834 = vmatpush.msra.mxu3 %v10147_v32  ;;  %v11461_v30 = vld [vmem:[#allocation140_spill] sm:$0xff] }
 0xc3d   :  { %5859 = vmatpush.msrb.mxu2 %v5670_v39  ;;  %5836 = vmatpush.msra.mxu3 %v10157_v57 }
 0xc3e   :  { %5840 = vmatmul.f32.vlgmr.msra.gmra.mxu3 %v11460_v63 }
 0xc3f   :  { %5863 = vmatpush.msrb.mxu2 %v5676_v1  ;;  %5914 = vmatpush.msrb.mxu3 %v10037_v15 }
 0xc41   :  { %5867 = vmatpush.msrb.mxu2 %v5682_v25  ;;  %5916 = vmatpush.msrb.mxu3 %v10012_v4 }
 0xc43   :  { %5871 = vmatpush.msrb.mxu2 %v5688_v47  ;;  %5918 = vmatpush.msrb.mxu3 %v10018_v26 }
 0xc45   :  { %5875 = vmatpush.msrb.mxu2 %v5694_v58  ;;  %5920 = vmatpush.msrb.mxu3 %v10024_v2 }
 0xc47   :  { %5879 = vmatpush.msrb.mxu2 %v5700_v6  ;;  %5922 = vmatpush.msrb.mxu3 %v10032_v36 }
 0xc49   :  { %5883 = vmatpush.msrb.mxu2 %v5706_v24  ;;  %5924 = vmatpush.msrb.mxu3 %v10042_v33 }
 0xc4b   :  { %5887 = vmatpush.msrb.mxu2 %v5712_v55  ;;  %5926 = vmatpush.msrb.mxu3 %v10055_v48 }
 0xc4d   :  { %5891 = vmatpush.msrb.mxu2 %v5718_v52  ;;  %5928 = vmatpush.msrb.mxu3 %v10066_v51 }
 0xc4f   :  { %5895 = vmatpush.msrb.mxu2 %v5724_v13  ;;  %5930 = vmatpush.msrb.mxu3 %v10082_v41 }
 0xc51   :  { %5899 = vmatpush.msrb.mxu2 %v5730_v27  ;;  %5932 = vmatpush.msrb.mxu3 %v10095_v10 }
 0xc53   :  { %5903 = vmatpush.msrb.mxu2 %v5736_v11  ;;  %5934 = vmatpush.msrb.mxu3 %v10106_v28 }
 0xc55   :  { %5907 = vmatpush.msrb.mxu2 %v5742_v40  ;;  %5936 = vmatpush.msrb.mxu3 %v10117_v35 }
 0xc56   :  { %5909 = vmatmul.f32.vlgmr.msrb.gmra.mxu2 %v11458_v29 }
 0xc57   :  { %5938 = vmatpush.msrb.mxu3 %v10127_v19 }
 0xc59   :  { %5940 = vmatpush.msrb.mxu3 %v10137_v34 }
 0xc5b   :  { %5942 = vmatpush.msrb.mxu3 %v10147_v32 }
 0xc5d   :  { %5944 = vmatpush.msrb.mxu3 %v10157_v57 }
 0xc5e   :  { %5946 = vmatmul.f32.vlgmr.msrb.gmra.mxu3 %v11458_v29 }
 0xc99   :  { %v5647_v4 = vpop.f32.mrf.mxu2 }
 0xc9a   :  { %v5648_v2 = vadd.f32 29.406033, %v5647_v4 }
 0xca1   :  { %v5748_v26 = vpop.f32.mrf.mxu3 }
 0xca2   :  { %v5749_v36 = vadd.f32 %v5748_v26, %v5648_v2 }
 0xcb9   :  { %v5802_v20 = vpop.f32.mrf.mxu2 }
 0xcba   :  { %v5803_v15 = vadd.f32 %v5802_v20, %v5749_v36 }
 0xcc1   :  { %v5841_v23 = vpop.f32.mrf.mxu3 }
 0xcc2   :  { %v5842_v16 = vadd.f32 %v5841_v23, %v5803_v15 }
 0xcd9   :  { %v5910_v33 = vpop.f32.mrf.mxu2 }
 0xcda   :  { %v5911_v62 = vadd.f32 %v5910_v33, %v5842_v16 }
 0xce1   :  { %v5947_v48 = vpop.f32.mrf.mxu3 }
 0xce2   :  { %v5948_v60 = vadd.f32 %v5947_v48, %v5911_v62 }
 0xce4   :  { %v5950_v37 = vmul.f32 -0.5, %v5948_v60 }
 0xce6   :  { %v5951_v51 = vadd.f32 %v5950_v37, %v11461_v30 }
 0xce8   :  { %v5958_v39 = vadd.f32 %v5956_v43, %v5951_v51 }
 0xcea   :  { %v5959_v41 = vadd.f32 20.248194, %v5958_v39 }
 0xcec   :  { %v6070_v0 = vclamps-f32 %v5959_v41, 30.0 }
 0xcee   :  { %v5962_v1 = vmul.f32 1.442695, %v6070_v0 }
 0xcf0   :  { %6120 = vpow2.f32 %v5962_v1 }
 0xcf6   :  { %v6121_v10 = vpop.eup %6120 }
 0xcf7   :  { %5964 = vst [vmem:[#allocation4] sm:$0xff] %v6121_v10  ;;  %v5965_v14 = vadd.f32 1.0, %v6121_v10 }
 0xcf8   :  { %5988 = dma.vmem_to_hbm [thread:$0]  %s5984_s25, 128, %s5986_s28, [#allocation5]  }
 0xcf9   :  { %5966 = vst [vmem:[#allocation2] sm:$0xff] %v5965_v14  ;;  %6001 = dma.vmem_to_hbm [thread:$0]  %s5994_s30, 256, %s5996_s0, [#allocation5], %s6204_s10, %s6204_s10, %s6205_s18  }
 0xcfa   :  { %5977 = dma.vmem_to_hbm [thread:$0]  %s5973_s15, 128, %s5975_s17, [#allocation3]  }
 0xcfb   :  { %6196 = dma.done.wait [#allocation3], 128  }
 0xcfc   :  { %6197 = vsyncadd [#allocation3], 4294967168 }
 0xcfd   :  { %6198 = dma.done.wait [#allocation5], 384  }
 0xcfe   :  { %6199 = vsyncadd [#allocation5], 4294966912 }
 0xcff   :  { %6014 = vsyncpa [#allocation3], 1 }
 0xd00   :  { %6015 = vsyncpa [#allocation5], 1 }

</bundles_post_ra>
